<compile_context>
chip_gen: v6e
topology: v6e:2x2x1
jax: 0.10.0
libtpu: 0.0.40
codegen_flags: <defaults>
</compile_context>

<pallas_src>
import functools

import jax
import jax.numpy as jnp
from jax.experimental import pallas as pl
from jax.experimental.pallas import tpu as pltpu


# --------------------------- fused MBConv kernel ----------------------------
def _mbconv_kernel(*refs, k, stride, pad, h, w, ho, wo, c_exp, c_out,
                   group, has_expand, mm_bf16):
    if has_expand:
        (x_ref, w_exp_ref, b_exp_ref, w_dw_ref, b_dw_ref,
         w_se1_ref, b_se1_ref, w_se2_ref, b_se2_ref,
         w_prj_ref, b_prj_ref, o_ref, xpad_ref, y_ref) = refs
    else:
        (x_ref, w_dw_ref, b_dw_ref,
         w_se1_ref, b_se1_ref, w_se2_ref, b_se2_ref,
         w_prj_ref, b_prj_ref, o_ref, xpad_ref, y_ref) = refs
        w_exp_ref = b_exp_ref = None

    hp, wp = h + 2 * pad, w + 2 * pad
    mm_dt = jnp.bfloat16 if mm_bf16 else jnp.float32
    silu = lambda t: t * jax.nn.sigmoid(t)

    # Hoisted per-grid-step weight loads (reused for all G images / strips).
    if has_expand:
        w_exp = w_exp_ref[...].astype(mm_dt)            # (cin, c_exp)
        b_exp = b_exp_ref[...]                          # (1, c_exp) f32
    wdw = w_dw_ref[...]                                 # (k, k, c_exp) f32
    b_dw = b_dw_ref[...].reshape(1, 1, c_exp)
    w_se1 = w_se1_ref[...]
    b_se1 = b_se1_ref[...]
    w_se2 = w_se2_ref[...]
    b_se2 = b_se2_ref[...]
    w_prj = w_prj_ref[...]                              # (c_out, c_exp) f32
    b_prj = b_prj_ref[...]                              # (c_out, 1)

    # Zero ONLY the halo border of the padded scratch (interior is overwritten
    # per image below).  Done every grid step: under the 'parallel' batch axis
    # each TensorCore owns its own scratch instance.
    if pad > 0:
        xpad_ref[0:pad, :, :] = jnp.zeros((pad, wp, c_exp), jnp.float32)
        xpad_ref[pad + h:hp, :, :] = jnp.zeros((pad, wp, c_exp), jnp.float32)
        xpad_ref[:, 0:pad, :] = jnp.zeros((hp, pad, c_exp), jnp.float32)
        xpad_ref[:, pad + w:wp, :] = jnp.zeros((hp, pad, c_exp), jnp.float32)

    HR = min(8, h)      # image rows per expand strip
    OR = min(8, ho)     # output rows per depthwise / projection strip

    for g in range(group):
        # ---- 1+2) expansion 1x1 conv + folded BN + SiLU, streamed in row
        #           strips straight into the padded VMEM scratch.
        for r0 in range(0, h, HR):
            rows = min(HR, h - r0)
            xs = x_ref[g, r0 * w:(r0 + rows) * w, :].astype(jnp.float32)
            if has_expand:
                e = jnp.dot(xs.astype(mm_dt), w_exp,
                            preferred_element_type=jnp.float32) + b_exp
                e = silu(e)
            else:
                e = xs                                   # cin == c_exp
            xpad_ref[pad + r0:pad + r0 + rows, pad:pad + w, :] = \
                e.reshape(rows, w, c_exp)

        # ---- 3) depthwise kxk conv + folded BN + SiLU, strip-mined over
        #         output rows; SiLU'd strips go to y_ref (VMEM) and the SE
        #         global pool is accumulated on the fly.
        pooled = jnp.zeros((1, c_exp), jnp.float32)
        for r0 in range(0, ho, OR):
            R = min(OR, ho - r0)
            acc = jnp.zeros((R, wo, c_exp), jnp.float32)
            for kh in range(k):
                for kw in range(k):
                    if stride == 1:
                        patch = xpad_ref[r0 + kh:r0 + kh + R, kw:kw + wo, :]
                    else:   # strided window load straight from the scratch
                        patch = xpad_ref[pl.ds(r0 * stride + kh, R, stride),
                                         pl.ds(kw, wo, stride), :]
                    acc = acc + patch * wdw[kh, kw, :]
            ys = silu(acc + b_dw)                        # (R, wo, c_exp)
            y_ref[r0:r0 + R, :, :] = ys
            pooled = pooled + jnp.sum(ys, axis=(0, 1)).reshape(1, c_exp)

        # ---- 4) Squeeze-Excitation (tiny, kept in f32)
        pooled = pooled * (1.0 / (ho * wo))
        s = jnp.dot(pooled, w_se1, preferred_element_type=jnp.float32) + b_se1
        s = silu(s)
        s = jnp.dot(s, w_se2, preferred_element_type=jnp.float32) + b_se2
        scale = jax.nn.sigmoid(s)                        # (1, c_exp)

        # ---- 5) projection 1x1 conv + folded BN.  SE scale is folded into the
        #         (transposed) projection weight, and the result is written
        #         channel-major (NCHW) strip by strip: out^T = W_eff @ Y^T.
        w_eff = (w_prj * scale).astype(mm_dt)            # (c_out, c_exp)
        for r0 in range(0, ho, OR):
            R = min(OR, ho - r0)
            y2d = y_ref[r0:r0 + R, :, :].reshape(R * wo, c_exp).astype(mm_dt)
            out_t = jax.lax.dot_general(
                w_eff, y2d, dimension_numbers=(((1,), (1,)), ((), ())),
                preferred_element_type=jnp.float32) + b_prj      # (c_out, R*wo)
            o_ref[g, :, r0 * wo:(r0 + R) * wo] = out_t.astype(o_ref.dtype)


# ------------------------------ MBConv wrapper ------------------------------
def fold_bn(gamma, beta, mean, var, eps=1e-5):
    scale = gamma / jnp.sqrt(var + eps)
    bias = beta - mean * scale
    return scale, bias


def _padded_bytes(shape, itemsize=4):
    """Lane/sublane-padded VMEM footprint of one buffer."""
    dims = list(shape)
    dims[-1] = -(-dims[-1] // 128) * 128
    if len(dims) >= 2:
        dims[-2] = -(-dims[-2] // 8) * 8
    n = 1
    for d in dims:
        n *= d
    return n * itemsize


def mbconv_forward(x, x_size, params, cfg, *, matmul_bf16=False, group_size=4):
    """x: (B, H*W, C_in)  ->  (B, C_out, H_out, W_out)  (matches the PyTorch module)."""
    bsz, hw, cin = x.shape
    h, w = x_size
    assert hw == h * w
    c_exp = cfg["expanded_channels"]
    c_out = cfg["out_channels"]
    k = cfg["kernel"]
    stride = cfg["stride"]
    pad = (k - 1) // 2                       # Conv2dNormActivation default padding
    hp, wp = h + 2 * pad, w + 2 * pad
    ho = (hp - k) // stride + 1
    wo = (wp - k) // stride + 1
    has_expand = (c_exp != cin)
    sq = params["w_se1"].shape[1]

    # Images per grid step (must divide the batch) to amortize per-step overhead.
    G = 1
    for g in range(min(group_size, bsz), 0, -1):
        if bsz % g == 0:
            G = g
            break

    # Fold BN (eval mode) into per-channel scale/bias of the preceding conv.
    s2, b2 = fold_bn(*params["bn2"])
    s3, b3 = fold_bn(*params["bn3"])
    w_dw_eff = params["w_dw"] * s2[None, None, :]
    # Projection weight stored transposed (c_out, c_exp): the kernel then writes
    # the output channel-major (NCHW) without any explicit transpose.
    w_prj_t = (params["w_project"] * s3[None, :]).T
    b_prj_col = b3.reshape(c_out, 1)

    def _const(shape):
        n = len(shape)
        return pl.BlockSpec(shape, lambda i, n=n: (0,) * n)

    inputs = [x]
    in_specs = [pl.BlockSpec((G, hw, cin), lambda i: (i, 0, 0))]
    if has_expand:
        s1, b1 = fold_bn(*params["bn1"])
        w_exp_eff = params["w_expand"] * s1[None, :]
        inputs += [w_exp_eff, b1.reshape(1, c_exp)]
        in_specs += [_const((cin, c_exp)), _const((1, c_exp))]
    inputs += [w_dw_eff, b2.reshape(1, c_exp),
               params["w_se1"], params["b_se1"].reshape(1, sq),
               params["w_se2"], params["b_se2"].reshape(1, c_exp),
               w_prj_t, b_prj_col]
    in_specs += [_const((k, k, c_exp)), _const((1, c_exp)),
                 _const((c_exp, sq)), _const((1, sq)),
                 _const((sq, c_exp)), _const((1, c_exp)),
                 _const((c_out, c_exp)), _const((c_out, 1))]

    kernel = functools.partial(
        _mbconv_kernel, k=k, stride=stride, pad=pad, h=h, w=w, ho=ho, wo=wo,
        c_exp=c_exp, c_out=c_out, group=G, has_expand=has_expand,
        mm_bf16=matmul_bf16)

    # Size the scoped-VMEM limit from the actual footprint (double-buffered
    # blocks + the two scratches), clamped to a range safe on v5e/v6e/v7x.
    est = (2 * _padded_bytes((G, hw, cin))
           + 2 * _padded_bytes((G, c_out, ho * wo))
           + 2 * sum(_padded_bytes(a.shape) for a in inputs[1:])
           + _padded_bytes((hp, wp, c_exp))
           + _padded_bytes((ho, wo, c_exp)))
    vmem_limit = int(min(64 << 20, max(32 << 20, 2 * est + (4 << 20))))

    out = pl.pallas_call(
        kernel,
        out_shape=jax.ShapeDtypeStruct((bsz, c_out, ho * wo), x.dtype),
        grid_spec=pltpu.PrefetchScalarGridSpec(
            num_scalar_prefetch=0,
            grid=(bsz // G,),
            in_specs=in_specs,
            out_specs=pl.BlockSpec((G, c_out, ho * wo), lambda i: (i, 0, 0)),
            scratch_shapes=[pltpu.VMEM((hp, wp, c_exp), jnp.float32),
                            pltpu.VMEM((ho, wo, c_exp), jnp.float32)],
        ),
        compiler_params=pltpu.CompilerParams(
            dimension_semantics=("parallel",),
            vmem_limit_bytes=vmem_limit),
    )(*inputs)

    # Free trailing-dim split -> (B, C_out, H_out, W_out) NCHW like the PyTorch module.
    return out.reshape(bsz, c_out, ho, wo)


# -------------------- pure-JAX reference (for verification) -----------------
def mbconv_reference(x, x_size, params, cfg):
    bsz, hw, cin = x.shape
    h, w = x_size
    c_exp = cfg["expanded_channels"]
    k = cfg["kernel"]
    stride = cfg["stride"]
    pad = (k - 1) // 2
    eps = 1e-5
    hi = jax.lax.Precision.HIGHEST

    def bn(y, p):
        g, beta, mean, var = p
        return (y - mean) / jnp.sqrt(var + eps) * g + beta

    silu = lambda t: t * jax.nn.sigmoid(t)

    y = x.reshape(bsz, h, w, cin).astype(jnp.float32)
    if c_exp != cin:
        y = silu(bn(jnp.einsum("bhwc,cd->bhwd", y, params["w_expand"], precision=hi),
                    params["bn1"]))
    w_dw = params["w_dw"].reshape(k, k, 1, c_exp)
    y = jax.lax.conv_general_dilated(
        y, w_dw, window_strides=(stride, stride),
        padding=((pad, pad), (pad, pad)),
        dimension_numbers=("NHWC", "HWIO", "NHWC"),
        feature_group_count=c_exp, precision=hi)
    y = silu(bn(y, params["bn2"]))
    pooled = jnp.mean(y, axis=(1, 2))                                   # (B, c_exp)
    s = silu(jnp.matmul(pooled, params["w_se1"], precision=hi) + params["b_se1"])
    s = jax.nn.sigmoid(jnp.matmul(s, params["w_se2"], precision=hi) + params["b_se2"])
    y = y * s[:, None, None, :]
    out = bn(jnp.einsum("bhwc,cd->bhwd", y, params["w_project"], precision=hi),
             params["bn3"])
    return jnp.transpose(out, (0, 3, 1, 2))                             # NCHW


# --------------------------------- params -----------------------------------
def init_params(key, cfg):
    cin = cfg["input_channels"]
    c_exp = cfg["expanded_channels"]
    c_out = cfg["out_channels"]
    sq = cfg["squeeze_channels"]
    k = cfg["kernel"]
    ks = jax.random.split(key, 12)

    def bn(key, c):
        g = 1.0 + 0.1 * jax.random.normal(key, (c,), jnp.float32)
        kk = jax.random.split(key, 3)
        beta = 0.1 * jax.random.normal(kk[0], (c,), jnp.float32)
        mean = 0.1 * jax.random.normal(kk[1], (c,), jnp.float32)
        var = 1.0 + 0.1 * jnp.abs(jax.random.normal(kk[2], (c,), jnp.float32))
        return (g, beta, mean, var)

    return {
        "w_expand": 0.2 * jax.random.normal(ks[0], (cin, c_exp), jnp.float32),
        "bn1": bn(ks[1], c_exp),
        "w_dw": 0.2 * jax.random.normal(ks[2], (k, k, c_exp), jnp.float32),
        "bn2": bn(ks[3], c_exp),
        "w_se1": 0.2 * jax.random.normal(ks[4], (c_exp, sq), jnp.float32),
        "b_se1": 0.1 * jax.random.normal(ks[5], (sq,), jnp.float32),
        "w_se2": 0.2 * jax.random.normal(ks[6], (sq, c_exp), jnp.float32),
        "b_se2": 0.1 * jax.random.normal(ks[7], (c_exp,), jnp.float32),
        "w_project": 0.2 * jax.random.normal(ks[8], (c_exp, c_out), jnp.float32),
        "bn3": bn(ks[9], c_out),
    }


if __name__ == "__main__":
    base_key = jax.random.PRNGKey(0)

    def run_case(case_idx, B, H, W, cin, expand_ratio, k, stride,
                 matmul_bf16=False, group_size=4, tol=2e-3):
        cfg = {
            "input_channels": cin,
            "out_channels": cin,
            "expand_ratio": expand_ratio,
            "kernel": k,
            "stride": stride,
        }
        cfg["expanded_channels"] = cin * expand_ratio
        cfg["squeeze_channels"] = max(1, cin // 4)

        key = jax.random.fold_in(base_key, case_idx)
        kx, kp = jax.random.split(key)
        x = jax.random.normal(kx, (B, H * W, cin), jnp.float32)
        params = init_params(kp, cfg)

        out = jax.block_until_ready(
            mbconv_forward(x, (H, W), params, cfg,
                           matmul_bf16=matmul_bf16, group_size=group_size))
        ref = jax.block_until_ready(mbconv_reference(x, (H, W), params, cfg))
        assert out.shape == ref.shape, (out.shape, ref.shape)
        err = float(jnp.max(jnp.abs(out - ref)))
        assert err < tol, f"case {case_idx}: max abs error {err} (tol {tol})"
        return out.shape

    # 1) standard stride-1 expanded block (G=2 images per grid step), f32 MXU
    s1 = run_case(0, B=2, H=16, W=16, cin=8, expand_ratio=4, k=3, stride=1)
    assert s1 == (2, 8, 16, 16)
    # 2) stride-2, k=5 downsampling block (strided window loads), f32 MXU
    s2 = run_case(1, B=2, H=16, W=16, cin=8, expand_ratio=4, k=5, stride=2)
    assert s2 == (2, 8, 8, 8)
    # 3) expand_ratio=1 block (no expansion conv), single image per grid step
    s3 = run_case(2, B=2, H=8, W=8, cin=32, expand_ratio=1, k=3, stride=1,
                  group_size=1)
    assert s3 == (2, 32, 8, 8)
    # 4) bf16 MXU operands + G=4 image grouping (looser tolerance for bf16)
    s4 = run_case(3, B=4, H=16, W=16, cin=8, expand_ratio=4, k=3, stride=1,
                  matmul_bf16=True, group_size=4, tol=3e-2)
    assert s4 == (4, 8, 16, 16)

    print("KERNEL_OK")
</pallas_src>

<mosaic_0001>
module attributes {stable_mosaic.version = 11 : i64} {
  func.func @_mbconv_kernel(%arg0: i32, %arg1: memref<2x256x8xf32, #tpu.memory_space<vmem>>, %arg2: memref<8x32xf32, #tpu.memory_space<vmem>>, %arg3: memref<1x32xf32, #tpu.memory_space<vmem>>, %arg4: memref<3x3x32xf32, #tpu.memory_space<vmem>>, %arg5: memref<1x32xf32, #tpu.memory_space<vmem>>, %arg6: memref<32x2xf32, #tpu.memory_space<vmem>>, %arg7: memref<1x2xf32, #tpu.memory_space<vmem>>, %arg8: memref<2x32xf32, #tpu.memory_space<vmem>>, %arg9: memref<1x32xf32, #tpu.memory_space<vmem>>, %arg10: memref<8x32xf32, #tpu.memory_space<vmem>>, %arg11: memref<8x1xf32, #tpu.memory_space<vmem>>, %arg12: memref<2x8x256xf32, #tpu.memory_space<vmem>>, %arg13: memref<18x18x32xf32, #tpu.memory_space<vmem>>, %arg14: memref<16x16x32xf32, #tpu.memory_space<vmem>>) attributes {dimension_semantics = [#tpu.dimension_semantics<parallel>], iteration_bounds = array<i64: 1>, scalar_prefetch = 0 : i64, scratch_operands = 2 : i64, tpu.core_type = #tpu.core_type<tc>, window_params = [{transform_indices = @transform_0, window_bounds = array<i64: 2, 256, 8>}, {pipeline_mode = #tpu.pipeline_mode<synchronous>, transform_indices = @transform_1, window_bounds = array<i64: 8, 32>}, {pipeline_mode = #tpu.pipeline_mode<synchronous>, transform_indices = @transform_2, window_bounds = array<i64: 1, 32>}, {pipeline_mode = #tpu.pipeline_mode<synchronous>, transform_indices = @transform_3, window_bounds = array<i64: 3, 3, 32>}, {pipeline_mode = #tpu.pipeline_mode<synchronous>, transform_indices = @transform_4, window_bounds = array<i64: 1, 32>}, {pipeline_mode = #tpu.pipeline_mode<synchronous>, transform_indices = @transform_5, window_bounds = array<i64: 32, 2>}, {pipeline_mode = #tpu.pipeline_mode<synchronous>, transform_indices = @transform_6, window_bounds = array<i64: 1, 2>}, {pipeline_mode = #tpu.pipeline_mode<synchronous>, transform_indices = @transform_7, window_bounds = array<i64: 2, 32>}, {pipeline_mode = #tpu.pipeline_mode<synchronous>, transform_indices = @transform_8, window_bounds = array<i64: 1, 32>}, {pipeline_mode = #tpu.pipeline_mode<synchronous>, transform_indices = @transform_9, window_bounds = array<i64: 8, 32>}, {pipeline_mode = #tpu.pipeline_mode<synchronous>, transform_indices = @transform_10, window_bounds = array<i64: 8, 1>}, {transform_indices = @transform_11, window_bounds = array<i64: 2, 8, 256>}]} {
    %c0 = arith.constant 0 : index
    %c0_0 = arith.constant 0 : index
    %0 = vector.load %arg2[%c0, %c0_0] : memref<8x32xf32, #tpu.memory_space<vmem>>, vector<8x32xf32>
    %c0_1 = arith.constant 0 : index
    %c0_2 = arith.constant 0 : index
    %1 = vector.load %arg3[%c0_1, %c0_2] : memref<1x32xf32, #tpu.memory_space<vmem>>, vector<1x32xf32>
    %c0_3 = arith.constant 0 : index
    %c0_4 = arith.constant 0 : index
    %c0_5 = arith.constant 0 : index
    %2 = vector.load %arg4[%c0_3, %c0_4, %c0_5] : memref<3x3x32xf32, #tpu.memory_space<vmem>>, vector<3x3x32xf32>
    %c0_6 = arith.constant 0 : index
    %c0_7 = arith.constant 0 : index
    %3 = vector.load %arg5[%c0_6, %c0_7] : memref<1x32xf32, #tpu.memory_space<vmem>>, vector<1x32xf32>
    %4 = vector.shape_cast %3 : vector<1x32xf32> to vector<1x1x32xf32>
    %c0_8 = arith.constant 0 : index
    %c0_9 = arith.constant 0 : index
    %5 = vector.load %arg6[%c0_8, %c0_9] : memref<32x2xf32, #tpu.memory_space<vmem>>, vector<32x2xf32>
    %c0_10 = arith.constant 0 : index
    %c0_11 = arith.constant 0 : index
    %6 = vector.load %arg7[%c0_10, %c0_11] : memref<1x2xf32, #tpu.memory_space<vmem>>, vector<1x2xf32>
    %c0_12 = arith.constant 0 : index
    %c0_13 = arith.constant 0 : index
    %7 = vector.load %arg8[%c0_12, %c0_13] : memref<2x32xf32, #tpu.memory_space<vmem>>, vector<2x32xf32>
    %c0_14 = arith.constant 0 : index
    %c0_15 = arith.constant 0 : index
    %8 = vector.load %arg9[%c0_14, %c0_15] : memref<1x32xf32, #tpu.memory_space<vmem>>, vector<1x32xf32>
    %c0_16 = arith.constant 0 : index
    %c0_17 = arith.constant 0 : index
    %9 = vector.load %arg10[%c0_16, %c0_17] : memref<8x32xf32, #tpu.memory_space<vmem>>, vector<8x32xf32>
    %c0_18 = arith.constant 0 : index
    %c0_19 = arith.constant 0 : index
    %10 = vector.load %arg11[%c0_18, %c0_19] : memref<8x1xf32, #tpu.memory_space<vmem>>, vector<8x1xf32>
    %cst = arith.constant 0.000000e+00 : f32
    %11 = vector.broadcast %cst : f32 to vector<1x18x32xf32>
    %c0_20 = arith.constant 0 : index
    %c0_21 = arith.constant 0 : index
    %c0_22 = arith.constant 0 : index
    %12 = vector.load %arg13[%c0_20, %c0_21, %c0_22] : memref<18x18x32xf32, #tpu.memory_space<vmem>>, vector<1x18x32xf32>
    tpu.vector_store %arg13[%c0_20, %c0_21, %c0_22], %11 {strides = array<i32>} : memref<18x18x32xf32, #tpu.memory_space<vmem>>, vector<1x18x32xf32>,
    %cst_23 = arith.constant 0.000000e+00 : f32
    %13 = vector.broadcast %cst_23 : f32 to vector<1x18x32xf32>
    %c17 = arith.constant 17 : index
    %c0_24 = arith.constant 0 : index
    %c0_25 = arith.constant 0 : index
    %14 = vector.load %arg13[%c17, %c0_24, %c0_25] : memref<18x18x32xf32, #tpu.memory_space<vmem>>, vector<1x18x32xf32>
    tpu.vector_store %arg13[%c17, %c0_24, %c0_25], %13 {strides = array<i32>} : memref<18x18x32xf32, #tpu.memory_space<vmem>>, vector<1x18x32xf32>,
    %cst_26 = arith.constant 0.000000e+00 : f32
    %15 = vector.broadcast %cst_26 : f32 to vector<18x1x32xf32>
    %c0_27 = arith.constant 0 : index
    %c0_28 = arith.constant 0 : index
    %c0_29 = arith.constant 0 : index
    %16 = vector.load %arg13[%c0_27, %c0_28, %c0_29] : memref<18x18x32xf32, #tpu.memory_space<vmem>>, vector<18x1x32xf32>
    tpu.vector_store %arg13[%c0_27, %c0_28, %c0_29], %15 {strides = array<i32>} : memref<18x18x32xf32, #tpu.memory_space<vmem>>, vector<18x1x32xf32>,
    %cst_30 = arith.constant 0.000000e+00 : f32
    %17 = vector.broadcast %cst_30 : f32 to vector<18x1x32xf32>
    %c0_31 = arith.constant 0 : index
    %c17_32 = arith.constant 17 : index
    %c0_33 = arith.constant 0 : index
    %18 = vector.load %arg13[%c0_31, %c17_32, %c0_33] : memref<18x18x32xf32, #tpu.memory_space<vmem>>, vector<18x1x32xf32>
    tpu.vector_store %arg13[%c0_31, %c17_32, %c0_33], %17 {strides = array<i32>} : memref<18x18x32xf32, #tpu.memory_space<vmem>>, vector<18x1x32xf32>,
    %c0_34 = arith.constant 0 : index
    %c0_35 = arith.constant 0 : index
    %c0_36 = arith.constant 0 : index
    %19 = vector.load %arg1[%c0_34, %c0_35, %c0_36] : memref<2x256x8xf32, #tpu.memory_space<vmem>>, vector<1x128x8xf32>
    %20 = vector.shape_cast %19 : vector<1x128x8xf32> to vector<128x8xf32>
    %cst_37 = arith.constant dense<0.000000e+00> : vector<128x32xf32>
    %21 = tpu.matmul %20, %0, %cst_37 {dimension_numbers = #tpu.dot_dimension_numbers<[1], [0], [0], [1], [0, 0, 1, 1], [], []>} : vector<128x8xf32>, vector<8x32xf32>, vector<128x32xf32> -> vector<128x32xf32>
    %22 = vector.broadcast %1 : vector<1x32xf32> to vector<128x32xf32>
    %23 = arith.addf %21, %22 : vector<128x32xf32>
    %24 = arith.negf %23 : vector<128x32xf32>
    %25 = math.exp %24 : vector<128x32xf32>
    %cst_38 = arith.constant 1.000000e+00 : f32
    %26 = vector.broadcast %cst_38 : f32 to vector<128x32xf32>
    %27 = arith.addf %26, %25 : vector<128x32xf32>
    %28 = arith.divf %26, %27 : vector<128x32xf32>
    %29 = arith.mulf %23, %28 : vector<128x32xf32>
    %30 = vector.shape_cast %29 : vector<128x32xf32> to vector<8x16x32xf32>
    %c1 = arith.constant 1 : index
    %c1_39 = arith.constant 1 : index
    %c0_40 = arith.constant 0 : index
    %31 = vector.load %arg13[%c1, %c1_39, %c0_40] : memref<18x18x32xf32, #tpu.memory_space<vmem>>, vector<8x16x32xf32>
    tpu.vector_store %arg13[%c1, %c1_39, %c0_40], %30 {strides = array<i32>} : memref<18x18x32xf32, #tpu.memory_space<vmem>>, vector<8x16x32xf32>,
    %c0_41 = arith.constant 0 : index
    %c128 = arith.constant 128 : index
    %c0_42 = arith.constant 0 : index
    %32 = vector.load %arg1[%c0_41, %c128, %c0_42] : memref<2x256x8xf32, #tpu.memory_space<vmem>>, vector<1x128x8xf32>
    %33 = vector.shape_cast %32 : vector<1x128x8xf32> to vector<128x8xf32>
    %cst_43 = arith.constant dense<0.000000e+00> : vector<128x32xf32>
    %34 = tpu.matmul %33, %0, %cst_43 {dimension_numbers = #tpu.dot_dimension_numbers<[1], [0], [0], [1], [0, 0, 1, 1], [], []>} : vector<128x8xf32>, vector<8x32xf32>, vector<128x32xf32> -> vector<128x32xf32>
    %35 = vector.broadcast %1 : vector<1x32xf32> to vector<128x32xf32>
    %36 = arith.addf %34, %35 : vector<128x32xf32>
    %37 = arith.negf %36 : vector<128x32xf32>
    %38 = math.exp %37 : vector<128x32xf32>
    %cst_44 = arith.constant 1.000000e+00 : f32
    %39 = vector.broadcast %cst_44 : f32 to vector<128x32xf32>
    %40 = arith.addf %39, %38 : vector<128x32xf32>
    %41 = arith.divf %39, %40 : vector<128x32xf32>
    %42 = arith.mulf %36, %41 : vector<128x32xf32>
    %43 = vector.shape_cast %42 : vector<128x32xf32> to vector<8x16x32xf32>
    %c9 = arith.constant 9 : index
    %c1_45 = arith.constant 1 : index
    %c0_46 = arith.constant 0 : index
    %44 = vector.load %arg13[%c9, %c1_45, %c0_46] : memref<18x18x32xf32, #tpu.memory_space<vmem>>, vector<8x16x32xf32>
    tpu.vector_store %arg13[%c9, %c1_45, %c0_46], %43 {strides = array<i32>} : memref<18x18x32xf32, #tpu.memory_space<vmem>>, vector<8x16x32xf32>,
    %cst_47 = arith.constant 0.000000e+00 : f32
    %45 = vector.broadcast %cst_47 : f32 to vector<1x32xf32>
    %cst_48 = arith.constant 0.000000e+00 : f32
    %46 = vector.broadcast %cst_48 : f32 to vector<8x16x32xf32>
    %c0_49 = arith.constant 0 : index
    %c0_50 = arith.constant 0 : index
    %c0_51 = arith.constant 0 : index
    %47 = vector.load %arg13[%c0_49, %c0_50, %c0_51] : memref<18x18x32xf32, #tpu.memory_space<vmem>>, vector<8x16x32xf32>
    %48 = vector.extract_strided_slice %2 {offsets = [0, 0, 0], sizes = [1, 1, 32], strides = [1, 1, 1]} : vector<3x3x32xf32> to vector<1x1x32xf32>
    %49 = vector.shape_cast %48 : vector<1x1x32xf32> to vector<32xf32>
    %50 = vector.shape_cast %49 : vector<32xf32> to vector<1x1x32xf32>
    %51 = vector.broadcast %50 : vector<1x1x32xf32> to vector<8x16x32xf32>
    %52 = arith.mulf %47, %51 : vector<8x16x32xf32>
    %53 = arith.addf %46, %52 : vector<8x16x32xf32>
    %c0_52 = arith.constant 0 : index
    %c1_53 = arith.constant 1 : index
    %c0_54 = arith.constant 0 : index
    %54 = vector.load %arg13[%c0_52, %c1_53, %c0_54] : memref<18x18x32xf32, #tpu.memory_space<vmem>>, vector<8x16x32xf32>
    %55 = vector.extract_strided_slice %2 {offsets = [0, 1, 0], sizes = [1, 1, 32], strides = [1, 1, 1]} : vector<3x3x32xf32> to vector<1x1x32xf32>
    %56 = vector.shape_cast %55 : vector<1x1x32xf32> to vector<32xf32>
    %57 = vector.shape_cast %56 : vector<32xf32> to vector<1x1x32xf32>
    %58 = vector.broadcast %57 : vector<1x1x32xf32> to vector<8x16x32xf32>
    %59 = arith.mulf %54, %58 : vector<8x16x32xf32>
    %60 = arith.addf %53, %59 : vector<8x16x32xf32>
    %c0_55 = arith.constant 0 : index
    %c2 = arith.constant 2 : index
    %c0_56 = arith.constant 0 : index
    %61 = vector.load %arg13[%c0_55, %c2, %c0_56] : memref<18x18x32xf32, #tpu.memory_space<vmem>>, vector<8x16x32xf32>
    %62 = vector.extract_strided_slice %2 {offsets = [0, 2, 0], sizes = [1, 1, 32], strides = [1, 1, 1]} : vector<3x3x32xf32> to vector<1x1x32xf32>
    %63 = vector.shape_cast %62 : vector<1x1x32xf32> to vector<32xf32>
    %64 = vector.shape_cast %63 : vector<32xf32> to vector<1x1x32xf32>
    %65 = vector.broadcast %64 : vector<1x1x32xf32> to vector<8x16x32xf32>
    %66 = arith.mulf %61, %65 : vector<8x16x32xf32>
    %67 = arith.addf %60, %66 : vector<8x16x32xf32>
    %c1_57 = arith.constant 1 : index
    %c0_58 = arith.constant 0 : index
    %c0_59 = arith.constant 0 : index
    %68 = vector.load %arg13[%c1_57, %c0_58, %c0_59] : memref<18x18x32xf32, #tpu.memory_space<vmem>>, vector<8x16x32xf32>
    %69 = vector.extract_strided_slice %2 {offsets = [1, 0, 0], sizes = [1, 1, 32], strides = [1, 1, 1]} : vector<3x3x32xf32> to vector<1x1x32xf32>
    %70 = vector.shape_cast %69 : vector<1x1x32xf32> to vector<32xf32>
    %71 = vector.shape_cast %70 : vector<32xf32> to vector<1x1x32xf32>
    %72 = vector.broadcast %71 : vector<1x1x32xf32> to vector<8x16x32xf32>
    %73 = arith.mulf %68, %72 : vector<8x16x32xf32>
    %74 = arith.addf %67, %73 : vector<8x16x32xf32>
    %c1_60 = arith.constant 1 : index
    %c1_61 = arith.constant 1 : index
    %c0_62 = arith.constant 0 : index
    %75 = vector.load %arg13[%c1_60, %c1_61, %c0_62] : memref<18x18x32xf32, #tpu.memory_space<vmem>>, vector<8x16x32xf32>
    %76 = vector.extract_strided_slice %2 {offsets = [1, 1, 0], sizes = [1, 1, 32], strides = [1, 1, 1]} : vector<3x3x32xf32> to vector<1x1x32xf32>
    %77 = vector.shape_cast %76 : vector<1x1x32xf32> to vector<32xf32>
    %78 = vector.shape_cast %77 : vector<32xf32> to vector<1x1x32xf32>
    %79 = vector.broadcast %78 : vector<1x1x32xf32> to vector<8x16x32xf32>
    %80 = arith.mulf %75, %79 : vector<8x16x32xf32>
    %81 = arith.addf %74, %80 : vector<8x16x32xf32>
    %c1_63 = arith.constant 1 : index
    %c2_64 = arith.constant 2 : index
    %c0_65 = arith.constant 0 : index
    %82 = vector.load %arg13[%c1_63, %c2_64, %c0_65] : memref<18x18x32xf32, #tpu.memory_space<vmem>>, vector<8x16x32xf32>
    %83 = vector.extract_strided_slice %2 {offsets = [1, 2, 0], sizes = [1, 1, 32], strides = [1, 1, 1]} : vector<3x3x32xf32> to vector<1x1x32xf32>
    %84 = vector.shape_cast %83 : vector<1x1x32xf32> to vector<32xf32>
    %85 = vector.shape_cast %84 : vector<32xf32> to vector<1x1x32xf32>
    %86 = vector.broadcast %85 : vector<1x1x32xf32> to vector<8x16x32xf32>
    %87 = arith.mulf %82, %86 : vector<8x16x32xf32>
    %88 = arith.addf %81, %87 : vector<8x16x32xf32>
    %c2_66 = arith.constant 2 : index
    %c0_67 = arith.constant 0 : index
    %c0_68 = arith.constant 0 : index
    %89 = vector.load %arg13[%c2_66, %c0_67, %c0_68] : memref<18x18x32xf32, #tpu.memory_space<vmem>>, vector<8x16x32xf32>
    %90 = vector.extract_strided_slice %2 {offsets = [2, 0, 0], sizes = [1, 1, 32], strides = [1, 1, 1]} : vector<3x3x32xf32> to vector<1x1x32xf32>
    %91 = vector.shape_cast %90 : vector<1x1x32xf32> to vector<32xf32>
    %92 = vector.shape_cast %91 : vector<32xf32> to vector<1x1x32xf32>
    %93 = vector.broadcast %92 : vector<1x1x32xf32> to vector<8x16x32xf32>
    %94 = arith.mulf %89, %93 : vector<8x16x32xf32>
    %95 = arith.addf %88, %94 : vector<8x16x32xf32>
    %c2_69 = arith.constant 2 : index
    %c1_70 = arith.constant 1 : index
    %c0_71 = arith.constant 0 : index
    %96 = vector.load %arg13[%c2_69, %c1_70, %c0_71] : memref<18x18x32xf32, #tpu.memory_space<vmem>>, vector<8x16x32xf32>
    %97 = vector.extract_strided_slice %2 {offsets = [2, 1, 0], sizes = [1, 1, 32], strides = [1, 1, 1]} : vector<3x3x32xf32> to vector<1x1x32xf32>
    %98 = vector.shape_cast %97 : vector<1x1x32xf32> to vector<32xf32>
    %99 = vector.shape_cast %98 : vector<32xf32> to vector<1x1x32xf32>
    %100 = vector.broadcast %99 : vector<1x1x32xf32> to vector<8x16x32xf32>
    %101 = arith.mulf %96, %100 : vector<8x16x32xf32>
    %102 = arith.addf %95, %101 : vector<8x16x32xf32>
    %c2_72 = arith.constant 2 : index
    %c2_73 = arith.constant 2 : index
    %c0_74 = arith.constant 0 : index
    %103 = vector.load %arg13[%c2_72, %c2_73, %c0_74] : memref<18x18x32xf32, #tpu.memory_space<vmem>>, vector<8x16x32xf32>
    %104 = vector.extract_strided_slice %2 {offsets = [2, 2, 0], sizes = [1, 1, 32], strides = [1, 1, 1]} : vector<3x3x32xf32> to vector<1x1x32xf32>
    %105 = vector.shape_cast %104 : vector<1x1x32xf32> to vector<32xf32>
    %106 = vector.shape_cast %105 : vector<32xf32> to vector<1x1x32xf32>
    %107 = vector.broadcast %106 : vector<1x1x32xf32> to vector<8x16x32xf32>
    %108 = arith.mulf %103, %107 : vector<8x16x32xf32>
    %109 = arith.addf %102, %108 : vector<8x16x32xf32>
    %110 = vector.broadcast %4 : vector<1x1x32xf32> to vector<8x16x32xf32>
    %111 = arith.addf %109, %110 : vector<8x16x32xf32>
    %112 = arith.negf %111 : vector<8x16x32xf32>
    %113 = math.exp %112 : vector<8x16x32xf32>
    %cst_75 = arith.constant 1.000000e+00 : f32
    %114 = vector.broadcast %cst_75 : f32 to vector<8x16x32xf32>
    %115 = arith.addf %114, %113 : vector<8x16x32xf32>
    %116 = arith.divf %114, %115 : vector<8x16x32xf32>
    %117 = arith.mulf %111, %116 : vector<8x16x32xf32>
    %c0_76 = arith.constant 0 : index
    %c0_77 = arith.constant 0 : index
    %c0_78 = arith.constant 0 : index
    %118 = vector.load %arg14[%c0_76, %c0_77, %c0_78] : memref<16x16x32xf32, #tpu.memory_space<vmem>>, vector<8x16x32xf32>
    tpu.vector_store %arg14[%c0_76, %c0_77, %c0_78], %117 {strides = array<i32>} : memref<16x16x32xf32, #tpu.memory_space<vmem>>, vector<8x16x32xf32>,
    %cst_79 = arith.constant dense<0.000000e+00> : vector<32xf32>
    %119 = vector.multi_reduction <add>, %117, %cst_79 [0, 1] : vector<8x16x32xf32> to vector<32xf32>
    %120 = vector.shape_cast %119 : vector<32xf32> to vector<1x32xf32>
    %121 = arith.addf %45, %120 : vector<1x32xf32>
    %cst_80 = arith.constant 0.000000e+00 : f32
    %122 = vector.broadcast %cst_80 : f32 to vector<8x16x32xf32>
    %c8 = arith.constant 8 : index
    %c0_81 = arith.constant 0 : index
    %c0_82 = arith.constant 0 : index
    %123 = vector.load %arg13[%c8, %c0_81, %c0_82] : memref<18x18x32xf32, #tpu.memory_space<vmem>>, vector<8x16x32xf32>
    %124 = vector.extract_strided_slice %2 {offsets = [0, 0, 0], sizes = [1, 1, 32], strides = [1, 1, 1]} : vector<3x3x32xf32> to vector<1x1x32xf32>
    %125 = vector.shape_cast %124 : vector<1x1x32xf32> to vector<32xf32>
    %126 = vector.shape_cast %125 : vector<32xf32> to vector<1x1x32xf32>
    %127 = vector.broadcast %126 : vector<1x1x32xf32> to vector<8x16x32xf32>
    %128 = arith.mulf %123, %127 : vector<8x16x32xf32>
    %129 = arith.addf %122, %128 : vector<8x16x32xf32>
    %c8_83 = arith.constant 8 : index
    %c1_84 = arith.constant 1 : index
    %c0_85 = arith.constant 0 : index
    %130 = vector.load %arg13[%c8_83, %c1_84, %c0_85] : memref<18x18x32xf32, #tpu.memory_space<vmem>>, vector<8x16x32xf32>
    %131 = vector.extract_strided_slice %2 {offsets = [0, 1, 0], sizes = [1, 1, 32], strides = [1, 1, 1]} : vector<3x3x32xf32> to vector<1x1x32xf32>
    %132 = vector.shape_cast %131 : vector<1x1x32xf32> to vector<32xf32>
    %133 = vector.shape_cast %132 : vector<32xf32> to vector<1x1x32xf32>
    %134 = vector.broadcast %133 : vector<1x1x32xf32> to vector<8x16x32xf32>
    %135 = arith.mulf %130, %134 : vector<8x16x32xf32>
    %136 = arith.addf %129, %135 : vector<8x16x32xf32>
    %c8_86 = arith.constant 8 : index
    %c2_87 = arith.constant 2 : index
    %c0_88 = arith.constant 0 : index
    %137 = vector.load %arg13[%c8_86, %c2_87, %c0_88] : memref<18x18x32xf32, #tpu.memory_space<vmem>>, vector<8x16x32xf32>
    %138 = vector.extract_strided_slice %2 {offsets = [0, 2, 0], sizes = [1, 1, 32], strides = [1, 1, 1]} : vector<3x3x32xf32> to vector<1x1x32xf32>
    %139 = vector.shape_cast %138 : vector<1x1x32xf32> to vector<32xf32>
    %140 = vector.shape_cast %139 : vector<32xf32> to vector<1x1x32xf32>
    %141 = vector.broadcast %140 : vector<1x1x32xf32> to vector<8x16x32xf32>
    %142 = arith.mulf %137, %141 : vector<8x16x32xf32>
    %143 = arith.addf %136, %142 : vector<8x16x32xf32>
    %c9_89 = arith.constant 9 : index
    %c0_90 = arith.constant 0 : index
    %c0_91 = arith.constant 0 : index
    %144 = vector.load %arg13[%c9_89, %c0_90, %c0_91] : memref<18x18x32xf32, #tpu.memory_space<vmem>>, vector<8x16x32xf32>
    %145 = vector.extract_strided_slice %2 {offsets = [1, 0, 0], sizes = [1, 1, 32], strides = [1, 1, 1]} : vector<3x3x32xf32> to vector<1x1x32xf32>
    %146 = vector.shape_cast %145 : vector<1x1x32xf32> to vector<32xf32>
    %147 = vector.shape_cast %146 : vector<32xf32> to vector<1x1x32xf32>
    %148 = vector.broadcast %147 : vector<1x1x32xf32> to vector<8x16x32xf32>
    %149 = arith.mulf %144, %148 : vector<8x16x32xf32>
    %150 = arith.addf %143, %149 : vector<8x16x32xf32>
    %c9_92 = arith.constant 9 : index
    %c1_93 = arith.constant 1 : index
    %c0_94 = arith.constant 0 : index
    %151 = vector.load %arg13[%c9_92, %c1_93, %c0_94] : memref<18x18x32xf32, #tpu.memory_space<vmem>>, vector<8x16x32xf32>
    %152 = vector.extract_strided_slice %2 {offsets = [1, 1, 0], sizes = [1, 1, 32], strides = [1, 1, 1]} : vector<3x3x32xf32> to vector<1x1x32xf32>
    %153 = vector.shape_cast %152 : vector<1x1x32xf32> to vector<32xf32>
    %154 = vector.shape_cast %153 : vector<32xf32> to vector<1x1x32xf32>
    %155 = vector.broadcast %154 : vector<1x1x32xf32> to vector<8x16x32xf32>
    %156 = arith.mulf %151, %155 : vector<8x16x32xf32>
    %157 = arith.addf %150, %156 : vector<8x16x32xf32>
    %c9_95 = arith.constant 9 : index
    %c2_96 = arith.constant 2 : index
    %c0_97 = arith.constant 0 : index
    %158 = vector.load %arg13[%c9_95, %c2_96, %c0_97] : memref<18x18x32xf32, #tpu.memory_space<vmem>>, vector<8x16x32xf32>
    %159 = vector.extract_strided_slice %2 {offsets = [1, 2, 0], sizes = [1, 1, 32], strides = [1, 1, 1]} : vector<3x3x32xf32> to vector<1x1x32xf32>
    %160 = vector.shape_cast %159 : vector<1x1x32xf32> to vector<32xf32>
    %161 = vector.shape_cast %160 : vector<32xf32> to vector<1x1x32xf32>
    %162 = vector.broadcast %161 : vector<1x1x32xf32> to vector<8x16x32xf32>
    %163 = arith.mulf %158, %162 : vector<8x16x32xf32>
    %164 = arith.addf %157, %163 : vector<8x16x32xf32>
    %c10 = arith.constant 10 : index
    %c0_98 = arith.constant 0 : index
    %c0_99 = arith.constant 0 : index
    %165 = vector.load %arg13[%c10, %c0_98, %c0_99] : memref<18x18x32xf32, #tpu.memory_space<vmem>>, vector<8x16x32xf32>
    %166 = vector.extract_strided_slice %2 {offsets = [2, 0, 0], sizes = [1, 1, 32], strides = [1, 1, 1]} : vector<3x3x32xf32> to vector<1x1x32xf32>
    %167 = vector.shape_cast %166 : vector<1x1x32xf32> to vector<32xf32>
    %168 = vector.shape_cast %167 : vector<32xf32> to vector<1x1x32xf32>
    %169 = vector.broadcast %168 : vector<1x1x32xf32> to vector<8x16x32xf32>
    %170 = arith.mulf %165, %169 : vector<8x16x32xf32>
    %171 = arith.addf %164, %170 : vector<8x16x32xf32>
    %c10_100 = arith.constant 10 : index
    %c1_101 = arith.constant 1 : index
    %c0_102 = arith.constant 0 : index
    %172 = vector.load %arg13[%c10_100, %c1_101, %c0_102] : memref<18x18x32xf32, #tpu.memory_space<vmem>>, vector<8x16x32xf32>
    %173 = vector.extract_strided_slice %2 {offsets = [2, 1, 0], sizes = [1, 1, 32], strides = [1, 1, 1]} : vector<3x3x32xf32> to vector<1x1x32xf32>
    %174 = vector.shape_cast %173 : vector<1x1x32xf32> to vector<32xf32>
    %175 = vector.shape_cast %174 : vector<32xf32> to vector<1x1x32xf32>
    %176 = vector.broadcast %175 : vector<1x1x32xf32> to vector<8x16x32xf32>
    %177 = arith.mulf %172, %176 : vector<8x16x32xf32>
    %178 = arith.addf %171, %177 : vector<8x16x32xf32>
    %c10_103 = arith.constant 10 : index
    %c2_104 = arith.constant 2 : index
    %c0_105 = arith.constant 0 : index
    %179 = vector.load %arg13[%c10_103, %c2_104, %c0_105] : memref<18x18x32xf32, #tpu.memory_space<vmem>>, vector<8x16x32xf32>
    %180 = vector.extract_strided_slice %2 {offsets = [2, 2, 0], sizes = [1, 1, 32], strides = [1, 1, 1]} : vector<3x3x32xf32> to vector<1x1x32xf32>
    %181 = vector.shape_cast %180 : vector<1x1x32xf32> to vector<32xf32>
    %182 = vector.shape_cast %181 : vector<32xf32> to vector<1x1x32xf32>
    %183 = vector.broadcast %182 : vector<1x1x32xf32> to vector<8x16x32xf32>
    %184 = arith.mulf %179, %183 : vector<8x16x32xf32>
    %185 = arith.addf %178, %184 : vector<8x16x32xf32>
    %186 = vector.broadcast %4 : vector<1x1x32xf32> to vector<8x16x32xf32>
    %187 = arith.addf %185, %186 : vector<8x16x32xf32>
    %188 = arith.negf %187 : vector<8x16x32xf32>
    %189 = math.exp %188 : vector<8x16x32xf32>
    %cst_106 = arith.constant 1.000000e+00 : f32
    %190 = vector.broadcast %cst_106 : f32 to vector<8x16x32xf32>
    %191 = arith.addf %190, %189 : vector<8x16x32xf32>
    %192 = arith.divf %190, %191 : vector<8x16x32xf32>
    %193 = arith.mulf %187, %192 : vector<8x16x32xf32>
    %c8_107 = arith.constant 8 : index
    %c0_108 = arith.constant 0 : index
    %c0_109 = arith.constant 0 : index
    %194 = vector.load %arg14[%c8_107, %c0_108, %c0_109] : memref<16x16x32xf32, #tpu.memory_space<vmem>>, vector<8x16x32xf32>
    tpu.vector_store %arg14[%c8_107, %c0_108, %c0_109], %193 {strides = array<i32>} : memref<16x16x32xf32, #tpu.memory_space<vmem>>, vector<8x16x32xf32>,
    %cst_110 = arith.constant dense<0.000000e+00> : vector<32xf32>
    %195 = vector.multi_reduction <add>, %193, %cst_110 [0, 1] : vector<8x16x32xf32> to vector<32xf32>
    %196 = vector.shape_cast %195 : vector<32xf32> to vector<1x32xf32>
    %197 = arith.addf %121, %196 : vector<1x32xf32>
    %cst_111 = arith.constant 3.906250e-03 : f32
    %198 = vector.broadcast %cst_111 : f32 to vector<1x32xf32>
    %199 = arith.mulf %197, %198 : vector<1x32xf32>
    %cst_112 = arith.constant dense<0.000000e+00> : vector<1x2xf32>
    %200 = tpu.matmul %199, %5, %cst_112 {dimension_numbers = #tpu.dot_dimension_numbers<[1], [0], [0], [1], [0, 0, 1, 1], [], []>} : vector<1x32xf32>, vector<32x2xf32>, vector<1x2xf32> -> vector<1x2xf32>
    %201 = arith.addf %200, %6 : vector<1x2xf32>
    %202 = arith.negf %201 : vector<1x2xf32>
    %203 = math.exp %202 : vector<1x2xf32>
    %cst_113 = arith.constant 1.000000e+00 : f32
    %204 = vector.broadcast %cst_113 : f32 to vector<1x2xf32>
    %205 = arith.addf %204, %203 : vector<1x2xf32>
    %206 = arith.divf %204, %205 : vector<1x2xf32>
    %207 = arith.mulf %201, %206 : vector<1x2xf32>
    %cst_114 = arith.constant dense<0.000000e+00> : vector<1x32xf32>
    %208 = tpu.matmul %207, %7, %cst_114 {dimension_numbers = #tpu.dot_dimension_numbers<[1], [0], [0], [1], [0, 0, 1, 1], [], []>} : vector<1x2xf32>, vector<2x32xf32>, vector<1x32xf32> -> vector<1x32xf32>
    %209 = arith.addf %208, %8 : vector<1x32xf32>
    %210 = arith.negf %209 : vector<1x32xf32>
    %211 = math.exp %210 : vector<1x32xf32>
    %cst_115 = arith.constant 1.000000e+00 : f32
    %212 = vector.broadcast %cst_115 : f32 to vector<1x32xf32>
    %213 = arith.addf %212, %211 : vector<1x32xf32>
    %214 = arith.divf %212, %213 : vector<1x32xf32>
    %215 = vector.broadcast %214 : vector<1x32xf32> to vector<8x32xf32>
    %216 = arith.mulf %9, %215 : vector<8x32xf32>
    %c0_116 = arith.constant 0 : index
    %c0_117 = arith.constant 0 : index
    %c0_118 = arith.constant 0 : index
    %217 = vector.load %arg14[%c0_116, %c0_117, %c0_118] : memref<16x16x32xf32, #tpu.memory_space<vmem>>, vector<8x16x32xf32>
    %218 = vector.shape_cast %217 : vector<8x16x32xf32> to vector<128x32xf32>
    %cst_119 = arith.constant dense<0.000000e+00> : vector<8x128xf32>
    %219 = tpu.matmul %216, %218, %cst_119 {dimension_numbers = #tpu.dot_dimension_numbers<[1], [1], [0], [0], [0, 0, 1, 0], [], []>} : vector<8x32xf32>, vector<128x32xf32>, vector<8x128xf32> -> vector<8x128xf32>
    %220 = vector.broadcast %10 : vector<8x1xf32> to vector<8x128xf32>
    %221 = arith.addf %219, %220 : vector<8x128xf32>
    %c0_120 = arith.constant 0 : index
    %c0_121 = arith.constant 0 : index
    %c0_122 = arith.constant 0 : index
    %222 = vector.load %arg12[%c0_120, %c0_121, %c0_122] : memref<2x8x256xf32, #tpu.memory_space<vmem>>, vector<1x8x128xf32>
    %223 = vector.shape_cast %222 : vector<1x8x128xf32> to vector<8x128xf32>
    %224 = vector.shape_cast %221 : vector<8x128xf32> to vector<1x8x128xf32>
    tpu.vector_store %arg12[%c0_120, %c0_121, %c0_122], %224 {strides = array<i32>} : memref<2x8x256xf32, #tpu.memory_space<vmem>>, vector<1x8x128xf32>,
    %c8_123 = arith.constant 8 : index
    %c0_124 = arith.constant 0 : index
    %c0_125 = arith.constant 0 : index
    %225 = vector.load %arg14[%c8_123, %c0_124, %c0_125] : memref<16x16x32xf32, #tpu.memory_space<vmem>>, vector<8x16x32xf32>
    %226 = vector.shape_cast %225 : vector<8x16x32xf32> to vector<128x32xf32>
    %cst_126 = arith.constant dense<0.000000e+00> : vector<8x128xf32>
    %227 = tpu.matmul %216, %226, %cst_126 {dimension_numbers = #tpu.dot_dimension_numbers<[1], [1], [0], [0], [0, 0, 1, 0], [], []>} : vector<8x32xf32>, vector<128x32xf32>, vector<8x128xf32> -> vector<8x128xf32>
    %228 = vector.broadcast %10 : vector<8x1xf32> to vector<8x128xf32>
    %229 = arith.addf %227, %228 : vector<8x128xf32>
    %c0_127 = arith.constant 0 : index
    %c0_128 = arith.constant 0 : index
    %c128_129 = arith.constant 128 : index
    %230 = vector.load %arg12[%c0_127, %c0_128, %c128_129] : memref<2x8x256xf32, #tpu.memory_space<vmem>>, vector<1x8x128xf32>
    %231 = vector.shape_cast %230 : vector<1x8x128xf32> to vector<8x128xf32>
    %232 = vector.shape_cast %229 : vector<8x128xf32> to vector<1x8x128xf32>
    tpu.vector_store %arg12[%c0_127, %c0_128, %c128_129], %232 {strides = array<i32>} : memref<2x8x256xf32, #tpu.memory_space<vmem>>, vector<1x8x128xf32>,
    %c1_130 = arith.constant 1 : index
    %c0_131 = arith.constant 0 : index
    %c0_132 = arith.constant 0 : index
    %233 = vector.load %arg1[%c1_130, %c0_131, %c0_132] : memref<2x256x8xf32, #tpu.memory_space<vmem>>, vector<1x128x8xf32>
    %234 = vector.shape_cast %233 : vector<1x128x8xf32> to vector<128x8xf32>
    %cst_133 = arith.constant dense<0.000000e+00> : vector<128x32xf32>
    %235 = tpu.matmul %234, %0, %cst_133 {dimension_numbers = #tpu.dot_dimension_numbers<[1], [0], [0], [1], [0, 0, 1, 1], [], []>} : vector<128x8xf32>, vector<8x32xf32>, vector<128x32xf32> -> vector<128x32xf32>
    %236 = vector.broadcast %1 : vector<1x32xf32> to vector<128x32xf32>
    %237 = arith.addf %235, %236 : vector<128x32xf32>
    %238 = arith.negf %237 : vector<128x32xf32>
    %239 = math.exp %238 : vector<128x32xf32>
    %cst_134 = arith.constant 1.000000e+00 : f32
    %240 = vector.broadcast %cst_134 : f32 to vector<128x32xf32>
    %241 = arith.addf %240, %239 : vector<128x32xf32>
    %242 = arith.divf %240, %241 : vector<128x32xf32>
    %243 = arith.mulf %237, %242 : vector<128x32xf32>
    %244 = vector.shape_cast %243 : vector<128x32xf32> to vector<8x16x32xf32>
    %c1_135 = arith.constant 1 : index
    %c1_136 = arith.constant 1 : index
    %c0_137 = arith.constant 0 : index
    %245 = vector.load %arg13[%c1_135, %c1_136, %c0_137] : memref<18x18x32xf32, #tpu.memory_space<vmem>>, vector<8x16x32xf32>
    tpu.vector_store %arg13[%c1_135, %c1_136, %c0_137], %244 {strides = array<i32>} : memref<18x18x32xf32, #tpu.memory_space<vmem>>, vector<8x16x32xf32>,
    %c1_138 = arith.constant 1 : index
    %c128_139 = arith.constant 128 : index
    %c0_140 = arith.constant 0 : index
    %246 = vector.load %arg1[%c1_138, %c128_139, %c0_140] : memref<2x256x8xf32, #tpu.memory_space<vmem>>, vector<1x128x8xf32>
    %247 = vector.shape_cast %246 : vector<1x128x8xf32> to vector<128x8xf32>
    %cst_141 = arith.constant dense<0.000000e+00> : vector<128x32xf32>
    %248 = tpu.matmul %247, %0, %cst_141 {dimension_numbers = #tpu.dot_dimension_numbers<[1], [0], [0], [1], [0, 0, 1, 1], [], []>} : vector<128x8xf32>, vector<8x32xf32>, vector<128x32xf32> -> vector<128x32xf32>
    %249 = vector.broadcast %1 : vector<1x32xf32> to vector<128x32xf32>
    %250 = arith.addf %248, %249 : vector<128x32xf32>
    %251 = arith.negf %250 : vector<128x32xf32>
    %252 = math.exp %251 : vector<128x32xf32>
    %cst_142 = arith.constant 1.000000e+00 : f32
    %253 = vector.broadcast %cst_142 : f32 to vector<128x32xf32>
    %254 = arith.addf %253, %252 : vector<128x32xf32>
    %255 = arith.divf %253, %254 : vector<128x32xf32>
    %256 = arith.mulf %250, %255 : vector<128x32xf32>
    %257 = vector.shape_cast %256 : vector<128x32xf32> to vector<8x16x32xf32>
    %c9_143 = arith.constant 9 : index
    %c1_144 = arith.constant 1 : index
    %c0_145 = arith.constant 0 : index
    %258 = vector.load %arg13[%c9_143, %c1_144, %c0_145] : memref<18x18x32xf32, #tpu.memory_space<vmem>>, vector<8x16x32xf32>
    tpu.vector_store %arg13[%c9_143, %c1_144, %c0_145], %257 {strides = array<i32>} : memref<18x18x32xf32, #tpu.memory_space<vmem>>, vector<8x16x32xf32>,
    %cst_146 = arith.constant 0.000000e+00 : f32
    %259 = vector.broadcast %cst_146 : f32 to vector<1x32xf32>
    %cst_147 = arith.constant 0.000000e+00 : f32
    %260 = vector.broadcast %cst_147 : f32 to vector<8x16x32xf32>
    %c0_148 = arith.constant 0 : index
    %c0_149 = arith.constant 0 : index
    %c0_150 = arith.constant 0 : index
    %261 = vector.load %arg13[%c0_148, %c0_149, %c0_150] : memref<18x18x32xf32, #tpu.memory_space<vmem>>, vector<8x16x32xf32>
    %262 = vector.extract_strided_slice %2 {offsets = [0, 0, 0], sizes = [1, 1, 32], strides = [1, 1, 1]} : vector<3x3x32xf32> to vector<1x1x32xf32>
    %263 = vector.shape_cast %262 : vector<1x1x32xf32> to vector<32xf32>
    %264 = vector.shape_cast %263 : vector<32xf32> to vector<1x1x32xf32>
    %265 = vector.broadcast %264 : vector<1x1x32xf32> to vector<8x16x32xf32>
    %266 = arith.mulf %261, %265 : vector<8x16x32xf32>
    %267 = arith.addf %260, %266 : vector<8x16x32xf32>
    %c0_151 = arith.constant 0 : index
    %c1_152 = arith.constant 1 : index
    %c0_153 = arith.constant 0 : index
    %268 = vector.load %arg13[%c0_151, %c1_152, %c0_153] : memref<18x18x32xf32, #tpu.memory_space<vmem>>, vector<8x16x32xf32>
    %269 = vector.extract_strided_slice %2 {offsets = [0, 1, 0], sizes = [1, 1, 32], strides = [1, 1, 1]} : vector<3x3x32xf32> to vector<1x1x32xf32>
    %270 = vector.shape_cast %269 : vector<1x1x32xf32> to vector<32xf32>
    %271 = vector.shape_cast %270 : vector<32xf32> to vector<1x1x32xf32>
    %272 = vector.broadcast %271 : vector<1x1x32xf32> to vector<8x16x32xf32>
    %273 = arith.mulf %268, %272 : vector<8x16x32xf32>
    %274 = arith.addf %267, %273 : vector<8x16x32xf32>
    %c0_154 = arith.constant 0 : index
    %c2_155 = arith.constant 2 : index
    %c0_156 = arith.constant 0 : index
    %275 = vector.load %arg13[%c0_154, %c2_155, %c0_156] : memref<18x18x32xf32, #tpu.memory_space<vmem>>, vector<8x16x32xf32>
    %276 = vector.extract_strided_slice %2 {offsets = [0, 2, 0], sizes = [1, 1, 32], strides = [1, 1, 1]} : vector<3x3x32xf32> to vector<1x1x32xf32>
    %277 = vector.shape_cast %276 : vector<1x1x32xf32> to vector<32xf32>
    %278 = vector.shape_cast %277 : vector<32xf32> to vector<1x1x32xf32>
    %279 = vector.broadcast %278 : vector<1x1x32xf32> to vector<8x16x32xf32>
    %280 = arith.mulf %275, %279 : vector<8x16x32xf32>
    %281 = arith.addf %274, %280 : vector<8x16x32xf32>
    %c1_157 = arith.constant 1 : index
    %c0_158 = arith.constant 0 : index
    %c0_159 = arith.constant 0 : index
    %282 = vector.load %arg13[%c1_157, %c0_158, %c0_159] : memref<18x18x32xf32, #tpu.memory_space<vmem>>, vector<8x16x32xf32>
    %283 = vector.extract_strided_slice %2 {offsets = [1, 0, 0], sizes = [1, 1, 32], strides = [1, 1, 1]} : vector<3x3x32xf32> to vector<1x1x32xf32>
    %284 = vector.shape_cast %283 : vector<1x1x32xf32> to vector<32xf32>
    %285 = vector.shape_cast %284 : vector<32xf32> to vector<1x1x32xf32>
    %286 = vector.broadcast %285 : vector<1x1x32xf32> to vector<8x16x32xf32>
    %287 = arith.mulf %282, %286 : vector<8x16x32xf32>
    %288 = arith.addf %281, %287 : vector<8x16x32xf32>
    %c1_160 = arith.constant 1 : index
    %c1_161 = arith.constant 1 : index
    %c0_162 = arith.constant 0 : index
    %289 = vector.load %arg13[%c1_160, %c1_161, %c0_162] : memref<18x18x32xf32, #tpu.memory_space<vmem>>, vector<8x16x32xf32>
    %290 = vector.extract_strided_slice %2 {offsets = [1, 1, 0], sizes = [1, 1, 32], strides = [1, 1, 1]} : vector<3x3x32xf32> to vector<1x1x32xf32>
    %291 = vector.shape_cast %290 : vector<1x1x32xf32> to vector<32xf32>
    %292 = vector.shape_cast %291 : vector<32xf32> to vector<1x1x32xf32>
    %293 = vector.broadcast %292 : vector<1x1x32xf32> to vector<8x16x32xf32>
    %294 = arith.mulf %289, %293 : vector<8x16x32xf32>
    %295 = arith.addf %288, %294 : vector<8x16x32xf32>
    %c1_163 = arith.constant 1 : index
    %c2_164 = arith.constant 2 : index
    %c0_165 = arith.constant 0 : index
    %296 = vector.load %arg13[%c1_163, %c2_164, %c0_165] : memref<18x18x32xf32, #tpu.memory_space<vmem>>, vector<8x16x32xf32>
    %297 = vector.extract_strided_slice %2 {offsets = [1, 2, 0], sizes = [1, 1, 32], strides = [1, 1, 1]} : vector<3x3x32xf32> to vector<1x1x32xf32>
    %298 = vector.shape_cast %297 : vector<1x1x32xf32> to vector<32xf32>
    %299 = vector.shape_cast %298 : vector<32xf32> to vector<1x1x32xf32>
    %300 = vector.broadcast %299 : vector<1x1x32xf32> to vector<8x16x32xf32>
    %301 = arith.mulf %296, %300 : vector<8x16x32xf32>
    %302 = arith.addf %295, %301 : vector<8x16x32xf32>
    %c2_166 = arith.constant 2 : index
    %c0_167 = arith.constant 0 : index
    %c0_168 = arith.constant 0 : index
    %303 = vector.load %arg13[%c2_166, %c0_167, %c0_168] : memref<18x18x32xf32, #tpu.memory_space<vmem>>, vector<8x16x32xf32>
    %304 = vector.extract_strided_slice %2 {offsets = [2, 0, 0], sizes = [1, 1, 32], strides = [1, 1, 1]} : vector<3x3x32xf32> to vector<1x1x32xf32>
    %305 = vector.shape_cast %304 : vector<1x1x32xf32> to vector<32xf32>
    %306 = vector.shape_cast %305 : vector<32xf32> to vector<1x1x32xf32>
    %307 = vector.broadcast %306 : vector<1x1x32xf32> to vector<8x16x32xf32>
    %308 = arith.mulf %303, %307 : vector<8x16x32xf32>
    %309 = arith.addf %302, %308 : vector<8x16x32xf32>
    %c2_169 = arith.constant 2 : index
    %c1_170 = arith.constant 1 : index
    %c0_171 = arith.constant 0 : index
    %310 = vector.load %arg13[%c2_169, %c1_170, %c0_171] : memref<18x18x32xf32, #tpu.memory_space<vmem>>, vector<8x16x32xf32>
    %311 = vector.extract_strided_slice %2 {offsets = [2, 1, 0], sizes = [1, 1, 32], strides = [1, 1, 1]} : vector<3x3x32xf32> to vector<1x1x32xf32>
    %312 = vector.shape_cast %311 : vector<1x1x32xf32> to vector<32xf32>
    %313 = vector.shape_cast %312 : vector<32xf32> to vector<1x1x32xf32>
    %314 = vector.broadcast %313 : vector<1x1x32xf32> to vector<8x16x32xf32>
    %315 = arith.mulf %310, %314 : vector<8x16x32xf32>
    %316 = arith.addf %309, %315 : vector<8x16x32xf32>
    %c2_172 = arith.constant 2 : index
    %c2_173 = arith.constant 2 : index
    %c0_174 = arith.constant 0 : index
    %317 = vector.load %arg13[%c2_172, %c2_173, %c0_174] : memref<18x18x32xf32, #tpu.memory_space<vmem>>, vector<8x16x32xf32>
    %318 = vector.extract_strided_slice %2 {offsets = [2, 2, 0], sizes = [1, 1, 32], strides = [1, 1, 1]} : vector<3x3x32xf32> to vector<1x1x32xf32>
    %319 = vector.shape_cast %318 : vector<1x1x32xf32> to vector<32xf32>
    %320 = vector.shape_cast %319 : vector<32xf32> to vector<1x1x32xf32>
    %321 = vector.broadcast %320 : vector<1x1x32xf32> to vector<8x16x32xf32>
    %322 = arith.mulf %317, %321 : vector<8x16x32xf32>
    %323 = arith.addf %316, %322 : vector<8x16x32xf32>
    %324 = vector.broadcast %4 : vector<1x1x32xf32> to vector<8x16x32xf32>
    %325 = arith.addf %323, %324 : vector<8x16x32xf32>
    %326 = arith.negf %325 : vector<8x16x32xf32>
    %327 = math.exp %326 : vector<8x16x32xf32>
    %cst_175 = arith.constant 1.000000e+00 : f32
    %328 = vector.broadcast %cst_175 : f32 to vector<8x16x32xf32>
    %329 = arith.addf %328, %327 : vector<8x16x32xf32>
    %330 = arith.divf %328, %329 : vector<8x16x32xf32>
    %331 = arith.mulf %325, %330 : vector<8x16x32xf32>
    %c0_176 = arith.constant 0 : index
    %c0_177 = arith.constant 0 : index
    %c0_178 = arith.constant 0 : index
    %332 = vector.load %arg14[%c0_176, %c0_177, %c0_178] : memref<16x16x32xf32, #tpu.memory_space<vmem>>, vector<8x16x32xf32>
    tpu.vector_store %arg14[%c0_176, %c0_177, %c0_178], %331 {strides = array<i32>} : memref<16x16x32xf32, #tpu.memory_space<vmem>>, vector<8x16x32xf32>,
    %cst_179 = arith.constant dense<0.000000e+00> : vector<32xf32>
    %333 = vector.multi_reduction <add>, %331, %cst_179 [0, 1] : vector<8x16x32xf32> to vector<32xf32>
    %334 = vector.shape_cast %333 : vector<32xf32> to vector<1x32xf32>
    %335 = arith.addf %259, %334 : vector<1x32xf32>
    %cst_180 = arith.constant 0.000000e+00 : f32
    %336 = vector.broadcast %cst_180 : f32 to vector<8x16x32xf32>
    %c8_181 = arith.constant 8 : index
    %c0_182 = arith.constant 0 : index
    %c0_183 = arith.constant 0 : index
    %337 = vector.load %arg13[%c8_181, %c0_182, %c0_183] : memref<18x18x32xf32, #tpu.memory_space<vmem>>, vector<8x16x32xf32>
    %338 = vector.extract_strided_slice %2 {offsets = [0, 0, 0], sizes = [1, 1, 32], strides = [1, 1, 1]} : vector<3x3x32xf32> to vector<1x1x32xf32>
    %339 = vector.shape_cast %338 : vector<1x1x32xf32> to vector<32xf32>
    %340 = vector.shape_cast %339 : vector<32xf32> to vector<1x1x32xf32>
    %341 = vector.broadcast %340 : vector<1x1x32xf32> to vector<8x16x32xf32>
    %342 = arith.mulf %337, %341 : vector<8x16x32xf32>
    %343 = arith.addf %336, %342 : vector<8x16x32xf32>
    %c8_184 = arith.constant 8 : index
    %c1_185 = arith.constant 1 : index
    %c0_186 = arith.constant 0 : index
    %344 = vector.load %arg13[%c8_184, %c1_185, %c0_186] : memref<18x18x32xf32, #tpu.memory_space<vmem>>, vector<8x16x32xf32>
    %345 = vector.extract_strided_slice %2 {offsets = [0, 1, 0], sizes = [1, 1, 32], strides = [1, 1, 1]} : vector<3x3x32xf32> to vector<1x1x32xf32>
    %346 = vector.shape_cast %345 : vector<1x1x32xf32> to vector<32xf32>
    %347 = vector.shape_cast %346 : vector<32xf32> to vector<1x1x32xf32>
    %348 = vector.broadcast %347 : vector<1x1x32xf32> to vector<8x16x32xf32>
    %349 = arith.mulf %344, %348 : vector<8x16x32xf32>
    %350 = arith.addf %343, %349 : vector<8x16x32xf32>
    %c8_187 = arith.constant 8 : index
    %c2_188 = arith.constant 2 : index
    %c0_189 = arith.constant 0 : index
    %351 = vector.load %arg13[%c8_187, %c2_188, %c0_189] : memref<18x18x32xf32, #tpu.memory_space<vmem>>, vector<8x16x32xf32>
    %352 = vector.extract_strided_slice %2 {offsets = [0, 2, 0], sizes = [1, 1, 32], strides = [1, 1, 1]} : vector<3x3x32xf32> to vector<1x1x32xf32>
    %353 = vector.shape_cast %352 : vector<1x1x32xf32> to vector<32xf32>
    %354 = vector.shape_cast %353 : vector<32xf32> to vector<1x1x32xf32>
    %355 = vector.broadcast %354 : vector<1x1x32xf32> to vector<8x16x32xf32>
    %356 = arith.mulf %351, %355 : vector<8x16x32xf32>
    %357 = arith.addf %350, %356 : vector<8x16x32xf32>
    %c9_190 = arith.constant 9 : index
    %c0_191 = arith.constant 0 : index
    %c0_192 = arith.constant 0 : index
    %358 = vector.load %arg13[%c9_190, %c0_191, %c0_192] : memref<18x18x32xf32, #tpu.memory_space<vmem>>, vector<8x16x32xf32>
    %359 = vector.extract_strided_slice %2 {offsets = [1, 0, 0], sizes = [1, 1, 32], strides = [1, 1, 1]} : vector<3x3x32xf32> to vector<1x1x32xf32>
    %360 = vector.shape_cast %359 : vector<1x1x32xf32> to vector<32xf32>
    %361 = vector.shape_cast %360 : vector<32xf32> to vector<1x1x32xf32>
    %362 = vector.broadcast %361 : vector<1x1x32xf32> to vector<8x16x32xf32>
    %363 = arith.mulf %358, %362 : vector<8x16x32xf32>
    %364 = arith.addf %357, %363 : vector<8x16x32xf32>
    %c9_193 = arith.constant 9 : index
    %c1_194 = arith.constant 1 : index
    %c0_195 = arith.constant 0 : index
    %365 = vector.load %arg13[%c9_193, %c1_194, %c0_195] : memref<18x18x32xf32, #tpu.memory_space<vmem>>, vector<8x16x32xf32>
    %366 = vector.extract_strided_slice %2 {offsets = [1, 1, 0], sizes = [1, 1, 32], strides = [1, 1, 1]} : vector<3x3x32xf32> to vector<1x1x32xf32>
    %367 = vector.shape_cast %366 : vector<1x1x32xf32> to vector<32xf32>
    %368 = vector.shape_cast %367 : vector<32xf32> to vector<1x1x32xf32>
    %369 = vector.broadcast %368 : vector<1x1x32xf32> to vector<8x16x32xf32>
    %370 = arith.mulf %365, %369 : vector<8x16x32xf32>
    %371 = arith.addf %364, %370 : vector<8x16x32xf32>
    %c9_196 = arith.constant 9 : index
    %c2_197 = arith.constant 2 : index
    %c0_198 = arith.constant 0 : index
    %372 = vector.load %arg13[%c9_196, %c2_197, %c0_198] : memref<18x18x32xf32, #tpu.memory_space<vmem>>, vector<8x16x32xf32>
    %373 = vector.extract_strided_slice %2 {offsets = [1, 2, 0], sizes = [1, 1, 32], strides = [1, 1, 1]} : vector<3x3x32xf32> to vector<1x1x32xf32>
    %374 = vector.shape_cast %373 : vector<1x1x32xf32> to vector<32xf32>
    %375 = vector.shape_cast %374 : vector<32xf32> to vector<1x1x32xf32>
    %376 = vector.broadcast %375 : vector<1x1x32xf32> to vector<8x16x32xf32>
    %377 = arith.mulf %372, %376 : vector<8x16x32xf32>
    %378 = arith.addf %371, %377 : vector<8x16x32xf32>
    %c10_199 = arith.constant 10 : index
    %c0_200 = arith.constant 0 : index
    %c0_201 = arith.constant 0 : index
    %379 = vector.load %arg13[%c10_199, %c0_200, %c0_201] : memref<18x18x32xf32, #tpu.memory_space<vmem>>, vector<8x16x32xf32>
    %380 = vector.extract_strided_slice %2 {offsets = [2, 0, 0], sizes = [1, 1, 32], strides = [1, 1, 1]} : vector<3x3x32xf32> to vector<1x1x32xf32>
    %381 = vector.shape_cast %380 : vector<1x1x32xf32> to vector<32xf32>
    %382 = vector.shape_cast %381 : vector<32xf32> to vector<1x1x32xf32>
    %383 = vector.broadcast %382 : vector<1x1x32xf32> to vector<8x16x32xf32>
    %384 = arith.mulf %379, %383 : vector<8x16x32xf32>
    %385 = arith.addf %378, %384 : vector<8x16x32xf32>
    %c10_202 = arith.constant 10 : index
    %c1_203 = arith.constant 1 : index
    %c0_204 = arith.constant 0 : index
    %386 = vector.load %arg13[%c10_202, %c1_203, %c0_204] : memref<18x18x32xf32, #tpu.memory_space<vmem>>, vector<8x16x32xf32>
    %387 = vector.extract_strided_slice %2 {offsets = [2, 1, 0], sizes = [1, 1, 32], strides = [1, 1, 1]} : vector<3x3x32xf32> to vector<1x1x32xf32>
    %388 = vector.shape_cast %387 : vector<1x1x32xf32> to vector<32xf32>
    %389 = vector.shape_cast %388 : vector<32xf32> to vector<1x1x32xf32>
    %390 = vector.broadcast %389 : vector<1x1x32xf32> to vector<8x16x32xf32>
    %391 = arith.mulf %386, %390 : vector<8x16x32xf32>
    %392 = arith.addf %385, %391 : vector<8x16x32xf32>
    %c10_205 = arith.constant 10 : index
    %c2_206 = arith.constant 2 : index
    %c0_207 = arith.constant 0 : index
    %393 = vector.load %arg13[%c10_205, %c2_206, %c0_207] : memref<18x18x32xf32, #tpu.memory_space<vmem>>, vector<8x16x32xf32>
    %394 = vector.extract_strided_slice %2 {offsets = [2, 2, 0], sizes = [1, 1, 32], strides = [1, 1, 1]} : vector<3x3x32xf32> to vector<1x1x32xf32>
    %395 = vector.shape_cast %394 : vector<1x1x32xf32> to vector<32xf32>
    %396 = vector.shape_cast %395 : vector<32xf32> to vector<1x1x32xf32>
    %397 = vector.broadcast %396 : vector<1x1x32xf32> to vector<8x16x32xf32>
    %398 = arith.mulf %393, %397 : vector<8x16x32xf32>
    %399 = arith.addf %392, %398 : vector<8x16x32xf32>
    %400 = vector.broadcast %4 : vector<1x1x32xf32> to vector<8x16x32xf32>
    %401 = arith.addf %399, %400 : vector<8x16x32xf32>
    %402 = arith.negf %401 : vector<8x16x32xf32>
    %403 = math.exp %402 : vector<8x16x32xf32>
    %cst_208 = arith.constant 1.000000e+00 : f32
    %404 = vector.broadcast %cst_208 : f32 to vector<8x16x32xf32>
    %405 = arith.addf %404, %403 : vector<8x16x32xf32>
    %406 = arith.divf %404, %405 : vector<8x16x32xf32>
    %407 = arith.mulf %401, %406 : vector<8x16x32xf32>
    %c8_209 = arith.constant 8 : index
    %c0_210 = arith.constant 0 : index
    %c0_211 = arith.constant 0 : index
    %408 = vector.load %arg14[%c8_209, %c0_210, %c0_211] : memref<16x16x32xf32, #tpu.memory_space<vmem>>, vector<8x16x32xf32>
    tpu.vector_store %arg14[%c8_209, %c0_210, %c0_211], %407 {strides = array<i32>} : memref<16x16x32xf32, #tpu.memory_space<vmem>>, vector<8x16x32xf32>,
    %cst_212 = arith.constant dense<0.000000e+00> : vector<32xf32>
    %409 = vector.multi_reduction <add>, %407, %cst_212 [0, 1] : vector<8x16x32xf32> to vector<32xf32>
    %410 = vector.shape_cast %409 : vector<32xf32> to vector<1x32xf32>
    %411 = arith.addf %335, %410 : vector<1x32xf32>
    %cst_213 = arith.constant 3.906250e-03 : f32
    %412 = vector.broadcast %cst_213 : f32 to vector<1x32xf32>
    %413 = arith.mulf %411, %412 : vector<1x32xf32>
    %cst_214 = arith.constant dense<0.000000e+00> : vector<1x2xf32>
    %414 = tpu.matmul %413, %5, %cst_214 {dimension_numbers = #tpu.dot_dimension_numbers<[1], [0], [0], [1], [0, 0, 1, 1], [], []>} : vector<1x32xf32>, vector<32x2xf32>, vector<1x2xf32> -> vector<1x2xf32>
    %415 = arith.addf %414, %6 : vector<1x2xf32>
    %416 = arith.negf %415 : vector<1x2xf32>
    %417 = math.exp %416 : vector<1x2xf32>
    %cst_215 = arith.constant 1.000000e+00 : f32
    %418 = vector.broadcast %cst_215 : f32 to vector<1x2xf32>
    %419 = arith.addf %418, %417 : vector<1x2xf32>
    %420 = arith.divf %418, %419 : vector<1x2xf32>
    %421 = arith.mulf %415, %420 : vector<1x2xf32>
    %cst_216 = arith.constant dense<0.000000e+00> : vector<1x32xf32>
    %422 = tpu.matmul %421, %7, %cst_216 {dimension_numbers = #tpu.dot_dimension_numbers<[1], [0], [0], [1], [0, 0, 1, 1], [], []>} : vector<1x2xf32>, vector<2x32xf32>, vector<1x32xf32> -> vector<1x32xf32>
    %423 = arith.addf %422, %8 : vector<1x32xf32>
    %424 = arith.negf %423 : vector<1x32xf32>
    %425 = math.exp %424 : vector<1x32xf32>
    %cst_217 = arith.constant 1.000000e+00 : f32
    %426 = vector.broadcast %cst_217 : f32 to vector<1x32xf32>
    %427 = arith.addf %426, %425 : vector<1x32xf32>
    %428 = arith.divf %426, %427 : vector<1x32xf32>
    %429 = vector.broadcast %428 : vector<1x32xf32> to vector<8x32xf32>
    %430 = arith.mulf %9, %429 : vector<8x32xf32>
    %c0_218 = arith.constant 0 : index
    %c0_219 = arith.constant 0 : index
    %c0_220 = arith.constant 0 : index
    %431 = vector.load %arg14[%c0_218, %c0_219, %c0_220] : memref<16x16x32xf32, #tpu.memory_space<vmem>>, vector<8x16x32xf32>
    %432 = vector.shape_cast %431 : vector<8x16x32xf32> to vector<128x32xf32>
    %cst_221 = arith.constant dense<0.000000e+00> : vector<8x128xf32>
    %433 = tpu.matmul %430, %432, %cst_221 {dimension_numbers = #tpu.dot_dimension_numbers<[1], [1], [0], [0], [0, 0, 1, 0], [], []>} : vector<8x32xf32>, vector<128x32xf32>, vector<8x128xf32> -> vector<8x128xf32>
    %434 = vector.broadcast %10 : vector<8x1xf32> to vector<8x128xf32>
    %435 = arith.addf %433, %434 : vector<8x128xf32>
    %c1_222 = arith.constant 1 : index
    %c0_223 = arith.constant 0 : index
    %c0_224 = arith.constant 0 : index
    %436 = vector.load %arg12[%c1_222, %c0_223, %c0_224] : memref<2x8x256xf32, #tpu.memory_space<vmem>>, vector<1x8x128xf32>
    %437 = vector.shape_cast %436 : vector<1x8x128xf32> to vector<8x128xf32>
    %438 = vector.shape_cast %435 : vector<8x128xf32> to vector<1x8x128xf32>
    tpu.vector_store %arg12[%c1_222, %c0_223, %c0_224], %438 {strides = array<i32>} : memref<2x8x256xf32, #tpu.memory_space<vmem>>, vector<1x8x128xf32>,
    %c8_225 = arith.constant 8 : index
    %c0_226 = arith.constant 0 : index
    %c0_227 = arith.constant 0 : index
    %439 = vector.load %arg14[%c8_225, %c0_226, %c0_227] : memref<16x16x32xf32, #tpu.memory_space<vmem>>, vector<8x16x32xf32>
    %440 = vector.shape_cast %439 : vector<8x16x32xf32> to vector<128x32xf32>
    %cst_228 = arith.constant dense<0.000000e+00> : vector<8x128xf32>
    %441 = tpu.matmul %430, %440, %cst_228 {dimension_numbers = #tpu.dot_dimension_numbers<[1], [1], [0], [0], [0, 0, 1, 0], [], []>} : vector<8x32xf32>, vector<128x32xf32>, vector<8x128xf32> -> vector<8x128xf32>
    %442 = vector.broadcast %10 : vector<8x1xf32> to vector<8x128xf32>
    %443 = arith.addf %441, %442 : vector<8x128xf32>
    %c1_229 = arith.constant 1 : index
    %c0_230 = arith.constant 0 : index
    %c128_231 = arith.constant 128 : index
    %444 = vector.load %arg12[%c1_229, %c0_230, %c128_231] : memref<2x8x256xf32, #tpu.memory_space<vmem>>, vector<1x8x128xf32>
    %445 = vector.shape_cast %444 : vector<1x8x128xf32> to vector<8x128xf32>
    %446 = vector.shape_cast %443 : vector<8x128xf32> to vector<1x8x128xf32>
    tpu.vector_store %arg12[%c1_229, %c0_230, %c128_231], %446 {strides = array<i32>} : memref<2x8x256xf32, #tpu.memory_space<vmem>>, vector<1x8x128xf32>,
    return
  }
  func.func @transform_0(%arg0: i32) -> (i32, i32, i32) {
    %c0_i32 = arith.constant 0 : i32
    %c0_i32_0 = arith.constant 0 : i32
    %c0_i32_1 = arith.constant 0 : i32
    return %arg0, %c0_i32, %c0_i32_0 : i32, i32, i32
  }
  func.func @transform_1(%arg0: i32) -> (i32, i32) {
    %c0_i32 = arith.constant 0 : i32
    %c0_i32_0 = arith.constant 0 : i32
    %c0_i32_1 = arith.constant 0 : i32
    return %c0_i32, %c0_i32_0 : i32, i32
  }
  func.func @transform_2(%arg0: i32) -> (i32, i32) {
    %c0_i32 = arith.constant 0 : i32
    %c0_i32_0 = arith.constant 0 : i32
    %c0_i32_1 = arith.constant 0 : i32
    return %c0_i32, %c0_i32_0 : i32, i32
  }
  func.func @transform_3(%arg0: i32) -> (i32, i32, i32) {
    %c0_i32 = arith.constant 0 : i32
    %c0_i32_0 = arith.constant 0 : i32
    %c0_i32_1 = arith.constant 0 : i32
    %c0_i32_2 = arith.constant 0 : i32
    return %c0_i32, %c0_i32_0, %c0_i32_1 : i32, i32, i32
  }
  func.func @transform_4(%arg0: i32) -> (i32, i32) {
    %c0_i32 = arith.constant 0 : i32
    %c0_i32_0 = arith.constant 0 : i32
    %c0_i32_1 = arith.constant 0 : i32
    return %c0_i32, %c0_i32_0 : i32, i32
  }
  func.func @transform_5(%arg0: i32) -> (i32, i32) {
    %c0_i32 = arith.constant 0 : i32
    %c0_i32_0 = arith.constant 0 : i32
    %c0_i32_1 = arith.constant 0 : i32
    return %c0_i32, %c0_i32_0 : i32, i32
  }
  func.func @transform_6(%arg0: i32) -> (i32, i32) {
    %c0_i32 = arith.constant 0 : i32
    %c0_i32_0 = arith.constant 0 : i32
    %c0_i32_1 = arith.constant 0 : i32
    return %c0_i32, %c0_i32_0 : i32, i32
  }
  func.func @transform_7(%arg0: i32) -> (i32, i32) {
    %c0_i32 = arith.constant 0 : i32
    %c0_i32_0 = arith.constant 0 : i32
    %c0_i32_1 = arith.constant 0 : i32
    return %c0_i32, %c0_i32_0 : i32, i32
  }
  func.func @transform_8(%arg0: i32) -> (i32, i32) {
    %c0_i32 = arith.constant 0 : i32
    %c0_i32_0 = arith.constant 0 : i32
    %c0_i32_1 = arith.constant 0 : i32
    return %c0_i32, %c0_i32_0 : i32, i32
  }
  func.func @transform_9(%arg0: i32) -> (i32, i32) {
    %c0_i32 = arith.constant 0 : i32
    %c0_i32_0 = arith.constant 0 : i32
    %c0_i32_1 = arith.constant 0 : i32
    return %c0_i32, %c0_i32_0 : i32, i32
  }
  func.func @transform_10(%arg0: i32) -> (i32, i32) {
    %c0_i32 = arith.constant 0 : i32
    %c0_i32_0 = arith.constant 0 : i32
    %c0_i32_1 = arith.constant 0 : i32
    return %c0_i32, %c0_i32_0 : i32, i32
  }
  func.func @transform_11(%arg0: i32) -> (i32, i32, i32) {
    %c0_i32 = arith.constant 0 : i32
    %c0_i32_0 = arith.constant 0 : i32
    %c0_i32_1 = arith.constant 0 : i32
    return %arg0, %c0_i32, %c0_i32_0 : i32, i32, i32
  }
}

</mosaic_0001>

<bundles_post_ra>
// kernel: tpu_custom_call.1
= control target key start
LH: loop header
LB: loop body
LE: loop exit
PB: predicated region body
PF: predicated region fallthrough
CT: control target
= control target key end

     0   :  { %vm122_vm0 = vcmask 64512   ;;  %vm54_vm1 = vcmask 261120   ;;  %vm63_vm2 = vcmask 253952   ;;  %v9562_v5 = vmov 0.0   ;;  %s9550_s0 = inlined_call_operand.vmem [shape: f32[2,256,8], index: 0, kind: input, shape index: {}]   ;;  %s9551_s1 = inlined_call_operand.vmem [shape: f32[8,32], index: 1, kind: input, shape index: {}]   ;;  %s9552_s2 = inlined_call_operand.vmem [shape: f32[1,32], index: 2, kind: input, shape index: {}]   ;;  %s9553_s3 = inlined_call_operand.vmem [shape: f32[3,3,32], index: 3, kind: input, shape index: {}]   ;;  %s9554_s4 = inlined_call_operand.vmem [shape: f32[1,32], index: 4, kind: input, shape index: {}]   ;;  %s9555_s5 = inlined_call_operand.vmem [shape: f32[32,2], index: 5, kind: input, shape index: {}]   ;;  %s9556_s6 = inlined_call_operand.vmem [shape: f32[1,2], index: 6, kind: input, shape index: {}]   ;;  %s9557_s7 = inlined_call_operand.vmem [shape: f32[2,32], index: 7, kind: input, shape index: {}]   ;;  %s9558_s8 = inlined_call_operand.vmem [shape: f32[1,32], index: 8, kind: input, shape index: {}]   ;;  %s9559_s9 = inlined_call_operand.vmem [shape: f32[8,32], index: 9, kind: input, shape index: {}]   ;;  %s9560_s10 = inlined_call_operand.vmem [shape: f32[8,1], index: 10, kind: input, shape index: {}]   ;;  %s9561_s11 = inlined_call_operand.hbm [shape: f32[2,8,256], index: 11, kind: output, shape index: {}]  }
   0x1   :  { %v39_v0 = vld [vmem:[%s9551_s1] sm:$0xff]  ;;  %v101_v3 = vld [vmem:[%s9550_s0 + $0x8] sm:$0xff]  ;;  %55 = vst.msk [vmem:[#allocation2] sm:$0xff] %vm54_vm1, %v9562_v5  ;;  %56 = vst.msk [vmem:[#allocation2 + $0x8] sm:$0xff] %vm54_vm1, %v9562_v5 }
   0x2   :  { %v100_v1 = vld [vmem:[%s9550_s0] sm:$0xff]  ;;  %5317 = vmatprep.subr.mxu0 %v39_v0  ;;  %5343 = vmatprep.subr.mxu1 %v39_v0  ;;  %v446_v4 = vld [vmem:[%s9550_s0 + $0x88] sm:$0xff]  ;;  %60 = vst.msk [vmem:[#allocation2 + $0x198] sm:$0xff] %vm54_vm1, %v9562_v5  ;;  %61 = vst.msk [vmem:[#allocation2 + $0x1a0] sm:$0xff] %vm54_vm1, %v9562_v5 }
   0x3   :  { %v445_v2 = vld [vmem:[%s9550_s0 + $0x80] sm:$0xff]  ;;  %5318 = vmatpush3.msra.mxu0 %v39_v0  ;;  %5319 = vmatprep.mubr.msk.f32.mxu0 %vm122_vm0, %v100_v1  ;;  %v102_v6 = vld [vmem:[%s9550_s0 + $0x10] sm:$0xff]  ;;  %83 = vst.msk [vmem:[#allocation2 + $0x29] sm:$0x1] %vm63_vm2, %v9562_v5  ;;  %65 = vst.msk [vmem:[#allocation2 + $0x18] sm:$0x1] %vm63_vm2, %v9562_v5 }
   0x4   :  { %v447_v7 = vld [vmem:[%s9550_s0 + $0x90] sm:$0xff]  ;;  %66 = vst.msk [vmem:[#allocation2 + $0x30] sm:$0x1] %vm63_vm2, %v9562_v5  ;;  %67 = vst.msk [vmem:[#allocation2 + $0x48] sm:$0x1] %vm63_vm2, %v9562_v5  ;;  %5344 = vmatpush3.msra.mxu1 %v39_v0  ;;  %5345 = vmatprep.mubr.msk.f32.mxu1 %vm122_vm0, %v445_v2  ;;  %v103_v8 = vld [vmem:[%s9550_s0 + $0x18] sm:$0xff] }
   0x5   :  { %68 = vst.msk [vmem:[#allocation2 + $0x60] sm:$0x1] %vm63_vm2, %v9562_v5  ;;  %69 = vst.msk [vmem:[#allocation2 + $0x78] sm:$0x1] %vm63_vm2, %v9562_v5  ;;  %5320 = vmatmul.mubr.msk.f32.vlgmr.msra.gmra.mxu0 %vm122_vm0, %v101_v3  ;;  %5346 = vmatmul.mubr.msk.f32.vlgmr.msra.gmra.mxu1 %vm122_vm0, %v446_v4  ;;  %v448_v9 = vld [vmem:[%s9550_s0 + $0x98] sm:$0xff]  ;;  %v104_v10 = vld [vmem:[%s9550_s0 + $0x20] sm:$0xff] }
   0x6   :  { %70 = vst.msk [vmem:[#allocation2 + $0x90] sm:$0x1] %vm63_vm2, %v9562_v5  ;;  %71 = vst.msk [vmem:[#allocation2 + $0xa8] sm:$0x1] %vm63_vm2, %v9562_v5  ;;  %5322 = vmatprep.mubr.msk.f32.mxu0 %vm122_vm0, %v102_v6  ;;  %5348 = vmatprep.mubr.msk.f32.mxu1 %vm122_vm0, %v447_v7  ;;  %v449_v11 = vld [vmem:[%s9550_s0 + $0xa0] sm:$0xff]  ;;  %v105_v12 = vld [vmem:[%s9550_s0 + $0x28] sm:$0xff] }
   0x7   :  { %72 = vst.msk [vmem:[#allocation2 + $0xc0] sm:$0x1] %vm63_vm2, %v9562_v5  ;;  %73 = vst.msk [vmem:[#allocation2 + $0xd8] sm:$0x1] %vm63_vm2, %v9562_v5  ;;  %5369 = vmatprep.subr.mxu0 %v9562_v5  ;;  %5380 = vmatprep.subr.mxu1 %v9562_v5  ;;  %v450_v13 = vld [vmem:[%s9550_s0 + $0xa8] sm:$0xff]  ;;  %v106_v14 = vld [vmem:[%s9550_s0 + $0x30] sm:$0xff] }
   0x8   :  { %74 = vst.msk [vmem:[#allocation2 + $0xf0] sm:$0x1] %vm63_vm2, %v9562_v5  ;;  %75 = vst.msk [vmem:[#allocation2 + $0x108] sm:$0x1] %vm63_vm2, %v9562_v5  ;;  %v451_v15 = vld [vmem:[%s9550_s0 + $0xb0] sm:$0xff] }
   0x9   :  { %76 = vst.msk [vmem:[#allocation2 + $0x120] sm:$0x1] %vm63_vm2, %v9562_v5  ;;  %77 = vst.msk [vmem:[#allocation2 + $0x138] sm:$0x1] %vm63_vm2, %v9562_v5  ;;  %5323 = vmatmul.mubr.msk.f32.gmra.mxu0 %vm122_vm0, %v103_v8  ;;  %5349 = vmatmul.mubr.msk.f32.gmra.mxu1 %vm122_vm0, %v448_v9 }
   0xa   :  { %78 = vst.msk [vmem:[#allocation2 + $0x150] sm:$0x1] %vm63_vm2, %v9562_v5  ;;  %79 = vst.msk [vmem:[#allocation2 + $0x168] sm:$0x1] %vm63_vm2, %v9562_v5  ;;  %5325 = vmatprep.mubr.msk.f32.mxu0 %vm122_vm0, %v104_v10  ;;  %5351 = vmatprep.mubr.msk.f32.mxu1 %vm122_vm0, %v449_v11 }
   0xb   :  { %80 = vst.msk [vmem:[#allocation2 + $0x180] sm:$0x1] %vm63_vm2, %v9562_v5  ;;  %84 = vst.msk [vmem:[#allocation2 + $0x41] sm:$0x1] %vm63_vm2, %v9562_v5 }
   0xc   :  { %85 = vst.msk [vmem:[#allocation2 + $0x59] sm:$0x1] %vm63_vm2, %v9562_v5  ;;  %86 = vst.msk [vmem:[#allocation2 + $0x71] sm:$0x1] %vm63_vm2, %v9562_v5 }
   0xd   :  { %87 = vst.msk [vmem:[#allocation2 + $0x89] sm:$0x1] %vm63_vm2, %v9562_v5  ;;  %88 = vst.msk [vmem:[#allocation2 + $0xa1] sm:$0x1] %vm63_vm2, %v9562_v5 }
   0xe   :  { %89 = vst.msk [vmem:[#allocation2 + $0xb9] sm:$0x1] %vm63_vm2, %v9562_v5  ;;  %90 = vst.msk [vmem:[#allocation2 + $0xd1] sm:$0x1] %vm63_vm2, %v9562_v5 }
   0xf   :  { %91 = vst.msk [vmem:[#allocation2 + $0xe9] sm:$0x1] %vm63_vm2, %v9562_v5  ;;  %92 = vst.msk [vmem:[#allocation2 + $0x101] sm:$0x1] %vm63_vm2, %v9562_v5 }
  0x10   :  { %93 = vst.msk [vmem:[#allocation2 + $0x119] sm:$0x1] %vm63_vm2, %v9562_v5  ;;  %94 = vst.msk [vmem:[#allocation2 + $0x131] sm:$0x1] %vm63_vm2, %v9562_v5 }
  0x11   :  { %95 = vst.msk [vmem:[#allocation2 + $0x149] sm:$0x1] %vm63_vm2, %v9562_v5  ;;  %96 = vst.msk [vmem:[#allocation2 + $0x161] sm:$0x1] %vm63_vm2, %v9562_v5 }
  0x12   :  { %97 = vst.msk [vmem:[#allocation2 + $0x179] sm:$0x1] %vm63_vm2, %v9562_v5  ;;  %98 = vst.msk [vmem:[#allocation2 + $0x191] sm:$0x1] %vm63_vm2, %v9562_v5 }
  0x13   :  { %64 = vst.msk [vmem:[#allocation2] sm:$0x1] %vm63_vm2, %v9562_v5  ;;  %81 = vst.msk [vmem:[#allocation2 + $0x198] sm:$0x1] %vm63_vm2, %v9562_v5 }
  0x14   :  { %16 = vsyncpa [#allocation5], 0  ;;  %5326 = vmatmul.mubr.msk.f32.gmra.mxu0 %vm122_vm0, %v105_v12  ;;  %5352 = vmatmul.mubr.msk.f32.gmra.mxu1 %vm122_vm0, %v450_v13  ;;  %v107_v16 = vld [vmem:[%s9550_s0 + $0x38] sm:$0xff]  ;;  %v108_v18 = vld [vmem:[%s9550_s0 + $0x40] sm:$0xff]  ;;  %vm57_vm3 = vcmask 254976   ;;  %v799_v12 = vlaneseq  ;;  %vm6164_vm4 = vmmov 0  }
  0x15   :  { %5328 = vmatprep.mubr.msk.f32.mxu0 %vm122_vm0, %v106_v14  ;;  %5354 = vmatprep.mubr.msk.f32.mxu1 %vm122_vm0, %v451_v15  ;;  %v452_v17 = vld [vmem:[%s9550_s0 + $0xb8] sm:$0xff]  ;;  %v453_v19 = vld [vmem:[%s9550_s0 + $0xc0] sm:$0xff]  ;;  %v109_v20 = vld [vmem:[%s9550_s0 + $0x48] sm:$0xff]  ;;  %58 = vst.msk [vmem:[#allocation2 + $0x10] sm:$0x3] %vm57_vm3, %v9562_v5  ;;  %vm2142_vm5 = vcmask 1041408  }
  0x16   :  { %v454_v21 = vld [vmem:[%s9550_s0 + $0xc8] sm:$0xff]  ;;  %v110_v22 = vld [vmem:[%s9550_s0 + $0x50] sm:$0xff]  ;;  %v111_v24 = vld [vmem:[%s9550_s0 + $0x58] sm:$0xff]  ;;  %62 = vst.msk [vmem:[#allocation2 + $0x1a8] sm:$0x3] %vm57_vm3, %v9562_v5  ;;  %vm2138_vm6 = vcmask 15360  }
  0x17   :  { %v455_v23 = vld [vmem:[%s9550_s0 + $0xd0] sm:$0xff]  ;;  %v456_v25 = vld [vmem:[%s9550_s0 + $0xd8] sm:$0xff]  ;;  %v112_v26 = vld [vmem:[%s9550_s0 + $0x60] sm:$0xff]  ;;  %82 = vst.msk [vmem:[#allocation2 + $0x11] sm:$0x1] %vm63_vm2, %v9562_v5 }
  0x18   :  { %5329 = vmatmul.mubr.msk.f32.gmra.mxu0 %vm122_vm0, %v107_v16  ;;  %5355 = vmatmul.mubr.msk.f32.gmra.mxu1 %vm122_vm0, %v452_v17  ;;  %v457_v27 = vld [vmem:[%s9550_s0 + $0xe0] sm:$0xff]  ;;  %v113_v28 = vld [vmem:[%s9550_s0 + $0x68] sm:$0xff]  ;;  %v114_v30 = vld [vmem:[%s9550_s0 + $0x70] sm:$0xff]  ;;  %99 = vst.msk [vmem:[#allocation2 + $0x1a9] sm:$0x1] %vm63_vm2, %v9562_v5 }
  0x19   :  { %5331 = vmatprep.mubr.msk.f32.mxu0 %vm122_vm0, %v108_v18  ;;  %5357 = vmatprep.mubr.msk.f32.mxu1 %vm122_vm0, %v453_v19  ;;  %v458_v29 = vld [vmem:[%s9550_s0 + $0xe8] sm:$0xff]  ;;  %v459_v31 = vld [vmem:[%s9550_s0 + $0xf0] sm:$0xff]  ;;  %v115_v32 = vld [vmem:[%s9550_s0 + $0x78] sm:$0xff] }
  0x1a   :  { %v460_v33 = vld [vmem:[%s9550_s0 + $0xf8] sm:$0xff]  ;;  %v6447_v34 = vld [vmem:[%s9552_s2] ss:$0 sm:$0xff] }
  0x1c   :  { %5332 = vmatmul.mubr.msk.f32.gmra.mxu0 %vm122_vm0, %v109_v20  ;;  %5358 = vmatmul.mubr.msk.f32.gmra.mxu1 %vm122_vm0, %v454_v21 }
  0x1d   :  { %5334 = vmatprep.mubr.msk.f32.mxu0 %vm122_vm0, %v110_v22  ;;  %5360 = vmatprep.mubr.msk.f32.mxu1 %vm122_vm0, %v455_v23  ;;  %v800_v23 = vshrl.u32 %v799_v12, 7 }
  0x20   :  { %5335 = vmatmul.mubr.msk.f32.gmra.mxu0 %vm122_vm0, %v111_v24  ;;  %5361 = vmatmul.mubr.msk.f32.gmra.mxu1 %vm122_vm0, %v456_v25 }
  0x21   :  { %5337 = vmatprep.mubr.msk.f32.mxu0 %vm122_vm0, %v112_v26  ;;  %5363 = vmatprep.mubr.msk.f32.mxu1 %vm122_vm0, %v457_v27 }
  0x24   :  { %5338 = vmatmul.mubr.msk.f32.gmra.mxu0 %vm122_vm0, %v113_v28  ;;  %5364 = vmatmul.mubr.msk.f32.gmra.mxu1 %vm122_vm0, %v458_v29 }
  0x25   :  { %5340 = vmatprep.mubr.msk.f32.mxu0 %vm122_vm0, %v114_v30  ;;  %5366 = vmatprep.mubr.msk.f32.mxu1 %vm122_vm0, %v459_v31 }
  0x28   :  { %5341 = vmatmul.mubr.msk.f32.gmra.mxu0 %vm122_vm0, %v115_v32  ;;  %5367 = vmatmul.mubr.msk.f32.gmra.mxu1 %vm122_vm0, %v460_v33  ;;  %v6498_v33 = vsub.s32 1, %v800_v23 }
  0xc5   :  { %v5321_v35 = vpop.f32.mrf.mxu0  ;;  %v5347_v36 = vpop.f32.mrf.mxu1 }
  0xc6   :  { %v6450_v37 = vadd.f32 %v5321_v35, %v6447_v34  ;;  %v6453_v38 = vadd.f32 %v5347_v36, %v6447_v34  ;;  %v6500_v35 = vsub.s32 0, %v800_v23 }
  0xc7   :  { %v237_v39 = vpop.f32.mrf.mxu0  ;;  %v575_v40 = vpop.f32.mrf.mxu1 }
  0xc8   :  { %v4881_v41 = vmul.f32 -1.442695, %v6450_v37  ;;  %v4913_v42 = vmul.f32 -1.442695, %v6453_v38  ;;  %v6458_v43 = vadd.f32 %v6447_v34, %v237_v39  ;;  %v6461_v44 = vadd.f32 %v6447_v34, %v575_v40  ;;  %9734 = vst [vmem:[#allocation7_spill] sm:$0xff] %v6500_v35 }
  0xc9   :  { %v5324_v45 = vpop.f32.mrf.mxu0  ;;  %v5350_v46 = vpop.f32.mrf.mxu1  ;;  %v41_v39 = vld [vmem:[%s9553_s3] sm:$0x7] }
  0xca   :  { %5600 = vpow2.f32 %v4881_v41  ;;  %v4880_v47 = vmul.f32 -1.442695, %v6458_v43  ;;  %v4912_v48 = vmul.f32 -1.442695, %v6461_v44  ;;  %v6466_v49 = vadd.f32 %v5324_v45, %v6447_v34 }
  0xcb   :  { %5602 = vpow2.f32 %v4913_v42  ;;  %v6469_v50 = vadd.f32 %v5350_v46, %v6447_v34  ;;  %v247_v51 = vpop.f32.mrf.mxu0  ;;  %v585_v52 = vpop.f32.mrf.mxu1  ;;  %v6516_v46 = vsub.s32 2, %v800_v23 }
  0xcc   :  { %5604 = vpow2.f32 %v4880_v47  ;;  %v4883_v53 = vmul.f32 -1.442695, %v6466_v49  ;;  %v6473_v54 = vadd.f32 %v6447_v34, %v247_v51  ;;  %v6476_v55 = vadd.f32 %v6447_v34, %v585_v52 }
  0xcd   :  { %5606 = vpow2.f32 %v4912_v48  ;;  %v4915_v56 = vmul.f32 -1.442695, %v6469_v50  ;;  %v6520_v51 = vrot.slane %v41_v39, %v6498_v33  ;;  %v6523_v52 = vrot.slane %v41_v39, %v6500_v35 }
  0xce   :  { %5608 = vpow2.f32 %v4883_v53  ;;  %v4882_v59 = vmul.f32 -1.442695, %v6473_v54  ;;  %v4914_v60 = vmul.f32 -1.442695, %v6476_v55 }
  0xcf   :  { %5610 = vpow2.f32 %v4915_v56  ;;  %9735 = vst [vmem:[#allocation8_spill] sm:$0xff] %v6520_v51  ;;  %9736 = vst [vmem:[#allocation9_spill] sm:$0xff] %v6523_v52 }
  0xd0   :  { %5612 = vpow2.f32 %v4882_v59  ;;  %v835_v59 = vld [vmem:[#allocation2 + $0x1] sm:$0xff] }
  0xd1   :  { %5614 = vpow2.f32 %v4914_v60 }
  0xd4   :  { %v5327_v57 = vpop.f32.mrf.mxu0  ;;  %v5353_v58 = vpop.f32.mrf.mxu1 }
  0xd5   :  { %v6482_v61 = vadd.f32 %v5327_v57, %v6447_v34  ;;  %v6485_v62 = vadd.f32 %v5353_v58, %v6447_v34  ;;  %v783_v58 = vld [vmem:[#allocation2] sm:$0xff] }
  0xd6   :  { %v257_v7 = vpop.f32.mrf.mxu0  ;;  %v595_v10 = vpop.f32.mrf.mxu1 }
  0xd7   :  { %v4885_v63 = vmul.f32 -1.442695, %v6482_v61  ;;  %v4917_v0 = vmul.f32 -1.442695, %v6485_v62  ;;  %v5601_v1 = vpop.eup %5600  ;;  %v6490_v27 = vadd.f32 %v6447_v34, %v257_v7  ;;  %v6493_v29 = vadd.f32 %v6447_v34, %v595_v10 }
  0xd8   :  { %v5603_v2 = vpop.eup %5602  ;;  %v365_v3 = vadd.f32 1.0, %v5601_v1  ;;  %v5330_v18 = vpop.f32.mrf.mxu0 }
  0xd9   :  { %5616 = vpow2.f32 %v4885_v63  ;;  %v5605_v4 = vpop.eup %5604  ;;  %v703_v6 = vadd.f32 1.0, %v5603_v2  ;;  %v5356_v21 = vpop.f32.mrf.mxu1  ;;  %v6496_v31 = vadd.f32 %v5330_v18, %v6447_v34  ;;  %v4884_v40 = vmul.f32 -1.442695, %v6490_v27 }
  0xda   :  { %5618 = vpow2.f32 %v4917_v0  ;;  %v5607_v8 = vpop.eup %5606  ;;  %v364_v9 = vadd.f32 1.0, %v5605_v4  ;;  %v267_v30 = vpop.f32.mrf.mxu0  ;;  %v6503_v36 = vadd.f32 %v5356_v21, %v6447_v34  ;;  %v4916_v42 = vmul.f32 -1.442695, %v6493_v29 }
  0xdb   :  { %5620 = vrcp.f32 %v365_v3  ;;  %v5609_v11 = vpop.eup %5608  ;;  %v702_v13 = vadd.f32 1.0, %v5607_v8  ;;  %v605_v32 = vpop.f32.mrf.mxu1  ;;  %v6510_v41 = vadd.f32 %v6447_v34, %v267_v30  ;;  %v4887_v47 = vmul.f32 -1.442695, %v6496_v31 }
  0xdc   :  { %5622 = vrcp.f32 %v703_v6  ;;  %v5611_v14 = vpop.eup %5610  ;;  %v367_v15 = vadd.f32 1.0, %v5609_v11  ;;  %v6514_v45 = vadd.f32 %v6447_v34, %v605_v32  ;;  %v4919_v53 = vmul.f32 -1.442695, %v6503_v36  ;;  %v836_v6 = vld [vmem:[#allocation2 + $0x9] sm:$0xff] }
  0xdd   :  { %5624 = vrcp.f32 %v364_v9  ;;  %v5613_v16 = vpop.eup %5612  ;;  %v705_v17 = vadd.f32 1.0, %v5611_v14  ;;  %v4886_v60 = vmul.f32 -1.442695, %v6510_v41  ;;  %v6532_v3 = vrot.slane %v41_v39, %v6516_v46  ;;  %v887_v11 = vld [vmem:[#allocation2 + $0x2] sm:$0xff]  ;;  %v5359_v32 = vpop.f32.mrf.mxu1 }
  0xde   :  { %5626 = vrcp.f32 %v702_v13  ;;  %v5615_v19 = vpop.eup %5614  ;;  %v366_v20 = vadd.f32 1.0, %v5613_v16  ;;  %v4918_v1 = vmul.f32 -1.442695, %v6514_v45  ;;  %v803_v8 = vmul.f32 %v6523_v52, %v783_v58 }
  0xdf   :  { %5628 = vrcp.f32 %v367_v15  ;;  %v704_v24 = vadd.f32 1.0, %v5615_v19  ;;  %9737 = vst [vmem:[#allocation10_spill] sm:$0xff] %v6532_v3  ;;  %v856_v14 = vmul.f32 %v6520_v51, %v836_v6  ;;  %v615_v58 = vpop.f32.mrf.mxu1 }
  0xe0   :  { %5630 = vrcp.f32 %v705_v17 }
  0xe1   :  { %5632 = vrcp.f32 %v366_v20  ;;  %v907_v20 = vmul.f32 %v6532_v3, %v887_v11 }
  0xe2   :  { %5634 = vrcp.f32 %v704_v24 }
  0xe6   :  { %v5617_v22 = vpop.eup %5616 }
  0xe7   :  { %v5619_v25 = vpop.eup %5618  ;;  %v369_v26 = vadd.f32 1.0, %v5617_v22 }
  0xe8   :  { %v707_v28 = vadd.f32 1.0, %v5619_v25  ;;  %v5621_v48 = vpop.eup %5620 }
  0xe9   :  { %5636 = vrcp.f32 %v369_v26  ;;  %v5623_v56 = vpop.eup %5622  ;;  %v413_v57 = vmul.f32 %v5621_v48, %v6450_v37  ;;  %v784_v37 = vld [vmem:[#allocation2 + $0x8] sm:$0xff]  ;;  %v5333_v26 = vpop.f32.mrf.mxu0 }
  0xea   :  { %5638 = vrcp.f32 %v707_v28  ;;  %v5625_v63 = vpop.eup %5624  ;;  %v751_v0 = vmul.f32 %v5623_v56, %v6453_v38  ;;  %v855_v38 = vmul.f32 %v6520_v51, %v835_v59  ;;  %v804_v13 = vmul.f32 %v6523_v52, %v784_v37 }
  0xeb   :  { %5640 = vpow2.f32 %v4884_v40  ;;  %v5627_v2 = vpop.eup %5626  ;;  %430 = vst.msk [vmem:[#allocation2 + $0x21] sm:$0xff] %vm54_vm1, %v413_v57  ;;  %v412_v4 = vmul.f32 %v5625_v63, %v6458_v43 }
  0xec   :  { %5642 = vpow2.f32 %v4916_v42  ;;  %v5629_v7 = vpop.eup %5628  ;;  %768 = vst.msk [vmem:[#allocation2 + $0xe1] sm:$0xff] %vm54_vm1, %v751_v0  ;;  %v750_v9 = vmul.f32 %v5627_v2, %v6461_v44  ;;  %v888_v44 = vld [vmem:[#allocation2 + $0xa] sm:$0xff]  ;;  %v871_v19 = vadd.f32 %v855_v38, %v803_v8  ;;  %v872_v23 = vadd.f32 %v856_v14, %v804_v13 }
  0xed   :  { %5644 = vpow2.f32 %v4887_v47  ;;  %v5631_v10 = vpop.eup %5630  ;;  %429 = vst.msk [vmem:[#allocation2 + $0x19] sm:$0xff] %vm54_vm1, %v412_v4  ;;  %v415_v12 = vmul.f32 %v5629_v7, %v6466_v49  ;;  %v42_v49 = vld [vmem:[%s9553_s3 + $0x4] sm:$0x7]  ;;  %v908_v24 = vmul.f32 %v6532_v3, %v888_v44  ;;  %v43_v14 = vld [vmem:[%s9553_s3 + $0x8] sm:$0x7] }
  0xee   :  { %5646 = vpow2.f32 %v4919_v53  ;;  %v5633_v43 = vpop.eup %5632  ;;  %767 = vst.msk [vmem:[#allocation2 + $0xd9] sm:$0xff] %vm54_vm1, %v750_v9  ;;  %v753_v15 = vmul.f32 %v5631_v10, %v6469_v50  ;;  %v6554_v22 = vrot.slane %v42_v49, %v6500_v35  ;;  %v923_v30 = vadd.f32 %v907_v20, %v871_v19 }
  0xef   :  { %5648 = vpow2.f32 %v4886_v60  ;;  %v5635_v16 = vpop.eup %5634  ;;  %432 = vst.msk [vmem:[#allocation2 + $0x39] sm:$0xff] %vm54_vm1, %v415_v12  ;;  %v414_v17 = vmul.f32 %v5633_v43, %v6473_v54  ;;  %v924_v40 = vadd.f32 %v908_v24, %v872_v23  ;;  %v6574_v56 = vrot.slane %v42_v49, %v6498_v33  ;;  %v5362_v43 = vpop.f32.mrf.mxu1 }
  0xf0   :  { %5650 = vpow2.f32 %v4918_v1  ;;  %770 = vst.msk [vmem:[#allocation2 + $0xf9] sm:$0xff] %vm54_vm1, %v753_v15  ;;  %v752_v21 = vmul.f32 %v5635_v16, %v6476_v55  ;;  %9738 = vst [vmem:[#allocation11_spill] sm:$0xff] %v6554_v22  ;;  %v6581_v7 = vrot.slane %v42_v49, %v6516_v46  ;;  %v6588_v12 = vadd.f32 %v5333_v26, %v6447_v34 }
  0xf1   :  { %431 = vst.msk [vmem:[#allocation2 + $0x31] sm:$0xff] %vm54_vm1, %v414_v17  ;;  %9739 = vst [vmem:[#allocation12_spill] sm:$0xff] %v6574_v56  ;;  %v6596_v16 = vadd.f32 %v5359_v32, %v6447_v34  ;;  %v6604_v20 = vrot.slane %v43_v14, %v6500_v35 }
  0xf2   :  { %769 = vst.msk [vmem:[#allocation2 + $0xf1] sm:$0xff] %vm54_vm1, %v752_v21  ;;  %v6576_v60 = vld [vmem:[#allocation2 + $0x21] sm:$0xff]  ;;  %9740 = vst [vmem:[#allocation13_spill] sm:$0xff] %v6581_v7 }
  0xf3   :  { %v1012_v9 = vmul.f32 %v6574_v56, %v6576_v60  ;;  %v6590_v13 = vld [vmem:[#allocation2 + $0x22] sm:$0xff]  ;;  %9741 = vst [vmem:[#allocation14_spill] sm:$0xff] %v6604_v20 }
  0xf4   :  { %v6562_v28 = vld [vmem:[#allocation2 + $0x18] sm:$0xff]  ;;  %v6564_v55 = vld [vmem:[#allocation2 + $0x20] sm:$0xff]  ;;  %v1064_v23 = vmul.f32 %v6581_v7, %v6590_v13 }
  0xf5   :  { %v960_v42 = vmul.f32 %v6554_v22, %v6564_v55  ;;  %v6571_v48 = vld [vmem:[#allocation2 + $0x19] sm:$0xff] }
  0xf6   :  { %v5637_v18 = vpop.eup %5636  ;;  %v1011_v2 = vmul.f32 %v6574_v56, %v6571_v48  ;;  %v6583_v8 = vld [vmem:[#allocation2 + $0x1a] sm:$0xff] }
  0xf7   :  { %v5639_v50 = vpop.eup %5638  ;;  %v417_v54 = vmul.f32 %v5637_v18, %v6482_v61  ;;  %v959_v61 = vmul.f32 %v6554_v22, %v6562_v28  ;;  %v976_v1 = vadd.f32 %v960_v42, %v924_v40  ;;  %v1063_v18 = vmul.f32 %v6581_v7, %v6583_v8  ;;  %v6628_v42 = vld [vmem:[#allocation2 + $0x39] sm:$0xff] }
  0xf8   :  { %v755_v25 = vmul.f32 %v5639_v50, %v6485_v62  ;;  %v5641_v39 = vpop.eup %5640  ;;  %v277_v62 = vpop.f32.mrf.mxu0  ;;  %v6606_v21 = vld [vmem:[#allocation2 + $0x30] sm:$0xff]  ;;  %v6609_v50 = vadd.f32 %v6447_v34, %v615_v58  ;;  %v6619_v26 = vld [vmem:[#allocation2 + $0x38] sm:$0xff]  ;;  %v6626_v40 = vadd.f32 %v5362_v43, %v6447_v34  ;;  %v805_v43 = vmul.f32 %v6523_v52, %v6562_v28 }
  0xf9   :  { %434 = vst.msk [vmem:[#allocation2 + $0x51] sm:$0xff] %vm54_vm1, %v417_v54  ;;  %v5643_v47 = vpop.eup %5642  ;;  %v975_v57 = vadd.f32 %v959_v61, %v923_v30  ;;  %v368_v63 = vadd.f32 1.0, %v5641_v39  ;;  %v6599_v44 = vadd.f32 %v6447_v34, %v277_v62  ;;  %v1028_v17 = vadd.f32 %v1012_v9, %v976_v1  ;;  %v625_v30 = vpop.f32.mrf.mxu1  ;;  %v6621_v32 = vld [vmem:[#allocation2 + $0x31] sm:$0xff]  ;;  %v6642_v1 = vld [vmem:[#allocation2 + $0x3a] sm:$0xff] }
  0xfa   :  { %772 = vst.msk [vmem:[#allocation2 + $0x111] sm:$0xff] %vm54_vm1, %v755_v25  ;;  %v5645_v53 = vpop.eup %5644  ;;  %v706_v4 = vadd.f32 1.0, %v5643_v47  ;;  %v5336_v37 = vpop.f32.mrf.mxu0  ;;  %v6617_v25 = vrot.slane %v43_v14, %v6498_v33  ;;  %v4889_v61 = vmul.f32 -1.442695, %v6588_v12  ;;  %v4921_v39 = vmul.f32 -1.442695, %v6596_v16 }
  0xfb   :  { %v5647_v59 = vpop.eup %5646  ;;  %v371_v38 = vadd.f32 1.0, %v5645_v53  ;;  %v1027_v10 = vadd.f32 %v1011_v2, %v975_v57  ;;  %5652 = vrcp.f32 %v368_v63  ;;  %v6612_v54 = vadd.f32 %v5336_v37, %v6447_v34  ;;  %9744 = vst [vmem:[#allocation17_spill] sm:$0xff] %v6626_v40  ;;  %v6636_v58 = vld [vmem:[#allocation2 + $0x32] sm:$0xff] }
  0xfc   :  { %v5649_v0 = vpop.eup %5648  ;;  %v709_v11 = vadd.f32 1.0, %v5647_v59  ;;  %5654 = vrcp.f32 %v706_v4  ;;  %v287_v19 = vpop.f32.mrf.mxu0  ;;  %9743 = vst [vmem:[#allocation16_spill] sm:$0xff] %v6617_v25  ;;  %v1080_v62 = vadd.f32 %v1064_v23, %v1028_v17  ;;  %v1116_v33 = vmul.f32 %v6604_v20, %v6606_v21 }
  0xfd   :  { %v5651_v6 = vpop.eup %5650  ;;  %v370_v15 = vadd.f32 1.0, %v5649_v0  ;;  %5656 = vrcp.f32 %v371_v38  ;;  %9742 = vst [vmem:[#allocation15_spill] sm:$0xff] %v6612_v54  ;;  %v1079_v24 = vadd.f32 %v1063_v18, %v1027_v10  ;;  %v4888_v47 = vmul.f32 -1.442695, %v6599_v44 }
  0xfe   :  { %v708_v49 = vadd.f32 1.0, %v5651_v6  ;;  %5658 = vrcp.f32 %v709_v11  ;;  %v5339_v53 = vpop.f32.mrf.mxu0  ;;  %v6634_v57 = vrot.slane %v43_v14, %v6516_v46  ;;  %v1117_v59 = vmul.f32 %v6604_v20, %v6619_v26  ;;  %v5365_v6 = vpop.f32.mrf.mxu1 }
  0xff   :  { %5660 = vrcp.f32 %v370_v15  ;;  %v4920_v63 = vmul.f32 -1.442695, %v6609_v50  ;;  %v4891_v0 = vmul.f32 -1.442695, %v6612_v54  ;;  %v1132_v2 = vadd.f32 %v1116_v33, %v1079_v24 }
 0x100   :  { %5662 = vrcp.f32 %v708_v49  ;;  %9745 = vst [vmem:[#allocation18_spill] sm:$0xff] %v6634_v57  ;;  %v1168_v4 = vmul.f32 %v6617_v25, %v6621_v32  ;;  %v6647_v37 = vadd.f32 %v6447_v34, %v287_v19  ;;  %v6650_v46 = vadd.f32 %v6447_v34, %v625_v30  ;;  %v6671_v19 = vld [vmem:[%s9554_s4] ss:$0 sm:$0xff] }
 0x101   :  { %v1169_v38 = vmul.f32 %v6617_v25, %v6628_v42  ;;  %v1133_v9 = vadd.f32 %v1117_v59, %v1080_v62  ;;  %v4923_v10 = vmul.f32 -1.442695, %v6626_v40  ;;  %v6656_v11 = vadd.f32 %v5339_v53, %v6447_v34  ;;  %v635_v59 = vpop.f32.mrf.mxu1 }
 0x102   :  { %9746 = vst [vmem:[#allocation19_spill] sm:$0xff] %v6647_v37  ;;  %9747 = vst [vmem:[#allocation20_spill] sm:$0xff] %v6650_v46  ;;  %v857_v14 = vmul.f32 %v6520_v51, %v6571_v48  ;;  %v1184_v15 = vadd.f32 %v1168_v4, %v1132_v2  ;;  %v1220_v17 = vmul.f32 %v6634_v57, %v6636_v58  ;;  %v297_v48 = vpop.f32.mrf.mxu0  ;;  %5664 = vpow2.f32 %v4889_v61 }
 0x103   :  { %9748 = vst [vmem:[#allocation21_spill] sm:$0xff] %v6656_v11  ;;  %v806_v18 = vmul.f32 %v6523_v52, %v6564_v55  ;;  %v1221_v49 = vmul.f32 %v6634_v57, %v6642_v1  ;;  %v1185_v23 = vadd.f32 %v1169_v38, %v1133_v9  ;;  %v6674_v28 = vadd.f32 %v5365_v6, %v6447_v34  ;;  %v6683_v6 = vld [vmem:[#allocation2 + $0xd8] sm:$0xff] }
 0x104   :  { %v1236_v24 = vadd.f32 %v1220_v17, %v1184_v15  ;;  %v4890_v30 = vmul.f32 -1.442695, %v6647_v37  ;;  %v4922_v62 = vmul.f32 -1.442695, %v6650_v46  ;;  %v858_v55 = vmul.f32 %v6520_v51, %v6576_v60  ;;  %v6685_v38 = vld [vmem:[#allocation2 + $0xd9] sm:$0xff] }
 0x105   :  { %9749 = vst [vmem:[#allocation22_spill] sm:$0xff] %v6674_v28  ;;  %v1237_v33 = vadd.f32 %v1221_v49, %v1185_v23  ;;  %5666 = vpow2.f32 %v4921_v39  ;;  %v6681_v53 = vmul.f32 -1.442695, %v6656_v11  ;;  %v873_v4 = vadd.f32 %v857_v14, %v805_v43  ;;  %v6693_v39 = vld [vmem:[#allocation2 + $0xe0] sm:$0xff] }
 0x106   :  { %v6688_v61 = vadd.f32 %v6671_v19, %v1236_v24  ;;  %5668 = vpow2.f32 %v4888_v47  ;;  %v6691_v9 = vadd.f32 %v6447_v34, %v297_v48  ;;  %v874_v15 = vadd.f32 %v858_v55, %v806_v18  ;;  %v6709_v24 = vld [vmem:[#allocation2 + $0xe1] sm:$0xff] }
 0x107   :  { %9750 = vst [vmem:[#allocation23_spill] sm:$0xff] %v6681_v53  ;;  %v6696_v17 = vadd.f32 %v6671_v19, %v1237_v33  ;;  %5670 = vpow2.f32 %v4920_v63  ;;  %v6699_v43 = vmul.f32 -1.442695, %v6674_v28  ;;  %v909_v49 = vmul.f32 %v6532_v3, %v6583_v8  ;;  %9754 = vst [vmem:[#allocation27_spill] sm:$0xff] %v6709_v24 }
 0x108   :  { %v5653_v2 = vpop.eup %5652  ;;  %9751 = vst [vmem:[#allocation24_spill] sm:$0xff] %v6691_v9  ;;  %v4929_v47 = vmul.f32 -1.442695, %v6688_v61  ;;  %5672 = vpow2.f32 %v4891_v0  ;;  %v6705_v23 = vadd.f32 %v6447_v34, %v635_v59  ;;  %v910_v48 = vmul.f32 %v6532_v3, %v6590_v13 }
 0x109   :  { %v5655_v60 = vpop.eup %5654  ;;  %9752 = vst [vmem:[#allocation25_spill] sm:$0xff] %v6699_v43  ;;  %v1459_v63 = vmul.f32 %v6683_v6, %v6523_v52  ;;  %v1507_v55 = vmul.f32 %v6685_v38, %v6520_v51  ;;  %v4930_v8 = vmul.f32 -1.442695, %v6696_v17  ;;  %v925_v5 = vadd.f32 %v909_v49, %v873_v4  ;;  %v1540_v4 = vld [vmem:[#allocation2 + $0xe2] sm:$0xff] }
 0x10a   :  { %v5657_v14 = vpop.eup %5656  ;;  %9753 = vst [vmem:[#allocation26_spill] sm:$0xff] %v6705_v23  ;;  %v1460_v34 = vmul.f32 %v6693_v39, %v6523_v52  ;;  %5674 = vpow2.f32 %v4929_v47  ;;  %v6719_v0 = vmul.f32 -1.442695, %v6691_v9  ;;  %v926_v59 = vadd.f32 %v910_v48, %v874_v15  ;;  %v6731_v9 = vld [vmem:[#allocation2 + $0xda] sm:$0xff] }
 0x10b   :  { %v5659_v18 = vpop.eup %5658  ;;  %v961_v35 = vmul.f32 %v6554_v22, %v6606_v21  ;;  %v962_v28 = vmul.f32 %v6554_v22, %v6619_v26  ;;  %5676 = vpow2.f32 %v4930_v8  ;;  %v1508_v11 = vmul.f32 %v6709_v24, %v6520_v51  ;;  %9757 = vst [vmem:[#allocation30_spill] sm:$0xff] %v6731_v9 }
 0x10c   :  { %v5661_v33 = vpop.eup %5660  ;;  %9755 = vst [vmem:[#allocation28_spill] sm:$0xff] %v6719_v0  ;;  %v416_v49 = vmul.f32 %v5653_v2, %v6490_v27  ;;  %5678 = vpow2.f32 %v4923_v10  ;;  %v6729_v47 = vmul.f32 -1.442695, %v6705_v23  ;;  %v1523_v15 = vadd.f32 %v1507_v55, %v1459_v63  ;;  %v6742_v63 = vld [vmem:[#allocation2 + $0xf8] sm:$0xff] }
 0x10d   :  { %v5663_v13 = vpop.eup %5662  ;;  %v754_v48 = vmul.f32 %v5655_v60, %v6493_v29  ;;  %v419_v0 = vmul.f32 %v5657_v14, %v6496_v31  ;;  %5680 = vpow2.f32 %v4890_v30  ;;  %v1524_v46 = vadd.f32 %v1508_v11, %v1460_v34  ;;  %9759 = vst [vmem:[#allocation32_spill] sm:$0xff] %v6742_v63  ;;  %v6780_v60 = vld [vmem:[#allocation2 + $0xf1] sm:$0xff] }
 0x10e   :  { %9756 = vst [vmem:[#allocation29_spill] sm:$0xff] %v6729_v47  ;;  %433 = vst.msk [vmem:[#allocation2 + $0x49] sm:$0xff] %vm54_vm1, %v416_v49  ;;  %v757_v8 = vmul.f32 %v5659_v18, %v6503_v36  ;;  %v418_v37 = vmul.f32 %v5661_v33, %v6510_v41  ;;  %v756_v27 = vmul.f32 %v5663_v13, %v6514_v45  ;;  %v6740_v47 = vld [vmem:[#allocation2 + $0xf0] sm:$0xff]  ;;  %5682 = vpow2.f32 %v4922_v62  ;;  %v6778_v62 = vld [vmem:[#allocation2 + $0xf9] sm:$0xff] }
 0x10f   :  { %v1556_v10 = vmul.f32 %v1540_v4, %v6532_v3  ;;  %v977_v2 = vadd.f32 %v961_v35, %v925_v5  ;;  %v978_v23 = vadd.f32 %v962_v28, %v926_v59  ;;  %9758 = vst [vmem:[#allocation31_spill] sm:$0xff] %v6740_v47  ;;  %771 = vst.msk [vmem:[#allocation2 + $0x109] sm:$0xff] %vm54_vm1, %v754_v48  ;;  %v6762_v36 = vpop.eup %5664  ;;  %v6794_v13 = vld [vmem:[#allocation2 + $0xfa] sm:$0xff] }
 0x110   :  { %436 = vst.msk [vmem:[#allocation2 + $0x69] sm:$0xff] %vm54_vm1, %v419_v0  ;;  %v6748_v29 = vmul.f32 %v6709_v24, %v6574_v56  ;;  %v6751_v31 = vmul.f32 %v1540_v4, %v6581_v7  ;;  %v6755_v5 = vmul.f32 %v6604_v20, %v6683_v6  ;;  %v1555_v35 = vmul.f32 %v6731_v9, %v6532_v3 }
 0x111   :  { %774 = vst.msk [vmem:[#allocation2 + $0x129] sm:$0xff] %vm54_vm1, %v757_v8  ;;  %435 = vst.msk [vmem:[#allocation2 + $0x61] sm:$0xff] %vm54_vm1, %v418_v37  ;;  %v6766_v41 = vmul.f32 %v6604_v20, %v6693_v39  ;;  %v6770_v45 = vmul.f32 %v6617_v25, %v6685_v38  ;;  %v1014_v11 = vmul.f32 %v6574_v56, %v6628_v42 }
 0x112   :  { %9760 = vst [vmem:[#allocation33_spill] sm:$0xff] %v6748_v29  ;;  %9761 = vst [vmem:[#allocation34_spill] sm:$0xff] %v6751_v31  ;;  %v1013_v28 = vmul.f32 %v6574_v56, %v6621_v32  ;;  %v6776_v30 = vpop.eup %5666  ;;  %v1571_v37 = vadd.f32 %v1555_v35, %v1523_v15  ;;  %v1572_v14 = vadd.f32 %v1556_v10, %v1524_v46  ;;  %v6832_v29 = vld [vmem:[#allocation2 + $0x51] sm:$0xff] }
 0x113   :  { %9762 = vst [vmem:[#allocation35_spill] sm:$0xff] %v6755_v5  ;;  %773 = vst.msk [vmem:[#allocation2 + $0x121] sm:$0xff] %vm54_vm1, %v756_v27  ;;  %v1603_v18 = vmul.f32 %v6740_v47, %v6554_v22  ;;  %v1604_v55 = vmul.f32 %v6742_v63, %v6554_v22  ;;  %v6786_v33 = vpop.eup %5668  ;;  %v6790_v34 = vmul.f32 %v6683_v6, %v6554_v22 }
 0x114   :  { %9763 = vst [vmem:[#allocation36_spill] sm:$0xff] %v6766_v41  ;;  %9764 = vst [vmem:[#allocation37_spill] sm:$0xff] %v6770_v45  ;;  %v860_v0 = vmul.f32 %v6520_v51, %v6628_v42  ;;  %v1029_v59 = vadd.f32 %v1013_v28, %v977_v2  ;;  %v1030_v4 = vadd.f32 %v1014_v11, %v978_v23  ;;  %v6796_v46 = vpop.eup %5670 }
 0x115   :  { %9765 = vst [vmem:[#allocation38_spill] sm:$0xff] %v6778_v62  ;;  %9766 = vst [vmem:[#allocation39_spill] sm:$0xff] %v6780_v60  ;;  %v6800_v49 = vmul.f32 %v6532_v3, %v6642_v1  ;;  %v1066_v15 = vmul.f32 %v6581_v7, %v6642_v1  ;;  %v807_v6 = vmul.f32 %v6523_v52, %v6606_v21  ;;  %v6808_v42 = vpop.eup %5672  ;;  %v6824_v35 = vld [vmem:[#allocation2 + $0x48] sm:$0xff]  ;;  %v6826_v11 = vld [vmem:[#allocation2 + $0x50] sm:$0xff] }
 0x116   :  { %9767 = vst [vmem:[#allocation40_spill] sm:$0xff] %v6790_v34  ;;  %9768 = vst [vmem:[#allocation41_spill] sm:$0xff] %v6794_v13  ;;  %v859_v48 = vmul.f32 %v6520_v51, %v6621_v32  ;;  %v1510_v23 = vmul.f32 %v6778_v62, %v6520_v51  ;;  %v1065_v8 = vmul.f32 %v6581_v7, %v6636_v58  ;;  %v6880_v54 = vld [vmem:[#allocation2 + $0x109] sm:$0xff] }
 0x117   :  { %v1461_v27 = vmul.f32 %v6740_v47, %v6523_v52  ;;  %v1509_v1 = vmul.f32 %v6780_v60, %v6520_v51  ;;  %v6820_v21 = vmul.f32 %v6794_v13, %v6532_v3  ;;  %v1652_v32 = vmul.f32 %v6778_v62, %v6574_v56  ;;  %v5675_v28 = vpop.eup %5674 }
 0x118   :  { %v1619_v10 = vadd.f32 %v1603_v18, %v1571_v37  ;;  %v1620_v2 = vadd.f32 %v1604_v55, %v1572_v14  ;;  %v1700_v31 = vmul.f32 %v6794_v13, %v6581_v7  ;;  %v808_v41 = vmul.f32 %v6523_v52, %v6619_v26  ;;  %v5677_v34 = vpop.eup %5676  ;;  %v6838_v18 = vld [vmem:[#allocation2 + $0x49] sm:$0xff]  ;;  %v6842_v26 = vld [vmem:[#allocation2 + $0xf2] sm:$0xff] }
 0x119   :  { %v1081_v45 = vadd.f32 %v1065_v8, %v1029_v59  ;;  %v1082_v5 = vadd.f32 %v1066_v15, %v1030_v4  ;;  %v875_v43 = vadd.f32 %v859_v48, %v807_v6  ;;  %v1322_v53 = vadd.f32 1.0, %v5675_v28  ;;  %v6840_v55 = vpop.eup %5678  ;;  %9769 = vst [vmem:[#allocation42_spill] sm:$0xff] %v6842_v26  ;;  %v6850_v8 = vld [vmem:[#allocation2 + $0x52] sm:$0xff] }
 0x11a   :  { %v1462_v37 = vmul.f32 %v6742_v63, %v6523_v52  ;;  %v1651_v14 = vmul.f32 %v6780_v60, %v6574_v56  ;;  %v1323_v24 = vadd.f32 1.0, %v5677_v34  ;;  %v1525_v47 = vadd.f32 %v1509_v1, %v1461_v27  ;;  %v6848_v15 = vpop.eup %5680  ;;  %v6854_v34 = vld [vmem:[#allocation2 + $0x4a] sm:$0xff] }
 0x11b   :  { %v1118_v59 = vmul.f32 %v6604_v20, %v6824_v35  ;;  %v1119_v4 = vmul.f32 %v6604_v20, %v6826_v11  ;;  %9770 = vst [vmem:[#allocation43_spill] sm:$0xff] %v6848_v15  ;;  %5684 = vrcp.f32 %v1322_v53  ;;  %v1668_v48 = vadd.f32 %v1652_v32, %v1620_v2  ;;  %v6858_v63 = vpop.eup %5682 }
 0x11c   :  { %v1667_v6 = vadd.f32 %v1651_v14, %v1619_v10  ;;  %v1171_v28 = vmul.f32 %v6617_v25, %v6832_v29  ;;  %5686 = vrcp.f32 %v1323_v24  ;;  %v1170_v60 = vmul.f32 %v6617_v25, %v6838_v18  ;;  %9771 = vst [vmem:[#allocation44_spill] sm:$0xff] %v6858_v63  ;;  %v6876_v63 = vld [vmem:[#allocation2 + $0x112] sm:$0xff] }
 0x11d   :  { %v1134_v27 = vadd.f32 %v1118_v59, %v1081_v45  ;;  %v1135_v1 = vadd.f32 %v1119_v4, %v1082_v5  ;;  %v876_v13 = vadd.f32 %v860_v0, %v808_v41  ;;  %v911_v53 = vmul.f32 %v6532_v3, %v6636_v58  ;;  %v6868_v45 = vld [vmem:[#allocation2 + $0x111] sm:$0xff]  ;;  %v6872_v41 = vld [vmem:[#allocation2 + $0x108] sm:$0xff] }
 0x11e   :  { %v1557_v32 = vmul.f32 %v6842_v26, %v6532_v3  ;;  %v1699_v10 = vmul.f32 %v6842_v26, %v6581_v7  ;;  %v1223_v24 = vmul.f32 %v6634_v57, %v6850_v8  ;;  %v1222_v14 = vmul.f32 %v6634_v57, %v6854_v34  ;;  %v6874_v0 = vld [vmem:[#allocation2 + $0x110] sm:$0xff] }
 0x11f   :  { %v1186_v5 = vadd.f32 %v1170_v60, %v1134_v27  ;;  %v1187_v2 = vadd.f32 %v1171_v28, %v1135_v1  ;;  %v927_v58 = vadd.f32 %v911_v53, %v875_v43  ;;  %v1526_v59 = vadd.f32 %v1510_v23, %v1462_v37 }
 0x120   :  { %v1715_v4 = vadd.f32 %v1699_v10, %v1667_v6  ;;  %v1716_v15 = vadd.f32 %v1700_v31, %v1668_v48  ;;  %v6878_v26 = vadd.f32 %v1557_v32, %v1525_v47  ;;  %v373_v60 = vadd.f32 1.0, %v6762_v36  ;;  %v6900_v6 = vld [vmem:[#allocation2 + $0x10a] sm:$0xff] }
 0x121   :  { %v1238_v62 = vadd.f32 %v1222_v14, %v1186_v5  ;;  %v1239_v40 = vadd.f32 %v1223_v24, %v1187_v2  ;;  %v1797_v28 = vmul.f32 %v6868_v45, %v6617_v25  ;;  %v963_v27 = vmul.f32 %v6554_v22, %v6824_v35 }
 0x122   :  { %v1748_v43 = vmul.f32 %v6872_v41, %v6604_v20  ;;  %v1749_v31 = vmul.f32 %v6874_v0, %v6604_v20  ;;  %v1845_v47 = vmul.f32 %v6876_v63, %v6634_v57  ;;  %v928_v23 = vadd.f32 %v6800_v49, %v876_v13 }
 0x123   :  { %v6895_v37 = vadd.f32 %v6671_v19, %v1238_v62  ;;  %v6898_v36 = vadd.f32 %v6671_v19, %v1239_v40  ;;  %v964_v48 = vmul.f32 %v6554_v22, %v6826_v11  ;;  %v1796_v32 = vmul.f32 %v6880_v54, %v6617_v25 }
 0x124   :  { %v1764_v1 = vadd.f32 %v1748_v43, %v1715_v4  ;;  %v1765_v53 = vadd.f32 %v1749_v31, %v1716_v15  ;;  %5688 = vrcp.f32 %v373_v60  ;;  %v711_v62 = vadd.f32 1.0, %v6776_v30 }
 0x125   :  { %v4931_v10 = vmul.f32 -1.442695, %v6895_v37  ;;  %v4932_v13 = vmul.f32 -1.442695, %v6898_v36  ;;  %v979_v49 = vadd.f32 %v963_v27, %v927_v58  ;;  %v1844_v5 = vmul.f32 %v6900_v6, %v6634_v57 }
 0x126   :  { %v1812_v40 = vadd.f32 %v1796_v32, %v1764_v1  ;;  %v1813_v24 = vadd.f32 %v1797_v28, %v1765_v53  ;;  %v1016_v2 = vmul.f32 %v6574_v56, %v6832_v29  ;;  %v1015_v15 = vmul.f32 %v6574_v56, %v6838_v18 }
 0x127   :  { %5690 = vpow2.f32 %v4931_v10  ;;  %v372_v14 = vadd.f32 1.0, %v6786_v33  ;;  %v980_v4 = vadd.f32 %v964_v48, %v928_v23  ;;  %v1574_v58 = vadd.f32 %v6820_v21, %v1526_v59  ;;  %v6939_v10 = vld [vmem:[#allocation2 + $0x60] sm:$0xff] }
 0x128   :  { %5692 = vpow2.f32 %v4932_v13  ;;  %v1860_v60 = vadd.f32 %v1844_v5, %v1812_v40  ;;  %v1861_v43 = vadd.f32 %v1845_v47, %v1813_v24  ;;  %v5685_v30 = vpop.eup %5684  ;;  %v710_v28 = vadd.f32 1.0, %v6796_v46  ;;  %v6946_v24 = vld [vmem:[#allocation2 + $0x68] sm:$0xff] }
 0x129   :  { %5694 = vrcp.f32 %v711_v62  ;;  %v375_v27 = vadd.f32 1.0, %v6808_v42  ;;  %v5687_v31 = vpop.eup %5686  ;;  %v1370_v1 = vmul.f32 %v5685_v30, %v6688_v61  ;;  %v1031_v53 = vadd.f32 %v1015_v15, %v979_v49  ;;  %v6969_v30 = vld [vmem:[#allocation2 + $0x62] sm:$0xff] }
 0x12a   :  { %v6921_v32 = vadd.f32 %v6671_v19, %v1860_v60  ;;  %v6924_v33 = vadd.f32 %v6671_v19, %v1861_v43  ;;  %v1371_v47 = vmul.f32 %v5687_v31, %v6696_v17  ;;  %v1067_v21 = vmul.f32 %v6581_v7, %v6854_v34 }
 0x12b   :  { %v1605_v46 = vmul.f32 %v6872_v41, %v6554_v22  ;;  %5696 = vrcp.f32 %v372_v14  ;;  %v1402_v42 = vsel %vm54_vm1, %v1370_v1, 0.0  ;;  %1386 = vst.msk [vmem:[#allocation3] sm:$0xff] %vm54_vm1, %v1370_v1  ;;  %v1032_v61 = vadd.f32 %v1016_v2, %v980_v4  ;;  %v6963_v4 = vld [vmem:[#allocation2 + $0x69] sm:$0xff] }
 0x12c   :  { %v4947_v59 = vmul.f32 -1.442695, %v6921_v32  ;;  %v4948_v23 = vmul.f32 -1.442695, %v6924_v33  ;;  %v1403_v48 = vsel %vm54_vm1, %v1371_v47, 0.0  ;;  %1387 = vst.msk [vmem:[#allocation3 + $0x8] sm:$0xff] %vm54_vm1, %v1371_v47  ;;  %v1606_v17 = vmul.f32 %v6874_v0, %v6554_v22 }
 0x12d   :  { %5698 = vrcp.f32 %v710_v28  ;;  %v713_v13 = vadd.f32 1.0, %v6840_v55  ;;  %v6942_v62 = vadd.f32 %v1403_v48, %v1402_v42  ;;  %v1068_v49 = vmul.f32 %v6581_v7, %v6850_v8  ;;  %v6957_v55 = vld [vmem:[#allocation2 + $0x61] sm:$0xff] }
 0x12e   :  { %v1083_v40 = vadd.f32 %v1067_v21, %v1031_v53  ;;  %5700 = vpow2.f32 %v4947_v59  ;;  %v6950_v5 = vmul.f32 %v6693_v39, %v6554_v22  ;;  %v6954_v2 = vmul.f32 %v6685_v38, %v6574_v56  ;;  %v6977_v53 = vld [vmem:[#allocation2 + $0x6a] sm:$0xff] }
 0x12f   :  { %v1621_v15 = vadd.f32 %v1605_v46, %v6878_v26  ;;  %5702 = vpow2.f32 %v4948_v23  ;;  %v6961_v14 = vmul.f32 %v6731_v9, %v6581_v7  ;;  %v1084_v60 = vadd.f32 %v1068_v49, %v1032_v61 }
 0x130   :  { %9772 = vst [vmem:[#allocation45_spill] sm:$0xff] %v6950_v5  ;;  %9773 = vst [vmem:[#allocation46_spill] sm:$0xff] %v6954_v2  ;;  %v1120_v39 = vmul.f32 %v6604_v20, %v6939_v10  ;;  %5704 = vrcp.f32 %v375_v27  ;;  %v1622_v43 = vadd.f32 %v1606_v17, %v1574_v58  ;;  %v1653_v38 = vmul.f32 %v6880_v54, %v6574_v56 }
 0x131   :  { %9774 = vst [vmem:[#allocation47_spill] sm:$0xff] %v6961_v14  ;;  %v1121_v26 = vmul.f32 %v6604_v20, %v6946_v24  ;;  %5706 = vrcp.f32 %v713_v13  ;;  %v5689_v28 = vpop.eup %5688  ;;  %v809_v31 = vmul.f32 %v6523_v52, %v6824_v35  ;;  %v861_v1 = vmul.f32 %v6520_v51, %v6838_v18 }
 0x132   :  { %v1136_v27 = vadd.f32 %v1120_v39, %v1083_v40  ;;  %v1172_v58 = vmul.f32 %v6617_v25, %v6957_v55  ;;  %v1654_v47 = vmul.f32 %v6868_v45, %v6574_v56  ;;  %v1669_v21 = vadd.f32 %v1653_v38, %v1621_v15 }
 0x133   :  { %v1173_v46 = vmul.f32 %v6617_v25, %v6963_v4  ;;  %v1137_v42 = vadd.f32 %v1121_v26, %v1084_v60  ;;  %v810_v35 = vmul.f32 %v6523_v52, %v6826_v11  ;;  %v1701_v18 = vmul.f32 %v6900_v6, %v6581_v7  ;;  %v6995_v26 = vld [vmem:[#allocation2 + $0x120] sm:$0xff] }
 0x134   :  { %v5691_v61 = vpop.eup %5690  ;;  %v1188_v59 = vadd.f32 %v1172_v58, %v1136_v27  ;;  %v1224_v23 = vmul.f32 %v6634_v57, %v6969_v30  ;;  %v1670_v13 = vadd.f32 %v1654_v47, %v1622_v43  ;;  %v1225_v49 = vmul.f32 %v6634_v57, %v6977_v53  ;;  %v7001_v47 = vld [vmem:[#allocation2 + $0x128] sm:$0xff] }
 0x135   :  { %v5693_v48 = vpop.eup %5692  ;;  %v1324_v17 = vadd.f32 1.0, %v5691_v61  ;;  %v1189_v40 = vadd.f32 %v1173_v46, %v1137_v42  ;;  %v862_v60 = vmul.f32 %v6520_v51, %v6832_v29  ;;  %v877_v39 = vadd.f32 %v861_v1, %v809_v31  ;;  %v6999_v61 = vld [vmem:[#allocation2 + $0x129] sm:$0xff]  ;;  %v7010_v1 = vld [vmem:[#allocation2 + $0x121] sm:$0xff] }
 0x136   :  { %v5695_v15 = vpop.eup %5694  ;;  %v1325_v11 = vadd.f32 1.0, %v5693_v48  ;;  %v1240_v38 = vadd.f32 %v1224_v23, %v1188_v59  ;;  %v1702_v27 = vmul.f32 %v6876_v63, %v6581_v7  ;;  %v1717_v58 = vadd.f32 %v1701_v18, %v1669_v21  ;;  %v7012_v59 = vld [vmem:[#allocation2 + $0x122] sm:$0xff] }
 0x137   :  { %5708 = vrcp.f32 %v1324_v17  ;;  %v1241_v43 = vadd.f32 %v1225_v49, %v1189_v40  ;;  %v914_v42 = vmul.f32 %v6532_v3, %v6850_v8  ;;  %v913_v29 = vmul.f32 %v6532_v3, %v6854_v34 }
 0x138   :  { %v5697_v46 = vpop.eup %5696  ;;  %5710 = vrcp.f32 %v1325_v11  ;;  %v7008_v31 = vadd.f32 %v6671_v19, %v1240_v38  ;;  %v878_v21 = vadd.f32 %v862_v60, %v810_v35  ;;  %v1718_v23 = vadd.f32 %v1702_v27, %v1670_v13  ;;  %v7024_v38 = vld [vmem:[#allocation2 + $0x12a] sm:$0xff] }
 0x139   :  { %v7015_v18 = vadd.f32 %v6671_v19, %v1241_v43  ;;  %v1750_v48 = vmul.f32 %v6995_v26, %v6604_v20  ;;  %v929_v17 = vadd.f32 %v913_v29, %v877_v39  ;;  %v1799_v34 = vmul.f32 %v6999_v61, %v6617_v25 }
 0x13a   :  { %9775 = vst [vmem:[#allocation48_spill] sm:$0xff] %v7008_v31  ;;  %v5699_v8 = vpop.eup %5698  ;;  %v4933_v49 = vmul.f32 -1.442695, %v7008_v31  ;;  %v1751_v40 = vmul.f32 %v7001_v47, %v6604_v20  ;;  %v1798_v13 = vmul.f32 %v7010_v1, %v6617_v25  ;;  %v1846_v39 = vmul.f32 %v7012_v59, %v6634_v57 }
 0x13b   :  { %9776 = vst [vmem:[#allocation49_spill] sm:$0xff] %v7015_v18  ;;  %v5701_v11 = vpop.eup %5700  ;;  %v4934_v35 = vmul.f32 -1.442695, %v7015_v18  ;;  %v1766_v60 = vadd.f32 %v1750_v48, %v1717_v58  ;;  %v421_v14 = vmul.f32 %v5689_v28, %v6588_v12  ;;  %v759_v31 = vmul.f32 %v5695_v15, %v6596_v16 }
 0x13c   :  { %v5703_v27 = vpop.eup %5702  ;;  %v1940_v43 = vadd.f32 1.0, %v5701_v11  ;;  %5712 = vpow2.f32 %v4933_v49  ;;  %v1767_v29 = vadd.f32 %v1751_v40, %v1718_v23  ;;  %v1847_v58 = vmul.f32 %v7024_v38, %v6634_v57 }
 0x13d   :  { %v5705_v2 = vpop.eup %5704  ;;  %v1941_v5 = vadd.f32 1.0, %v5703_v27  ;;  %5714 = vpow2.f32 %v4934_v35  ;;  %v1814_v9 = vadd.f32 %v1798_v13, %v1766_v60  ;;  %438 = vst.msk [vmem:[#allocation2 + $0x81] sm:$0xff] %vm54_vm1, %v421_v14  ;;  %v420_v11 = vmul.f32 %v5697_v46, %v6599_v44  ;;  %776 = vst.msk [vmem:[#allocation2 + $0x141] sm:$0xff] %vm54_vm1, %v759_v31  ;;  %v9787_v60 = vld [vmem:[#allocation39_spill] sm:$0xff]  ;;  %v9789_v27 = vld [vmem:[#allocation42_spill] sm:$0xff] }
 0x13e   :  { %v5707_v18 = vpop.eup %5706  ;;  %5716 = vrcp.f32 %v1940_v43  ;;  %v1815_v48 = vadd.f32 %v1799_v34, %v1767_v29  ;;  %v1463_v23 = vmul.f32 %v6872_v41, %v6523_v52  ;;  %v758_v28 = vmul.f32 %v5699_v8, %v6609_v50  ;;  %v9777_v34 = vld [vmem:[#allocation15_spill] sm:$0xff]  ;;  %v9778_v50 = vld [vmem:[#allocation17_spill] sm:$0xff] }
 0x13f   :  { %5718 = vrcp.f32 %v1941_v5  ;;  %v1862_v12 = vadd.f32 %v1846_v39, %v1814_v9  ;;  %v1511_v16 = vmul.f32 %v6880_v54, %v6520_v51  ;;  %v930_v15 = vadd.f32 %v914_v42, %v878_v21  ;;  %437 = vst.msk [vmem:[#allocation2 + $0x79] sm:$0xff] %vm54_vm1, %v420_v11  ;;  %v9779_v54 = vld [vmem:[#allocation38_spill] sm:$0xff]  ;;  %v9781_v42 = vld [vmem:[#allocation41_spill] sm:$0xff]  ;;  %v9783_v8 = vld [vmem:[#allocation31_spill] sm:$0xff] }
 0x140   :  { %v1863_v49 = vadd.f32 %v1847_v58, %v1815_v48  ;;  %v423_v14 = vmul.f32 %v5705_v2, %v9777_v34  ;;  %v965_v44 = vmul.f32 %v6554_v22, %v6939_v10  ;;  %v966_v41 = vmul.f32 %v6554_v22, %v6946_v24  ;;  %775 = vst.msk [vmem:[#allocation2 + $0x139] sm:$0xff] %vm54_vm1, %v758_v28  ;;  %v5342_v34 = vpop.f32.mrf.mxu0 }
 0x141   :  { %v7050_v9 = vadd.f32 %v6671_v19, %v1862_v12  ;;  %v761_v5 = vmul.f32 %v5707_v18, %v9778_v50  ;;  %v7056_v46 = vmul.f32 %v9779_v54, %v6617_v25  ;;  %v7060_v2 = vmul.f32 %v9781_v42, %v6634_v57  ;;  %v9785_v18 = vld [vmem:[#allocation32_spill] sm:$0xff] }
 0x142   :  { %v1464_v31 = vmul.f32 %v6874_v0, %v6523_v52  ;;  %v7065_v21 = vadd.f32 %v6671_v19, %v1863_v49  ;;  %440 = vst.msk [vmem:[#allocation2 + $0x99] sm:$0xff] %vm54_vm1, %v423_v14  ;;  %v7070_v40 = vmul.f32 %v9783_v8, %v6604_v20  ;;  %v7074_v35 = vmul.f32 %v9785_v18, %v6604_v20 }
 0x143   :  { %9780 = vst [vmem:[#allocation15_spill] sm:$0xff] %v7056_v46  ;;  %9782 = vst [vmem:[#allocation17_spill] sm:$0xff] %v7060_v2  ;;  %v7078_v13 = vmul.f32 %v9787_v60, %v6617_v25  ;;  %v4949_v39 = vmul.f32 -1.442695, %v7050_v9  ;;  %v7084_v43 = vmul.f32 %v9789_v27, %v6634_v57  ;;  %v1512_v29 = vmul.f32 %v6868_v45, %v6520_v51  ;;  %v307_v60 = vpop.f32.mrf.mxu0 }
 0x144   :  { %9784 = vst [vmem:[#allocation38_spill] sm:$0xff] %v7070_v40  ;;  %9786 = vst [vmem:[#allocation41_spill] sm:$0xff] %v7074_v35  ;;  %v5709_v0 = vpop.eup %5708  ;;  %v1527_v58 = vadd.f32 %v1511_v16, %v1463_v23  ;;  %v4950_v48 = vmul.f32 -1.442695, %v7065_v21  ;;  %v981_v28 = vadd.f32 %v965_v44, %v929_v17  ;;  %v982_v49 = vadd.f32 %v966_v41, %v930_v15  ;;  %v5368_v16 = vpop.f32.mrf.mxu1  ;;  %v9791_v15 = vld [vmem:[#allocation43_spill] sm:$0xff]  ;;  %v9792_v41 = vld [vmem:[#allocation44_spill] sm:$0xff] }
 0x145   :  { %9788 = vst [vmem:[#allocation31_spill] sm:$0xff] %v7078_v13  ;;  %778 = vst.msk [vmem:[#allocation2 + $0x159] sm:$0xff] %vm54_vm1, %v761_v5  ;;  %v5711_v11 = vpop.eup %5710  ;;  %v1372_v12 = vmul.f32 %v5709_v0, %v6895_v37  ;;  %5720 = vpow2.f32 %v4949_v39  ;;  %v1528_v50 = vadd.f32 %v1512_v29, %v1464_v31  ;;  %v1559_v5 = vmul.f32 %v6900_v6, %v6532_v3  ;;  %v9802_v13 = vld [vmem:[#allocation49_spill] sm:$0xff] }
 0x146   :  { %9790 = vst [vmem:[#allocation32_spill] sm:$0xff] %v7084_v43  ;;  %v1373_v14 = vmul.f32 %v5711_v11, %v6898_v36  ;;  %5722 = vpow2.f32 %v4950_v48  ;;  %v1560_v45 = vmul.f32 %v6876_v63, %v6532_v3  ;;  %v1018_v37 = vmul.f32 %v6574_v56, %v6963_v4 }
 0x147   :  { %v1405_v23 = vsel %vm54_vm1, %v1372_v12, 0.0  ;;  %1388 = vst.msk [vmem:[#allocation3 + $0x10] sm:$0xff] %vm54_vm1, %v1372_v12  ;;  %v1017_v17 = vmul.f32 %v6574_v56, %v6957_v55  ;;  %v1575_v6 = vadd.f32 %v1559_v5, %v1527_v58  ;;  %v374_v44 = vadd.f32 1.0, %v9791_v15  ;;  %v6128_v12 = vld [vmem:[%s9552_s2] ss:$0 sm:$0xff] }
 0x148   :  { %v1406_v36 = vadd.f32 %v1405_v23, %v6942_v62  ;;  %1389 = vst.msk [vmem:[#allocation3 + $0x18] sm:$0xff] %vm54_vm1, %v1373_v14  ;;  %v712_v63 = vadd.f32 1.0, %v9792_v41  ;;  %v1034_v31 = vadd.f32 %v1018_v37, %v982_v49  ;;  %v1407_v8 = vsel %vm54_vm1, %v1373_v14, 0.0  ;;  %v645_v14 = vpop.f32.mrf.mxu1  ;;  %v7126_v23 = vld [vmem:[#allocation2 + $0x78] sm:$0xff] }
 0x149   :  { %v5713_v54 = vpop.eup %5712  ;;  %v1033_v42 = vadd.f32 %v1017_v17, %v981_v28  ;;  %v1607_v18 = vmul.f32 %v6995_v26, %v6554_v22  ;;  %v1576_v62 = vadd.f32 %v1560_v45, %v1528_v50  ;;  %v1608_v29 = vmul.f32 %v7001_v47, %v6554_v22  ;;  %v7137_v15 = vld [vmem:[#allocation2 + $0x79] sm:$0xff] }
 0x14a   :  { %v5715_v39 = vpop.eup %5714  ;;  %v1326_v0 = vadd.f32 1.0, %v5713_v54  ;;  %v7108_v27 = vadd.f32 %v1407_v8, %v1406_v36  ;;  %v1069_v48 = vmul.f32 %v6581_v7, %v6969_v30  ;;  %v7117_v28 = vadd.f32 %v6128_v12, %v5342_v34  ;;  %v7133_v36 = vld [vmem:[#allocation2 + $0x80] sm:$0xff]  ;;  %v9796_v8 = vld [vmem:[#allocation27_spill] sm:$0xff] }
 0x14b   :  { %v5717_v58 = vpop.eup %5716  ;;  %v1327_v11 = vadd.f32 1.0, %v5715_v39  ;;  %v7119_v49 = vadd.f32 %v6128_v12, %v5368_v16  ;;  %v1070_v45 = vmul.f32 %v6581_v7, %v6977_v53  ;;  %v7128_v37 = vadd.f32 %v6128_v12, %v307_v60 }
 0x14c   :  { %v5719_v5 = vpop.eup %5718  ;;  %v7122_v50 = vmul.f32 %v5717_v58, %v6921_v32  ;;  %5724 = vrcp.f32 %v1326_v0  ;;  %v1085_v34 = vadd.f32 %v1069_v48, %v1033_v42  ;;  %v1623_v16 = vadd.f32 %v1607_v18, %v1575_v6  ;;  %v7151_v42 = vld [vmem:[#allocation2 + $0x81] sm:$0xff] }
 0x14d   :  { %9794 = vst [vmem:[#allocation42_spill] sm:$0xff] %v7128_v37  ;;  %v7131_v17 = vmul.f32 %v5719_v5, %v6924_v33  ;;  %5726 = vrcp.f32 %v1327_v11  ;;  %v1624_v32 = vadd.f32 %v1608_v29, %v1576_v62  ;;  %v1086_v41 = vadd.f32 %v1070_v45, %v1034_v31  ;;  %v7159_v0 = vld [vmem:[#allocation2 + $0x7a] sm:$0xff]  ;;  %v7163_v58 = vld [vmem:[#allocation2 + $0x82] sm:$0xff] }
 0x14e   :  { %9793 = vst [vmem:[#allocation39_spill] sm:$0xff] %v7122_v50  ;;  %2005 = vst.msk [vmem:[#allocation3 + $0x90] sm:$0xff] %vm54_vm1, %v7122_v50  ;;  %v7139_v54 = vadd.f32 %v6128_v12, %v645_v14  ;;  %v7143_v60 = vmul.f32 %v6617_v25, %v9796_v8  ;;  %v1656_v33 = vmul.f32 %v6999_v61, %v6574_v56  ;;  %5728 = vrcp.f32 %v374_v44  ;;  %v9798_v44 = vld [vmem:[#allocation23_spill] sm:$0xff]  ;;  %v9799_v45 = vld [vmem:[#allocation25_spill] sm:$0xff] }
 0x14f   :  { %9795 = vst [vmem:[#allocation43_spill] sm:$0xff] %v7131_v17  ;;  %2006 = vst.msk [vmem:[#allocation3 + $0x98] sm:$0xff] %vm54_vm1, %v7131_v17  ;;  %v1655_v6 = vmul.f32 %v7010_v1, %v6574_v56  ;;  %v1122_v31 = vmul.f32 %v6604_v20, %v7126_v23  ;;  %v1704_v18 = vmul.f32 %v7024_v38, %v6581_v7  ;;  %5730 = vrcp.f32 %v712_v63  ;;  %v1215_v8 = vld [vmem:[#allocation2 + $0xe2] sm:$0xff] }
 0x150   :  { %9797 = vst [vmem:[#allocation44_spill] sm:$0xff] %v7143_v60  ;;  %v811_v39 = vmul.f32 %v6523_v52, %v6939_v10  ;;  %v1123_v62 = vmul.f32 %v6604_v20, %v7133_v36  ;;  %v1174_v11 = vmul.f32 %v6617_v25, %v7137_v15  ;;  %5732 = vpow2.f32 %v9798_v44  ;;  %v7181_v50 = vld [vmem:[#allocation2 + $0x140] sm:$0xff] }
 0x151   :  { %v1671_v29 = vadd.f32 %v1655_v6, %v1623_v16  ;;  %v1138_v48 = vadd.f32 %v1122_v31, %v1085_v34  ;;  %v1672_v14 = vadd.f32 %v1656_v33, %v1624_v32  ;;  %v1175_v10 = vmul.f32 %v6617_v25, %v7151_v42 }
 0x152   :  { %v5721_v12 = vpop.eup %5720  ;;  %v1139_v5 = vadd.f32 %v1123_v62, %v1086_v41  ;;  %5734 = vpow2.f32 %v9799_v45  ;;  %v1703_v63 = vmul.f32 %v7012_v59, %v6581_v7  ;;  %v1226_v6 = vmul.f32 %v6634_v57, %v7159_v0  ;;  %v7179_v62 = vld [vmem:[#allocation2 + $0x138] sm:$0xff] }
 0x153   :  { %v5723_v17 = vpop.eup %5722  ;;  %v1942_v16 = vadd.f32 1.0, %v5721_v12  ;;  %v1190_v34 = vadd.f32 %v1174_v11, %v1138_v48  ;;  %v863_v31 = vmul.f32 %v6520_v51, %v6957_v55  ;;  %v1227_v33 = vmul.f32 %v6634_v57, %v7163_v58  ;;  %v7186_v12 = vld [vmem:[#allocation2 + $0x139] sm:$0xff] }
 0x154   :  { %v1943_v32 = vadd.f32 1.0, %v5723_v17  ;;  %v1191_v41 = vadd.f32 %v1175_v10, %v1139_v5  ;;  %v1719_v44 = vadd.f32 %v1703_v63, %v1671_v29  ;;  %v7184_v48 = vmul.f32 %v6634_v57, %v1215_v8  ;;  %v7193_v5 = vld [vmem:[#allocation2 + $0x141] sm:$0xff] }
 0x155   :  { %5736 = vrcp.f32 %v1942_v16  ;;  %v1242_v45 = vadd.f32 %v1226_v6, %v1190_v34  ;;  %v1720_v55 = vadd.f32 %v1704_v18, %v1672_v14  ;;  %v7189_v17 = vmul.f32 -1.442695, %v7117_v28  ;;  %v7208_v34 = vld [vmem:[#allocation2 + $0x13a] sm:$0xff] }
 0x156   :  { %9800 = vst [vmem:[#allocation27_spill] sm:$0xff] %v7184_v48  ;;  %5738 = vrcp.f32 %v1943_v32  ;;  %v1243_v11 = vadd.f32 %v1227_v33, %v1191_v41  ;;  %v812_v10 = vmul.f32 %v6523_v52, %v6946_v24  ;;  %v1752_v8 = vmul.f32 %v7179_v62, %v6604_v20  ;;  %v7214_v33 = vld [vmem:[#allocation2 + $0x142] sm:$0xff] }
 0x157   :  { %v7196_v29 = vadd.f32 %v6671_v19, %v1242_v45  ;;  %v7201_v63 = vmul.f32 -1.442695, %v7119_v49  ;;  %v879_v16 = vadd.f32 %v863_v31, %v811_v39  ;;  %v915_v18 = vmul.f32 %v6532_v3, %v6969_v30  ;;  %v9801_v45 = vld [vmem:[#allocation48_spill] sm:$0xff] }
 0x158   :  { %v7206_v14 = vadd.f32 %v6671_v19, %v1243_v11  ;;  %v1753_v24 = vmul.f32 %v7181_v50, %v6604_v20  ;;  %v1465_v32 = vmul.f32 %v6995_v26, %v6523_v52  ;;  %v1768_v39 = vadd.f32 %v1752_v8, %v1719_v44 }
 0x159   :  { %v5725_v6 = vpop.eup %5724  ;;  %v4935_v41 = vmul.f32 -1.442695, %v7196_v29  ;;  %v1800_v30 = vmul.f32 %v7186_v12, %v6617_v25  ;;  %v1801_v2 = vmul.f32 %v7193_v5, %v6617_v25  ;;  %v1848_v35 = vmul.f32 %v7208_v34, %v6634_v57 }
 0x15a   :  { %v5727_v31 = vpop.eup %5726  ;;  %v1374_v11 = vmul.f32 %v5725_v6, %v9801_v45  ;;  %v4936_v43 = vmul.f32 -1.442695, %v7206_v14  ;;  %v1769_v46 = vadd.f32 %v1753_v24, %v1720_v55  ;;  %v1849_v6 = vmul.f32 %v7214_v33, %v6634_v57 }
 0x15b   :  { %v1375_v48 = vmul.f32 %v5727_v31, %v9802_v13  ;;  %5740 = vpow2.f32 %v4935_v41  ;;  %v1816_v26 = vadd.f32 %v1800_v30, %v1768_v39  ;;  %v5729_v44 = vpop.eup %5728  ;;  %v1466_v13 = vmul.f32 %v7001_v47, %v6523_v52 }
 0x15c   :  { %v1409_v8 = vsel %vm54_vm1, %v1374_v11, 0.0  ;;  %1390 = vst.msk [vmem:[#allocation3 + $0x20] sm:$0xff] %vm54_vm1, %v1374_v11  ;;  %5742 = vpow2.f32 %v4936_v43  ;;  %v1817_v45 = vadd.f32 %v1801_v2, %v1769_v46  ;;  %v5731_v40 = vpop.eup %5730  ;;  %v1513_v24 = vmul.f32 %v7010_v1, %v6520_v51 }
 0x15d   :  { %v1410_v55 = vadd.f32 %v1409_v8, %v7108_v27  ;;  %1391 = vst.msk [vmem:[#allocation3 + $0x28] sm:$0xff] %vm54_vm1, %v1375_v48  ;;  %v1864_v41 = vadd.f32 %v1848_v35, %v1816_v26  ;;  %v5733_v39 = vpop.eup %5732  ;;  %v864_v30 = vmul.f32 %v6520_v51, %v6963_v4  ;;  %v931_v31 = vadd.f32 %v915_v18, %v879_v16  ;;  %v9803_v18 = vld [vmem:[#allocation19_spill] sm:$0xff] }
 0x15e   :  { %v967_v46 = vmul.f32 %v6554_v22, %v7126_v23  ;;  %v1865_v2 = vadd.f32 %v1849_v6, %v1817_v45  ;;  %v916_v27 = vmul.f32 %v6532_v3, %v6977_v53  ;;  %v1514_v47 = vmul.f32 %v6999_v61, %v6520_v51  ;;  %v9804_v61 = vld [vmem:[#allocation20_spill] sm:$0xff] }
 0x15f   :  { %v5735_v43 = vpop.eup %5734  ;;  %v7245_v11 = vadd.f32 %v6671_v19, %v1864_v41  ;;  %v7248_v1 = vmul.f32 -1.442695, %v7128_v37  ;;  %v880_v35 = vadd.f32 %v864_v30, %v812_v10  ;;  %v1561_v4 = vmul.f32 %v7012_v59, %v6532_v3 }
 0x160   :  { %v7253_v16 = vadd.f32 %v6671_v19, %v1865_v2  ;;  %v422_v26 = vmul.f32 %v5729_v44, %v9803_v18  ;;  %v1529_v8 = vadd.f32 %v1513_v24, %v1465_v32  ;;  %v1530_v53 = vadd.f32 %v1514_v47, %v1466_v13  ;;  %v48_v32 = vld [vmem:[%s9555_s5 + $0x18] sm:$0xff]  ;;  %v1793_v47 = vld [vmem:[#allocation2 + $0x1a1] sm:$0xff] }
 0x161   :  { %v4951_v6 = vmul.f32 -1.442695, %v7245_v11  ;;  %v760_v45 = vmul.f32 %v5731_v40, %v9804_v61  ;;  %v983_v60 = vadd.f32 %v967_v46, %v931_v31  ;;  %v377_v10 = vadd.f32 1.0, %v5733_v39  ;;  %v47_v40 = vld [vmem:[%s9555_s5 + $0x10] sm:$0xff]  ;;  %v1744_v13 = vld [vmem:[#allocation2 + $0x198] sm:$0xff]  ;;  %5370 = vmatpush3.msra.mxu0 %v48_v32  ;;  %v1745_v46 = vld [vmem:[#allocation2 + $0x1a0] sm:$0xff] }
 0x162   :  { %v5737_v41 = vpop.eup %5736  ;;  %v4952_v37 = vmul.f32 -1.442695, %v7253_v16  ;;  %439 = vst.msk [vmem:[#allocation2 + $0x91] sm:$0xff] %vm54_vm1, %v422_v26  ;;  %v715_v30 = vadd.f32 1.0, %v5735_v43  ;;  %v1411_v44 = vsel %vm54_vm1, %v1375_v48, 0.0  ;;  %v1562_v24 = vmul.f32 %v7024_v38, %v6532_v3  ;;  %v1792_v2 = vld [vmem:[#allocation2 + $0x199] sm:$0xff] }
 0x163   :  { %v5739_v59 = vpop.eup %5738  ;;  %v7261_v19 = vmul.f32 %v5737_v41, %v7050_v9  ;;  %5744 = vpow2.f32 %v4951_v6  ;;  %777 = vst.msk [vmem:[#allocation2 + $0x151] sm:$0xff] %vm54_vm1, %v760_v45  ;;  %v9807_v39 = vmov 0.0   ;;  %v7278_v31 = vadd.f32 %v1411_v44, %v1410_v55  ;;  %v9808_v48 = vld [vmem:[#allocation30_spill] sm:$0xff]  ;;  %v45_v41 = vld [vmem:[%s9555_s5] sm:$0xff] }
 0x164   :  { %v7274_v9 = vmul.f32 %v5739_v59, %v7065_v21  ;;  %5746 = vpow2.f32 %v4952_v37  ;;  %5377 = vmatprep.mubr.msk.f32.mxu0 %vm6164_vm4, %v9807_v39  ;;  %v1577_v43 = vadd.f32 %v1561_v4, %v1529_v8  ;;  %v1019_v38 = vmul.f32 %v6574_v56, %v7137_v15  ;;  %5371 = vmatprep.subr.mxu0 %v9807_v39  ;;  %v46_v37 = vld [vmem:[%s9555_s5 + $0x8] sm:$0xff]  ;;  %v1840_v4 = vld [vmem:[#allocation2 + $0x19a] sm:$0xff] }
 0x165   :  { %9805 = vst [vmem:[#allocation23_spill] sm:$0xff] %v7261_v19  ;;  %2007 = vst.msk [vmem:[#allocation3 + $0xa0] sm:$0xff] %vm54_vm1, %v7261_v19  ;;  %v7285_v21 = vmul.f32 -1.442695, %v7139_v54  ;;  %v7293_v55 = vmul.f32 %v6634_v57, %v9808_v48  ;;  %5382 = vmatprep.mubr.msk.f32.mxu1 %vm6164_vm4, %v9807_v39  ;;  %v932_v18 = vadd.f32 %v916_v27, %v880_v35  ;;  %5748 = vrcp.f32 %v377_v10  ;;  %v1841_v6 = vld [vmem:[#allocation2 + $0x1a2] sm:$0xff] }
 0x166   :  { %9806 = vst [vmem:[#allocation25_spill] sm:$0xff] %v7274_v9  ;;  %2008 = vst.msk [vmem:[#allocation3 + $0xa8] sm:$0xff] %vm54_vm1, %v7274_v9  ;;  %v7299_v26 = vadd.f32 %v1562_v24, %v1530_v53  ;;  %5372 = vmatpush3.msra.mxu0 %v47_v40  ;;  %v7302_v8 = vmul.f32 %v1744_v13, %v6604_v20  ;;  %v1035_v61 = vadd.f32 %v1019_v38, %v983_v60  ;;  %v9812_v53 = vld [vmem:[#allocation28_spill] sm:$0xff]  ;;  %v9816_v44 = vld [vmem:[#allocation29_spill] sm:$0xff] }
 0x167   :  { %9809 = vst [vmem:[#allocation48_spill] sm:$0xff] %v7293_v55  ;;  %v1609_v45 = vmul.f32 %v7179_v62, %v6554_v22  ;;  %5750 = vrcp.f32 %v715_v30  ;;  %5373 = vmatprep.subr.mxu0 %v9807_v39  ;;  %v7311_v27 = vmul.f32 %v1745_v46, %v6604_v20  ;;  %v7315_v10 = vmul.f32 %v1792_v2, %v6617_v25 }
 0x168   :  { %9810 = vst [vmem:[#allocation49_spill] sm:$0xff] %v7302_v8  ;;  %v5741_v35 = vpop.eup %5740  ;;  %5752 = vpow2.f32 %v9812_v53  ;;  %5374 = vmatpush3.msra.mxu0 %v46_v37  ;;  %v7318_v60 = vmul.f32 %v1793_v47, %v6617_v25  ;;  %v7321_v30 = vmul.f32 %v1840_v4, %v6634_v57  ;;  %v1071_v32 = vmul.f32 %v6581_v7, %v7159_v0 }
 0x169   :  { %9811 = vst [vmem:[#allocation19_spill] sm:$0xff] %v7311_v27  ;;  %9813 = vst [vmem:[#allocation20_spill] sm:$0xff] %v7315_v10  ;;  %v5743_v59 = vpop.eup %5742  ;;  %v1328_v40 = vadd.f32 1.0, %v5741_v35  ;;  %5754 = vpow2.f32 %v9816_v44  ;;  %5375 = vmatprep.subr.mxu0 %v9807_v39  ;;  %v7328_v13 = vmul.f32 %v1841_v6, %v6634_v57  ;;  %v866_v24 = vmul.f32 %v6520_v51, %v7151_v42  ;;  %v7336_v38 = vld [vmem:[#allocation2 + $0x90] sm:$0xff] }
 0x16a   :  { %9814 = vst [vmem:[#allocation30_spill] sm:$0xff] %v7318_v60  ;;  %9815 = vst [vmem:[#allocation28_spill] sm:$0xff] %v7321_v30  ;;  %v7334_v46 = vmul.f32 %v6532_v3, %v7163_v58  ;;  %v1329_v2 = vadd.f32 1.0, %v5743_v59  ;;  %5756 = vpow2.f32 %v7189_v17  ;;  %5376 = vmatpush3.msra.mxu0 %v45_v41  ;;  %v1020_v37 = vmul.f32 %v6574_v56, %v7151_v42  ;;  %v7348_v17 = vld [vmem:[#allocation2 + $0x91] sm:$0xff] }
 0x16b   :  { %9817 = vst [vmem:[#allocation29_spill] sm:$0xff] %v7328_v13  ;;  %v1087_v48 = vadd.f32 %v1071_v32, %v1035_v61  ;;  %5758 = vrcp.f32 %v1328_v40  ;;  %v1625_v47 = vadd.f32 %v1609_v45, %v1577_v43  ;;  %5385 = vmatprep.subr.mxu0 %v9807_v39  ;;  %v813_v4 = vmul.f32 %v6523_v52, %v7126_v23  ;;  %v7370_v53 = vld [vmem:[#allocation2 + $0x92] sm:$0xff] }
 0x16c   :  { %v865_v6 = vmul.f32 %v6520_v51, %v7137_v15  ;;  %v968_v35 = vmul.f32 %v6554_v22, %v7133_v36  ;;  %5760 = vrcp.f32 %v1329_v2  ;;  %v7352_v42 = vmul.f32 %v6581_v7, %v7163_v58 }
 0x16d   :  { %v1516_v43 = vmul.f32 %v7193_v5, %v6520_v51  ;;  %v1657_v61 = vmul.f32 %v7186_v12, %v6574_v56  ;;  %v1124_v23 = vmul.f32 %v6604_v20, %v7336_v38  ;;  %v7362_v15 = vmul.f32 %v7214_v33, %v6532_v3 }
 0x16e   :  { %v1467_v45 = vmul.f32 %v7179_v62, %v6523_v52  ;;  %v1515_v58 = vmul.f32 %v7186_v12, %v6520_v51  ;;  %v1610_v41 = vmul.f32 %v7181_v50, %v6554_v22  ;;  %v1658_v59 = vmul.f32 %v7193_v5, %v6574_v56 }
 0x16f   :  { %v1673_v32 = vadd.f32 %v1657_v61, %v1625_v47  ;;  %v1140_v40 = vadd.f32 %v1124_v23, %v1087_v48  ;;  %v1176_v44 = vmul.f32 %v6617_v25, %v7348_v17  ;;  %v814_v62 = vmul.f32 %v6523_v52, %v7133_v36  ;;  %v848_v23 = vld [vmem:[#allocation2 + $0x99] sm:$0xff] }
 0x170   :  { %v5745_v2 = vpop.eup %5744  ;;  %v881_v39 = vadd.f32 %v865_v6, %v813_v4  ;;  %v984_v9 = vadd.f32 %v968_v35, %v932_v18  ;;  %v1468_v12 = vmul.f32 %v7181_v50, %v6523_v52  ;;  %v1705_v13 = vmul.f32 %v7208_v34, %v6581_v7  ;;  %v7387_v18 = vld [vmem:[#allocation2 + $0x150] sm:$0xff] }
 0x171   :  { %v5747_v19 = vpop.eup %5746  ;;  %v1944_v60 = vadd.f32 1.0, %v5745_v2  ;;  %v1192_v5 = vadd.f32 %v1176_v44, %v1140_v40  ;;  %v1228_v48 = vmul.f32 %v6634_v57, %v7370_v53  ;;  %v917_v47 = vmul.f32 %v6532_v3, %v7159_v0  ;;  %v900_v40 = vld [vmem:[#allocation2 + $0x9a] sm:$0xff] }
 0x172   :  { %v1531_v61 = vadd.f32 %v1515_v58, %v1467_v45  ;;  %v1626_v36 = vadd.f32 %v1610_v41, %v7299_v26  ;;  %v1945_v4 = vadd.f32 1.0, %v5747_v19  ;;  %v5749_v6 = vpop.eup %5748  ;;  %v1706_v50 = vmul.f32 %v7214_v33, %v6581_v7  ;;  %v7397_v26 = vld [vmem:[#allocation2 + $0x151] sm:$0xff]  ;;  %v7404_v33 = vld [vmem:[%s9554_s4] ss:$0 sm:$0xff] }
 0x173   :  { %v1721_v35 = vadd.f32 %v1705_v13, %v1673_v32  ;;  %5762 = vrcp.f32 %v1944_v60  ;;  %v1244_v44 = vadd.f32 %v1228_v48, %v1192_v5  ;;  %v7391_v30 = vadd.f32 %v866_v24, %v814_v62  ;;  %v9819_v5 = vld [vmem:[#allocation21_spill] sm:$0xff] }
 0x174   :  { %v5751_v2 = vpop.eup %5750  ;;  %v7393_v27 = vadd.f32 %v917_v47, %v881_v39  ;;  %v1036_v0 = vadd.f32 %v1020_v37, %v984_v9  ;;  %v1563_v19 = vmul.f32 %v7208_v34, %v6532_v3  ;;  %v7399_v58 = vadd.f32 %v1516_v43, %v1468_v12  ;;  %v7419_v43 = vld [vmem:[#allocation2 + $0x152] sm:$0xff] }
 0x175   :  { %v5753_v45 = vpop.eup %5752  ;;  %5764 = vrcp.f32 %v1945_v4  ;;  %v7407_v60 = vadd.f32 %v7404_v33, %v1244_v44  ;;  %v1754_v9 = vmul.f32 %v7387_v18, %v6604_v20  ;;  %v1674_v34 = vadd.f32 %v1658_v59, %v1626_v36  ;;  %v796_v36 = vld [vmem:[#allocation2 + $0x98] sm:$0xff]  ;;  %v9820_v4 = vld [vmem:[#allocation22_spill] sm:$0xff] }
 0x176   :  { %v5755_v39 = vpop.eup %5754  ;;  %v7411_v13 = vadd.f32 %v1563_v19, %v1531_v61  ;;  %v7414_v24 = vmul.f32 %v6520_v51, %v848_v23  ;;  %v7417_v37 = vmul.f32 %v6532_v3, %v900_v40  ;;  %v1802_v12 = vmul.f32 %v7397_v26, %v6617_v25 }
 0x177   :  { %9818 = vst [vmem:[#allocation50_spill] sm:$0xff] %v7407_v60  ;;  %v5757_v41 = vpop.eup %5756  ;;  %v4937_v32 = vmul.f32 -1.442695, %v7407_v60  ;;  %v1770_v62 = vadd.f32 %v1754_v9, %v1721_v35  ;;  %v425_v48 = vmul.f32 %v5749_v6, %v9819_v5  ;;  %v7426_v59 = vmul.f32 %v6574_v56, %v848_v23  ;;  %v1502_v35 = vld [vmem:[#allocation2 + $0x159] sm:$0xff] }
 0x178   :  { %v5759_v47 = vpop.eup %5758  ;;  %v7429_v61 = vmul.f32 %v6581_v7, %v900_v40  ;;  %v763_v44 = vmul.f32 %v5751_v2, %v9820_v4  ;;  %v376_v19 = vadd.f32 1.0, %v5753_v45  ;;  %v1088_v9 = vadd.f32 %v7352_v42, %v1036_v0  ;;  %v1454_v42 = vld [vmem:[#allocation2 + $0x158] sm:$0xff] }
 0x179   :  { %v5761_v10 = vpop.eup %5760  ;;  %v1376_v8 = vmul.f32 %v5759_v47, %v7196_v29  ;;  %v1818_v55 = vadd.f32 %v1802_v12, %v1770_v62  ;;  %v1850_v6 = vmul.f32 %v7419_v43, %v6634_v57  ;;  %442 = vst.msk [vmem:[#allocation2 + $0xb1] sm:$0xff] %vm54_vm1, %v425_v48  ;;  %v1177_v5 = vmul.f32 %v6617_v25, %v848_v23  ;;  %v1550_v29 = vld [vmem:[#allocation2 + $0x15a] sm:$0xff] }
 0x17a   :  { %v1229_v60 = vmul.f32 %v6634_v57, %v900_v40  ;;  %780 = vst.msk [vmem:[#allocation2 + $0x171] sm:$0xff] %vm54_vm1, %v763_v44  ;;  %5766 = vrcp.f32 %v376_v19  ;;  %v714_v2 = vadd.f32 1.0, %v5755_v39  ;;  %v1125_v45 = vmul.f32 %v6604_v20, %v796_v36 }
 0x17b   :  { %1392 = vst.msk [vmem:[#allocation3 + $0x30] sm:$0xff] %vm54_vm1, %v1376_v8  ;;  %5768 = vpow2.f32 %v4937_v32  ;;  %v1866_v0 = vadd.f32 %v1850_v6, %v1818_v55  ;;  %v379_v62 = vadd.f32 1.0, %v5757_v41  ;;  %v7443_v12 = vmul.f32 %v1502_v35, %v6520_v51 }
 0x17c   :  { %v1722_v48 = vadd.f32 %v1706_v50, %v1674_v34  ;;  %5770 = vrcp.f32 %v714_v2  ;;  %v1377_v23 = vmul.f32 %v5761_v10, %v7206_v14  ;;  %v1141_v40 = vadd.f32 %v1125_v45, %v1088_v9 }
 0x17d   :  { %v7447_v47 = vadd.f32 %v7404_v33, %v1866_v0  ;;  %5772 = vrcp.f32 %v379_v62  ;;  %v1413_v39 = vsel %vm54_vm1, %v1376_v8, 0.0  ;;  %v7451_v4 = vmul.f32 %v1550_v29, %v6532_v3 }
 0x17e   :  { %v1755_v55 = vmul.f32 %v1454_v42, %v6604_v20  ;;  %5774 = vpow2.f32 %v7201_v63  ;;  %v1414_v41 = vadd.f32 %v1413_v39, %v7278_v31  ;;  %1393 = vst.msk [vmem:[#allocation3 + $0x38] sm:$0xff] %vm54_vm1, %v1377_v23  ;;  %v1803_v14 = vmul.f32 %v1502_v35, %v6617_v25 }
 0x17f   :  { %v4953_v10 = vmul.f32 -1.442695, %v7447_v47  ;;  %5776 = vpow2.f32 %v7248_v1  ;;  %v1415_v50 = vsel %vm54_vm1, %v1377_v23, 0.0  ;;  %v969_v34 = vmul.f32 %v6554_v22, %v7336_v38 }
 0x180   :  { %v5763_v8 = vpop.eup %5762  ;;  %v1771_v32 = vadd.f32 %v1755_v55, %v1722_v48  ;;  %5778 = vpow2.f32 %v7285_v21  ;;  %v7464_v63 = vadd.f32 %v1415_v50, %v1414_v41  ;;  %v1193_v44 = vadd.f32 %v1177_v5, %v1141_v40 }
 0x181   :  { %v7467_v31 = vmul.f32 %v5763_v8, %v7245_v11  ;;  %v1611_v19 = vmul.f32 %v7387_v18, %v6554_v22  ;;  %5780 = vpow2.f32 %v4953_v10  ;;  %v815_v9 = vmul.f32 %v6523_v52, %v7336_v38  ;;  %v9821_v10 = vld [vmem:[#allocation24_spill] sm:$0xff] }
 0x182   :  { %v5765_v1 = vpop.eup %5764  ;;  %v867_v6 = vmul.f32 %v6520_v51, %v7348_v17  ;;  %v934_v21 = vadd.f32 %v7334_v46, %v7391_v30  ;;  %v970_v2 = vmul.f32 %v6554_v22, %v796_v36  ;;  %v1660_v11 = vmul.f32 %v1502_v35, %v6574_v56 }
 0x183   :  { %2009 = vst.msk [vmem:[#allocation3 + $0xb0] sm:$0xff] %vm54_vm1, %v7467_v31  ;;  %v7482_v5 = vmul.f32 %v1550_v29, %v6581_v7  ;;  %v1580_v45 = vadd.f32 %v7362_v15, %v7399_v58  ;;  %v1612_v38 = vmul.f32 %v1454_v42, %v6554_v22  ;;  %v985_v0 = vadd.f32 %v969_v34, %v7393_v27 }
 0x184   :  { %v1469_v30 = vmul.f32 %v7387_v18, %v6523_v52  ;;  %v1517_v46 = vmul.f32 %v7397_v26, %v6520_v51  ;;  %v1819_v62 = vadd.f32 %v1803_v14, %v1771_v32  ;;  %v816_v48 = vmul.f32 %v6523_v52, %v796_v36 }
 0x185   :  { %v1245_v35 = vadd.f32 %v1229_v60, %v1193_v44  ;;  %v1627_v23 = vadd.f32 %v1611_v19, %v7411_v13  ;;  %v7495_v40 = vmul.f32 %v5765_v1, %v7253_v16  ;;  %v1851_v15 = vmul.f32 %v1550_v29, %v6634_v57 }
 0x186   :  { %v883_v58 = vadd.f32 %v867_v6, %v815_v9  ;;  %v986_v39 = vadd.f32 %v970_v2, %v934_v21  ;;  %v1021_v27 = vmul.f32 %v6574_v56, %v7348_v17  ;;  %v919_v55 = vmul.f32 %v6532_v3, %v7370_v53  ;;  %v9822_v9 = vld [vmem:[#allocation26_spill] sm:$0xff] }
 0x187   :  { %v5767_v18 = vpop.eup %5766  ;;  %v1470_v41 = vmul.f32 %v1454_v42, %v6523_v52  ;;  %v1628_v36 = vadd.f32 %v1612_v38, %v1580_v45  ;;  %v1659_v60 = vmul.f32 %v7397_v26, %v6574_v56  ;;  %2010 = vst.msk [vmem:[#allocation3 + $0xb8] sm:$0xff] %vm54_vm1, %v7495_v40  ;;  %v1533_v29 = vadd.f32 %v1517_v46, %v1469_v30 }
 0x188   :  { %v5769_v16 = vpop.eup %5768  ;;  %v1037_v13 = vadd.f32 %v1021_v27, %v985_v0  ;;  %v1867_v14 = vadd.f32 %v1851_v15, %v1819_v62  ;;  %v424_v50 = vmul.f32 %v5767_v18, %v9821_v10  ;;  %v884_v8 = vadd.f32 %v7414_v24, %v816_v48 }
 0x189   :  { %v5771_v17 = vpop.eup %5770  ;;  %v1073_v34 = vmul.f32 %v6581_v7, %v7370_v53  ;;  %v1675_v42 = vadd.f32 %v1659_v60, %v1627_v23  ;;  %v7512_v32 = vadd.f32 %v7404_v33, %v1245_v35  ;;  %v935_v44 = vadd.f32 %v919_v55, %v883_v58  ;;  %v1552_v60 = vld [vmem:[#allocation2 + $0x172] sm:$0xff] }
 0x18a   :  { %v5773_v26 = vpop.eup %5772  ;;  %v1038_v19 = vadd.f32 %v7426_v59, %v986_v39  ;;  %v1565_v1 = vmul.f32 %v7419_v43, %v6532_v3  ;;  %441 = vst.msk [vmem:[#allocation2 + $0xa9] sm:$0xff] %vm54_vm1, %v424_v50  ;;  %v762_v6 = vmul.f32 %v5771_v17, %v9822_v9  ;;  %v1534_v24 = vadd.f32 %v7443_v12, %v1470_v41  ;;  %v850_v12 = vld [vmem:[#allocation2 + $0xb1] sm:$0xff] }
 0x18b   :  { %v5775_v21 = vpop.eup %5774  ;;  %v1676_v2 = vadd.f32 %v1660_v11, %v1628_v36  ;;  %v1707_v53 = vmul.f32 %v7419_v43, %v6581_v7  ;;  %v427_v45 = vmul.f32 %v5773_v26, %v7117_v28  ;;  %v1089_v0 = vadd.f32 %v1073_v34, %v1037_v13  ;;  %v902_v11 = vld [vmem:[#allocation2 + $0xb2] sm:$0xff] }
 0x18c   :  { %v5777_v38 = vpop.eup %5776  ;;  %v7523_v30 = vadd.f32 %v1565_v1, %v1533_v29  ;;  %779 = vst.msk [vmem:[#allocation2 + $0x169] sm:$0xff] %vm54_vm1, %v762_v6  ;;  %v717_v59 = vadd.f32 1.0, %v5775_v21  ;;  %v7527_v46 = vadd.f32 %v7404_v33, %v1867_v14  ;;  %v936_v35 = vadd.f32 %v7417_v37, %v884_v8  ;;  %v1504_v36 = vld [vmem:[#allocation2 + $0x171] sm:$0xff] }
 0x18d   :  { %v5779_v62 = vpop.eup %5778  ;;  %v7529_v48 = vadd.f32 %v1707_v53, %v1675_v42  ;;  %444 = vst.msk [vmem:[#allocation2 + $0xc9] sm:$0xff] %vm54_vm1, %v427_v45  ;;  %v378_v28 = vadd.f32 1.0, %v5777_v38  ;;  %v4938_v43 = vmul.f32 -1.442695, %v7512_v32  ;;  %v1330_v15 = vadd.f32 1.0, %v5769_v16 }
 0x18e   :  { %v5781_v23 = vpop.eup %5780  ;;  %v1090_v58 = vadd.f32 %v7429_v61, %v1038_v19  ;;  %5782 = vrcp.f32 %v717_v59  ;;  %v716_v39 = vadd.f32 1.0, %v5779_v62  ;;  %v7536_v18 = vadd.f32 %v7451_v4, %v1534_v24 }
 0x18f   :  { %v1946_v27 = vadd.f32 1.0, %v5781_v23  ;;  %v7539_v55 = vadd.f32 %v7482_v5, %v1676_v2  ;;  %5784 = vrcp.f32 %v378_v28  ;;  %v870_v37 = vmul.f32 %v6520_v51, %v850_v12 }
 0x190   :  { %v7543_v41 = vmul.f32 %v6532_v3, %v902_v11  ;;  %5786 = vrcp.f32 %v716_v39  ;;  %v4954_v61 = vmul.f32 -1.442695, %v7527_v46  ;;  %v1024_v16 = vmul.f32 %v6574_v56, %v850_v12 }
 0x191   :  { %v7548_v13 = vmul.f32 %v6581_v7, %v902_v11  ;;  %v1179_v4 = vmul.f32 %v6617_v25, %v850_v12  ;;  %v797_v5 = vld [vmem:[#allocation2 + $0xa8] sm:$0xff]  ;;  %v798_v29 = vld [vmem:[#allocation2 + $0xb0] sm:$0xff]  ;;  %5788 = vpow2.f32 %v4938_v43  ;;  %v7555_v8 = vmul.f32 %v6634_v57, %v902_v11 }
 0x192   :  { %v849_v14 = vld [vmem:[#allocation2 + $0xa9] sm:$0xff]  ;;  %5790 = vrcp.f32 %v1330_v15  ;;  %v817_v10 = vmul.f32 %v6523_v52, %v797_v5  ;;  %v971_v17 = vmul.f32 %v6554_v22, %v797_v5  ;;  %v1520_v34 = vmul.f32 %v1504_v36, %v6520_v51 }
 0x193   :  { %v869_v50 = vmul.f32 %v6520_v51, %v849_v14  ;;  %5792 = vrcp.f32 %v1946_v27  ;;  %v972_v42 = vmul.f32 %v6554_v22, %v798_v29  ;;  %v7560_v26 = vmul.f32 %v1552_v60, %v6532_v3  ;;  %v901_v19 = vld [vmem:[#allocation2 + $0xaa] sm:$0xff] }
 0x194   :  { %v987_v1 = vadd.f32 %v971_v17, %v935_v44  ;;  %v1126_v9 = vmul.f32 %v6604_v20, %v797_v5  ;;  %5794 = vpow2.f32 %v4954_v61  ;;  %v1662_v6 = vmul.f32 %v1504_v36, %v6574_v56  ;;  %v1455_v53 = vld [vmem:[#allocation2 + $0x168] sm:$0xff]  ;;  %v1456_v12 = vld [vmem:[#allocation2 + $0x170] sm:$0xff] }
 0x195   :  { %v7565_v21 = vmul.f32 %v1552_v60, %v6581_v7  ;;  %v818_v24 = vmul.f32 %v6523_v52, %v798_v29  ;;  %v1023_v2 = vmul.f32 %v6574_v56, %v849_v14  ;;  %v1503_v45 = vld [vmem:[#allocation2 + $0x169] sm:$0xff]  ;;  %v1805_v38 = vmul.f32 %v1504_v36, %v6617_v25 }
 0x196   :  { %v885_v59 = vadd.f32 %v869_v50, %v817_v10  ;;  %v1127_v62 = vmul.f32 %v6604_v20, %v798_v29  ;;  %v1142_v44 = vadd.f32 %v1126_v9, %v1089_v0  ;;  %v921_v11 = vmul.f32 %v6532_v3, %v901_v19  ;;  %v1551_v29 = vld [vmem:[#allocation2 + $0x16a] sm:$0xff] }
 0x197   :  { %v988_v28 = vadd.f32 %v972_v42, %v936_v35  ;;  %v1039_v43 = vadd.f32 %v1023_v2, %v987_v1  ;;  %v1178_v23 = vmul.f32 %v6617_v25, %v849_v14  ;;  %v1471_v39 = vmul.f32 %v1455_v53, %v6523_v52 }
 0x198   :  { %v1143_v15 = vadd.f32 %v1127_v62, %v1090_v58  ;;  %v1519_v27 = vmul.f32 %v1503_v45, %v6520_v51  ;;  %v1613_v61 = vmul.f32 %v1455_v53, %v6554_v22  ;;  %v1853_v36 = vmul.f32 %v1552_v60, %v6634_v57 }
 0x199   :  { %v7577_v5 = vadd.f32 %v870_v37, %v818_v24  ;;  %v1075_v0 = vmul.f32 %v6581_v7, %v901_v19  ;;  %v1614_v10 = vmul.f32 %v1456_v12, %v6554_v22  ;;  %v7581_v35 = vadd.f32 %v921_v11, %v885_v59 }
 0x19a   :  { %v1194_v50 = vadd.f32 %v1178_v23, %v1142_v44  ;;  %v1230_v58 = vmul.f32 %v6634_v57, %v901_v19  ;;  %v1472_v14 = vmul.f32 %v1456_v12, %v6523_v52  ;;  %v7585_v42 = vadd.f32 %v1024_v16, %v988_v28 }
 0x19b   :  { %v5783_v17 = vpop.eup %5782  ;;  %v7587_v1 = vadd.f32 %v1075_v0, %v1039_v43  ;;  %v1756_v37 = vmul.f32 %v1455_v53, %v6604_v20  ;;  %v1757_v60 = vmul.f32 %v1456_v12, %v6604_v20  ;;  %v1195_v24 = vadd.f32 %v1179_v4, %v1143_v15  ;;  %v1006_v15 = vld [vmem:[#allocation2 + $0xc9] sm:$0xff] }
 0x19c   :  { %v5785_v9 = vpop.eup %5784  ;;  %v1535_v2 = vadd.f32 %v1519_v27, %v1471_v39  ;;  %v1567_v59 = vmul.f32 %v1551_v29, %v6532_v3  ;;  %v1629_v62 = vadd.f32 %v1613_v61, %v7523_v30  ;;  %v1630_v19 = vadd.f32 %v1614_v10, %v7536_v18  ;;  %v1058_v10 = vld [vmem:[#allocation2 + $0xca] sm:$0xff] }
 0x19d   :  { %v5787_v44 = vpop.eup %5786  ;;  %v1772_v11 = vadd.f32 %v1756_v37, %v7529_v48  ;;  %v1773_v16 = vadd.f32 %v1757_v60, %v7539_v55  ;;  %v1804_v28 = vmul.f32 %v1503_v45, %v6617_v25  ;;  %v1246_v53 = vadd.f32 %v1230_v58, %v1194_v50  ;;  %v9823_v37 = vld [vmem:[#allocation42_spill] sm:$0xff] }
 0x19e   :  { %v5789_v43 = vpop.eup %5788  ;;  %v1536_v23 = vadd.f32 %v1520_v34, %v1472_v14  ;;  %v1661_v12 = vmul.f32 %v1503_v45, %v6574_v56  ;;  %v1709_v4 = vmul.f32 %v1551_v29, %v6581_v7  ;;  %v1852_v61 = vmul.f32 %v1551_v29, %v6634_v57 }
 0x19f   :  { %v5791_v39 = vpop.eup %5790  ;;  %v1820_v27 = vadd.f32 %v1804_v28, %v1772_v11  ;;  %v1821_v30 = vadd.f32 %v1805_v38, %v1773_v16  ;;  %v765_v18 = vmul.f32 %v5783_v17, %v7119_v49  ;;  %v7601_v0 = vadd.f32 %v1567_v59, %v1535_v2  ;;  %v9824_v17 = vld [vmem:[#allocation50_spill] sm:$0xff] }
 0x1a0   :  { %v5793_v48 = vpop.eup %5792  ;;  %v1677_v55 = vadd.f32 %v1661_v12, %v1629_v62  ;;  %v426_v50 = vmul.f32 %v5785_v9, %v9823_v37  ;;  %v764_v34 = vmul.f32 %v5787_v44, %v7139_v54  ;;  %v1678_v58 = vadd.f32 %v1662_v6, %v1630_v19 }
 0x1a1   :  { %v5795_v45 = vpop.eup %5794  ;;  %v1868_v14 = vadd.f32 %v1852_v61, %v1820_v27  ;;  %v7606_v60 = vmul.f32 %v6574_v56, %v1006_v15  ;;  %782 = vst.msk [vmem:[#allocation2 + $0x189] sm:$0xff] %vm54_vm1, %v765_v18  ;;  %v1247_v38 = vadd.f32 %v7555_v8, %v1195_v24  ;;  %v7613_v49 = vadd.f32 %v7404_v33, %v1246_v53 }
 0x1a2   :  { %443 = vst.msk [vmem:[#allocation2 + $0xc1] sm:$0xff] %vm54_vm1, %v426_v50  ;;  %781 = vst.msk [vmem:[#allocation2 + $0x181] sm:$0xff] %vm54_vm1, %v764_v34  ;;  %v1331_v29 = vadd.f32 1.0, %v5789_v43  ;;  %v1378_v54 = vmul.f32 %v5791_v39, %v9824_v17  ;;  %v1869_v9 = vadd.f32 %v1853_v36, %v1821_v30  ;;  %v7617_v6 = vmul.f32 %v6581_v7, %v1058_v10 }
 0x1a3   :  { %v7620_v2 = vadd.f32 %v7404_v33, %v1247_v38  ;;  %v7623_v59 = vadd.f32 %v7404_v33, %v1868_v14  ;;  %v7626_v8 = vmul.f32 %v5793_v48, %v7447_v47  ;;  %v4939_v24 = vmul.f32 -1.442695, %v7613_v49 }
 0x1a4   :  { %5796 = vrcp.f32 %v1331_v29  ;;  %v1417_v62 = vsel %vm54_vm1, %v1378_v54, 0.0  ;;  %v1947_v44 = vadd.f32 1.0, %v5795_v45  ;;  %1394 = vst.msk [vmem:[#allocation3 + $0x40] sm:$0xff] %vm54_vm1, %v1378_v54  ;;  %v7636_v11 = vadd.f32 %v7404_v33, %v1869_v9 }
 0x1a5   :  { %v4940_v36 = vmul.f32 -1.442695, %v7620_v2  ;;  %v7633_v19 = vadd.f32 %v1417_v62, %v7464_v63  ;;  %v4955_v16 = vmul.f32 -1.442695, %v7623_v59  ;;  %2011 = vst.msk [vmem:[#allocation3 + $0xc0] sm:$0xff] %vm54_vm1, %v7626_v8  ;;  %v7641_v47 = vadd.f32 %v1709_v4, %v1677_v55 }
 0x1a6   :  { %v7644_v28 = vmul.f32 %v6617_v25, %v1006_v15  ;;  %v7647_v43 = vmul.f32 %v6634_v57, %v1058_v10  ;;  %5798 = vpow2.f32 %v4939_v24  ;;  %v1506_v63 = vmul.f32 %v1006_v15, %v6520_v51 }
 0x1a7   :  { %v1554_v53 = vmul.f32 %v1058_v10, %v6532_v3  ;;  %v938_v12 = vadd.f32 %v7543_v41, %v7577_v5  ;;  %5800 = vpow2.f32 %v4940_v36  ;;  %v1092_v4 = vadd.f32 %v7548_v13, %v7585_v42 }
 0x1a8   :  { %v1648_v39 = vld [vmem:[#allocation2 + $0x189] sm:$0xff]  ;;  %v1584_v30 = vadd.f32 %v7560_v26, %v1536_v23  ;;  %v1726_v61 = vadd.f32 %v7565_v21, %v1678_v58  ;;  %5802 = vrcp.f32 %v1947_v44  ;;  %v7664_v5 = vmul.f32 -1.442695, %v7636_v11 }
 0x1a9   :  { %v1696_v27 = vld [vmem:[#allocation2 + $0x18a] sm:$0xff]  ;;  %v7658_v18 = vmul.f32 %v1648_v39, %v6574_v56  ;;  %v953_v48 = vld [vmem:[#allocation2 + $0xc0] sm:$0xff]  ;;  %5804 = vpow2.f32 %v4955_v16  ;;  %v7667_v13 = vmul.f32 %v1648_v39, %v6617_v25 }
 0x1aa   :  { %v7661_v15 = vmul.f32 %v1696_v27, %v6581_v7  ;;  %v954_v55 = vld [vmem:[#allocation2 + $0xc8] sm:$0xff]  ;;  %v973_v26 = vmul.f32 %v6554_v22, %v953_v48  ;;  %v1128_v23 = vmul.f32 %v6604_v20, %v953_v48  ;;  %v7673_v10 = vmul.f32 %v1696_v27, %v6634_v57  ;;  %v1599_v45 = vld [vmem:[#allocation2 + $0x180] sm:$0xff] }
 0x1ab   :  { %v1005_v41 = vld [vmem:[#allocation2 + $0xc1] sm:$0xff]  ;;  %v974_v21 = vmul.f32 %v6554_v22, %v954_v55  ;;  %v1129_v34 = vmul.f32 %v6604_v20, %v954_v55  ;;  %v1457_v17 = vmul.f32 %v953_v48, %v6523_v52  ;;  %v1458_v24 = vmul.f32 %v954_v55, %v6523_v52 }
 0x1ac   :  { %v1057_v42 = vld [vmem:[#allocation2 + $0xc2] sm:$0xff]  ;;  %v1025_v37 = vmul.f32 %v6574_v56, %v1005_v41  ;;  %v989_v14 = vadd.f32 %v973_v26, %v7581_v35  ;;  %v1144_v38 = vadd.f32 %v1128_v23, %v7587_v1  ;;  %v1180_v29 = vmul.f32 %v6617_v25, %v1005_v41 }
 0x1ad   :  { %v1077_v50 = vmul.f32 %v6581_v7, %v1057_v42  ;;  %v1600_v58 = vld [vmem:[#allocation2 + $0x188] sm:$0xff]  ;;  %v990_v54 = vadd.f32 %v974_v21, %v938_v12  ;;  %v1232_v9 = vmul.f32 %v6634_v57, %v1057_v42  ;;  %v1505_v62 = vmul.f32 %v1005_v41, %v6520_v51 }
 0x1ae   :  { %v1647_v44 = vld [vmem:[#allocation2 + $0x181] sm:$0xff]  ;;  %v1041_v16 = vadd.f32 %v1025_v37, %v989_v14  ;;  %v1145_v39 = vadd.f32 %v1129_v34, %v1092_v4  ;;  %v1615_v35 = vmul.f32 %v1599_v45, %v6554_v22  ;;  %v1616_v1 = vmul.f32 %v1600_v58, %v6554_v22 }
 0x1af   :  { %v7685_v36 = vld [vmem:[#allocation2 + $0x182] sm:$0xff]  ;;  %v1196_v27 = vadd.f32 %v1180_v29, %v1144_v38  ;;  %v1521_v26 = vadd.f32 %v1505_v62, %v1457_v17  ;;  %v1522_v23 = vadd.f32 %v1506_v63, %v1458_v24  ;;  %v1553_v12 = vmul.f32 %v1057_v42, %v6532_v3 }
 0x1b0   :  { %v1093_v48 = vadd.f32 %v1077_v50, %v1041_v16  ;;  %v1631_v21 = vadd.f32 %v1615_v35, %v7601_v0  ;;  %v1663_v55 = vmul.f32 %v1647_v44, %v6574_v56  ;;  %v1711_v41 = vmul.f32 %v7685_v36, %v6581_v7  ;;  %v9825_v0 = vld [vmem:[#allocation40_spill] sm:$0xff]  ;;  %v9826_v17 = vld [vmem:[#allocation45_spill] sm:$0xff]  ;;  %v9827_v16 = vld [vmem:[#allocation35_spill] sm:$0xff] }
 0x1b1   :  { %v5797_v51 = vpop.eup %5796  ;;  %v1569_v37 = vadd.f32 %v1553_v12, %v1521_v26  ;;  %v1570_v4 = vadd.f32 %v1554_v53, %v1522_v23  ;;  %v1632_v34 = vadd.f32 %v1616_v1, %v1584_v30  ;;  %v1758_v14 = vmul.f32 %v1599_v45, %v6604_v20  ;;  %v9830_v12 = vld [vmem:[#allocation37_spill] sm:$0xff] }
 0x1b2   :  { %v1679_v22 = vadd.f32 %v1663_v55, %v1631_v21  ;;  %v1759_v38 = vmul.f32 %v1600_v58, %v6604_v20  ;;  %v1806_v63 = vmul.f32 %v1647_v44, %v6617_v25  ;;  %v1042_v42 = vadd.f32 %v7606_v60, %v990_v54  ;;  %v9828_v44 = vld [vmem:[#allocation46_spill] sm:$0xff]  ;;  %v9829_v60 = vld [vmem:[#allocation33_spill] sm:$0xff] }
 0x1b3   :  { %v5799_v50 = vpop.eup %5798  ;;  %v1617_v29 = vadd.f32 %v9825_v0, %v1569_v37  ;;  %v1618_v24 = vadd.f32 %v9826_v17, %v1570_v4  ;;  %v1774_v62 = vadd.f32 %v1758_v14, %v7641_v47  ;;  %v1146_v35 = vadd.f32 %v9827_v16, %v1093_v48  ;;  %v9831_v4 = vld [vmem:[#allocation36_spill] sm:$0xff]  ;;  %v9837_v17 = vld [vmem:[#allocation41_spill] sm:$0xff] }
 0x1b4   :  { %v5801_v53 = vpop.eup %5800  ;;  %v1727_v30 = vadd.f32 %v1711_v41, %v1679_v22  ;;  %v1775_v1 = vadd.f32 %v1759_v38, %v1726_v61  ;;  %v1094_v45 = vadd.f32 %v7617_v6, %v1042_v42  ;;  %v1197_v58 = vadd.f32 %v7644_v28, %v1145_v39  ;;  %v9832_v61 = vld [vmem:[#allocation47_spill] sm:$0xff]  ;;  %v9833_v6 = vld [vmem:[#allocation34_spill] sm:$0xff]  ;;  %v9834_v28 = vld [vmem:[#allocation48_spill] sm:$0xff] }
 0x1b5   :  { %v5803_v26 = vpop.eup %5802  ;;  %v1665_v23 = vadd.f32 %v9828_v44, %v1617_v29  ;;  %v1666_v54 = vadd.f32 %v9829_v60, %v1618_v24  ;;  %v1198_v21 = vadd.f32 %v9830_v12, %v1146_v35  ;;  %v1248_v55 = vadd.f32 %v1232_v9, %v1196_v27  ;;  %v9835_v0 = vld [vmem:[#allocation44_spill] sm:$0xff] }
 0x1b6   :  { %v5805_v37 = vpop.eup %5804  ;;  %v1147_v47 = vadd.f32 %v9831_v4, %v1094_v45  ;;  %v1249_v48 = vadd.f32 %v7647_v43, %v1197_v58  ;;  %v1332_v14 = vadd.f32 1.0, %v5799_v50  ;;  %v1333_v22 = vadd.f32 1.0, %v5801_v53  ;;  %v9836_v43 = vld [vmem:[#allocation38_spill] sm:$0xff]  ;;  %v9838_v45 = vld [vmem:[#allocation27_spill] sm:$0xff]  ;;  %v9842_v4 = vld [vmem:[#allocation17_spill] sm:$0xff] }
 0x1b7   :  { %v1713_v41 = vadd.f32 %v9832_v61, %v1665_v23  ;;  %v1714_v38 = vadd.f32 %v9833_v6, %v1666_v54  ;;  %v1250_v39 = vadd.f32 %v9834_v28, %v1198_v21  ;;  %v7713_v42 = vadd.f32 %v7404_v33, %v1248_v55  ;;  %v9840_v23 = vld [vmem:[#allocation15_spill] sm:$0xff]  ;;  %v9841_v21 = vld [vmem:[#allocation32_spill] sm:$0xff] }
 0x1b8   :  { %v1199_v29 = vadd.f32 %v9835_v0, %v1147_v47  ;;  %v7717_v9 = vadd.f32 %v7404_v33, %v1249_v48  ;;  %5806 = vrcp.f32 %v1332_v14  ;;  %v7720_v27 = vmul.f32 %v5797_v51, %v7512_v32  ;;  %v9839_v51 = vld [vmem:[#allocation31_spill] sm:$0xff]  ;;  %v9843_v48 = vld [vmem:[#allocation49_spill] sm:$0xff]  ;;  %v9846_v0 = vld [vmem:[#allocation28_spill] sm:$0xff] }
 0x1b9   :  { %v1762_v50 = vadd.f32 %v9836_v43, %v1713_v41  ;;  %v1763_v24 = vadd.f32 %v9837_v17, %v1714_v38  ;;  %v7725_v16 = vadd.f32 %v7404_v33, %v1250_v39  ;;  %v4941_v35 = vmul.f32 -1.442695, %v7713_v42  ;;  %v9845_v28 = vld [vmem:[#allocation19_spill] sm:$0xff]  ;;  %v9847_v43 = vld [vmem:[#allocation30_spill] sm:$0xff] }
 0x1ba   :  { %v1822_v53 = vadd.f32 %v1806_v63, %v1774_v62  ;;  %v1251_v58 = vadd.f32 %v9838_v45, %v1199_v29  ;;  %v4942_v44 = vmul.f32 -1.442695, %v7717_v9  ;;  %5808 = vrcp.f32 %v1333_v22  ;;  %1395 = vst.msk [vmem:[#allocation3 + $0x48] sm:$0xff] %vm54_vm1, %v7720_v27 }
 0x1bb   :  { %v1810_v32 = vadd.f32 %v9839_v51, %v1762_v50  ;;  %v1811_v60 = vadd.f32 %v9840_v23, %v1763_v24  ;;  %5810 = vpow2.f32 %v4941_v35  ;;  %v4943_v54 = vmul.f32 -1.442695, %v7725_v16  ;;  %v9848_v35 = vld [vmem:[#allocation29_spill] sm:$0xff] }
 0x1bc   :  { %v1854_v12 = vmul.f32 %v7685_v36, %v6634_v57  ;;  %v7738_v63 = vadd.f32 %v7404_v33, %v1251_v58  ;;  %5812 = vpow2.f32 %v4942_v44  ;;  %v1680_v62 = vadd.f32 %v7658_v18, %v1632_v34  ;;  %v9844_v18 = vld [vmem:[#allocation20_spill] sm:$0xff] }
 0x1bd   :  { %v1858_v55 = vadd.f32 %v9841_v21, %v1810_v32  ;;  %v1859_v47 = vadd.f32 %v9842_v4, %v1811_v60  ;;  %5814 = vpow2.f32 %v4943_v54  ;;  %v1776_v14 = vadd.f32 %v9843_v48, %v1727_v30 }
 0x1be   :  { %v4944_v22 = vmul.f32 -1.442695, %v7738_v63  ;;  %v1728_v61 = vadd.f32 %v7661_v15, %v1680_v62  ;;  %v1823_v41 = vadd.f32 %v7667_v13, %v1775_v1  ;;  %v1870_v36 = vadd.f32 %v1854_v12, %v1822_v53 }
 0x1bf   :  { %v7748_v6 = vadd.f32 %v7404_v33, %v1858_v55  ;;  %v7751_v38 = vadd.f32 %v7404_v33, %v1859_v47  ;;  %v1824_v34 = vadd.f32 %v9844_v18, %v1776_v14  ;;  %5816 = vpow2.f32 %v7664_v5 }
 0x1c0   :  { %5818 = vpow2.f32 %v4944_v22  ;;  %v1777_v30 = vadd.f32 %v9845_v28, %v1728_v61  ;;  %v1871_v39 = vadd.f32 %v7673_v10, %v1823_v41  ;;  %v7758_v15 = vadd.f32 %v7404_v33, %v1870_v36 }
 0x1c1   :  { %v4945_v13 = vmul.f32 -1.442695, %v7748_v6  ;;  %v4946_v1 = vmul.f32 -1.442695, %v7751_v38  ;;  %v1872_v29 = vadd.f32 %v9846_v0, %v1824_v34  ;;  %v7769_v24 = vmul.f32 %v5803_v26, %v7527_v46 }
 0x1c2   :  { %v1825_v50 = vadd.f32 %v9847_v43, %v1777_v30  ;;  %v7765_v17 = vadd.f32 %v7404_v33, %v1871_v39  ;;  %v4957_v5 = vmul.f32 -1.442695, %v7758_v15  ;;  %v1948_v58 = vadd.f32 1.0, %v5805_v37 }
 0x1c3   :  { %5820 = vpow2.f32 %v4945_v13  ;;  %v7772_v10 = vadd.f32 %v7404_v33, %v1872_v29  ;;  %2012 = vst.msk [vmem:[#allocation3 + $0xc8] sm:$0xff] %vm54_vm1, %v7769_v24 }
 0x1c4   :  { %5822 = vpow2.f32 %v4946_v1  ;;  %v1873_v53 = vadd.f32 %v9848_v35, %v1825_v50  ;;  %v4958_v45 = vmul.f32 -1.442695, %v7765_v17 }
 0x1c5   :  { %v5807_v44 = vpop.eup %5806  ;;  %5824 = vpow2.f32 %v4957_v5  ;;  %v4959_v51 = vmul.f32 -1.442695, %v7772_v10 }
 0x1c6   :  { %v1380_v46 = vmul.f32 %v5807_v44, %v7613_v49  ;;  %v7781_v26 = vadd.f32 %v7404_v33, %v1873_v53  ;;  %5826 = vpow2.f32 %v4958_v45  ;;  %v1419_v53 = vsel %vm54_vm1, %v7720_v27, 0.0 }
 0x1c7   :  { %v5809_v32 = vpop.eup %5808  ;;  %5828 = vpow2.f32 %v4959_v51 }
 0x1c8   :  { %v5811_v23 = vpop.eup %5810  ;;  %v7784_v60 = vmul.f32 %v5809_v32, %v7620_v2  ;;  %v4960_v37 = vmul.f32 -1.442695, %v7781_v26  ;;  %5830 = vrcp.f32 %v1948_v58  ;;  %1396 = vst.msk [vmem:[#allocation3 + $0x50] sm:$0xff] %vm54_vm1, %v1380_v46  ;;  %v1420_v58 = vadd.f32 %v1419_v53, %v7633_v19 }
 0x1c9   :  { %v5813_v54 = vpop.eup %5812  ;;  %v1334_v12 = vadd.f32 1.0, %v5811_v23  ;;  %v1421_v44 = vsel %vm54_vm1, %v1380_v46, 0.0 }
 0x1ca   :  { %v5815_v62 = vpop.eup %5814  ;;  %v1335_v21 = vadd.f32 1.0, %v5813_v54  ;;  %5832 = vpow2.f32 %v4960_v37  ;;  %1397 = vst.msk [vmem:[#allocation3 + $0x58] sm:$0xff] %vm54_vm1, %v7784_v60  ;;  %v1422_v27 = vadd.f32 %v1421_v44, %v1420_v58  ;;  %v1423_v46 = vsel %vm54_vm1, %v7784_v60, 0.0 }
 0x1cb   :  { %v1336_v33 = vadd.f32 1.0, %v5815_v62  ;;  %5834 = vrcp.f32 %v1334_v12 }
 0x1cc   :  { %v5817_v49 = vpop.eup %5816  ;;  %5836 = vrcp.f32 %v1335_v21 }
 0x1cd   :  { %v5819_v55 = vpop.eup %5818  ;;  %5838 = vrcp.f32 %v1336_v33  ;;  %v1949_v2 = vadd.f32 1.0, %v5817_v49  ;;  %v9849_v33 = vld [vmem:[#allocation39_spill] sm:$0xff] }
 0x1ce   :  { %v1337_v4 = vadd.f32 1.0, %v5819_v55  ;;  %v9850_v55 = vld [vmem:[#allocation43_spill] sm:$0xff] }
 0x1cf   :  { %5840 = vrcp.f32 %v1949_v2  ;;  %v2024_v2 = vsel %vm54_vm1, %v9850_v55, 0.0  ;;  %v2237_v55 = vld [vmem:[#allocation3 + $0x50] sm:$0xff] }
 0x1d0   :  { %v5821_v47 = vpop.eup %5820  ;;  %5842 = vrcp.f32 %v1337_v4 }
 0x1d1   :  { %v5823_v48 = vpop.eup %5822  ;;  %v1938_v14 = vadd.f32 1.0, %v5821_v47 }
 0x1d2   :  { %v5825_v22 = vpop.eup %5824  ;;  %v1939_v61 = vadd.f32 1.0, %v5823_v48  ;;  %v9851_v48 = vld [vmem:[#allocation23_spill] sm:$0xff] }
 0x1d3   :  { %v5827_v41 = vpop.eup %5826  ;;  %5844 = vrcp.f32 %v1938_v14  ;;  %v1950_v36 = vadd.f32 1.0, %v5825_v22  ;;  %v2026_v14 = vsel %vm54_vm1, %v9851_v48, 0.0  ;;  %v2232_v48 = vld [vmem:[#allocation3 + $0x28] sm:$0xff] }
 0x1d4   :  { %v5829_v18 = vpop.eup %5828  ;;  %5846 = vrcp.f32 %v1939_v61  ;;  %v1951_v34 = vadd.f32 1.0, %v5827_v41  ;;  %v9852_v41 = vld [vmem:[#allocation25_spill] sm:$0xff] }
 0x1d5   :  { %v5831_v28 = vpop.eup %5830  ;;  %v1952_v30 = vadd.f32 1.0, %v5829_v18  ;;  %5848 = vrcp.f32 %v1950_v36  ;;  %v2028_v36 = vsel %vm54_vm1, %v9852_v41, 0.0  ;;  %v2228_v41 = vld [vmem:[#allocation3 + $0x8] sm:$0xff] }
 0x1d6   :  { %5850 = vrcp.f32 %v1951_v34  ;;  %v7791_v39 = vmul.f32 %v5831_v28, %v7623_v59 }
 0x1d7   :  { %v5833_v13 = vpop.eup %5832  ;;  %5852 = vrcp.f32 %v1952_v30 }
 0x1d8   :  { %v5835_v1 = vpop.eup %5834  ;;  %v1953_v0 = vadd.f32 1.0, %v5833_v13  ;;  %2013 = vst.msk [vmem:[#allocation3 + $0xd0] sm:$0xff] %vm54_vm1, %v7791_v39  ;;  %v2032_v13 = vsel %vm54_vm1, %v7495_v40, 0.0 }
 0x1d9   :  { %v5837_v29 = vpop.eup %5836  ;;  %v1382_v43 = vmul.f32 %v5835_v1, %v7713_v42 }
 0x1da   :  { %v5839_v50 = vpop.eup %5838  ;;  %v1383_v5 = vmul.f32 %v5837_v29, %v7717_v9  ;;  %5854 = vrcp.f32 %v1953_v0  ;;  %v2034_v29 = vsel %vm54_vm1, %v7626_v8, 0.0 }
 0x1db   :  { %v1384_v35 = vmul.f32 %v5839_v50, %v7725_v16  ;;  %1398 = vst.msk [vmem:[#allocation3 + $0x60] sm:$0xff] %vm54_vm1, %v1382_v43  ;;  %v1425_v49 = vsel %vm54_vm1, %v1382_v43, 0.0 }
 0x1dc   :  { %v5841_v59 = vpop.eup %5840  ;;  %1399 = vst.msk [vmem:[#allocation3 + $0x68] sm:$0xff] %vm54_vm1, %v1383_v5  ;;  %v1427_v61 = vsel %vm54_vm1, %v1383_v5, 0.0  ;;  %v2036_v5 = vsel %vm54_vm1, %v7769_v24, 0.0 }
 0x1dd   :  { %v5843_v45 = vpop.eup %5842  ;;  %1400 = vst.msk [vmem:[#allocation3 + $0x70] sm:$0xff] %vm54_vm1, %v1384_v35  ;;  %v1997_v42 = vmul.f32 %v5841_v59, %v7636_v11  ;;  %v1429_v28 = vsel %vm54_vm1, %v1384_v35, 0.0 }
 0x1de   :  { %v1385_v9 = vmul.f32 %v5843_v45, %v7738_v63 }
 0x1df   :  { %2014 = vst.msk [vmem:[#allocation3 + $0xd8] sm:$0xff] %vm54_vm1, %v1997_v42  ;;  %v2040_v45 = vsel %vm54_vm1, %v1997_v42, 0.0 }
 0x1e0   :  { %v5845_v16 = vpop.eup %5844  ;;  %1401 = vst.msk [vmem:[#allocation3 + $0x78] sm:$0xff] %vm54_vm1, %v1385_v9  ;;  %v1431_v50 = vsel %vm54_vm1, %v1385_v9, 0.0 }
 0x1e1   :  { %v5847_v51 = vpop.eup %5846  ;;  %v1986_v32 = vmul.f32 %v5845_v16, %v7748_v6  ;;  %v1424_v6 = vadd.f32 %v1423_v46, %v1422_v27 }
 0x1e2   :  { %v5849_v23 = vpop.eup %5848  ;;  %v1987_v37 = vmul.f32 %v5847_v51, %v7751_v38 }
 0x1e3   :  { %v5851_v54 = vpop.eup %5850  ;;  %2003 = vst.msk [vmem:[#allocation3 + $0x80] sm:$0xff] %vm54_vm1, %v1986_v32  ;;  %v1998_v19 = vmul.f32 %v5849_v23, %v7758_v15  ;;  %v2019_v11 = vsel %vm54_vm1, %v1986_v32, 0.0  ;;  %v2022_v15 = vsel %vm54_vm1, %v9849_v33, 0.0 }
 0x1e4   :  { %v5853_v63 = vpop.eup %5852  ;;  %v1999_v12 = vmul.f32 %v5851_v54, %v7765_v17  ;;  %v2020_v62 = vsel %vm54_vm1, %v1987_v37, 0.0  ;;  %2004 = vst.msk [vmem:[#allocation3 + $0x88] sm:$0xff] %vm54_vm1, %v1987_v37 }
 0x1e5   :  { %v2000_v38 = vmul.f32 %v5853_v63, %v7772_v10  ;;  %2015 = vst.msk [vmem:[#allocation3 + $0xe0] sm:$0xff] %vm54_vm1, %v1998_v19  ;;  %v2021_v21 = vadd.f32 %v2020_v62, %v2019_v11  ;;  %v1426_v10 = vadd.f32 %v1425_v49, %v1424_v6  ;;  %v2042_v44 = vsel %vm54_vm1, %v1998_v19, 0.0  ;;  %v2240_v49 = vld [vmem:[#allocation3 + $0x68] sm:$0xff] }
 0x1e6   :  { %2016 = vst.msk [vmem:[#allocation3 + $0xe8] sm:$0xff] %vm54_vm1, %v1999_v12  ;;  %v2044_v8 = vsel %vm54_vm1, %v1999_v12, 0.0 }
 0x1e7   :  { %v5855_v60 = vpop.eup %5854  ;;  %2017 = vst.msk [vmem:[#allocation3 + $0xf0] sm:$0xff] %vm54_vm1, %v2000_v38  ;;  %v2023_v17 = vadd.f32 %v2022_v15, %v2021_v21  ;;  %v1428_v18 = vadd.f32 %v1427_v61, %v1426_v10  ;;  %v2046_v32 = vsel %vm54_vm1, %v2000_v38, 0.0  ;;  %v2242_v33 = vld [vmem:[#allocation3 + $0x78] sm:$0xff]  ;;  %v9853_v38 = vmov 0.0   ;;  %v2241_v15 = vld [vmem:[#allocation3 + $0x70] sm:$0xff] }
 0x1e8   :  { %v2001_v4 = vmul.f32 %v5855_v60, %v7781_v26  ;;  %v2030_v26 = vsel %vm54_vm1, %v7467_v31, 0.0  ;;  %v2038_v31 = vsel %vm54_vm1, %v7791_v39, 0.0  ;;  %v2239_v60 = vld [vmem:[#allocation3 + $0x60] sm:$0xff]  ;;  %v2234_v10 = vld [vmem:[#allocation3 + $0x38] sm:$0xff]  ;;  %v2229_v61 = vld [vmem:[#allocation3 + $0x10] sm:$0xff] }
 0x1e9   :  { %v2025_v47 = vadd.f32 %v2024_v2, %v2023_v17  ;;  %v1430_v1 = vadd.f32 %v1429_v28, %v1428_v18  ;;  %v2238_v17 = vld [vmem:[#allocation3 + $0x58] sm:$0xff]  ;;  %v2236_v2 = vld [vmem:[#allocation3 + $0x48] sm:$0xff]  ;;  %v7889_v18 = vld [vmem:[%s9551_s1] sm:$0xff] }
 0x1ea   :  { %2018 = vst.msk [vmem:[#allocation3 + $0xf8] sm:$0xff] %vm54_vm1, %v2001_v4  ;;  %v2048_v27 = vsel %vm54_vm1, %v2001_v4, 0.0  ;;  %v2235_v4 = vld [vmem:[#allocation3 + $0x40] sm:$0xff]  ;;  %v49_v28 = vld [vmem:[%s9556_s6] sm:$0x1] }
 0x1eb   :  { %v2027_v22 = vadd.f32 %v2026_v14, %v2025_v47  ;;  %v1432_v59 = vadd.f32 %v1431_v50, %v1430_v1  ;;  %v2233_v47 = vld [vmem:[#allocation3 + $0x30] sm:$0xff]  ;;  %v2231_v14 = vld [vmem:[#allocation3 + $0x20] sm:$0xff] }
 0x1ed   :  { %v2029_v34 = vadd.f32 %v2028_v36, %v2027_v22  ;;  %v1433_v40 = vrot.slane %v1432_v59, 4  ;;  %v2230_v22 = vld [vmem:[#allocation3 + $0x18] sm:$0xff]  ;;  %v2227_v36 = vld [vmem:[#allocation3] sm:$0xff] }
 0x1ef   :  { %v2031_v30 = vadd.f32 %v2030_v26, %v2029_v34  ;;  %v1434_v51 = vadd.f32 %v1433_v40, %v1432_v59  ;;  %v7895_v34 = vld [vmem:[%s9557_s7] sm:$0x3]  ;;  %v2379_v40 = vld [vmem:[#allocation3 + $0xc8] sm:$0xff] }
 0x1f0   :  { %5381 = vmatpush3.msk.msra.mxu1 %vm2142_vm5, %v7895_v34  ;;  %v2384_v59 = vld [vmem:[#allocation3 + $0xf0] sm:$0xff] }
 0x1f1   :  { %v2033_v0 = vadd.f32 %v2032_v13, %v2031_v30  ;;  %v1435_v23 = vrot.slane %v1434_v51, 2  ;;  %5420 = vmatprep.subr.mxu1 %v9853_v38 }
 0x1f3   :  { %v2035_v43 = vadd.f32 %v2034_v29, %v2033_v0  ;;  %v1436_v54 = vadd.f32 %v1435_v23, %v1434_v51  ;;  %v2374_v51 = vld [vmem:[#allocation3 + $0xa0] sm:$0xff]  ;;  %v53_v23 = vld [vmem:[%s9560_s10] sm:$0xff] }
 0x1f5   :  { %v2037_v35 = vadd.f32 %v2036_v5, %v2035_v43  ;;  %v1437_v63 = vrot.slane %v1436_v54, 1  ;;  %v2385_v5 = vld [vmem:[#allocation3 + $0xf8] sm:$0xff] }
 0x1f7   :  { %v2039_v53 = vadd.f32 %v2038_v31, %v2037_v35  ;;  %v1438_v19 = vadd.f32 %v1437_v63, %v1436_v54  ;;  %v2383_v35 = vld [vmem:[#allocation3 + $0xe8] sm:$0xff]  ;;  %v2382_v31 = vld [vmem:[#allocation3 + $0xe0] sm:$0xff] }
 0x1f9   :  { %v2041_v58 = vadd.f32 %v2040_v45, %v2039_v53  ;;  %v2381_v53 = vld [vmem:[#allocation3 + $0xd8] sm:$0xff]  ;;  %v2380_v45 = vld [vmem:[#allocation3 + $0xd0] sm:$0xff] }
 0x1fb   :  { %v2043_v16 = vadd.f32 %v2042_v44, %v2041_v58  ;;  %v2378_v58 = vld [vmem:[#allocation3 + $0xc0] sm:$0xff]  ;;  %v2377_v44 = vld [vmem:[#allocation3 + $0xb8] sm:$0xff] }
 0x1fd   :  { %v2045_v9 = vadd.f32 %v2044_v8, %v2043_v16  ;;  %v2376_v16 = vld [vmem:[#allocation3 + $0xb0] sm:$0xff]  ;;  %v2375_v8 = vld [vmem:[#allocation3 + $0xa8] sm:$0xff] }
 0x1ff   :  { %v2047_v24 = vadd.f32 %v2046_v32, %v2045_v9  ;;  %v2373_v9 = vld [vmem:[#allocation3 + $0x98] sm:$0xff]  ;;  %v2372_v32 = vld [vmem:[#allocation3 + $0x90] sm:$0xff] }
 0x201   :  { %v2049_v37 = vadd.f32 %v2048_v27, %v2047_v24  ;;  %v2371_v24 = vld [vmem:[#allocation3 + $0x88] sm:$0xff]  ;;  %v2370_v27 = vld [vmem:[#allocation3 + $0x80] sm:$0xff] }
 0x203   :  { %v2050_v39 = vrot.slane %v2049_v37, 4 }
 0x205   :  { %v2051_v11 = vadd.f32 %v2050_v39, %v2049_v37  ;;  %v6165_v37 = vmov 0   ;;  %v51_v39 = vld [vmem:[%s9558_s8] sm:$0x1] }
 0x206   :  { %5599 = vset.pattern.permute.xlu0 %v6165_v37 }
 0x207   :  { %v2052_v42 = vrot.slane %v2051_v11, 2  ;;  %2245 = vperm.xlu0 %5599, %v53_v23  }
 0x209   :  { %v2053_v46 = vadd.f32 %v2052_v42, %v2051_v11 }
 0x20b   :  { %v2054_v62 = vrot.slane %v2053_v46, 1 }
 0x20d   :  { %v2055_v6 = vadd.f32 %v2054_v62, %v2053_v46 }
 0x20f   :  { %v2056_v21 = vadd.f32 %v2055_v6, %v1438_v19  ;;  %v52_v6 = vld [vmem:[%s9559_s9] sm:$0xff] }
 0x211   :  { %v2057_v12 = vmul.f32 0.00390625, %v2056_v21  ;;  %v9854_v21 = vld [vmem:[#allocation7_spill] sm:$0xff] }
 0x213   :  { %5378 = vmatmul.mubr.msk.f32.vlgmr.msra.gmra.mxu0 %vm54_vm1, %v2057_v12 }
 0x214   :  { %5386 = vmatpush3.xpose.msk.msra.mxu0 %vm54_vm1, %v2242_v33  ;;  %5417 = vmatprep.mubr.msk.f32.mxu0 %vm6164_vm4, %v9853_v38 }
 0x215   :  { %5387 = vmatprep.subr.mxu0 %v9853_v38 }
 0x218   :  { %5388 = vmatpush3.xpose.msk.msra.mxu0 %vm54_vm1, %v2241_v15  ;;  %v5000_v15 = vld [vmem:[%s9550_s0 + $0x100] sm:$0xff] }
 0x219   :  { %5389 = vmatprep.subr.mxu0 %v9853_v38 }
 0x21c   :  { %5390 = vmatpush3.xpose.msk.msra.mxu0 %vm54_vm1, %v2240_v49  ;;  %v5048_v49 = vld [vmem:[%s9550_s0 + $0x180] sm:$0xff] }
 0x21d   :  { %5391 = vmatprep.subr.mxu0 %v9853_v38 }
 0x220   :  { %5392 = vmatpush3.xpose.msk.msra.mxu0 %vm54_vm1, %v2239_v60  ;;  %v5001_v60 = vld [vmem:[%s9550_s0 + $0x108] sm:$0xff] }
 0x221   :  { %5393 = vmatprep.subr.mxu0 %v9853_v38 }
 0x224   :  { %5394 = vmatpush3.xpose.msk.msra.mxu0 %vm54_vm1, %v2238_v17  ;;  %v5049_v17 = vld [vmem:[%s9550_s0 + $0x188] sm:$0xff] }
 0x225   :  { %5395 = vmatprep.subr.mxu0 %v9853_v38 }
 0x228   :  { %5396 = vmatpush3.xpose.msk.msra.mxu0 %vm54_vm1, %v2237_v55  ;;  %v5002_v55 = vld [vmem:[%s9550_s0 + $0x110] sm:$0xff] }
 0x229   :  { %5397 = vmatprep.subr.mxu0 %v9853_v38 }
 0x22c   :  { %5398 = vmatpush3.xpose.msk.msra.mxu0 %vm54_vm1, %v2236_v2  ;;  %v5050_v2 = vld [vmem:[%s9550_s0 + $0x190] sm:$0xff] }
 0x22d   :  { %5399 = vmatprep.subr.mxu0 %v9853_v38 }
 0x230   :  { %5400 = vmatpush3.xpose.msk.msra.mxu0 %vm54_vm1, %v2235_v4  ;;  %v5003_v4 = vld [vmem:[%s9550_s0 + $0x118] sm:$0xff] }
 0x231   :  { %5401 = vmatprep.subr.mxu0 %v9853_v38 }
 0x234   :  { %5402 = vmatpush3.xpose.msk.msra.mxu0 %vm54_vm1, %v2234_v10  ;;  %v5051_v10 = vld [vmem:[%s9550_s0 + $0x198] sm:$0xff] }
 0x235   :  { %5403 = vmatprep.subr.mxu0 %v9853_v38 }
 0x238   :  { %5404 = vmatpush3.xpose.msk.msra.mxu0 %vm54_vm1, %v2233_v47  ;;  %v5004_v47 = vld [vmem:[%s9550_s0 + $0x120] sm:$0xff] }
 0x239   :  { %5405 = vmatprep.subr.mxu0 %v9853_v38 }
 0x23c   :  { %5406 = vmatpush3.xpose.msk.msra.mxu0 %vm54_vm1, %v2232_v48  ;;  %v5052_v48 = vld [vmem:[%s9550_s0 + $0x1a0] sm:$0xff] }
 0x23d   :  { %5407 = vmatprep.subr.mxu0 %v9853_v38 }
 0x240   :  { %5408 = vmatpush3.xpose.msk.msra.mxu0 %vm54_vm1, %v2231_v14  ;;  %v6131_v14 = vld [vmem:[%s9555_s5 + $0x18] sm:$0xff] }
 0x241   :  { %5409 = vmatprep.subr.mxu0 %v9853_v38 }
 0x244   :  { %5410 = vmatpush3.xpose.msk.msra.mxu0 %vm54_vm1, %v2230_v22  ;;  %v5005_v22 = vld [vmem:[%s9550_s0 + $0x128] sm:$0xff] }
 0x245   :  { %5411 = vmatprep.subr.mxu0 %v9853_v38 }
 0x248   :  { %5412 = vmatpush3.xpose.msk.msra.mxu0 %vm54_vm1, %v2229_v61  ;;  %v5053_v61 = vld [vmem:[%s9550_s0 + $0x1a8] sm:$0xff] }
 0x249   :  { %5413 = vmatprep.subr.mxu0 %v9853_v38 }
 0x24c   :  { %5414 = vmatpush3.xpose.msk.msra.mxu0 %vm54_vm1, %v2228_v41  ;;  %v5006_v41 = vld [vmem:[%s9550_s0 + $0x130] sm:$0xff] }
 0x24d   :  { %5415 = vmatprep.subr.mxu0 %v9853_v38 }
 0x250   :  { %5416 = vmatpush3.xpose.msk.msra.mxu0 %vm54_vm1, %v2227_v36  ;;  %v5054_v36 = vld [vmem:[%s9550_s0 + $0x1b0] sm:$0xff] }
 0x251   :  { %5455 = vmatprep.subr.mxu0 %v7889_v18 }
 0x2d3   :  { %v2127_v26 = vpop.f32.mrf.mxu0 }
 0x2d4   :  { %v2128_v30 = vadd.f32 %v2127_v26, %v49_v28  ;;  %v5055_v28 = vld [vmem:[%s9550_s0 + $0x1b8] sm:$0xff]  ;;  %v5008_v26 = vld [vmem:[%s9550_s0 + $0x140] sm:$0xff] }
 0x2d5   :  { %v5379_v13 = vpop.f32.mrf.mxu0 }
 0x2d6   :  { %v4962_v1 = vmul.f32 -1.442695, %v2128_v30  ;;  %v6133_v13 = vld [vmem:[%s9555_s5 + $0x8] sm:$0xff] }
 0x2d8   :  { %5856 = vpow2.f32 %v4962_v1  ;;  %v5009_v1 = vld [vmem:[%s9550_s0 + $0x148] sm:$0xff] }
 0x2e5   :  { %v5857_v0 = vpop.eup %5856 }
 0x2e6   :  { %v2134_v29 = vadd.f32 1.0, %v5857_v0  ;;  %v5057_v0 = vld [vmem:[%s9550_s0 + $0x1c8] sm:$0xff] }
 0x2e8   :  { %5858 = vrcp.f32 %v2134_v29  ;;  %v5010_v29 = vld [vmem:[%s9550_s0 + $0x150] sm:$0xff] }
 0x2f5   :  { %v5859_v43 = vpop.eup %5858 }
 0x2f6   :  { %v2137_v50 = vmul.f32 %v5859_v43, %v2128_v30  ;;  %v5056_v30 = vld [vmem:[%s9550_s0 + $0x1c0] sm:$0xff]  ;;  %v5058_v43 = vld [vmem:[%s9550_s0 + $0x1d0] sm:$0xff] }
 0x2f8   :  { %5383 = vmatmul.mubr.msk.f32.vlgmr.msra.gmra.mxu1 %vm2138_vm6, %v2137_v50  ;;  %v6134_v50 = vld [vmem:[%s9555_s5] sm:$0xff] }
 0x2f9   :  { %5421 = vmatpush3.xpose.msk.msra.mxu1 %vm54_vm1, %v2385_v5  ;;  %5452 = vmatprep.mubr.msk.f32.mxu1 %vm6164_vm4, %v9853_v38  ;;  %v5011_v5 = vld [vmem:[%s9550_s0 + $0x158] sm:$0xff] }
 0x2fa   :  { %5422 = vmatprep.subr.mxu1 %v9853_v38 }
 0x2fd   :  { %5423 = vmatpush3.xpose.msk.msra.mxu1 %vm54_vm1, %v2384_v59  ;;  %v5059_v59 = vld [vmem:[%s9550_s0 + $0x1d8] sm:$0xff] }
 0x2fe   :  { %5424 = vmatprep.subr.mxu1 %v9853_v38 }
 0x301   :  { %5425 = vmatpush3.xpose.msk.msra.mxu1 %vm54_vm1, %v2383_v35  ;;  %v5012_v35 = vld [vmem:[%s9550_s0 + $0x160] sm:$0xff] }
 0x302   :  { %5426 = vmatprep.subr.mxu1 %v9853_v38 }
 0x305   :  { %5427 = vmatpush3.xpose.msk.msra.mxu1 %vm54_vm1, %v2382_v31  ;;  %v5060_v31 = vld [vmem:[%s9550_s0 + $0x1e0] sm:$0xff] }
 0x306   :  { %5428 = vmatprep.subr.mxu1 %v9853_v38 }
 0x309   :  { %5429 = vmatpush3.xpose.msk.msra.mxu1 %vm54_vm1, %v2381_v53  ;;  %v5013_v53 = vld [vmem:[%s9550_s0 + $0x168] sm:$0xff] }
 0x30a   :  { %5430 = vmatprep.subr.mxu1 %v9853_v38 }
 0x30d   :  { %5431 = vmatpush3.xpose.msk.msra.mxu1 %vm54_vm1, %v2380_v45  ;;  %v5061_v45 = vld [vmem:[%s9550_s0 + $0x1e8] sm:$0xff] }
 0x30e   :  { %5432 = vmatprep.subr.mxu1 %v9853_v38 }
 0x311   :  { %5433 = vmatpush3.xpose.msk.msra.mxu1 %vm54_vm1, %v2379_v40  ;;  %v5014_v40 = vld [vmem:[%s9550_s0 + $0x170] sm:$0xff] }
 0x312   :  { %5434 = vmatprep.subr.mxu1 %v9853_v38 }
 0x315   :  { %5435 = vmatpush3.xpose.msk.msra.mxu1 %vm54_vm1, %v2378_v58  ;;  %v5062_v58 = vld [vmem:[%s9550_s0 + $0x1f0] sm:$0xff] }
 0x316   :  { %5436 = vmatprep.subr.mxu1 %v9853_v38 }
 0x319   :  { %5437 = vmatpush3.xpose.msk.msra.mxu1 %vm54_vm1, %v2377_v44  ;;  %v5015_v44 = vld [vmem:[%s9550_s0 + $0x178] sm:$0xff] }
 0x31a   :  { %5438 = vmatprep.subr.mxu1 %v9853_v38 }
 0x31d   :  { %5439 = vmatpush3.xpose.msk.msra.mxu1 %vm54_vm1, %v2376_v16  ;;  %v5063_v16 = vld [vmem:[%s9550_s0 + $0x1f8] sm:$0xff] }
 0x31e   :  { %5440 = vmatprep.subr.mxu1 %v9853_v38 }
 0x321   :  { %5441 = vmatpush3.xpose.msk.msra.mxu1 %vm54_vm1, %v2375_v8  ;;  %v8105_v8 = vpop.permute.xlu0 %2245 }
 0x322   :  { %5442 = vmatprep.subr.mxu1 %v9853_v38  ;;  %9855 = vst [vmem:[#allocation21_spill] sm:$0xff] %v8105_v8 }
 0x325   :  { %5443 = vmatpush3.xpose.msk.msra.mxu1 %vm54_vm1, %v2374_v51 }
 0x326   :  { %5444 = vmatprep.subr.mxu1 %v9853_v38 }
 0x329   :  { %5445 = vmatpush3.xpose.msk.msra.mxu1 %vm54_vm1, %v2373_v9 }
 0x32a   :  { %5446 = vmatprep.subr.mxu1 %v9853_v38 }
 0x32d   :  { %5447 = vmatpush3.xpose.msk.msra.mxu1 %vm54_vm1, %v2372_v32 }
 0x32e   :  { %5448 = vmatprep.subr.mxu1 %v9853_v38 }
 0x331   :  { %5449 = vmatpush3.xpose.msk.msra.mxu1 %vm54_vm1, %v2371_v24 }
 0x332   :  { %5450 = vmatprep.subr.mxu1 %v9853_v38 }
 0x335   :  { %5451 = vmatpush3.xpose.msk.msra.mxu1 %vm54_vm1, %v2370_v27 }
 0x336   :  { %5481 = vmatprep.subr.mxu1 %v7889_v18 }
 0x3b8   :  { %v2212_v54 = vpop.f32.mrf.mxu1 }
 0x3b9   :  { %v2213_v11 = vadd.f32 %v2212_v54, %v51_v39  ;;  %v8112_v54 = vld [vmem:[%s9552_s2] ss:$0 sm:$0xff] }
 0x3ba   :  { %v5384_v42 = vpop.f32.mrf.mxu1 }
 0x3bb   :  { %v4965_v63 = vmul.f32 -1.442695, %v2213_v11 }
 0x3bd   :  { %5860 = vpow2.f32 %v4965_v63 }
 0x3ca   :  { %v5861_v46 = vpop.eup %5860 }
 0x3cb   :  { %v2219_v62 = vadd.f32 1.0, %v5861_v46 }
 0x3cd   :  { %5862 = vrcp.f32 %v2219_v62 }
 0x3da   :  { %v5863_v19 = vpop.eup %5862 }
 0x3db   :  { %v2225_v12 = vrot.slane %v5863_v19, %v9854_v21 }
 0x3dd   :  { %v2226_v33 = vmul.f32 %v2225_v12, %v52_v6 }
 0x3df   :  { %5418 = vmatmul.mubr.msk.f32.vlgmr.msra.gmra.mxu0 %vm54_vm1, %v2226_v33  ;;  %5453 = vmatmul.mubr.msk.f32.vlgmr.msra.gmra.mxu1 %vm54_vm1, %v2226_v33 }
 0x3e0   :  { %5456 = vmatpush3.msra.mxu0 %v7889_v18  ;;  %5457 = vmatprep.mubr.msk.f32.mxu0 %vm122_vm0, %v5000_v15 }
 0x3e1   :  { %5482 = vmatpush3.msra.mxu1 %v7889_v18  ;;  %5483 = vmatprep.mubr.msk.f32.mxu1 %vm122_vm0, %v5048_v49  ;;  %v6132_v18 = vld [vmem:[%s9555_s5 + $0x10] sm:$0xff] }
 0x3e2   :  { %5507 = vmatprep.subr.mxu0 %v9853_v38  ;;  %5518 = vmatprep.subr.mxu1 %v9853_v38 }
 0x3e3   :  { %5458 = vmatmul.mubr.msk.f32.vlgmr.msra.gmra.mxu0 %vm122_vm0, %v5001_v60  ;;  %5484 = vmatmul.mubr.msk.f32.vlgmr.msra.gmra.mxu1 %vm122_vm0, %v5049_v17 }
 0x3e4   :  { %5460 = vmatprep.mubr.msk.f32.mxu0 %vm122_vm0, %v5002_v55  ;;  %5486 = vmatprep.mubr.msk.f32.mxu1 %vm122_vm0, %v5050_v2 }
 0x3e5   :  { %5508 = vmatpush3.msra.mxu0 %v6131_v14  ;;  %5519 = vmatpush3.msk.msra.mxu1 %vm2142_vm5, %v7895_v34  ;;  %v5007_v34 = vld [vmem:[%s9550_s0 + $0x138] sm:$0xff] }
 0x3e6   :  { %5509 = vmatprep.subr.mxu0 %v9853_v38  ;;  %5558 = vmatprep.subr.mxu1 %v9853_v38 }
 0x3e7   :  { %5461 = vmatmul.mubr.msk.f32.gmra.mxu0 %vm122_vm0, %v5003_v4  ;;  %5487 = vmatmul.mubr.msk.f32.gmra.mxu1 %vm122_vm0, %v5051_v10 }
 0x3e8   :  { %5463 = vmatprep.mubr.msk.f32.mxu0 %vm122_vm0, %v5004_v47  ;;  %5489 = vmatprep.mubr.msk.f32.mxu1 %vm122_vm0, %v5052_v48 }
 0x3e9   :  { %5510 = vmatpush3.msra.mxu0 %v6132_v18 }
 0x3ea   :  { %5511 = vmatprep.subr.mxu0 %v9853_v38 }
 0x3eb   :  { %5464 = vmatmul.mubr.msk.f32.gmra.mxu0 %vm122_vm0, %v5005_v22  ;;  %5490 = vmatmul.mubr.msk.f32.gmra.mxu1 %vm122_vm0, %v5053_v61 }
 0x3ec   :  { %5466 = vmatprep.mubr.msk.f32.mxu0 %vm122_vm0, %v5006_v41  ;;  %5492 = vmatprep.mubr.msk.f32.mxu1 %vm122_vm0, %v5054_v36 }
 0x3ed   :  { %5512 = vmatpush3.msra.mxu0 %v6133_v13 }
 0x3ee   :  { %5513 = vmatprep.subr.mxu0 %v9853_v38 }
 0x3ef   :  { %5467 = vmatmul.mubr.msk.f32.gmra.mxu0 %vm122_vm0, %v5007_v34  ;;  %5493 = vmatmul.mubr.msk.f32.gmra.mxu1 %vm122_vm0, %v5055_v28 }
 0x3f0   :  { %5469 = vmatprep.mubr.msk.f32.mxu0 %vm122_vm0, %v5008_v26  ;;  %5495 = vmatprep.mubr.msk.f32.mxu1 %vm122_vm0, %v5056_v30 }
 0x3f1   :  { %5514 = vmatpush3.msra.mxu0 %v6134_v50 }
 0x3f2   :  { %5523 = vmatprep.subr.mxu0 %v9853_v38 }
 0x3f3   :  { %5470 = vmatmul.mubr.msk.f32.gmra.mxu0 %vm122_vm0, %v5009_v1  ;;  %5496 = vmatmul.mubr.msk.f32.gmra.mxu1 %vm122_vm0, %v5057_v0 }
 0x3f4   :  { %5472 = vmatprep.mubr.msk.f32.mxu0 %vm122_vm0, %v5010_v29  ;;  %5498 = vmatprep.mubr.msk.f32.mxu1 %vm122_vm0, %v5058_v43 }
 0x3f7   :  { %5473 = vmatmul.mubr.msk.f32.gmra.mxu0 %vm122_vm0, %v5011_v5  ;;  %5499 = vmatmul.mubr.msk.f32.gmra.mxu1 %vm122_vm0, %v5059_v59 }
 0x3f8   :  { %5475 = vmatprep.mubr.msk.f32.mxu0 %vm122_vm0, %v5012_v35  ;;  %5501 = vmatprep.mubr.msk.f32.mxu1 %vm122_vm0, %v5060_v31 }
 0x3fb   :  { %5476 = vmatmul.mubr.msk.f32.gmra.mxu0 %vm122_vm0, %v5013_v53  ;;  %5502 = vmatmul.mubr.msk.f32.gmra.mxu1 %vm122_vm0, %v5061_v45 }
 0x3fc   :  { %5478 = vmatprep.mubr.msk.f32.mxu0 %vm122_vm0, %v5014_v40  ;;  %5504 = vmatprep.mubr.msk.f32.mxu1 %vm122_vm0, %v5062_v58 }
 0x3ff   :  { %5479 = vmatmul.mubr.msk.f32.gmra.mxu0 %vm122_vm0, %v5015_v44  ;;  %5505 = vmatmul.mubr.msk.f32.gmra.mxu1 %vm122_vm0, %v5063_v16 }
 0x400   :  { %5515 = vmatprep.mubr.msk.f32.mxu0 %vm6164_vm4, %v9853_v38  ;;  %5520 = vmatprep.mubr.msk.f32.mxu1 %vm6164_vm4, %v9853_v38 }
 0x49f   :  { %v2365_v51 = vpop.f32.mrf.mxu0  ;;  %v2500_v9 = vpop.f32.mrf.mxu1 }
 0x4a0   :  { %v2366_v32 = vadd.f32 %v2365_v51, %v8105_v8  ;;  %v2501_v24 = vadd.f32 %v2500_v9, %v8105_v8 }
 0x4a1   :  { %v5419_v27 = vpop.f32.mrf.mxu0  ;;  %v5454_v23 = vpop.f32.mrf.mxu1 }
 0x4a2   :  { %2369 = vst [vmem:[#allocation4] sm:$0xff] %v2366_v32  ;;  %2504 = vst [vmem:[#allocation4 + $0x8] sm:$0xff] %v2501_v24 }
 0x4a3   :  { %v5459_v37 = vpop.f32.mrf.mxu0  ;;  %v5485_v39 = vpop.f32.mrf.mxu1 }
 0x4a4   :  { %v8115_v11 = vadd.f32 %v8112_v54, %v5459_v37  ;;  %v8118_v42 = vadd.f32 %v8112_v54, %v5485_v39 }
 0x4a5   :  { %v2636_v63 = vpop.f32.mrf.mxu0  ;;  %v2973_v46 = vpop.f32.mrf.mxu1 }
 0x4a6   :  { %v5033_v62 = vmul.f32 -1.442695, %v8115_v11  ;;  %v5081_v19 = vmul.f32 -1.442695, %v8118_v42  ;;  %v8123_v6 = vadd.f32 %v8112_v54, %v2636_v63  ;;  %v8126_v12 = vadd.f32 %v8112_v54, %v2973_v46 }
 0x4a7   :  { %v5462_v33 = vpop.f32.mrf.mxu0  ;;  %v5488_v15 = vpop.f32.mrf.mxu1 }
 0x4a8   :  { %5864 = vpow2.f32 %v5033_v62  ;;  %v5032_v49 = vmul.f32 -1.442695, %v8123_v6  ;;  %v5080_v60 = vmul.f32 -1.442695, %v8126_v12  ;;  %v8131_v17 = vadd.f32 %v8112_v54, %v5462_v33 }
 0x4a9   :  { %5866 = vpow2.f32 %v5081_v19  ;;  %v8134_v55 = vadd.f32 %v8112_v54, %v5488_v15  ;;  %v2646_v2 = vpop.f32.mrf.mxu0  ;;  %v2983_v4 = vpop.f32.mrf.mxu1 }
 0x4aa   :  { %5868 = vpow2.f32 %v5032_v49  ;;  %v5035_v10 = vmul.f32 -1.442695, %v8131_v17  ;;  %v8138_v47 = vadd.f32 %v8112_v54, %v2646_v2  ;;  %v8141_v48 = vadd.f32 %v8112_v54, %v2983_v4 }
 0x4ab   :  { %5870 = vpow2.f32 %v5080_v60  ;;  %v5083_v14 = vmul.f32 -1.442695, %v8134_v55  ;;  %v5465_v22 = vpop.f32.mrf.mxu0  ;;  %v5491_v61 = vpop.f32.mrf.mxu1 }
 0x4ac   :  { %5872 = vpow2.f32 %v5035_v10  ;;  %v5034_v41 = vmul.f32 -1.442695, %v8138_v47  ;;  %v5082_v36 = vmul.f32 -1.442695, %v8141_v48  ;;  %v8147_v18 = vadd.f32 %v8112_v54, %v5465_v22 }
 0x4ad   :  { %5874 = vpow2.f32 %v5083_v14  ;;  %v8150_v34 = vadd.f32 %v8112_v54, %v5491_v61  ;;  %v2656_v28 = vpop.f32.mrf.mxu0  ;;  %v2993_v26 = vpop.f32.mrf.mxu1 }
 0x4ae   :  { %5876 = vpow2.f32 %v5034_v41  ;;  %v5037_v30 = vmul.f32 -1.442695, %v8147_v18  ;;  %v8154_v13 = vadd.f32 %v8112_v54, %v2656_v28  ;;  %v8157_v1 = vadd.f32 %v8112_v54, %v2993_v26 }
 0x4af   :  { %5878 = vpow2.f32 %v5082_v36  ;;  %v5085_v0 = vmul.f32 -1.442695, %v8150_v34  ;;  %v5468_v29 = vpop.f32.mrf.mxu0  ;;  %v5494_v43 = vpop.f32.mrf.mxu1 }
 0x4b0   :  { %5880 = vpow2.f32 %v5037_v30  ;;  %v5036_v50 = vmul.f32 -1.442695, %v8154_v13  ;;  %v5084_v5 = vmul.f32 -1.442695, %v8157_v1  ;;  %v8163_v59 = vadd.f32 %v8112_v54, %v5468_v29  ;;  %v3180_v30 = vld [vmem:[#allocation2] sm:$0xff] }
 0x4b1   :  { %5882 = vpow2.f32 %v5085_v0  ;;  %v8166_v35 = vadd.f32 %v8112_v54, %v5494_v43  ;;  %v2666_v31 = vpop.f32.mrf.mxu0  ;;  %v3003_v53 = vpop.f32.mrf.mxu1  ;;  %v3181_v43 = vld [vmem:[#allocation2 + $0x8] sm:$0xff] }
 0x4b2   :  { %5884 = vpow2.f32 %v5036_v50  ;;  %v5039_v45 = vmul.f32 -1.442695, %v8163_v59  ;;  %v8170_v40 = vadd.f32 %v8112_v54, %v2666_v31  ;;  %v8173_v58 = vadd.f32 %v8112_v54, %v3003_v53  ;;  %v3228_v53 = vld [vmem:[#allocation2 + $0x1] sm:$0xff] }
 0x4b3   :  { %5886 = vpow2.f32 %v5084_v5  ;;  %v5087_v44 = vmul.f32 -1.442695, %v8166_v35  ;;  %v5471_v16 = vpop.f32.mrf.mxu0  ;;  %v5497_v51 = vpop.f32.mrf.mxu1 }
 0x4b4   :  { %5888 = vpow2.f32 %v5039_v45  ;;  %v5038_v9 = vmul.f32 -1.442695, %v8170_v40  ;;  %v5086_v32 = vmul.f32 -1.442695, %v8173_v58 }
 0x4b5   :  { %v5865_v24 = vpop.eup %5864  ;;  %5890 = vpow2.f32 %v5087_v44  ;;  %v2676_v27 = vpop.f32.mrf.mxu0 }
 0x4b6   :  { %v3013_v23 = vpop.f32.mrf.mxu1  ;;  %v5867_v37 = vpop.eup %5866  ;;  %v2764_v39 = vadd.f32 1.0, %v5865_v24  ;;  %5892 = vpow2.f32 %v5038_v9  ;;  %v8179_v9 = vadd.f32 %v8112_v54, %v5471_v16  ;;  %v8182_v24 = vmul.f32 %v3180_v30, %v6523_v52 }
 0x4b7   :  { %v5869_v63 = vpop.eup %5868  ;;  %v3101_v46 = vadd.f32 1.0, %v5867_v37  ;;  %5894 = vpow2.f32 %v5086_v32  ;;  %v5474_v62 = vpop.f32.mrf.mxu0  ;;  %v3229_v37 = vld [vmem:[#allocation2 + $0x9] sm:$0xff]  ;;  %v8191_v16 = vadd.f32 %v8112_v54, %v2676_v27 }
 0x4b8   :  { %v5871_v19 = vpop.eup %5870  ;;  %5896 = vrcp.f32 %v2764_v39  ;;  %v2763_v33 = vadd.f32 1.0, %v5869_v63  ;;  %v5500_v15 = vpop.f32.mrf.mxu1  ;;  %v8204_v27 = vadd.f32 %v8112_v54, %v5474_v62 }
 0x4b9   :  { %v5873_v49 = vpop.eup %5872  ;;  %5898 = vrcp.f32 %v3101_v46  ;;  %v3100_v60 = vadd.f32 1.0, %v5871_v19  ;;  %v2686_v22 = vpop.f32.mrf.mxu0  ;;  %v8185_v46 = vadd.f32 %v8112_v54, %v5497_v51  ;;  %v8188_v19 = vmul.f32 %v3181_v43, %v6523_v52 }
 0x4ba   :  { %v5875_v2 = vpop.eup %5874  ;;  %5900 = vrcp.f32 %v2763_v33  ;;  %v2766_v4 = vadd.f32 1.0, %v5873_v49  ;;  %v3023_v36 = vpop.f32.mrf.mxu1 }
 0x4bb   :  { %v5877_v10 = vpop.eup %5876  ;;  %5902 = vrcp.f32 %v3100_v60  ;;  %v3103_v14 = vadd.f32 1.0, %v5875_v2  ;;  %v5477_v31 = vpop.f32.mrf.mxu0  ;;  %v9856_v60 = vld [vmem:[#allocation8_spill] sm:$0xff]  ;;  %v5089_v43 = vmul.f32 -1.442695, %v8185_v46 }
 0x4bc   :  { %v5879_v61 = vpop.eup %5878  ;;  %5904 = vrcp.f32 %v2766_v4  ;;  %v2765_v41 = vadd.f32 1.0, %v5877_v10  ;;  %v5503_v32 = vpop.f32.mrf.mxu1  ;;  %v8194_v2 = vmul.f32 %v3228_v53, %v9856_v60  ;;  %v5040_v53 = vmul.f32 -1.442695, %v8191_v16 }
 0x4bd   :  { %v5881_v28 = vpop.eup %5880  ;;  %5906 = vrcp.f32 %v3103_v14  ;;  %v3102_v26 = vadd.f32 1.0, %v5879_v61  ;;  %v8197_v14 = vadd.f32 %v8112_v54, %v3013_v23  ;;  %v2696_v51 = vpop.f32.mrf.mxu0  ;;  %v8200_v61 = vmul.f32 %v3229_v37, %v9856_v60 }
 0x4be   :  { %v5883_v0 = vpop.eup %5882  ;;  %5908 = vrcp.f32 %v2765_v41  ;;  %v2768_v29 = vadd.f32 1.0, %v5881_v28  ;;  %v3033_v30 = vpop.f32.mrf.mxu1  ;;  %v8208_v23 = vadd.f32 %v8112_v54, %v5500_v15 }
 0x4bf   :  { %v5885_v50 = vpop.eup %5884  ;;  %5910 = vrcp.f32 %v3102_v26  ;;  %v3105_v5 = vadd.f32 1.0, %v5883_v0  ;;  %v5041_v26 = vmul.f32 -1.442695, %v8179_v9  ;;  %v5088_v37 = vmul.f32 -1.442695, %v8197_v14  ;;  %v5480_v15 = vpop.f32.mrf.mxu0 }
 0x4c0   :  { %v5887_v45 = vpop.eup %5886  ;;  %5912 = vrcp.f32 %v2768_v29  ;;  %v2767_v44 = vadd.f32 1.0, %v5885_v50 }
 0x4c1   :  { %v5889_v39 = vpop.eup %5888  ;;  %5914 = vrcp.f32 %v3105_v5  ;;  %v3104_v63 = vadd.f32 1.0, %v5887_v45  ;;  %v8213_v45 = vadd.f32 %v8112_v54, %v2686_v22  ;;  %v8224_v22 = vadd.f32 %v8112_v54, %v5477_v31 }
 0x4c2   :  { %v5891_v33 = vpop.eup %5890  ;;  %5916 = vrcp.f32 %v2767_v44  ;;  %v2770_v49 = vadd.f32 1.0, %v5889_v39  ;;  %v8218_v39 = vadd.f32 %v8112_v54, %v3023_v36  ;;  %v5091_v36 = vmul.f32 -1.442695, %v8208_v23 }
 0x4c3   :  { %v5893_v4 = vpop.eup %5892  ;;  %5918 = vrcp.f32 %v3104_v63  ;;  %v3107_v10 = vadd.f32 1.0, %v5891_v33  ;;  %v5043_v33 = vmul.f32 -1.442695, %v8204_v27  ;;  %v5042_v31 = vmul.f32 -1.442695, %v8213_v45 }
 0x4c4   :  { %v5895_v41 = vpop.eup %5894  ;;  %5920 = vrcp.f32 %v2770_v49  ;;  %v2769_v28 = vadd.f32 1.0, %v5893_v4  ;;  %v5506_v49 = vpop.f32.mrf.mxu1 }
 0x4c5   :  { %v5897_v0 = vpop.eup %5896  ;;  %5922 = vrcp.f32 %v3107_v10  ;;  %v3106_v29 = vadd.f32 1.0, %v5895_v41  ;;  %v8230_v10 = vadd.f32 %v8112_v54, %v5503_v32  ;;  %v5090_v32 = vmul.f32 -1.442695, %v8218_v39 }
 0x4c6   :  { %v5899_v50 = vpop.eup %5898  ;;  %v2812_v5 = vmul.f32 %v5897_v0, %v8115_v11  ;;  %5924 = vrcp.f32 %v2769_v28  ;;  %v8236_v28 = vadd.f32 %v8112_v54, %v2696_v51  ;;  %v8242_v0 = vadd.f32 %v8112_v54, %v3033_v30 }
 0x4c7   :  { %v5901_v62 = vpop.eup %5900  ;;  %v3149_v44 = vmul.f32 %v5899_v50, %v8118_v42  ;;  %5926 = vrcp.f32 %v3106_v29  ;;  %v2706_v29 = vpop.f32.mrf.mxu0  ;;  %v5045_v51 = vmul.f32 -1.442695, %v8224_v22  ;;  %v8248_v50 = vadd.f32 %v8112_v54, %v5480_v15 }
 0x4c8   :  { %v5903_v63 = vpop.eup %5902  ;;  %2828 = vst.msk [vmem:[#allocation2 + $0x21] sm:$0xff] %vm54_vm1, %v2812_v5  ;;  %v2811_v11 = vmul.f32 %v5901_v62, %v8123_v6  ;;  %5928 = vpow2.f32 %v5041_v26  ;;  %v3043_v5 = vpop.f32.mrf.mxu1  ;;  %v5093_v30 = vmul.f32 -1.442695, %v8230_v10  ;;  %v8254_v62 = vadd.f32 %v8112_v54, %v5506_v49 }
 0x4c9   :  { %v5905_v42 = vpop.eup %5904  ;;  %3165 = vst.msk [vmem:[#allocation2 + $0xe1] sm:$0xff] %vm54_vm1, %v3149_v44  ;;  %v3148_v4 = vmul.f32 %v5903_v63, %v8126_v12  ;;  %5930 = vpow2.f32 %v5089_v43  ;;  %9857 = vst [vmem:[#allocation22_spill] sm:$0xff] %v8248_v50  ;;  %v8260_v15 = vadd.f32 %v8112_v54, %v2706_v29  ;;  %v3276_v63 = vld [vmem:[#allocation2 + $0x2] sm:$0xff]  ;;  %v8266_v49 = vadd.f32 %v8112_v54, %v3043_v5 }
 0x4ca   :  { %v5907_v41 = vpop.eup %5906  ;;  %2827 = vst.msk [vmem:[#allocation2 + $0x19] sm:$0xff] %vm54_vm1, %v2811_v11  ;;  %v2814_v6 = vmul.f32 %v5905_v42, %v8131_v17  ;;  %5932 = vpow2.f32 %v5040_v53  ;;  %9858 = vst [vmem:[#allocation24_spill] sm:$0xff] %v8254_v62  ;;  %v3277_v42 = vld [vmem:[#allocation2 + $0xa] sm:$0xff]  ;;  %v5095_v54 = vmul.f32 -1.442695, %v8254_v62  ;;  %v3261_v29 = vadd.f32 %v8200_v61, %v8188_v19 }
 0x4cb   :  { %v5909_v26 = vpop.eup %5908  ;;  %3164 = vst.msk [vmem:[#allocation2 + $0xd9] sm:$0xff] %vm54_vm1, %v3148_v4  ;;  %v3151_v12 = vmul.f32 %v5907_v41, %v8134_v55  ;;  %5934 = vpow2.f32 %v5088_v37  ;;  %v5044_v37 = vmul.f32 -1.442695, %v8236_v28  ;;  %9859 = vst [vmem:[#allocation26_spill] sm:$0xff] %v8260_v15  ;;  %v3260_v41 = vadd.f32 %v8194_v2, %v8182_v24 }
 0x4cc   :  { %v5911_v43 = vpop.eup %5910  ;;  %2830 = vst.msk [vmem:[#allocation2 + $0x39] sm:$0xff] %vm54_vm1, %v2814_v6  ;;  %v2813_v17 = vmul.f32 %v5909_v26, %v8138_v47  ;;  %5936 = vpow2.f32 %v5043_v33  ;;  %v5092_v33 = vmul.f32 -1.442695, %v8242_v0  ;;  %9860 = vst [vmem:[#allocation42_spill] sm:$0xff] %v8266_v49  ;;  %v3293_v24 = vmul.f32 %v3277_v42, %v6532_v3 }
 0x4cd   :  { %v5913_v55 = vpop.eup %5912  ;;  %3167 = vst.msk [vmem:[#allocation2 + $0xf9] sm:$0xff] %vm54_vm1, %v3151_v12  ;;  %v3150_v53 = vmul.f32 %v5911_v43, %v8141_v48  ;;  %5938 = vpow2.f32 %v5091_v36  ;;  %v5047_v36 = vmul.f32 -1.442695, %v8248_v50  ;;  %v5046_v12 = vmul.f32 -1.442695, %v8260_v15 }
 0x4ce   :  { %v5915_v44 = vpop.eup %5914  ;;  %2829 = vst.msk [vmem:[#allocation2 + $0x31] sm:$0xff] %vm54_vm1, %v2813_v17  ;;  %v2816_v47 = vmul.f32 %v5913_v55, %v8147_v18  ;;  %5940 = vpow2.f32 %v5042_v31  ;;  %v3292_v31 = vmul.f32 %v3276_v63, %v6532_v3  ;;  %v8305_v63 = vadd.f32 %v3293_v24, %v3261_v29 }
 0x4cf   :  { %v5917_v11 = vpop.eup %5916  ;;  %3166 = vst.msk [vmem:[#allocation2 + $0xf1] sm:$0xff] %vm54_vm1, %v3150_v53  ;;  %v3153_v48 = vmul.f32 %v5915_v44, %v8150_v34  ;;  %5942 = vpow2.f32 %v5090_v32  ;;  %v5094_v32 = vmul.f32 -1.442695, %v8266_v49  ;;  %v3231_v17 = vld [vmem:[#allocation2 + $0x21] sm:$0xff] }
 0x4d0   :  { %v5919_v18 = vpop.eup %5918  ;;  %2832 = vst.msk [vmem:[#allocation2 + $0x51] sm:$0xff] %vm54_vm1, %v2816_v47  ;;  %v2815_v4 = vmul.f32 %v5917_v11, %v8154_v13  ;;  %5944 = vpow2.f32 %v5045_v51  ;;  %v8292_v55 = vld [vmem:[#allocation2 + $0x22] sm:$0xff]  ;;  %v3247_v47 = vmul.f32 %v3231_v17, %v9856_v60  ;;  %v8330_v24 = vmul.f32 %v3231_v17, %v6574_v56 }
 0x4d1   :  { %v5921_v6 = vpop.eup %5920  ;;  %3169 = vst.msk [vmem:[#allocation2 + $0x111] sm:$0xff] %vm54_vm1, %v3153_v48  ;;  %v3152_v34 = vmul.f32 %v5919_v18, %v8157_v1  ;;  %5946 = vpow2.f32 %v5093_v30  ;;  %v8295_v61 = vld [vmem:[#allocation2 + $0x20] sm:$0xff]  ;;  %v8299_v30 = vadd.f32 %v3292_v31, %v3260_v41 }
 0x4d2   :  { %v5923_v26 = vpop.eup %5922  ;;  %2831 = vst.msk [vmem:[#allocation2 + $0x49] sm:$0xff] %vm54_vm1, %v2815_v4  ;;  %v2818_v13 = vmul.f32 %v5921_v6, %v8163_v59  ;;  %5948 = vpow2.f32 %v5044_v37  ;;  %v8303_v37 = vld [vmem:[#allocation2 + $0x1a] sm:$0xff]  ;;  %v8315_v4 = vmul.f32 %v8292_v55, %v6532_v3  ;;  %9864 = vst [vmem:[#allocation35_spill] sm:$0xff] %v8330_v24 }
 0x4d3   :  { %v5925_v2 = vpop.eup %5924  ;;  %3168 = vst.msk [vmem:[#allocation2 + $0x109] sm:$0xff] %vm54_vm1, %v3152_v34  ;;  %v3155_v1 = vmul.f32 %v5923_v26, %v8166_v35  ;;  %5950 = vpow2.f32 %v5092_v33  ;;  %v8290_v35 = vld [vmem:[#allocation2 + $0x18] sm:$0xff]  ;;  %9861 = vst [vmem:[#allocation50_spill] sm:$0xff] %v8303_v37  ;;  %v3199_v34 = vmul.f32 %v8295_v61, %v6523_v52 }
 0x4d4   :  { %v5927_v43 = vpop.eup %5926  ;;  %2834 = vst.msk [vmem:[#allocation2 + $0x69] sm:$0xff] %vm54_vm1, %v2818_v13  ;;  %v2817_v59 = vmul.f32 %v5925_v2, %v8170_v40  ;;  %5952 = vpow2.f32 %v5047_v36  ;;  %v8297_v40 = vld [vmem:[#allocation2 + $0x19] sm:$0xff]  ;;  %v3198_v42 = vmul.f32 %v8290_v35, %v6523_v52 }
 0x4d5   :  { %v5929_v51 = vpop.eup %5928  ;;  %3171 = vst.msk [vmem:[#allocation2 + $0x129] sm:$0xff] %vm54_vm1, %v3155_v1  ;;  %v3154_v5 = vmul.f32 %v5927_v43, %v8173_v58  ;;  %5954 = vpow2.f32 %v5095_v54  ;;  %v8307_v33 = vld [vmem:[#allocation2 + $0x38] sm:$0xff]  ;;  %v8317_v6 = vld [vmem:[#allocation2 + $0x30] sm:$0xff]  ;;  %v3246_v31 = vmul.f32 %v8297_v40, %v9856_v60 }
 0x4d6   :  { %v5931_v53 = vpop.eup %5930  ;;  %2833 = vst.msk [vmem:[#allocation2 + $0x61] sm:$0xff] %vm54_vm1, %v2817_v59  ;;  %v2772_v19 = vadd.f32 1.0, %v5929_v51  ;;  %5956 = vpow2.f32 %v5046_v12  ;;  %v8311_v18 = vld [vmem:[#allocation2 + $0x39] sm:$0xff]  ;;  %v8321_v54 = vld [vmem:[#allocation2 + $0x31] sm:$0xff]  ;;  %v8327_v12 = vmul.f32 %v8303_v37, %v6532_v3  ;;  %v3200_v17 = vmul.f32 %v8317_v6, %v6523_v52 }
 0x4d7   :  { %v5933_v44 = vpop.eup %5932  ;;  %3170 = vst.msk [vmem:[#allocation2 + $0x121] sm:$0xff] %vm54_vm1, %v3154_v5  ;;  %v3109_v58 = vadd.f32 1.0, %v5931_v53  ;;  %5958 = vpow2.f32 %v5094_v32  ;;  %9862 = vst [vmem:[#allocation40_spill] sm:$0xff] %v8311_v18  ;;  %v3201_v32 = vmul.f32 %v8307_v33, %v6523_v52  ;;  %v3249_v29 = vmul.f32 %v8311_v18, %v9856_v60  ;;  %v8336_v43 = vld [vmem:[#allocation2 + $0x32] sm:$0xff]  ;;  %v8338_v59 = vld [vmem:[#allocation2 + $0x3a] sm:$0xff] }
 0x4d8   :  { %v5935_v11 = vpop.eup %5934  ;;  %5960 = vrcp.f32 %v2772_v19  ;;  %v2771_v48 = vadd.f32 1.0, %v5933_v44  ;;  %9863 = vst [vmem:[#allocation45_spill] sm:$0xff] %v8321_v54  ;;  %9865 = vst [vmem:[#allocation46_spill] sm:$0xff] %v8336_v43  ;;  %v8342_v53 = vld [vmem:[#allocation2 + $0x51] sm:$0xff]  ;;  %v3248_v19 = vmul.f32 %v8321_v54, %v9856_v60  ;;  %v3296_v8 = vmul.f32 %v8336_v43, %v6532_v3 }
 0x4d9   :  { %v5937_v36 = vpop.eup %5936  ;;  %5962 = vrcp.f32 %v3109_v58  ;;  %v3108_v41 = vadd.f32 1.0, %v5935_v11  ;;  %9866 = vst [vmem:[#allocation33_spill] sm:$0xff] %v8338_v59  ;;  %9867 = vst [vmem:[#allocation37_spill] sm:$0xff] %v8342_v53  ;;  %v8346_v11 = vld [vmem:[#allocation2 + $0x48] sm:$0xff]  ;;  %v8358_v21 = vmul.f32 %v8338_v59, %v6532_v3 }
 0x4da   :  { %v5939_v26 = vpop.eup %5938  ;;  %5964 = vrcp.f32 %v2771_v48  ;;  %v2774_v13 = vadd.f32 1.0, %v5937_v36  ;;  %v3262_v48 = vadd.f32 %v3246_v31, %v3198_v42  ;;  %v8348_v36 = vadd.f32 %v3247_v47, %v3199_v34  ;;  %v8362_v34 = vld [vmem:[#allocation2 + $0x4a] sm:$0xff]  ;;  %v8364_v31 = vld [vmem:[#allocation2 + $0x52] sm:$0xff] }
 0x4db   :  { %v5941_v2 = vpop.eup %5940  ;;  %5966 = vrcp.f32 %v3108_v41  ;;  %v3111_v1 = vadd.f32 1.0, %v5939_v26  ;;  %v3251_v47 = vmul.f32 %v8342_v53, %v9856_v60  ;;  %v3265_v42 = vadd.f32 %v3249_v29, %v3201_v32  ;;  %9869 = vst [vmem:[#allocation47_spill] sm:$0xff] %v8362_v34  ;;  %9870 = vst [vmem:[#allocation34_spill] sm:$0xff] %v8364_v31  ;;  %v8370_v25 = vld [vmem:[#allocation2 + $0x69] sm:$0xff] }
 0x4dc   :  { %v5943_v51 = vpop.eup %5942  ;;  %5968 = vrcp.f32 %v2774_v13  ;;  %v2773_v5 = vadd.f32 1.0, %v5941_v2  ;;  %v8350_v13 = vld [vmem:[#allocation2 + $0x50] sm:$0xff]  ;;  %v3202_v57 = vmul.f32 %v8346_v11, %v6523_v52  ;;  %9872 = vst [vmem:[#allocation44_spill] sm:$0xff] %v8370_v25  ;;  %v3298_v37 = vmul.f32 %v8362_v34, %v6532_v3 }
 0x4dd   :  { %v5945_v44 = vpop.eup %5944  ;;  %5970 = vrcp.f32 %v3111_v1  ;;  %v3110_v58 = vadd.f32 1.0, %v5943_v51  ;;  %v8352_v2 = vld [vmem:[#allocation2 + $0x49] sm:$0xff]  ;;  %v8372_v59 = vld [vmem:[#allocation2 + $0x60] sm:$0xff]  ;;  %v3203_v32 = vmul.f32 %v8350_v13, %v6523_v52  ;;  %v3253_v49 = vmul.f32 %v8370_v25, %v9856_v60 }
 0x4de   :  { %v5947_v41 = vpop.eup %5946  ;;  %5972 = vrcp.f32 %v2773_v5  ;;  %v2776_v26 = vadd.f32 1.0, %v5945_v44  ;;  %9868 = vst [vmem:[#allocation36_spill] sm:$0xff] %v8352_v2  ;;  %v8366_v38 = vld [vmem:[#allocation2 + $0x68] sm:$0xff]  ;;  %9873 = vst [vmem:[#allocation38_spill] sm:$0xff] %v8372_v59  ;;  %v3204_v34 = vmul.f32 %v8372_v59, %v6523_v52 }
 0x4df   :  { %v5949_v1 = vpop.eup %5948  ;;  %5974 = vrcp.f32 %v3110_v58  ;;  %v3113_v51 = vadd.f32 1.0, %v5947_v41  ;;  %9871 = vst [vmem:[#allocation48_spill] sm:$0xff] %v8366_v38  ;;  %v3264_v58 = vadd.f32 %v3248_v19, %v3200_v17  ;;  %v8376_v29 = vld [vmem:[#allocation2 + $0x61] sm:$0xff]  ;;  %v3299_v17 = vmul.f32 %v8364_v31, %v6532_v3  ;;  %v8390_v15 = vld [vmem:[#allocation2 + $0x6a] sm:$0xff] }
 0x4e0   :  { %v5951_v5 = vpop.eup %5950  ;;  %5976 = vrcp.f32 %v2776_v26  ;;  %v2775_v44 = vadd.f32 1.0, %v5949_v1  ;;  %9874 = vst [vmem:[#allocation41_spill] sm:$0xff] %v8376_v29  ;;  %v3250_v26 = vmul.f32 %v8352_v2, %v9856_v60  ;;  %v8388_v24 = vld [vmem:[#allocation2 + $0x62] sm:$0xff]  ;;  %9876 = vst [vmem:[#allocation31_spill] sm:$0xff] %v8390_v15  ;;  %v3267_v50 = vadd.f32 %v3251_v47, %v3203_v32 }
 0x4e1   :  { %v5953_v41 = vpop.eup %5952  ;;  %5978 = vrcp.f32 %v3113_v51  ;;  %v3112_v20 = vadd.f32 1.0, %v5951_v5  ;;  %v3205_v5 = vmul.f32 %v8366_v38, %v6523_v52  ;;  %9875 = vst [vmem:[#allocation27_spill] sm:$0xff] %v8388_v24  ;;  %v3300_v2 = vmul.f32 %v8388_v24, %v6532_v3 }
 0x4e2   :  { %v5955_v1 = vpop.eup %5954  ;;  %5980 = vrcp.f32 %v2775_v44  ;;  %v2778_v43 = vadd.f32 1.0, %v5953_v41  ;;  %v3266_v62 = vadd.f32 %v3250_v26, %v3202_v57  ;;  %v3311_v47 = vadd.f32 %v8315_v4, %v8348_v36 }
 0x4e3   :  { %v5957_v19 = vpop.eup %5956  ;;  %5982 = vrcp.f32 %v3112_v20  ;;  %v3115_v51 = vadd.f32 1.0, %v5955_v1  ;;  %v3252_v20 = vmul.f32 %v8376_v29, %v9856_v60  ;;  %v3269_v29 = vadd.f32 %v3253_v49, %v3205_v5 }
 0x4e4   :  { %v5959_v44 = vpop.eup %5958  ;;  %5984 = vrcp.f32 %v2778_v43  ;;  %v2777_v41 = vadd.f32 1.0, %v5957_v19  ;;  %v3301_v43 = vmul.f32 %v8390_v15, %v6532_v3  ;;  %v3312_v32 = vadd.f32 %v3296_v8, %v3264_v58 }
 0x4e5   :  { %v5961_v1 = vpop.eup %5960  ;;  %5986 = vrcp.f32 %v3115_v51  ;;  %v3114_v31 = vadd.f32 1.0, %v5959_v44  ;;  %v3310_v51 = vadd.f32 %v8327_v12, %v3262_v48  ;;  %v3314_v49 = vadd.f32 %v3298_v37, %v3266_v62 }
 0x4e6   :  { %v5963_v53 = vpop.eup %5962  ;;  %v2820_v25 = vmul.f32 %v5961_v1, %v8179_v9  ;;  %5988 = vrcp.f32 %v2777_v41  ;;  %v3268_v9 = vadd.f32 %v3252_v20, %v3204_v34  ;;  %v3315_v4 = vadd.f32 %v3299_v17, %v3267_v50 }
 0x4e7   :  { %v5965_v19 = vpop.eup %5964  ;;  %v3157_v52 = vmul.f32 %v5963_v53, %v8185_v46  ;;  %5990 = vrcp.f32 %v3114_v31  ;;  %v3313_v46 = vadd.f32 %v8358_v21, %v3265_v42  ;;  %v9877_v53 = vld [vmem:[#allocation11_spill] sm:$0xff]  ;;  %v8440_v58 = vadd.f32 %v3301_v43, %v3269_v29 }
 0x4e8   :  { %v5967_v44 = vpop.eup %5966  ;;  %2836 = vst.msk [vmem:[#allocation2 + $0x81] sm:$0xff] %vm54_vm1, %v2820_v25  ;;  %v2819_v57 = vmul.f32 %v5965_v19, %v8191_v16  ;;  %v3340_v12 = vmul.f32 %v8290_v35, %v9877_v53  ;;  %v3341_v16 = vmul.f32 %v8295_v61, %v9877_v53  ;;  %v3342_v8 = vmul.f32 %v8317_v6, %v9877_v53 }
 0x4e9   :  { %v5969_v26 = vpop.eup %5968  ;;  %3173 = vst.msk [vmem:[#allocation2 + $0x141] sm:$0xff] %vm54_vm1, %v3157_v52  ;;  %v3156_v41 = vmul.f32 %v5967_v44, %v8197_v14  ;;  %v3343_v52 = vmul.f32 %v8307_v33, %v9877_v53  ;;  %v3344_v62 = vmul.f32 %v8346_v11, %v9877_v53  ;;  %v3346_v35 = vmul.f32 %v8372_v59, %v9877_v53 }
 0x4ea   :  { %v5971_v48 = vpop.eup %5970  ;;  %2835 = vst.msk [vmem:[#allocation2 + $0x79] sm:$0xff] %vm54_vm1, %v2819_v57  ;;  %v2822_v25 = vmul.f32 %v5969_v26, %v8204_v27  ;;  %v3345_v27 = vmul.f32 %v8350_v13, %v9877_v53  ;;  %v3347_v36 = vmul.f32 %v8366_v38, %v9877_v53  ;;  %v8438_v31 = vadd.f32 %v3300_v2, %v3268_v9  ;;  %v9880_v26 = vld [vmem:[#allocation36_spill] sm:$0xff] }
 0x4eb   :  { %v5973_v14 = vpop.eup %5972  ;;  %3172 = vst.msk [vmem:[#allocation2 + $0x139] sm:$0xff] %vm54_vm1, %v3156_v41  ;;  %v3159_v21 = vmul.f32 %v5971_v48, %v8208_v23  ;;  %v8434_v23 = vmul.f32 %v8292_v55, %v6581_v7  ;;  %v3356_v5 = vadd.f32 %v3340_v12, %v8299_v30  ;;  %v3357_v17 = vadd.f32 %v3341_v16, %v8305_v63  ;;  %v9881_v41 = vld [vmem:[#allocation37_spill] sm:$0xff] }
 0x4ec   :  { %v5975_v61 = vpop.eup %5974  ;;  %2838 = vst.msk [vmem:[#allocation2 + $0x99] sm:$0xff] %vm54_vm1, %v2822_v25  ;;  %v2821_v37 = vmul.f32 %v5973_v14, %v8213_v45  ;;  %v3358_v55 = vadd.f32 %v3342_v8, %v3310_v51  ;;  %v8446_v20 = vadd.f32 %v3343_v52, %v3311_v47  ;;  %v8450_v2 = vadd.f32 %v3344_v62, %v3312_v32  ;;  %v9883_v48 = vld [vmem:[#allocation9_spill] sm:$0xff] }
 0x4ed   :  { %v5977_v42 = vpop.eup %5976  ;;  %3175 = vst.msk [vmem:[#allocation2 + $0x159] sm:$0xff] %vm54_vm1, %v3159_v21  ;;  %v3158_v34 = vmul.f32 %v5975_v61, %v8218_v39  ;;  %v8452_v29 = vadd.f32 %v3345_v27, %v3313_v46  ;;  %v8454_v30 = vadd.f32 %v3346_v35, %v3314_v49  ;;  %v8460_v19 = vadd.f32 %v3347_v36, %v3315_v4  ;;  %v9885_v21 = vld [vmem:[#allocation24_spill] sm:$0xff]  ;;  %v9886_v61 = vld [vmem:[#allocation41_spill] sm:$0xff] }
 0x4ee   :  { %v5979_v45 = vpop.eup %5978  ;;  %2837 = vst.msk [vmem:[#allocation2 + $0x91] sm:$0xff] %vm54_vm1, %v2821_v37  ;;  %v2824_v50 = vmul.f32 %v5977_v42, %v8224_v22  ;;  %v3388_v51 = vmul.f32 %v8297_v40, %v6574_v56  ;;  %v3391_v32 = vmul.f32 %v8311_v18, %v6574_v56  ;;  %v8478_v40 = vmul.f32 %v9880_v26, %v6574_v56  ;;  %v9887_v4 = vld [vmem:[#allocation44_spill] sm:$0xff] }
 0x4ef   :  { %v5981_v1 = vpop.eup %5980  ;;  %3174 = vst.msk [vmem:[#allocation2 + $0x151] sm:$0xff] %vm54_vm1, %v3158_v34  ;;  %v3161_v39 = vmul.f32 %v5979_v45, %v8230_v10  ;;  %v8458_v63 = vld [vmem:[#allocation2 + $0x81] sm:$0xff]  ;;  %v3390_v10 = vmul.f32 %v8321_v54, %v6574_v56  ;;  %v8482_v46 = vmul.f32 %v9881_v41, %v6574_v56  ;;  %v3394_v37 = vmul.f32 %v9886_v61, %v6574_v56 }
 0x4f0   :  { %v5983_v43 = vpop.eup %5982  ;;  %2840 = vst.msk [vmem:[#allocation2 + $0xb1] sm:$0xff] %vm54_vm1, %v2824_v50  ;;  %v2823_v22 = vmul.f32 %v5981_v1, %v8236_v28  ;;  %v3255_v35 = vmul.f32 %v8458_v63, %v9856_v60  ;;  %v8504_v36 = vmul.f32 %v9887_v4, %v6574_v56  ;;  %v9888_v34 = vld [vmem:[#allocation26_spill] sm:$0xff]  ;;  %v3397_v59 = vmul.f32 %v8458_v63, %v6574_v56 }
 0x4f1   :  { %v5985_v44 = vpop.eup %5984  ;;  %3177 = vst.msk [vmem:[#allocation2 + $0x171] sm:$0xff] %vm54_vm1, %v3161_v39  ;;  %v3160_v57 = vmul.f32 %v5983_v43, %v8242_v0  ;;  %v8468_v9 = vld [vmem:[#allocation2 + $0x78] sm:$0xff]  ;;  %v8470_v47 = vld [vmem:[#allocation2 + $0x80] sm:$0xff]  ;;  %v9882_v0 = vld [vmem:[#allocation22_spill] sm:$0xff]  ;;  %v8512_v43 = vadd.f32 %v3388_v51, %v3356_v5 }
 0x4f2   :  { %9878 = vst [vmem:[#allocation15_spill] sm:$0xff] %v8468_v9  ;;  %9879 = vst [vmem:[#allocation32_spill] sm:$0xff] %v8470_v47  ;;  %v8472_v28 = vld [vmem:[#allocation2 + $0x79] sm:$0xff]  ;;  %v5987_v49 = vpop.eup %5986  ;;  %v2826_v12 = vmul.f32 %v5985_v44, %v9882_v0  ;;  %v3206_v25 = vmul.f32 %v8468_v9, %v9883_v48  ;;  %v3207_v16 = vmul.f32 %v8470_v47, %v9883_v48  ;;  %v8508_v1 = vld [vmem:[#allocation2 + $0x82] sm:$0xff] }
 0x4f3   :  { %2839 = vst.msk [vmem:[#allocation2 + $0xa9] sm:$0xff] %vm54_vm1, %v2823_v22  ;;  %v3254_v8 = vmul.f32 %v8472_v28, %v9856_v60  ;;  %v8492_v52 = vld [vmem:[#allocation2 + $0x7a] sm:$0xff]  ;;  %v5989_v14 = vpop.eup %5988  ;;  %3176 = vst.msk [vmem:[#allocation2 + $0x169] sm:$0xff] %vm54_vm1, %v3160_v57  ;;  %v3163_v62 = vmul.f32 %v5987_v49, %v9885_v21  ;;  %v9891_v22 = vld [vmem:[#allocation35_spill] sm:$0xff] }
 0x4f4   :  { %9884 = vst [vmem:[#allocation17_spill] sm:$0xff] %v8492_v52  ;;  %v8496_v27 = vld [vmem:[#allocation2 + $0x99] sm:$0xff]  ;;  %v5991_v42 = vpop.eup %5990  ;;  %2842 = vst.msk [vmem:[#allocation2 + $0xc9] sm:$0xff] %vm54_vm1, %v2826_v12  ;;  %v2825_v45 = vmul.f32 %v5989_v14, %v9888_v34  ;;  %v8515_v44 = vadd.f32 %v9891_v22, %v3357_v17  ;;  %v9892_v57 = vld [vmem:[#allocation42_spill] sm:$0xff]  ;;  %v8527_v14 = vadd.f32 %v3390_v10, %v3358_v55 }
 0x4f5   :  { %v3270_v50 = vadd.f32 %v3254_v8, %v3206_v25  ;;  %9889 = vst [vmem:[#allocation49_spill] sm:$0xff] %v8508_v1  ;;  %v8510_v39 = vld [vmem:[#allocation2 + $0x9a] sm:$0xff]  ;;  %3179 = vst.msk [vmem:[#allocation2 + $0x189] sm:$0xff] %vm54_vm1, %v3163_v62  ;;  %v3162_v49 = vmul.f32 %v5991_v42, %v9892_v57  ;;  %v8519_v0 = vld [vmem:[#allocation2 + $0x90] sm:$0xff]  ;;  %v3271_v25 = vadd.f32 %v3255_v35, %v3207_v16 }
 0x4f6   :  { %9890 = vst [vmem:[#allocation20_spill] sm:$0xff] %v8510_v39  ;;  %9893 = vst [vmem:[#allocation19_spill] sm:$0xff] %v8519_v0  ;;  %v8521_v21 = vld [vmem:[#allocation2 + $0x98] sm:$0xff]  ;;  %v3302_v8 = vmul.f32 %v8492_v52, %v6532_v3  ;;  %v3208_v5 = vmul.f32 %v8519_v0, %v9883_v48  ;;  %v3257_v62 = vmul.f32 %v8496_v27, %v9856_v60 }
 0x4f7   :  { %9894 = vst [vmem:[#allocation28_spill] sm:$0xff] %v8521_v21  ;;  %v8523_v12 = vld [vmem:[#allocation2 + $0x91] sm:$0xff]  ;;  %2841 = vst.msk [vmem:[#allocation2 + $0xc1] sm:$0xff] %vm54_vm1, %v2825_v45  ;;  %v3209_v17 = vmul.f32 %v8521_v21, %v9883_v48  ;;  %v3303_v10 = vmul.f32 %v8508_v1, %v6532_v3  ;;  %v3348_v35 = vmul.f32 %v8468_v9, %v9877_v53 }
 0x4f8   :  { %v3256_v51 = vmul.f32 %v8523_v12, %v9856_v60  ;;  %v8538_v16 = vld [vmem:[#allocation2 + $0x92] sm:$0xff]  ;;  %3178 = vst.msk [vmem:[#allocation2 + $0x181] sm:$0xff] %vm54_vm1, %v3162_v49  ;;  %v3349_v42 = vmul.f32 %v8470_v47, %v9877_v53  ;;  %v8550_v34 = vadd.f32 %v3391_v32, %v8446_v20  ;;  %v3305_v49 = vmul.f32 %v8510_v39, %v6532_v3 }
 0x4f9   :  { %9895 = vst [vmem:[#allocation30_spill] sm:$0xff] %v8538_v16  ;;  %v8541_v55 = vld [vmem:[#allocation2 + $0xb1] sm:$0xff]  ;;  %v3273_v22 = vadd.f32 %v3257_v62, %v3209_v17  ;;  %v3318_v4 = vadd.f32 %v3302_v8, %v3270_v50  ;;  %v3304_v18 = vmul.f32 %v8538_v16, %v6532_v3  ;;  %v3319_v54 = vadd.f32 %v3303_v10, %v3271_v25 }
 0x4fa   :  { %9896 = vst [vmem:[#allocation29_spill] sm:$0xff] %v8541_v55  ;;  %v3272_v45 = vadd.f32 %v3256_v51, %v3208_v5  ;;  %v8552_v57 = vld [vmem:[#allocation2 + $0xb2] sm:$0xff]  ;;  %v8556_v61 = vld [vmem:[#allocation2 + $0xa8] sm:$0xff]  ;;  %v3350_v20 = vmul.f32 %v8519_v0, %v9877_v53  ;;  %v3351_v32 = vmul.f32 %v8521_v21, %v9877_v53  ;;  %v3259_v17 = vmul.f32 %v8541_v55, %v9856_v60 }
 0x4fb   :  { %9897 = vst [vmem:[#allocation39_spill] sm:$0xff] %v8552_v57  ;;  %v8558_v41 = vld [vmem:[#allocation2 + $0xb0] sm:$0xff]  ;;  %v3210_v5 = vmul.f32 %v8556_v61, %v9883_v48  ;;  %v3307_v62 = vmul.f32 %v8552_v57, %v6532_v3  ;;  %v3321_v21 = vadd.f32 %v3305_v49, %v3273_v22 }
 0x4fc   :  { %v8560_v26 = vld [vmem:[#allocation2 + $0xa9] sm:$0xff]  ;;  %v3211_v50 = vmul.f32 %v8558_v41, %v9883_v48  ;;  %v3320_v10 = vadd.f32 %v3304_v18, %v3272_v45  ;;  %v3352_v48 = vmul.f32 %v8556_v61, %v9877_v53  ;;  %v3353_v9 = vmul.f32 %v8558_v41, %v9877_v53 }
 0x4fd   :  { %9898 = vst [vmem:[#allocation43_spill] sm:$0xff] %v8560_v26  ;;  %v3258_v8 = vmul.f32 %v8560_v26, %v9856_v60  ;;  %v8576_v51 = vld [vmem:[#allocation2 + $0xaa] sm:$0xff]  ;;  %v3409_v18 = vadd.f32 %v8482_v46, %v8452_v29  ;;  %v3410_v45 = vadd.f32 %v3394_v37, %v8454_v30  ;;  %v3366_v46 = vadd.f32 %v3350_v20, %v3318_v4 }
 0x4fe   :  { %9899 = vst [vmem:[#allocation23_spill] sm:$0xff] %v8576_v51  ;;  %v3306_v25 = vmul.f32 %v8576_v51, %v6532_v3  ;;  %v3275_v47 = vadd.f32 %v3259_v17, %v3211_v50  ;;  %v8586_v38 = vld [vmem:[#allocation2 + $0xc0] sm:$0xff]  ;;  %v8588_v60 = vld [vmem:[#allocation2 + $0xc8] sm:$0xff]  ;;  %v3408_v3 = vadd.f32 %v8478_v40, %v8450_v2  ;;  %v3365_v17 = vadd.f32 %v3349_v42, %v8440_v58 }
 0x4ff   :  { %v3274_v0 = vadd.f32 %v3258_v8, %v3210_v5  ;;  %v3354_v5 = vmul.f32 %v8586_v38, %v9877_v53  ;;  %v3355_v50 = vmul.f32 %v8588_v60, %v9877_v53  ;;  %v3364_v8 = vadd.f32 %v3348_v35, %v8438_v31  ;;  %v9900_v40 = vld [vmem:[#allocation50_spill] sm:$0xff]  ;;  %v9905_v53 = vld [vmem:[#allocation33_spill] sm:$0xff] }
 0x500   :  { %v3323_v49 = vadd.f32 %v3307_v62, %v3275_v47  ;;  %v3411_v2 = vadd.f32 %v8504_v36, %v8460_v19  ;;  %v3436_v29 = vmul.f32 %v9900_v40, %v6581_v7  ;;  %v3367_v30 = vadd.f32 %v3351_v32, %v3319_v54  ;;  %v9902_v19 = vld [vmem:[#allocation46_spill] sm:$0xff] }
 0x501   :  { %v3322_v22 = vadd.f32 %v3306_v25, %v3274_v0  ;;  %v3368_v37 = vadd.f32 %v3352_v48, %v3320_v10  ;;  %v3369_v47 = vadd.f32 %v3353_v9, %v3321_v21  ;;  %v8607_v0 = vld [vmem:[#allocation2 + $0xc1] sm:$0xff]  ;;  %v8609_v25 = vld [vmem:[#allocation2 + $0xc9] sm:$0xff]  ;;  %v3396_v31 = vmul.f32 %v8472_v28, %v6574_v56 }
 0x502   :  { %9901 = vst [vmem:[#allocation25_spill] sm:$0xff] %v8607_v0  ;;  %v3398_v58 = vmul.f32 %v8523_v12, %v6574_v56  ;;  %v3438_v36 = vmul.f32 %v9902_v19, %v6581_v7  ;;  %v3371_v35 = vadd.f32 %v3355_v50, %v3323_v49  ;;  %v3399_v54 = vmul.f32 %v8496_v27, %v6574_v56  ;;  %v8627_v50 = vld [vmem:[#allocation2 + $0xc2] sm:$0xff]  ;;  %v8629_v40 = vld [vmem:[#allocation2 + $0xca] sm:$0xff] }
 0x503   :  { %v3370_v62 = vadd.f32 %v3354_v5, %v3322_v22  ;;  %v3400_v9 = vmul.f32 %v8560_v26, %v6574_v56  ;;  %v3401_v48 = vmul.f32 %v8541_v55, %v6574_v56  ;;  %v3402_v4 = vmul.f32 %v8607_v0, %v6574_v56  ;;  %9903 = vst [vmem:[#allocation22_spill] sm:$0xff] %v8627_v50  ;;  %v9906_v55 = vld [vmem:[#allocation47_spill] sm:$0xff]  ;;  %v9907_v26 = vld [vmem:[#allocation34_spill] sm:$0xff] }
 0x504   :  { %v3403_v21 = vmul.f32 %v8609_v25, %v6574_v56  ;;  %v3412_v42 = vadd.f32 %v3396_v31, %v3364_v8  ;;  %v3413_v20 = vadd.f32 %v3397_v59, %v3365_v17  ;;  %v3414_v32 = vadd.f32 %v3398_v58, %v3366_v46  ;;  %9904 = vst [vmem:[#allocation24_spill] sm:$0xff] %v8629_v40 }
 0x505   :  { %v3415_v10 = vadd.f32 %v3399_v54, %v3367_v30  ;;  %v3416_v22 = vadd.f32 %v3400_v9, %v3368_v37  ;;  %v3417_v49 = vadd.f32 %v3401_v48, %v3369_v47  ;;  %v3418_v5 = vadd.f32 %v3402_v4, %v3370_v62 }
 0x506   :  { %v3439_v19 = vmul.f32 %v9905_v53, %v6581_v7  ;;  %v3440_v0 = vmul.f32 %v9906_v55, %v6581_v7  ;;  %v3441_v56 = vmul.f32 %v9907_v26, %v6581_v7  ;;  %v3419_v8 = vadd.f32 %v3403_v21, %v3371_v35 }
 0x507   :  { %v3442_v59 = vmul.f32 %v8388_v24, %v6581_v7  ;;  %v3443_v17 = vmul.f32 %v8390_v15, %v6581_v7  ;;  %v3444_v46 = vmul.f32 %v8492_v52, %v6581_v7  ;;  %v3445_v30 = vmul.f32 %v8508_v1, %v6581_v7 }
 0x508   :  { %v3446_v37 = vmul.f32 %v8538_v16, %v6581_v7  ;;  %v3447_v47 = vmul.f32 %v8510_v39, %v6581_v7  ;;  %v3448_v62 = vmul.f32 %v8576_v51, %v6581_v7  ;;  %v3449_v31 = vmul.f32 %v8552_v57, %v6581_v7 }
 0x509   :  { %v3450_v58 = vmul.f32 %v8627_v50, %v6581_v7  ;;  %v3451_v35 = vmul.f32 %v8629_v40, %v6581_v7  ;;  %v3452_v54 = vadd.f32 %v3436_v29, %v8512_v43  ;;  %v3453_v9 = vadd.f32 %v8434_v23, %v8515_v44  ;;  %v9908_v43 = vld [vmem:[#allocation14_spill] sm:$0xff]  ;;  %v8664_v23 = vld [vmem:[#allocation2 + $0xd8] sm:$0xff]  ;;  %v8666_v44 = vld [vmem:[#allocation2 + $0xe0] sm:$0xff] }
 0x50a   :  { %v3454_v48 = vadd.f32 %v3438_v36, %v8527_v14  ;;  %v3455_v4 = vadd.f32 %v3439_v19, %v8550_v34  ;;  %v3456_v21 = vadd.f32 %v3440_v0, %v3408_v3  ;;  %v3457_v51 = vadd.f32 %v3441_v56, %v3409_v18  ;;  %9909 = vst [vmem:[#allocation26_spill] sm:$0xff] %v8664_v23  ;;  %v9911_v34 = vld [vmem:[#allocation38_spill] sm:$0xff]  ;;  %v9914_v19 = vld [vmem:[#allocation32_spill] sm:$0xff] }
 0x50b   :  { %v3458_v39 = vadd.f32 %v3442_v59, %v3410_v45  ;;  %v3459_v16 = vadd.f32 %v3443_v17, %v3411_v2  ;;  %v3460_v57 = vadd.f32 %v3444_v46, %v3412_v42  ;;  %v3461_v1 = vadd.f32 %v3445_v30, %v3413_v20  ;;  %9910 = vst [vmem:[#allocation35_spill] sm:$0xff] %v8666_v44  ;;  %v9912_v45 = vld [vmem:[#allocation48_spill] sm:$0xff] }
 0x50c   :  { %v3462_v52 = vadd.f32 %v3446_v37, %v3414_v32  ;;  %v3463_v50 = vadd.f32 %v3447_v47, %v3415_v10  ;;  %v3464_v15 = vadd.f32 %v3448_v62, %v3416_v22  ;;  %v3465_v24 = vadd.f32 %v3449_v31, %v3417_v49 }
 0x50d   :  { %v3466_v7 = vadd.f32 %v3450_v58, %v3418_v5  ;;  %v3467_v40 = vadd.f32 %v3451_v35, %v3419_v8  ;;  %v3484_v29 = vmul.f32 %v8317_v6, %v9908_v43  ;;  %v3485_v3 = vmul.f32 %v8307_v33, %v9908_v43  ;;  %v9913_v6 = vld [vmem:[#allocation15_spill] sm:$0xff] }
 0x50e   :  { %v3486_v56 = vmul.f32 %v8346_v11, %v9908_v43  ;;  %v3487_v14 = vmul.f32 %v8350_v13, %v9908_v43  ;;  %v3488_v18 = vmul.f32 %v9911_v34, %v9908_v43  ;;  %v3489_v2 = vmul.f32 %v9912_v45, %v9908_v43  ;;  %v9915_v33 = vld [vmem:[#allocation19_spill] sm:$0xff]  ;;  %v9916_v11 = vld [vmem:[#allocation28_spill] sm:$0xff] }
 0x50f   :  { %v3490_v0 = vmul.f32 %v9913_v6, %v9908_v43  ;;  %v3491_v36 = vmul.f32 %v9914_v19, %v9908_v43  ;;  %v3492_v42 = vmul.f32 %v9915_v33, %v9908_v43  ;;  %v3493_v20 = vmul.f32 %v9916_v11, %v9908_v43  ;;  %v9917_v19 = vld [vmem:[#allocation16_spill] sm:$0xff]  ;;  %v9918_v33 = vld [vmem:[#allocation45_spill] sm:$0xff] }
 0x510   :  { %v3494_v13 = vmul.f32 %v8556_v61, %v9908_v43  ;;  %v3495_v32 = vmul.f32 %v8558_v41, %v9908_v43  ;;  %v3496_v10 = vmul.f32 %v8586_v38, %v9908_v43  ;;  %v3497_v22 = vmul.f32 %v8588_v60, %v9908_v43 }
 0x511   :  { %v3498_v49 = vmul.f32 %v8664_v23, %v9908_v43  ;;  %v3499_v5 = vmul.f32 %v8666_v44, %v9908_v43  ;;  %v3500_v8 = vadd.f32 %v3484_v29, %v3452_v54  ;;  %v3501_v59 = vadd.f32 %v3485_v3, %v3453_v9  ;;  %v8700_v43 = vld [vmem:[#allocation2 + $0xd9] sm:$0xff]  ;;  %v8702_v54 = vld [vmem:[#allocation2 + $0xe1] sm:$0xff] }
 0x512   :  { %v3502_v17 = vadd.f32 %v3486_v56, %v3454_v48  ;;  %v3503_v46 = vadd.f32 %v3487_v14, %v3455_v4  ;;  %v3504_v61 = vadd.f32 %v3488_v18, %v3456_v21  ;;  %v3505_v30 = vadd.f32 %v3489_v2, %v3457_v51  ;;  %9919 = vst [vmem:[#allocation42_spill] sm:$0xff] %v8700_v43  ;;  %v9921_v9 = vld [vmem:[#allocation40_spill] sm:$0xff]  ;;  %v9926_v21 = vld [vmem:[#allocation43_spill] sm:$0xff]  ;;  %v9927_v3 = vld [vmem:[#allocation29_spill] sm:$0xff] }
 0x513   :  { %v3506_v37 = vadd.f32 %v3490_v0, %v3458_v39  ;;  %v3507_v41 = vadd.f32 %v3491_v36, %v3459_v16  ;;  %v3508_v47 = vadd.f32 %v3492_v42, %v3460_v57  ;;  %v3509_v62 = vadd.f32 %v3493_v20, %v3461_v1  ;;  %9920 = vst [vmem:[#allocation50_spill] sm:$0xff] %v8702_v54  ;;  %v9922_v39 = vld [vmem:[#allocation36_spill] sm:$0xff]  ;;  %v9928_v14 = vld [vmem:[#allocation25_spill] sm:$0xff] }
 0x514   :  { %v3510_v31 = vadd.f32 %v3494_v13, %v3462_v52  ;;  %v3511_v58 = vadd.f32 %v3495_v32, %v3463_v50  ;;  %v3512_v35 = vadd.f32 %v3496_v10, %v3464_v15  ;;  %v3513_v34 = vadd.f32 %v3497_v22, %v3465_v24  ;;  %v9923_v52 = vld [vmem:[#allocation37_spill] sm:$0xff]  ;;  %v9925_v24 = vld [vmem:[#allocation44_spill] sm:$0xff] }
 0x515   :  { %v3514_v45 = vadd.f32 %v3498_v49, %v3466_v7  ;;  %v3515_v6 = vadd.f32 %v3499_v5, %v3467_v40  ;;  %v3532_v11 = vmul.f32 %v9918_v33, %v9917_v19  ;;  %v3533_v51 = vmul.f32 %v9921_v9, %v9917_v19  ;;  %v9924_v15 = vld [vmem:[#allocation41_spill] sm:$0xff]  ;;  %v9929_v49 = vld [vmem:[#allocation18_spill] sm:$0xff] }
 0x516   :  { %v3534_v16 = vmul.f32 %v9922_v39, %v9917_v19  ;;  %v3535_v1 = vmul.f32 %v9923_v52, %v9917_v19  ;;  %v3536_v7 = vmul.f32 %v9924_v15, %v9917_v19  ;;  %v3537_v57 = vmul.f32 %v9925_v24, %v9917_v19  ;;  %v9930_v5 = vld [vmem:[#allocation46_spill] sm:$0xff]  ;;  %v9937_v24 = vld [vmem:[#allocation23_spill] sm:$0xff] }
 0x517   :  { %v3538_v50 = vmul.f32 %v8472_v28, %v9917_v19  ;;  %v3539_v40 = vmul.f32 %v8458_v63, %v9917_v19  ;;  %v3540_v48 = vmul.f32 %v8523_v12, %v9917_v19  ;;  %v3541_v4 = vmul.f32 %v8496_v27, %v9917_v19  ;;  %v9935_v15 = vld [vmem:[#allocation30_spill] sm:$0xff] }
 0x518   :  { %v3542_v29 = vmul.f32 %v9926_v21, %v9917_v19  ;;  %v3543_v56 = vmul.f32 %v9927_v3, %v9917_v19  ;;  %v3544_v18 = vmul.f32 %v9928_v14, %v9917_v19  ;;  %v3545_v28 = vmul.f32 %v8609_v25, %v9917_v19  ;;  %v9939_v3 = vld [vmem:[#allocation39_spill] sm:$0xff] }
 0x519   :  { %v3546_v63 = vmul.f32 %v8700_v43, %v9917_v19  ;;  %v3547_v12 = vmul.f32 %v8702_v54, %v9917_v19  ;;  %v3548_v2 = vadd.f32 %v3532_v11, %v3500_v8  ;;  %v3549_v27 = vadd.f32 %v3533_v51, %v3501_v59  ;;  %v9932_v11 = vld [vmem:[#allocation31_spill] sm:$0xff] }
 0x51a   :  { %v3550_v0 = vadd.f32 %v3534_v16, %v3502_v17  ;;  %v3551_v36 = vadd.f32 %v3535_v1, %v3503_v46  ;;  %v3552_v42 = vadd.f32 %v3536_v7, %v3504_v61  ;;  %v3553_v20 = vadd.f32 %v3537_v57, %v3505_v30  ;;  %v9931_v46 = vld [vmem:[#allocation27_spill] sm:$0xff]  ;;  %v8750_v1 = vld [vmem:[#allocation2 + $0xda] sm:$0xff] }
 0x51b   :  { %v3554_v13 = vadd.f32 %v3538_v50, %v3506_v37  ;;  %v3555_v32 = vadd.f32 %v3539_v40, %v3507_v41  ;;  %v3556_v10 = vadd.f32 %v3540_v48, %v3508_v47  ;;  %v3557_v22 = vadd.f32 %v3541_v4, %v3509_v62  ;;  %v8763_v48 = vld [vmem:[%s9554_s4] ss:$0 sm:$0xff] }
 0x51c   :  { %v3580_v33 = vmul.f32 %v9930_v5, %v9929_v49  ;;  %v3581_v9 = vmul.f32 %v9905_v53, %v9929_v49  ;;  %v3582_v39 = vmul.f32 %v9906_v55, %v9929_v49  ;;  %v3558_v52 = vadd.f32 %v3542_v29, %v3510_v31  ;;  %v9933_v55 = vld [vmem:[#allocation17_spill] sm:$0xff]  ;;  %9938 = vst [vmem:[#allocation33_spill] sm:$0xff] %v8763_v48 }
 0x51d   :  { %v3559_v8 = vadd.f32 %v3543_v56, %v3511_v58  ;;  %v3560_v59 = vadd.f32 %v3544_v18, %v3512_v35  ;;  %v3583_v17 = vmul.f32 %v9907_v26, %v9929_v49  ;;  %v3584_v61 = vmul.f32 %v9931_v46, %v9929_v49  ;;  %v9934_v58 = vld [vmem:[#allocation49_spill] sm:$0xff]  ;;  %v9940_v18 = vld [vmem:[#allocation22_spill] sm:$0xff] }
 0x51e   :  { %v3596_v30 = vadd.f32 %v3580_v33, %v3548_v2  ;;  %v3597_v37 = vadd.f32 %v3581_v9, %v3549_v27  ;;  %v3598_v41 = vadd.f32 %v3582_v39, %v3550_v0  ;;  %v3561_v47 = vadd.f32 %v3545_v28, %v3513_v34  ;;  %v9936_v34 = vld [vmem:[#allocation20_spill] sm:$0xff] }
 0x51f   :  { %v3562_v62 = vadd.f32 %v3546_v63, %v3514_v45  ;;  %v3585_v53 = vmul.f32 %v9932_v11, %v9929_v49  ;;  %v3599_v51 = vadd.f32 %v3583_v17, %v3551_v36  ;;  %v3563_v16 = vadd.f32 %v3547_v12, %v3515_v6  ;;  %v8758_v6 = vld [vmem:[#allocation2 + $0xe2] sm:$0xff]  ;;  %v9941_v2 = vld [vmem:[#allocation24_spill] sm:$0xff] }
 0x520   :  { %v3586_v31 = vmul.f32 %v9933_v55, %v9929_v49  ;;  %v3587_v35 = vmul.f32 %v9934_v58, %v9929_v49  ;;  %v3600_v26 = vadd.f32 %v3584_v61, %v3552_v42  ;;  %v3588_v7 = vmul.f32 %v9935_v15, %v9929_v49 }
 0x521   :  { %v3589_v45 = vmul.f32 %v9936_v34, %v9929_v49  ;;  %v3590_v57 = vmul.f32 %v9937_v24, %v9929_v49  ;;  %v3601_v50 = vadd.f32 %v3585_v53, %v3553_v20  ;;  %v8766_v4 = vadd.f32 %v8763_v48, %v3596_v30  ;;  %v9943_v24 = vld [vmem:[#allocation9_spill] sm:$0xff] }
 0x522   :  { %v3602_v40 = vadd.f32 %v3586_v31, %v3554_v13  ;;  %v8769_v21 = vadd.f32 %v8763_v48, %v3597_v37  ;;  %v8772_v29 = vadd.f32 %v8763_v48, %v3598_v41  ;;  %v3591_v56 = vmul.f32 %v9939_v3, %v9929_v49  ;;  %v8843_v3 = vld [vmem:[#allocation2 + $0x108] sm:$0xff] }
 0x523   :  { %v3592_v28 = vmul.f32 %v9940_v18, %v9929_v49  ;;  %v3603_v63 = vadd.f32 %v3587_v35, %v3555_v32  ;;  %v8779_v12 = vadd.f32 %v8763_v48, %v3599_v51  ;;  %v3593_v27 = vmul.f32 %v9941_v2, %v9929_v49  ;;  %9945 = vst [vmem:[#allocation38_spill] sm:$0xff] %v8843_v3 }
 0x524   :  { %v3594_v0 = vmul.f32 %v8750_v1, %v9929_v49  ;;  %v3604_v36 = vadd.f32 %v3588_v7, %v3556_v10  ;;  %v8786_v42 = vadd.f32 %v8763_v48, %v3600_v26  ;;  %v3595_v20 = vmul.f32 %v8758_v6, %v9929_v49 }
 0x525   :  { %v3605_v13 = vadd.f32 %v3589_v45, %v3557_v22  ;;  %v3606_v5 = vadd.f32 %v3590_v57, %v3558_v52  ;;  %v8791_v32 = vadd.f32 %v8763_v48, %v3601_v50  ;;  %v8794_v33 = vadd.f32 %v8763_v48, %v3602_v40  ;;  %v8836_v45 = vld [vmem:[#allocation2 + $0xf0] sm:$0xff]  ;;  %v8841_v40 = vld [vmem:[#allocation2 + $0xf8] sm:$0xff] }
 0x526   :  { %v5096_v9 = vmul.f32 -1.442695, %v8766_v4  ;;  %v5097_v39 = vmul.f32 -1.442695, %v8769_v21  ;;  %v5098_v10 = vmul.f32 -1.442695, %v8772_v29  ;;  %v3607_v17 = vadd.f32 %v3591_v56, %v3559_v8 }
 0x527   :  { %v3608_v46 = vadd.f32 %v3592_v28, %v3560_v59  ;;  %v8800_v61 = vadd.f32 %v8763_v48, %v3603_v63  ;;  %v5099_v22 = vmul.f32 -1.442695, %v8779_v12  ;;  %v3609_v52 = vadd.f32 %v3593_v27, %v3561_v47  ;;  %9942 = vst [vmem:[#allocation47_spill] sm:$0xff] %v8836_v45  ;;  %9944 = vst [vmem:[#allocation34_spill] sm:$0xff] %v8841_v40  ;;  %v8845_v56 = vld [vmem:[#allocation2 + $0x110] sm:$0xff]  ;;  %v9947_v63 = vld [vmem:[#allocation8_spill] sm:$0xff] }
 0x528   :  { %v8804_v30 = vadd.f32 %v8763_v48, %v3604_v36  ;;  %5992 = vpow2.f32 %v5096_v9  ;;  %v5100_v37 = vmul.f32 -1.442695, %v8786_v42  ;;  %v3610_v41 = vadd.f32 %v3594_v0, %v3562_v62  ;;  %9946 = vst [vmem:[#allocation48_spill] sm:$0xff] %v8845_v56  ;;  %v8853_v36 = vld [vmem:[#allocation2 + $0x120] sm:$0xff] }
 0x529   :  { %v8808_v11 = vadd.f32 %v8763_v48, %v3605_v13  ;;  %5994 = vpow2.f32 %v5097_v39  ;;  %v5101_v8 = vmul.f32 -1.442695, %v8791_v32  ;;  %v3611_v59 = vadd.f32 %v3595_v20, %v3563_v16  ;;  %9948 = vst [vmem:[#allocation15_spill] sm:$0xff] %v8853_v36  ;;  %v8859_v13 = vld [vmem:[#allocation2 + $0x128] sm:$0xff]  ;;  %v8873_v39 = vld [vmem:[#allocation2 + $0x140] sm:$0xff] }
 0x52a   :  { %v8812_v53 = vadd.f32 %v8763_v48, %v3606_v5  ;;  %5996 = vpow2.f32 %v5098_v10  ;;  %v5102_v47 = vmul.f32 -1.442695, %v8794_v33  ;;  %v8816_v51 = vadd.f32 %v8763_v48, %v3607_v17  ;;  %9949 = vst [vmem:[#allocation32_spill] sm:$0xff] %v8859_v13  ;;  %v8861_v5 = vld [vmem:[#allocation2 + $0x138] sm:$0xff]  ;;  %9951 = vst [vmem:[#allocation28_spill] sm:$0xff] %v8873_v39  ;;  %v8875_v10 = vld [vmem:[#allocation2 + $0x150] sm:$0xff] }
 0x52b   :  { %5998 = vpow2.f32 %v5099_v22  ;;  %v5103_v55 = vmul.f32 -1.442695, %v8800_v61  ;;  %v8820_v62 = vadd.f32 %v8763_v48, %v3608_v46  ;;  %v5104_v31 = vmul.f32 -1.442695, %v8804_v30  ;;  %9950 = vst [vmem:[#allocation19_spill] sm:$0xff] %v8861_v5  ;;  %9952 = vst [vmem:[#allocation45_spill] sm:$0xff] %v8875_v10 }
 0x52c   :  { %6000 = vpow2.f32 %v5100_v37  ;;  %v8824_v16 = vadd.f32 %v8763_v48, %v3609_v52  ;;  %v5105_v58 = vmul.f32 -1.442695, %v8808_v11  ;;  %v8828_v35 = vadd.f32 %v8763_v48, %v3610_v41  ;;  %v8891_v37 = vld [vmem:[#allocation2 + $0x168] sm:$0xff] }
 0x52d   :  { %6002 = vpow2.f32 %v5101_v8  ;;  %v8831_v26 = vadd.f32 %v8763_v48, %v3611_v59  ;;  %v5106_v15 = vmul.f32 -1.442695, %v8812_v53  ;;  %v5107_v7 = vmul.f32 -1.442695, %v8816_v51  ;;  %9954 = vst [vmem:[#allocation36_spill] sm:$0xff] %v8891_v37 }
 0x52e   :  { %6004 = vpow2.f32 %v5102_v47  ;;  %v5108_v34 = vmul.f32 -1.442695, %v8820_v62  ;;  %v3810_v57 = vmul.f32 %v8586_v38, %v9943_v24  ;;  %v5109_v50 = vmul.f32 -1.442695, %v8824_v16 }
 0x52f   :  { %6006 = vpow2.f32 %v5103_v55  ;;  %v3811_v28 = vmul.f32 %v8588_v60, %v9943_v24  ;;  %v3858_v27 = vmul.f32 %v9928_v14, %v9947_v63  ;;  %v5110_v0 = vmul.f32 -1.442695, %v8828_v35 }
 0x530   :  { %6008 = vpow2.f32 %v5104_v31  ;;  %v5111_v38 = vmul.f32 -1.442695, %v8831_v26  ;;  %v8857_v20 = vmul.f32 %v8664_v23, %v9943_v24  ;;  %v8865_v60 = vmul.f32 %v8666_v44, %v9943_v24  ;;  %v8901_v31 = vld [vmem:[#allocation2 + $0x170] sm:$0xff] }
 0x531   :  { %6010 = vpow2.f32 %v5105_v58  ;;  %v8869_v14 = vmul.f32 %v8836_v45, %v9943_v24  ;;  %v3859_v9 = vmul.f32 %v8609_v25, %v9947_v63  ;;  %v8879_v17 = vmul.f32 %v8841_v40, %v9943_v24  ;;  %v8889_v25 = vld [vmem:[#allocation2 + $0x158] sm:$0xff]  ;;  %9955 = vst [vmem:[#allocation37_spill] sm:$0xff] %v8901_v31 }
 0x532   :  { %6012 = vpow2.f32 %v5106_v15  ;;  %v8883_v46 = vmul.f32 %v8843_v3, %v9943_v24  ;;  %v8887_v22 = vmul.f32 %v8845_v56, %v9943_v24  ;;  %9953 = vst [vmem:[#allocation40_spill] sm:$0xff] %v8889_v25  ;;  %v8895_v41 = vmul.f32 %v8853_v36, %v9943_v24  ;;  %v8953_v36 = vld [vmem:[#allocation2 + $0x151] sm:$0xff]  ;;  %v8961_v3 = vld [vmem:[#allocation2 + $0x169] sm:$0xff] }
 0x533   :  { %6014 = vpow2.f32 %v5107_v7  ;;  %v8897_v8 = vadd.f32 %v3858_v27, %v3810_v57  ;;  %v8899_v59 = vadd.f32 %v3859_v9, %v3811_v28  ;;  %v8905_v58 = vmul.f32 %v8859_v13, %v9943_v24  ;;  %v8919_v28 = vld [vmem:[#allocation2 + $0xf1] sm:$0xff]  ;;  %v8951_v13 = vld [vmem:[#allocation2 + $0x141] sm:$0xff]  ;;  %9964 = vst [vmem:[#allocation17_spill] sm:$0xff] %v8953_v36  ;;  %9966 = vst [vmem:[#allocation30_spill] sm:$0xff] %v8961_v3 }
 0x534   :  { %6016 = vpow2.f32 %v5108_v34  ;;  %v8909_v15 = vmul.f32 %v8861_v5, %v9943_v24  ;;  %v8913_v57 = vmul.f32 %v8873_v39, %v9943_v24  ;;  %9956 = vst [vmem:[#allocation41_spill] sm:$0xff] %v8919_v28  ;;  %v8923_v9 = vmul.f32 %v8889_v25, %v9943_v24  ;;  %v8943_v39 = vld [vmem:[#allocation2 + $0x129] sm:$0xff]  ;;  %v8945_v5 = vld [vmem:[#allocation2 + $0x139] sm:$0xff]  ;;  %9963 = vst [vmem:[#allocation31_spill] sm:$0xff] %v8951_v13 }
 0x535   :  { %v5993_v52 = vpop.eup %5992  ;;  %6018 = vpow2.f32 %v5109_v50  ;;  %v8917_v50 = vmul.f32 %v8875_v10, %v9943_v24  ;;  %v8935_v19 = vmul.f32 %v8901_v31, %v9943_v24  ;;  %v3860_v25 = vmul.f32 %v8700_v43, %v9947_v63  ;;  %9961 = vst [vmem:[#allocation46_spill] sm:$0xff] %v8943_v39  ;;  %9962 = vst [vmem:[#allocation27_spill] sm:$0xff] %v8945_v5 }
 0x536   :  { %v5995_v47 = vpop.eup %5994  ;;  %6020 = vpow2.f32 %v5110_v0  ;;  %v3676_v55 = vadd.f32 1.0, %v5993_v52  ;;  %v8929_v52 = vld [vmem:[#allocation2 + $0xf9] sm:$0xff] }
 0x537   :  { %v5997_v7 = vpop.eup %5996  ;;  %6022 = vpow2.f32 %v5111_v38  ;;  %v3677_v34 = vadd.f32 1.0, %v5995_v47  ;;  %v8927_v38 = vmul.f32 %v8891_v37, %v9943_v24  ;;  %9957 = vst [vmem:[#allocation44_spill] sm:$0xff] %v8929_v52  ;;  %v8931_v47 = vld [vmem:[#allocation2 + $0x109] sm:$0xff]  ;;  %v3862_v24 = vmul.f32 %v8919_v28, %v9947_v63 }
 0x538   :  { %v5999_v27 = vpop.eup %5998  ;;  %v3678_v0 = vadd.f32 1.0, %v5997_v7  ;;  %6024 = vrcp.f32 %v3676_v55  ;;  %9958 = vst [vmem:[#allocation43_spill] sm:$0xff] %v8931_v47  ;;  %v8937_v55 = vld [vmem:[#allocation2 + $0x111] sm:$0xff]  ;;  %v8939_v7 = vld [vmem:[#allocation2 + $0x121] sm:$0xff] }
 0x539   :  { %v6001_v48 = vpop.eup %6000  ;;  %v3679_v49 = vadd.f32 1.0, %v5999_v27  ;;  %6026 = vrcp.f32 %v3677_v34  ;;  %9959 = vst [vmem:[#allocation29_spill] sm:$0xff] %v8937_v55  ;;  %9960 = vst [vmem:[#allocation25_spill] sm:$0xff] %v8939_v7  ;;  %v3861_v34 = vmul.f32 %v8702_v54, %v9947_v63  ;;  %v8959_v54 = vld [vmem:[#allocation2 + $0x159] sm:$0xff] }
 0x53a   :  { %v6003_v37 = vpop.eup %6002  ;;  %v3680_v10 = vadd.f32 1.0, %v6001_v48  ;;  %6028 = vrcp.f32 %v3678_v0  ;;  %v3863_v48 = vmul.f32 %v8929_v52, %v9947_v63  ;;  %v3864_v0 = vmul.f32 %v8931_v47, %v9947_v63  ;;  %9965 = vst [vmem:[#allocation49_spill] sm:$0xff] %v8959_v54  ;;  %v8967_v52 = vld [vmem:[#allocation2 + $0x171] sm:$0xff] }
 0x53b   :  { %v6005_v27 = vpop.eup %6004  ;;  %v3681_v31 = vadd.f32 1.0, %v6003_v37  ;;  %6030 = vrcp.f32 %v3679_v49  ;;  %v3865_v49 = vmul.f32 %v8937_v55, %v9947_v63  ;;  %v3866_v37 = vmul.f32 %v8939_v7, %v9947_v63  ;;  %9967 = vst [vmem:[#allocation20_spill] sm:$0xff] %v8967_v52 }
 0x53c   :  { %v6007_v43 = vpop.eup %6006  ;;  %v3682_v56 = vadd.f32 1.0, %v6005_v27  ;;  %6032 = vrcp.f32 %v3680_v10  ;;  %v3867_v47 = vmul.f32 %v8943_v39, %v9947_v63  ;;  %v3868_v10 = vmul.f32 %v8945_v5, %v9947_v63 }
 0x53d   :  { %v6009_v28 = vpop.eup %6008  ;;  %v3683_v40 = vadd.f32 1.0, %v6007_v43  ;;  %6034 = vrcp.f32 %v3681_v31  ;;  %v3869_v55 = vmul.f32 %v8951_v13, %v9947_v63  ;;  %v3870_v7 = vmul.f32 %v8953_v36, %v9947_v63 }
 0x53e   :  { %v6011_v27 = vpop.eup %6010  ;;  %v3684_v45 = vadd.f32 1.0, %v6009_v28  ;;  %6036 = vrcp.f32 %v3682_v56  ;;  %v3871_v31 = vmul.f32 %v8959_v54, %v9947_v63  ;;  %v3872_v39 = vmul.f32 %v8961_v3, %v9947_v63 }
 0x53f   :  { %v6013_v44 = vpop.eup %6012  ;;  %v3685_v43 = vadd.f32 1.0, %v6011_v27  ;;  %6038 = vrcp.f32 %v3683_v40  ;;  %v3873_v56 = vmul.f32 %v8967_v52, %v9947_v63  ;;  %v8984_v28 = vadd.f32 %v3860_v25, %v8857_v20 }
 0x540   :  { %v6015_v23 = vpop.eup %6014  ;;  %v3686_v5 = vadd.f32 1.0, %v6013_v44  ;;  %6040 = vrcp.f32 %v3684_v45  ;;  %v8987_v40 = vadd.f32 %v3861_v34, %v8865_v60  ;;  %v8990_v27 = vadd.f32 %v3862_v24, %v8869_v14 }
 0x541   :  { %v6017_v13 = vpop.eup %6016  ;;  %v3687_v36 = vadd.f32 1.0, %v6015_v23  ;;  %6042 = vrcp.f32 %v3685_v43  ;;  %v8993_v44 = vadd.f32 %v3863_v48, %v8879_v17  ;;  %v8996_v45 = vadd.f32 %v3864_v0, %v8883_v46  ;;  %v9968_v23 = vld [vmem:[#allocation10_spill] sm:$0xff] }
 0x542   :  { %v6019_v54 = vpop.eup %6018  ;;  %v3688_v3 = vadd.f32 1.0, %v6017_v13  ;;  %6044 = vrcp.f32 %v3686_v5  ;;  %v3906_v25 = vmul.f32 %v9940_v18, %v9968_v23  ;;  %v3907_v60 = vmul.f32 %v9941_v2, %v9968_v23  ;;  %v9057_v43 = vld [vmem:[#allocation2 + $0x12a] sm:$0xff] }
 0x543   :  { %v6021_v63 = vpop.eup %6020  ;;  %v3689_v20 = vadd.f32 1.0, %v6019_v54  ;;  %6046 = vrcp.f32 %v3687_v36  ;;  %v9003_v13 = vadd.f32 %v3865_v49, %v8887_v22  ;;  %v9006_v5 = vadd.f32 %v3866_v37, %v8895_v41 }
 0x544   :  { %v6023_v14 = vpop.eup %6022  ;;  %v3690_v34 = vadd.f32 1.0, %v6021_v63  ;;  %6048 = vrcp.f32 %v3688_v3  ;;  %v9009_v54 = vadd.f32 %v3906_v25, %v8897_v8  ;;  %v9012_v18 = vadd.f32 %v3907_v60, %v8899_v59  ;;  %v9063_v63 = vld [vmem:[#allocation2 + $0x13a] sm:$0xff] }
 0x545   :  { %v6025_v17 = vpop.eup %6024  ;;  %v3691_v46 = vadd.f32 1.0, %v6023_v14  ;;  %6050 = vrcp.f32 %v3689_v20  ;;  %v9016_v3 = vadd.f32 %v3867_v47, %v8905_v58  ;;  %v9019_v22 = vadd.f32 %v3868_v10, %v8909_v15  ;;  %v9036_v47 = vld [vmem:[#allocation2 + $0xf2] sm:$0xff]  ;;  %9969 = vst [vmem:[#allocation23_spill] sm:$0xff] %v9063_v63  ;;  %v9065_v20 = vld [vmem:[#allocation2 + $0x142] sm:$0xff] }
 0x546   :  { %v6027_v36 = vpop.eup %6026  ;;  %6052 = vrcp.f32 %v3690_v34  ;;  %v3724_v2 = vmul.f32 %v6025_v17, %v8766_v4  ;;  %v9023_v8 = vadd.f32 %v3869_v55, %v8913_v57  ;;  %v9026_v59 = vadd.f32 %v3870_v7, %v8917_v50  ;;  %v9040_v57 = vld [vmem:[#allocation2 + $0x10a] sm:$0xff]  ;;  %9970 = vst [vmem:[#allocation39_spill] sm:$0xff] %v9065_v20 }
 0x547   :  { %v6029_v41 = vpop.eup %6028  ;;  %6054 = vrcp.f32 %v3691_v46  ;;  %v3725_v24 = vmul.f32 %v6027_v36, %v8769_v21  ;;  %v9031_v58 = vadd.f32 %v3871_v31, %v8923_v9  ;;  %v9034_v15 = vadd.f32 %v3872_v39, %v8927_v38  ;;  %v9038_v21 = vld [vmem:[#allocation2 + $0xfa] sm:$0xff]  ;;  %v9048_v9 = vld [vmem:[#allocation2 + $0x112] sm:$0xff]  ;;  %v9050_v39 = vld [vmem:[#allocation2 + $0x122] sm:$0xff] }
 0x548   :  { %v6031_v48 = vpop.eup %6030  ;;  %v3726_v0 = vmul.f32 %v6029_v41, %v8772_v29  ;;  %v3756_v4 = vsel %vm54_vm1, %v3724_v2, 0.0  ;;  %3740 = vst.msk [vmem:[#allocation3] sm:$0xff] %vm54_vm1, %v3724_v2  ;;  %v9046_v7 = vadd.f32 %v3873_v56, %v8935_v19  ;;  %v3908_v38 = vmul.f32 %v8750_v1, %v9968_v23  ;;  %v9077_v46 = vld [vmem:[#allocation2 + $0x15a] sm:$0xff]  ;;  %v9079_v36 = vld [vmem:[#allocation2 + $0x16a] sm:$0xff] }
 0x549   :  { %v6033_v50 = vpop.eup %6032  ;;  %v3727_v55 = vmul.f32 %v6031_v48, %v8779_v12  ;;  %v3757_v29 = vsel %vm54_vm1, %v3725_v24, 0.0  ;;  %3741 = vst.msk [vmem:[#allocation3 + $0x8] sm:$0xff] %vm54_vm1, %v3725_v24  ;;  %v3909_v19 = vmul.f32 %v8758_v6, %v9968_v23  ;;  %v3911_v25 = vmul.f32 %v9038_v21, %v9968_v23  ;;  %9972 = vst [vmem:[#allocation24_spill] sm:$0xff] %v9077_v46 }
 0x54a   :  { %v6035_v49 = vpop.eup %6034  ;;  %v3728_v37 = vmul.f32 %v6033_v50, %v8786_v42  ;;  %v3758_v10 = vadd.f32 %v3757_v29, %v3756_v4  ;;  %v3759_v12 = vsel %vm54_vm1, %v3726_v0, 0.0  ;;  %3742 = vst.msk [vmem:[#allocation3 + $0x10] sm:$0xff] %vm54_vm1, %v3726_v0  ;;  %v3910_v42 = vmul.f32 %v9036_v47, %v9968_v23  ;;  %9973 = vst [vmem:[#allocation9_spill] sm:$0xff] %v9079_v36  ;;  %v9089_v4 = vld [vmem:[#allocation2 + $0x172] sm:$0xff] }
 0x54b   :  { %v6037_v31 = vpop.eup %6036  ;;  %v3729_v56 = vmul.f32 %v6035_v49, %v8791_v32  ;;  %v3912_v60 = vmul.f32 %v9040_v57, %v9968_v23  ;;  %3743 = vst.msk [vmem:[#allocation3 + $0x18] sm:$0xff] %vm54_vm1, %v3727_v55  ;;  %v9075_v32 = vld [vmem:[#allocation2 + $0x152] sm:$0xff]  ;;  %v3913_v2 = vmul.f32 %v9048_v9, %v9968_v23  ;;  %v3914_v41 = vmul.f32 %v9050_v39, %v9968_v23 }
 0x54c   :  { %v6039_v14 = vpop.eup %6038  ;;  %v3730_v34 = vmul.f32 %v6037_v31, %v8794_v33  ;;  %v3760_v17 = vadd.f32 %v3759_v12, %v3758_v10  ;;  %9971 = vst [vmem:[#allocation22_spill] sm:$0xff] %v9075_v32  ;;  %3744 = vst.msk [vmem:[#allocation3 + $0x20] sm:$0xff] %vm54_vm1, %v3728_v37  ;;  %v3761_v33 = vsel %vm54_vm1, %v3727_v55, 0.0  ;;  %v3763_v0 = vsel %vm54_vm1, %v3728_v37, 0.0 }
 0x54d   :  { %v6041_v24 = vpop.eup %6040  ;;  %v3731_v48 = vmul.f32 %v6039_v14, %v8800_v61  ;;  %9974 = vst [vmem:[#allocation8_spill] sm:$0xff] %v9089_v4  ;;  %v3915_v50 = vmul.f32 %v9057_v43, %v9968_v23  ;;  %3745 = vst.msk [vmem:[#allocation3 + $0x28] sm:$0xff] %vm54_vm1, %v3729_v56  ;;  %v3916_v12 = vmul.f32 %v9063_v63, %v9968_v23 }
 0x54e   :  { %v6043_v29 = vpop.eup %6042  ;;  %v3732_v49 = vmul.f32 %v6041_v24, %v8804_v30  ;;  %v3762_v10 = vadd.f32 %v3761_v33, %v3760_v17  ;;  %v3917_v61 = vmul.f32 %v9065_v20, %v9968_v23  ;;  %3746 = vst.msk [vmem:[#allocation3 + $0x30] sm:$0xff] %vm54_vm1, %v3730_v34  ;;  %v3918_v31 = vmul.f32 %v9075_v32, %v9968_v23 }
 0x54f   :  { %v6045_v55 = vpop.eup %6044  ;;  %v3733_v37 = vmul.f32 %v6043_v29, %v8808_v11  ;;  %v3919_v14 = vmul.f32 %v9077_v46, %v9968_v23  ;;  %v3920_v30 = vmul.f32 %v9079_v36, %v9968_v23  ;;  %3747 = vst.msk [vmem:[#allocation3 + $0x38] sm:$0xff] %vm54_vm1, %v3731_v48  ;;  %v3921_v20 = vmul.f32 %v9089_v4, %v9968_v23 }
 0x550   :  { %v6047_v17 = vpop.eup %6046  ;;  %v3734_v24 = vmul.f32 %v6045_v55, %v8812_v53  ;;  %v3764_v33 = vadd.f32 %v3763_v0, %v3762_v10  ;;  %v9112_v11 = vadd.f32 %v3908_v38, %v8984_v28  ;;  %3748 = vst.msk [vmem:[#allocation3 + $0x40] sm:$0xff] %vm54_vm1, %v3732_v49  ;;  %v3765_v32 = vsel %vm54_vm1, %v3729_v56, 0.0 }
 0x551   :  { %v6049_v29 = vpop.eup %6048  ;;  %v3735_v46 = vmul.f32 %v6047_v17, %v8816_v51  ;;  %v3767_v36 = vsel %vm54_vm1, %v3730_v34, 0.0  ;;  %v9119_v63 = vadd.f32 %v3909_v19, %v8987_v40  ;;  %3749 = vst.msk [vmem:[#allocation3 + $0x48] sm:$0xff] %vm54_vm1, %v3733_v37  ;;  %v3926_v28 = vadd.f32 %v3910_v42, %v8990_v27 }
 0x552   :  { %v6051_v53 = vpop.eup %6050  ;;  %v3736_v23 = vmul.f32 %v6049_v29, %v8820_v62  ;;  %v3766_v0 = vadd.f32 %v3765_v32, %v3764_v33  ;;  %v3927_v38 = vadd.f32 %v3911_v25, %v8993_v44  ;;  %3750 = vst.msk [vmem:[#allocation3 + $0x50] sm:$0xff] %vm54_vm1, %v3734_v24  ;;  %v3928_v34 = vadd.f32 %v3912_v60, %v8996_v45  ;;  %v9976_v60 = vld [vmem:[#allocation26_spill] sm:$0xff]  ;;  %v9985_v29 = vld [vmem:[#allocation32_spill] sm:$0xff] }
 0x553   :  { %v6053_v51 = vpop.eup %6052  ;;  %v3737_v56 = vmul.f32 %v6051_v53, %v8824_v16  ;;  %v3929_v40 = vadd.f32 %v3913_v2, %v9003_v13  ;;  %v3930_v19 = vadd.f32 %v3914_v41, %v9006_v5  ;;  %3751 = vst.msk [vmem:[#allocation3 + $0x58] sm:$0xff] %vm54_vm1, %v3735_v46  ;;  %v3931_v27 = vadd.f32 %v3915_v50, %v9016_v3  ;;  %v9978_v41 = vld [vmem:[#allocation47_spill] sm:$0xff]  ;;  %v9166_v33 = vld [vmem:[#allocation2 + $0x188] sm:$0xff] }
 0x554   :  { %v6055_v10 = vpop.eup %6054  ;;  %v3738_v62 = vmul.f32 %v6053_v51, %v8828_v35  ;;  %v3768_v32 = vadd.f32 %v3767_v36, %v3766_v0  ;;  %v3932_v44 = vadd.f32 %v3916_v12, %v9019_v22  ;;  %3752 = vst.msk [vmem:[#allocation3 + $0x60] sm:$0xff] %vm54_vm1, %v3736_v23  ;;  %v3769_v45 = vsel %vm54_vm1, %v3731_v48, 0.0  ;;  %v9975_v22 = vld [vmem:[#allocation11_spill] sm:$0xff]  ;;  %v9987_v51 = vld [vmem:[#allocation28_spill] sm:$0xff] }
 0x555   :  { %v3739_v16 = vmul.f32 %v6055_v10, %v8831_v26  ;;  %v3771_v13 = vsel %vm54_vm1, %v3732_v49, 0.0  ;;  %v3933_v5 = vadd.f32 %v3917_v61, %v9023_v8  ;;  %3753 = vst.msk [vmem:[#allocation3 + $0x68] sm:$0xff] %vm54_vm1, %v3737_v56  ;;  %v3934_v35 = vadd.f32 %v3918_v31, %v9026_v59  ;;  %v9977_v8 = vld [vmem:[#allocation35_spill] sm:$0xff]  ;;  %v9980_v49 = vld [vmem:[#allocation38_spill] sm:$0xff]  ;;  %v9981_v61 = vld [vmem:[#allocation48_spill] sm:$0xff] }
 0x556   :  { %v3770_v42 = vadd.f32 %v3769_v45, %v3768_v32  ;;  %v3935_v25 = vadd.f32 %v3919_v14, %v9031_v58  ;;  %v3936_v3 = vadd.f32 %v3920_v30, %v9034_v15  ;;  %3754 = vst.msk [vmem:[#allocation3 + $0x70] sm:$0xff] %vm54_vm1, %v3738_v62  ;;  %v3937_v26 = vadd.f32 %v3921_v20, %v9046_v7  ;;  %v9979_v15 = vld [vmem:[#allocation34_spill] sm:$0xff]  ;;  %v9982_v31 = vld [vmem:[#allocation15_spill] sm:$0xff]  ;;  %v9988_v32 = vld [vmem:[#allocation45_spill] sm:$0xff] }
 0x557   :  { %3755 = vst.msk [vmem:[#allocation3 + $0x78] sm:$0xff] %vm54_vm1, %v3739_v16  ;;  %v3954_v36 = vmul.f32 %v9976_v60, %v9975_v22  ;;  %v3955_v2 = vmul.f32 %v9977_v8, %v9975_v22  ;;  %v3956_v48 = vmul.f32 %v9978_v41, %v9975_v22  ;;  %v3773_v58 = vsel %vm54_vm1, %v3733_v37, 0.0  ;;  %v9164_v37 = vld [vmem:[#allocation2 + $0x180] sm:$0xff]  ;;  %9984 = vst [vmem:[#allocation11_spill] sm:$0xff] %v9166_v33  ;;  %v9990_v8 = vld [vmem:[#allocation36_spill] sm:$0xff] }
 0x558   :  { %v3772_v59 = vadd.f32 %v3771_v13, %v3770_v42  ;;  %v3957_v50 = vmul.f32 %v9979_v15, %v9975_v22  ;;  %v3958_v12 = vmul.f32 %v9980_v49, %v9975_v22  ;;  %v3775_v7 = vsel %vm54_vm1, %v3734_v24, 0.0  ;;  %9983 = vst [vmem:[#allocation10_spill] sm:$0xff] %v9164_v37  ;;  %v9986_v24 = vld [vmem:[#allocation19_spill] sm:$0xff] }
 0x559   :  { %v3777_v20 = vsel %vm54_vm1, %v3735_v46, 0.0  ;;  %v3959_v55 = vmul.f32 %v9981_v61, %v9975_v22  ;;  %v3960_v14 = vmul.f32 %v9982_v31, %v9975_v22  ;;  %v3779_v17 = vsel %vm54_vm1, %v3736_v23, 0.0  ;;  %v9989_v23 = vld [vmem:[#allocation40_spill] sm:$0xff] }
 0x55a   :  { %v3774_v30 = vadd.f32 %v3773_v58, %v3772_v59  ;;  %v3961_v53 = vmul.f32 %v9985_v29, %v9975_v22  ;;  %v3962_v0 = vmul.f32 %v9986_v24, %v9975_v22  ;;  %v3781_v46 = vsel %vm54_vm1, %v3737_v56, 0.0  ;;  %v9991_v58 = vld [vmem:[#allocation37_spill] sm:$0xff] }
 0x55b   :  { %v3963_v10 = vmul.f32 %v9987_v51, %v9975_v22  ;;  %v3964_v45 = vmul.f32 %v9988_v32, %v9975_v22  ;;  %v3965_v13 = vmul.f32 %v9989_v23, %v9975_v22  ;;  %v3783_v60 = vsel %vm54_vm1, %v3738_v62, 0.0 }
 0x55c   :  { %v3776_v42 = vadd.f32 %v3775_v7, %v3774_v30  ;;  %v3966_v59 = vmul.f32 %v9990_v8, %v9975_v22  ;;  %v3967_v24 = vmul.f32 %v9991_v58, %v9975_v22  ;;  %v3785_v56 = vsel %vm54_vm1, %v3739_v16, 0.0 }
 0x55d   :  { %v3968_v51 = vmul.f32 %v9164_v37, %v9975_v22  ;;  %v3969_v32 = vmul.f32 %v9166_v33, %v9975_v22  ;;  %v3970_v29 = vadd.f32 %v3954_v36, %v9009_v54  ;;  %v3971_v7 = vadd.f32 %v3955_v2, %v9012_v18  ;;  %v9993_v18 = vld [vmem:[#allocation42_spill] sm:$0xff] }
 0x55e   :  { %v3778_v23 = vadd.f32 %v3777_v20, %v3776_v42  ;;  %v3972_v62 = vadd.f32 %v3956_v48, %v9112_v11  ;;  %v3973_v30 = vadd.f32 %v3957_v50, %v9119_v63  ;;  %v3974_v8 = vadd.f32 %v3958_v12, %v3926_v28  ;;  %v9992_v20 = vld [vmem:[#allocation12_spill] sm:$0xff]  ;;  %v9994_v11 = vld [vmem:[#allocation50_spill] sm:$0xff] }
 0x55f   :  { %v3975_v31 = vadd.f32 %v3959_v55, %v3927_v38  ;;  %v3976_v58 = vadd.f32 %v3960_v14, %v3928_v34  ;;  %v3977_v61 = vadd.f32 %v3961_v53, %v3929_v40  ;;  %v3978_v49 = vadd.f32 %v3962_v0, %v3930_v19  ;;  %v9197_v28 = vld [vmem:[#allocation2 + $0x181] sm:$0xff]  ;;  %v9199_v38 = vld [vmem:[#allocation2 + $0x189] sm:$0xff]  ;;  %v9997_v19 = vld [vmem:[#allocation44_spill] sm:$0xff] }
 0x560   :  { %v3780_v16 = vadd.f32 %v3779_v17, %v3778_v23  ;;  %v3979_v15 = vadd.f32 %v3963_v10, %v3931_v27  ;;  %v3980_v37 = vadd.f32 %v3964_v45, %v3932_v44  ;;  %v3981_v41 = vadd.f32 %v3965_v13, %v3933_v5  ;;  %9995 = vst [vmem:[#allocation26_spill] sm:$0xff] %v9197_v28  ;;  %v9996_v34 = vld [vmem:[#allocation41_spill] sm:$0xff]  ;;  %v9998_v44 = vld [vmem:[#allocation43_spill] sm:$0xff]  ;;  %v10001_v50 = vld [vmem:[#allocation46_spill] sm:$0xff] }
 0x561   :  { %v3982_v4 = vadd.f32 %v3966_v59, %v3934_v35  ;;  %v3983_v22 = vadd.f32 %v3967_v24, %v3935_v25  ;;  %v3984_v33 = vadd.f32 %v3968_v51, %v3936_v3  ;;  %v3985_v36 = vadd.f32 %v3969_v32, %v3937_v26  ;;  %v9999_v35 = vld [vmem:[#allocation29_spill] sm:$0xff]  ;;  %v10002_v55 = vld [vmem:[#allocation27_spill] sm:$0xff]  ;;  %v10006_v10 = vld [vmem:[#allocation30_spill] sm:$0xff] }
 0x562   :  { %v3782_v54 = vadd.f32 %v3781_v46, %v3780_v16  ;;  %v4002_v2 = vmul.f32 %v9993_v18, %v9992_v20  ;;  %v4003_v63 = vmul.f32 %v9994_v11, %v9992_v20  ;;  %v4004_v40 = vmul.f32 %v9996_v34, %v9992_v20  ;;  %v10000_v26 = vld [vmem:[#allocation25_spill] sm:$0xff]  ;;  %v10003_v17 = vld [vmem:[#allocation31_spill] sm:$0xff] }
 0x563   :  { %v4005_v27 = vmul.f32 %v9997_v19, %v9992_v20  ;;  %v4006_v5 = vmul.f32 %v9998_v44, %v9992_v20  ;;  %v4007_v25 = vmul.f32 %v9999_v35, %v9992_v20  ;;  %v4008_v48 = vmul.f32 %v10000_v26, %v9992_v20  ;;  %v10004_v24 = vld [vmem:[#allocation17_spill] sm:$0xff]  ;;  %v9233_v26 = vld [vmem:[#allocation2 + $0x18a] sm:$0xff] }
 0x564   :  { %v3784_v3 = vadd.f32 %v3783_v60, %v3782_v54  ;;  %v4009_v12 = vmul.f32 %v10001_v50, %v9992_v20  ;;  %v4010_v14 = vmul.f32 %v10002_v55, %v9992_v20  ;;  %v4011_v53 = vmul.f32 %v10003_v17, %v9992_v20  ;;  %v10005_v46 = vld [vmem:[#allocation49_spill] sm:$0xff]  ;;  %10009 = vst [vmem:[#allocation42_spill] sm:$0xff] %v9233_v26 }
 0x565   :  { %v4012_v0 = vmul.f32 %v10004_v24, %v9992_v20  ;;  %v4013_v51 = vmul.f32 %v10005_v46, %v9992_v20  ;;  %v4014_v32 = vmul.f32 %v10006_v10, %v9992_v20  ;;  %v4015_v23 = vmul.f32 %v8967_v52, %v9992_v20 }
 0x566   :  { %v9223_v45 = vadd.f32 %v3785_v56, %v3784_v3  ;;  %v4016_v13 = vmul.f32 %v9197_v28, %v9992_v20  ;;  %v4017_v42 = vmul.f32 %v9199_v38, %v9992_v20  ;;  %v4018_v60 = vadd.f32 %v4002_v2, %v3970_v29  ;;  %v9231_v28 = vld [vmem:[#allocation2 + $0x182] sm:$0xff]  ;;  %v10016_v2 = vld [vmem:[#allocation8_spill] sm:$0xff] }
 0x567   :  { %v4019_v59 = vadd.f32 %v4003_v63, %v3971_v7  ;;  %v4020_v16 = vadd.f32 %v4004_v40, %v3972_v62  ;;  %v4021_v54 = vadd.f32 %v4005_v27, %v3973_v30  ;;  %v4022_v18 = vadd.f32 %v4006_v5, %v3974_v8  ;;  %10008 = vst [vmem:[#allocation12_spill] sm:$0xff] %v9231_v28  ;;  %v10010_v29 = vld [vmem:[#allocation13_spill] sm:$0xff]  ;;  %v10014_v30 = vld [vmem:[#allocation24_spill] sm:$0xff] }
 0x568   :  { %10007 = vst [vmem:[#allocation35_spill] sm:$0xff] %v9223_v45  ;;  %v4023_v11 = vadd.f32 %v4007_v25, %v3975_v31  ;;  %v4024_v46 = vadd.f32 %v4008_v48, %v3976_v58  ;;  %v4025_v24 = vadd.f32 %v4009_v12, %v3977_v61  ;;  %v4026_v10 = vadd.f32 %v4010_v14, %v3978_v49  ;;  %v10013_v58 = vld [vmem:[#allocation22_spill] sm:$0xff] }
 0x569   :  { %v4027_v56 = vadd.f32 %v4011_v53, %v3979_v15  ;;  %v4028_v3 = vadd.f32 %v4012_v0, %v3980_v37  ;;  %v4029_v45 = vadd.f32 %v4013_v51, %v3981_v41  ;;  %v4030_v17 = vadd.f32 %v4014_v32, %v3982_v4 }
 0x56a   :  { %v4031_v52 = vadd.f32 %v4015_v23, %v3983_v22  ;;  %v4032_v55 = vadd.f32 %v4016_v13, %v3984_v33  ;;  %v4033_v50 = vadd.f32 %v4017_v42, %v3985_v36  ;;  %v4050_v7 = vmul.f32 %v8750_v1, %v10010_v29  ;;  %v10012_v33 = vld [vmem:[#allocation39_spill] sm:$0xff]  ;;  %v10015_v36 = vld [vmem:[#allocation9_spill] sm:$0xff] }
 0x56b   :  { %v4051_v31 = vmul.f32 %v8758_v6, %v10010_v29  ;;  %v4052_v49 = vmul.f32 %v9036_v47, %v10010_v29  ;;  %v4053_v41 = vmul.f32 %v9038_v21, %v10010_v29  ;;  %v4054_v4 = vmul.f32 %v9040_v57, %v10010_v29  ;;  %v10011_v6 = vld [vmem:[#allocation23_spill] sm:$0xff] }
 0x56c   :  { %v4055_v15 = vmul.f32 %v9048_v9, %v10010_v29  ;;  %v4056_v61 = vmul.f32 %v9050_v39, %v10010_v29  ;;  %v4057_v1 = vmul.f32 %v9057_v43, %v10010_v29  ;;  %v4058_v37 = vmul.f32 %v10011_v6, %v10010_v29  ;;  %v10017_v6 = vld [vmem:[#allocation14_spill] sm:$0xff] }
 0x56d   :  { %v4059_v8 = vmul.f32 %v10012_v33, %v10010_v29  ;;  %v4060_v62 = vmul.f32 %v10013_v58, %v10010_v29  ;;  %v4061_v22 = vmul.f32 %v10014_v30, %v10010_v29  ;;  %v4062_v20 = vmul.f32 %v10015_v36, %v10010_v29  ;;  %v4097_v33 = vld [vmem:[#allocation2 + $0x1a0] sm:$0xff] }
 0x56e   :  { %v4063_v63 = vmul.f32 %v10016_v2, %v10010_v29  ;;  %v4064_v40 = vmul.f32 %v9231_v28, %v10010_v29  ;;  %v4065_v27 = vmul.f32 %v9233_v26, %v10010_v29  ;;  %v4066_v5 = vadd.f32 %v4050_v7, %v4018_v60  ;;  %v4096_v28 = vld [vmem:[#allocation2 + $0x198] sm:$0xff]  ;;  %v10018_v29 = vld [vmem:[#allocation47_spill] sm:$0xff] }
 0x56f   :  { %v4067_v25 = vadd.f32 %v4051_v31, %v4019_v59  ;;  %v4068_v48 = vadd.f32 %v4052_v49, %v4020_v16  ;;  %v4069_v12 = vadd.f32 %v4053_v41, %v4021_v54  ;;  %v4070_v14 = vadd.f32 %v4054_v4, %v4022_v18  ;;  %v10019_v59 = vld [vmem:[#allocation34_spill] sm:$0xff]  ;;  %v10027_v31 = vld [vmem:[#allocation40_spill] sm:$0xff] }
 0x570   :  { %v4071_v53 = vadd.f32 %v4055_v15, %v4023_v11  ;;  %v4072_v0 = vadd.f32 %v4056_v61, %v4024_v46  ;;  %v4073_v51 = vadd.f32 %v4057_v1, %v4025_v24  ;;  %v4074_v32 = vadd.f32 %v4058_v37, %v4026_v10  ;;  %v10020_v54 = vld [vmem:[#allocation38_spill] sm:$0xff]  ;;  %v10021_v24 = vld [vmem:[#allocation48_spill] sm:$0xff]  ;;  %v10029_v15 = vld [vmem:[#allocation37_spill] sm:$0xff] }
 0x571   :  { %v4075_v23 = vadd.f32 %v4059_v8, %v4027_v56  ;;  %v4076_v13 = vadd.f32 %v4060_v62, %v4028_v3  ;;  %v4077_v42 = vadd.f32 %v4061_v22, %v4029_v45  ;;  %v4078_v36 = vadd.f32 %v4062_v20, %v4030_v17  ;;  %v10022_v45 = vld [vmem:[#allocation15_spill] sm:$0xff]  ;;  %v10025_v11 = vld [vmem:[#allocation28_spill] sm:$0xff]  ;;  %v10026_v3 = vld [vmem:[#allocation45_spill] sm:$0xff] }
 0x572   :  { %v4079_v2 = vadd.f32 %v4063_v63, %v4031_v52  ;;  %v4080_v30 = vadd.f32 %v4064_v40, %v4032_v55  ;;  %v4081_v58 = vadd.f32 %v4065_v27, %v4033_v50  ;;  %v4098_v60 = vmul.f32 %v10018_v29, %v10017_v6  ;;  %v10023_v52 = vld [vmem:[#allocation32_spill] sm:$0xff]  ;;  %v10024_v55 = vld [vmem:[#allocation19_spill] sm:$0xff]  ;;  %v10030_v1 = vld [vmem:[#allocation10_spill] sm:$0xff] }
 0x573   :  { %v4099_v16 = vmul.f32 %v10019_v59, %v10017_v6  ;;  %v4100_v46 = vmul.f32 %v10020_v54, %v10017_v6  ;;  %v4101_v10 = vmul.f32 %v10021_v24, %v10017_v6  ;;  %v4102_v17 = vmul.f32 %v10022_v45, %v10017_v6  ;;  %v10028_v41 = vld [vmem:[#allocation36_spill] sm:$0xff]  ;;  %v10031_v8 = vld [vmem:[#allocation11_spill] sm:$0xff] }
 0x574   :  { %v4103_v50 = vmul.f32 %v10023_v52, %v10017_v6  ;;  %v4104_v18 = vmul.f32 %v10024_v55, %v10017_v6  ;;  %v4105_v56 = vmul.f32 %v10025_v11, %v10017_v6  ;;  %v4106_v7 = vmul.f32 %v10026_v3, %v10017_v6  ;;  %v10032_v26 = vld [vmem:[#allocation16_spill] sm:$0xff] }
 0x575   :  { %v4107_v49 = vmul.f32 %v10027_v31, %v10017_v6  ;;  %v4108_v4 = vmul.f32 %v10028_v41, %v10017_v6  ;;  %v4109_v61 = vmul.f32 %v10029_v15, %v10017_v6  ;;  %v4110_v37 = vmul.f32 %v10030_v1, %v10017_v6 }
 0x576   :  { %v4111_v62 = vmul.f32 %v10031_v8, %v10017_v6  ;;  %v4112_v22 = vmul.f32 %v4096_v28, %v10017_v6  ;;  %v4113_v20 = vmul.f32 %v4097_v33, %v10017_v6  ;;  %v4114_v63 = vadd.f32 %v4098_v60, %v4066_v5  ;;  %v4144_v8 = vld [vmem:[#allocation2 + $0x199] sm:$0xff]  ;;  %v4145_v28 = vld [vmem:[#allocation2 + $0x1a1] sm:$0xff] }
 0x577   :  { %v4115_v40 = vadd.f32 %v4099_v16, %v4067_v25  ;;  %v4116_v27 = vadd.f32 %v4100_v46, %v4068_v48  ;;  %v4117_v29 = vadd.f32 %v4101_v10, %v4069_v12  ;;  %v4118_v59 = vadd.f32 %v4102_v17, %v4070_v14  ;;  %v10033_v48 = vld [vmem:[#allocation25_spill] sm:$0xff] }
 0x578   :  { %v4119_v54 = vadd.f32 %v4103_v50, %v4071_v53  ;;  %v4120_v24 = vadd.f32 %v4104_v18, %v4072_v0  ;;  %v4121_v45 = vadd.f32 %v4105_v56, %v4073_v51  ;;  %v4122_v52 = vadd.f32 %v4106_v7, %v4074_v32  ;;  %v10040_v32 = vld [vmem:[#allocation20_spill] sm:$0xff] }
 0x579   :  { %v4123_v55 = vadd.f32 %v4107_v49, %v4075_v23  ;;  %v4124_v11 = vadd.f32 %v4108_v4, %v4076_v13  ;;  %v4125_v3 = vadd.f32 %v4109_v61, %v4077_v42  ;;  %v4126_v31 = vadd.f32 %v4110_v37, %v4078_v36  ;;  %v10041_v13 = vld [vmem:[#allocation26_spill] sm:$0xff] }
 0x57a   :  { %v4127_v41 = vadd.f32 %v4111_v62, %v4079_v2  ;;  %v4128_v15 = vadd.f32 %v4112_v22, %v4080_v30  ;;  %v4129_v1 = vadd.f32 %v4113_v20, %v4081_v58  ;;  %v4146_v6 = vmul.f32 %v9996_v34, %v10032_v26  ;;  %v10034_v30 = vld [vmem:[#allocation46_spill] sm:$0xff]  ;;  %v10035_v2 = vld [vmem:[#allocation27_spill] sm:$0xff] }
 0x57b   :  { %v4147_v33 = vmul.f32 %v9997_v19, %v10032_v26  ;;  %v4148_v5 = vmul.f32 %v9998_v44, %v10032_v26  ;;  %v4149_v25 = vmul.f32 %v9999_v35, %v10032_v26  ;;  %v4150_v36 = vmul.f32 %v10033_v48, %v10032_v26  ;;  %v10036_v34 = vld [vmem:[#allocation31_spill] sm:$0xff]  ;;  %v10037_v19 = vld [vmem:[#allocation17_spill] sm:$0xff]  ;;  %v10039_v35 = vld [vmem:[#allocation30_spill] sm:$0xff] }
 0x57c   :  { %v4151_v58 = vmul.f32 %v10034_v30, %v10032_v26  ;;  %v4152_v12 = vmul.f32 %v10035_v2, %v10032_v26  ;;  %v4153_v14 = vmul.f32 %v10036_v34, %v10032_v26  ;;  %v4154_v53 = vmul.f32 %v10037_v19, %v10032_v26  ;;  %v10038_v44 = vld [vmem:[#allocation49_spill] sm:$0xff]  ;;  %v10042_v37 = vld [vmem:[#allocation18_spill] sm:$0xff]  ;;  %v10049_v30 = vld [vmem:[#allocation8_spill] sm:$0xff] }
 0x57d   :  { %v4155_v0 = vmul.f32 %v10038_v44, %v10032_v26  ;;  %v4156_v51 = vmul.f32 %v10039_v35, %v10032_v26  ;;  %v4157_v23 = vmul.f32 %v10040_v32, %v10032_v26  ;;  %v4158_v42 = vmul.f32 %v10041_v13, %v10032_v26  ;;  %v10048_v48 = vld [vmem:[#allocation9_spill] sm:$0xff] }
 0x57e   :  { %v4159_v60 = vmul.f32 %v9199_v38, %v10032_v26  ;;  %v4160_v16 = vmul.f32 %v4144_v8, %v10032_v26  ;;  %v4161_v46 = vmul.f32 %v4145_v28, %v10032_v26  ;;  %v4162_v10 = vadd.f32 %v4146_v6, %v4114_v63  ;;  %v10046_v6 = vld [vmem:[#allocation24_spill] sm:$0xff]  ;;  %v4193_v34 = vld [vmem:[#allocation2 + $0x1a2] sm:$0xff] }
 0x57f   :  { %v4163_v17 = vadd.f32 %v4147_v33, %v4115_v40  ;;  %v4164_v50 = vadd.f32 %v4148_v5, %v4116_v27  ;;  %v4165_v18 = vadd.f32 %v4149_v25, %v4117_v29  ;;  %v4166_v56 = vadd.f32 %v4150_v36, %v4118_v59  ;;  %v4192_v33 = vld [vmem:[#allocation2 + $0x19a] sm:$0xff] }
 0x580   :  { %v4167_v7 = vadd.f32 %v4151_v58, %v4119_v54  ;;  %v4168_v49 = vadd.f32 %v4152_v12, %v4120_v24  ;;  %v4169_v4 = vadd.f32 %v4153_v14, %v4121_v45  ;;  %v4170_v61 = vadd.f32 %v4154_v53, %v4122_v52  ;;  %v10050_v14 = vld [vmem:[#allocation12_spill] sm:$0xff]  ;;  %v10051_v53 = vld [vmem:[#allocation42_spill] sm:$0xff] }
 0x581   :  { %v4194_v62 = vmul.f32 %v9036_v47, %v10042_v37  ;;  %v4195_v22 = vmul.f32 %v9038_v21, %v10042_v37  ;;  %v4196_v38 = vmul.f32 %v9040_v57, %v10042_v37  ;;  %v4171_v20 = vadd.f32 %v4155_v0, %v4123_v55  ;;  %v10043_v55 = vld [vmem:[#allocation23_spill] sm:$0xff] }
 0x582   :  { %v4172_v26 = vadd.f32 %v4156_v51, %v4124_v11  ;;  %v4173_v63 = vadd.f32 %v4157_v23, %v4125_v3  ;;  %v4197_v40 = vmul.f32 %v9048_v9, %v10042_v37  ;;  %v4198_v27 = vmul.f32 %v9050_v39, %v10042_v37  ;;  %v10044_v9 = vld [vmem:[#allocation39_spill] sm:$0xff]  ;;  %v10045_v39 = vld [vmem:[#allocation22_spill] sm:$0xff] }
 0x583   :  { %v4210_v29 = vadd.f32 %v4194_v62, %v4162_v10  ;;  %v4211_v59 = vadd.f32 %v4195_v22, %v4163_v17  ;;  %v4212_v54 = vadd.f32 %v4196_v38, %v4164_v50  ;;  %v4174_v24 = vadd.f32 %v4158_v42, %v4126_v31  ;;  %v6137_v50 = vld [vmem:[%s9554_s4] ss:$0 sm:$0xff] }
 0x584   :  { %v4175_v47 = vadd.f32 %v4159_v60, %v4127_v41  ;;  %v4199_v21 = vmul.f32 %v9057_v43, %v10042_v37  ;;  %v4213_v45 = vadd.f32 %v4197_v40, %v4165_v18  ;;  %v4176_v52 = vadd.f32 %v4160_v16, %v4128_v15  ;;  %v10047_v43 = vld [vmem:[#allocation33_spill] sm:$0xff] }
 0x585   :  { %v4177_v57 = vadd.f32 %v4161_v46, %v4129_v1  ;;  %v4200_v11 = vmul.f32 %v10043_v55, %v10042_v37  ;;  %v4214_v3 = vadd.f32 %v4198_v27, %v4166_v56  ;;  %v4201_v8 = vmul.f32 %v10044_v9, %v10042_v37 }
 0x586   :  { %v4202_v28 = vmul.f32 %v10045_v39, %v10042_v37  ;;  %v4203_v31 = vmul.f32 %v10046_v6, %v10042_v37  ;;  %v4215_v41 = vadd.f32 %v4199_v21, %v4167_v7  ;;  %v9348_v25 = vadd.f32 %v10047_v43, %v4210_v29 }
 0x587   :  { %v4216_v5 = vadd.f32 %v4200_v11, %v4168_v49  ;;  %v9351_v15 = vadd.f32 %v10047_v43, %v4211_v59  ;;  %v9354_v1 = vadd.f32 %v10047_v43, %v4212_v54  ;;  %v4204_v36 = vmul.f32 %v10048_v48, %v10042_v37 }
 0x588   :  { %v4205_v58 = vmul.f32 %v10049_v30, %v10042_v37  ;;  %v4217_v2 = vadd.f32 %v4201_v8, %v4169_v4  ;;  %v9361_v12 = vadd.f32 %v10047_v43, %v4213_v45  ;;  %v4206_v19 = vmul.f32 %v10050_v14, %v10042_v37 }
 0x589   :  { %v4207_v44 = vmul.f32 %v10051_v53, %v10042_v37  ;;  %v4218_v0 = vadd.f32 %v4202_v28, %v4170_v61  ;;  %v9368_v35 = vadd.f32 %v10047_v43, %v4214_v3  ;;  %v4208_v51 = vmul.f32 %v4192_v33, %v10042_v37 }
 0x58a   :  { %v4219_v32 = vadd.f32 %v4203_v31, %v4171_v20  ;;  %v4220_v23 = vadd.f32 %v4204_v36, %v4172_v26  ;;  %v9372_v13 = vadd.f32 %v10047_v43, %v4215_v41  ;;  %v9375_v42 = vadd.f32 %v10047_v43, %v4216_v5 }
 0x58b   :  { %v5112_v60 = vmul.f32 -1.442695, %v9348_v25  ;;  %v5113_v16 = vmul.f32 -1.442695, %v9351_v15  ;;  %v5114_v46 = vmul.f32 -1.442695, %v9354_v1  ;;  %v4209_v10 = vmul.f32 %v4193_v34, %v10042_v37 }
 0x58c   :  { %v4221_v17 = vadd.f32 %v4205_v58, %v4173_v63  ;;  %v9384_v18 = vadd.f32 %v6137_v50, %v4217_v2  ;;  %v5115_v56 = vmul.f32 -1.442695, %v9361_v12  ;;  %v4222_v7 = vadd.f32 %v4206_v19, %v4174_v24 }
 0x58d   :  { %v9387_v49 = vadd.f32 %v6137_v50, %v4218_v0  ;;  %6056 = vpow2.f32 %v5112_v60  ;;  %v5116_v4 = vmul.f32 -1.442695, %v9368_v35  ;;  %v4223_v61 = vadd.f32 %v4207_v44, %v4175_v47 }
 0x58e   :  { %v9390_v62 = vadd.f32 %v6137_v50, %v4219_v32  ;;  %6058 = vpow2.f32 %v5113_v16  ;;  %v5117_v37 = vmul.f32 -1.442695, %v9372_v13  ;;  %v4224_v22 = vadd.f32 %v4208_v51, %v4176_v52 }
 0x58f   :  { %v9393_v38 = vadd.f32 %v6137_v50, %v4220_v23  ;;  %6060 = vpow2.f32 %v5114_v46  ;;  %v5118_v20 = vmul.f32 -1.442695, %v9375_v42  ;;  %v4225_v26 = vadd.f32 %v4209_v10, %v4177_v57 }
 0x590   :  { %v9396_v63 = vadd.f32 %v6137_v50, %v4221_v17  ;;  %6062 = vpow2.f32 %v5115_v56  ;;  %v5119_v40 = vmul.f32 -1.442695, %v9384_v18  ;;  %v9399_v27 = vadd.f32 %v6137_v50, %v4222_v7 }
 0x591   :  { %6064 = vpow2.f32 %v5116_v4  ;;  %v5120_v29 = vmul.f32 -1.442695, %v9387_v49  ;;  %v9402_v59 = vadd.f32 %v6137_v50, %v4223_v61  ;;  %v5121_v54 = vmul.f32 -1.442695, %v9390_v62 }
 0x592   :  { %6066 = vpow2.f32 %v5117_v37  ;;  %v9405_v24 = vadd.f32 %v6137_v50, %v4224_v22  ;;  %v5122_v47 = vmul.f32 -1.442695, %v9393_v38  ;;  %v9408_v21 = vadd.f32 %v6137_v50, %v4225_v26 }
 0x593   :  { %6068 = vpow2.f32 %v5118_v20  ;;  %v5123_v45 = vmul.f32 -1.442695, %v9396_v63  ;;  %v5124_v52 = vmul.f32 -1.442695, %v9399_v27  ;;  %v5125_v57 = vmul.f32 -1.442695, %v9402_v59 }
 0x594   :  { %6070 = vpow2.f32 %v5119_v40  ;;  %v5126_v55 = vmul.f32 -1.442695, %v9405_v24  ;;  %v5127_v11 = vmul.f32 -1.442695, %v9408_v21 }
 0x595   :  { %6072 = vpow2.f32 %v5120_v29 }
 0x596   :  { %6074 = vpow2.f32 %v5121_v54 }
 0x597   :  { %6076 = vpow2.f32 %v5122_v47 }
 0x598   :  { %6078 = vpow2.f32 %v5123_v45 }
 0x599   :  { %6080 = vpow2.f32 %v5124_v52 }
 0x59a   :  { %v6057_v3 = vpop.eup %6056  ;;  %6082 = vpow2.f32 %v5125_v57 }
 0x59b   :  { %v6059_v9 = vpop.eup %6058  ;;  %6084 = vpow2.f32 %v5126_v55  ;;  %v4290_v8 = vadd.f32 1.0, %v6057_v3 }
 0x59c   :  { %v6061_v39 = vpop.eup %6060  ;;  %6086 = vpow2.f32 %v5127_v11  ;;  %v4291_v28 = vadd.f32 1.0, %v6059_v9 }
 0x59d   :  { %v6063_v6 = vpop.eup %6062  ;;  %v4292_v31 = vadd.f32 1.0, %v6061_v39  ;;  %6088 = vrcp.f32 %v4290_v8 }
 0x59e   :  { %v6065_v41 = vpop.eup %6064  ;;  %v4293_v33 = vadd.f32 1.0, %v6063_v6  ;;  %6090 = vrcp.f32 %v4291_v28 }
 0x59f   :  { %v6067_v5 = vpop.eup %6066  ;;  %v4294_v43 = vadd.f32 1.0, %v6065_v41  ;;  %6092 = vrcp.f32 %v4292_v31 }
 0x5a0   :  { %v6069_v48 = vpop.eup %6068  ;;  %v4295_v36 = vadd.f32 1.0, %v6067_v5  ;;  %6094 = vrcp.f32 %v4293_v33 }
 0x5a1   :  { %v6071_v30 = vpop.eup %6070  ;;  %v4296_v58 = vadd.f32 1.0, %v6069_v48  ;;  %6096 = vrcp.f32 %v4294_v43 }
 0x5a2   :  { %v6073_v2 = vpop.eup %6072  ;;  %v4297_v34 = vadd.f32 1.0, %v6071_v30  ;;  %6098 = vrcp.f32 %v4295_v36 }
 0x5a3   :  { %v6075_v14 = vpop.eup %6074  ;;  %v4298_v19 = vadd.f32 1.0, %v6073_v2  ;;  %6100 = vrcp.f32 %v4296_v58 }
 0x5a4   :  { %v6077_v53 = vpop.eup %6076  ;;  %v4299_v44 = vadd.f32 1.0, %v6075_v14  ;;  %6102 = vrcp.f32 %v4297_v34 }
 0x5a5   :  { %v6079_v0 = vpop.eup %6078  ;;  %v4300_v51 = vadd.f32 1.0, %v6077_v53  ;;  %6104 = vrcp.f32 %v4298_v19 }
 0x5a6   :  { %v6081_v32 = vpop.eup %6080  ;;  %v4301_v23 = vadd.f32 1.0, %v6079_v0  ;;  %6106 = vrcp.f32 %v4299_v44 }
 0x5a7   :  { %v6083_v60 = vpop.eup %6082  ;;  %v4302_v16 = vadd.f32 1.0, %v6081_v32  ;;  %6108 = vrcp.f32 %v4300_v51  ;;  %v10052_v51 = vld [vmem:[#allocation35_spill] sm:$0xff] }
 0x5a8   :  { %v6085_v46 = vpop.eup %6084  ;;  %v4303_v10 = vadd.f32 1.0, %v6083_v60  ;;  %6110 = vrcp.f32 %v4301_v23  ;;  %v3787_v32 = vrot.slane %v10052_v51, 4 }
 0x5a9   :  { %v6087_v17 = vpop.eup %6086  ;;  %v4304_v50 = vadd.f32 1.0, %v6085_v46  ;;  %6112 = vrcp.f32 %v4302_v16 }
 0x5aa   :  { %v6089_v56 = vpop.eup %6088  ;;  %v4305_v7 = vadd.f32 1.0, %v6087_v17  ;;  %6114 = vrcp.f32 %v4303_v10  ;;  %v3788_v10 = vadd.f32 %v3787_v32, %v10052_v51 }
 0x5ab   :  { %v6091_v4 = vpop.eup %6090  ;;  %6116 = vrcp.f32 %v4304_v50  ;;  %v4338_v61 = vmul.f32 %v6089_v56, %v9348_v25 }
 0x5ac   :  { %v6093_v37 = vpop.eup %6092  ;;  %6118 = vrcp.f32 %v4305_v7  ;;  %v4339_v22 = vmul.f32 %v6091_v4, %v9351_v15  ;;  %v3789_v4 = vrot.slane %v3788_v10, 2 }
 0x5ad   :  { %v6095_v20 = vpop.eup %6094  ;;  %v4340_v26 = vmul.f32 %v6093_v37, %v9354_v1  ;;  %v4370_v40 = vsel %vm54_vm1, %v4338_v61, 0.0  ;;  %4354 = vst.msk [vmem:[#allocation3 + $0x80] sm:$0xff] %vm54_vm1, %v4338_v61 }
 0x5ae   :  { %v6097_v29 = vpop.eup %6096  ;;  %v4341_v54 = vmul.f32 %v6095_v20, %v9361_v12  ;;  %v4371_v47 = vsel %vm54_vm1, %v4339_v22, 0.0  ;;  %4355 = vst.msk [vmem:[#allocation3 + $0x88] sm:$0xff] %vm54_vm1, %v4339_v22  ;;  %v3790_v22 = vadd.f32 %v3789_v4, %v3788_v10 }
 0x5af   :  { %v6099_v45 = vpop.eup %6098  ;;  %v4342_v25 = vmul.f32 %v6097_v29, %v9368_v35  ;;  %v4372_v52 = vadd.f32 %v4371_v47, %v4370_v40  ;;  %4356 = vst.msk [vmem:[#allocation3 + $0x90] sm:$0xff] %vm54_vm1, %v4340_v26  ;;  %v4373_v57 = vsel %vm54_vm1, %v4340_v26, 0.0 }
 0x5b0   :  { %v6101_v15 = vpop.eup %6100  ;;  %v4343_v1 = vmul.f32 %v6099_v45, %v9372_v13  ;;  %4357 = vst.msk [vmem:[#allocation3 + $0x98] sm:$0xff] %vm54_vm1, %v4341_v54  ;;  %v4375_v35 = vsel %vm54_vm1, %v4341_v54, 0.0  ;;  %v3791_v40 = vrot.slane %v3790_v22, 1 }
 0x5b1   :  { %v6103_v55 = vpop.eup %6102  ;;  %v4344_v12 = vmul.f32 %v6101_v15, %v9375_v42  ;;  %v4374_v11 = vadd.f32 %v4373_v57, %v4372_v52  ;;  %4358 = vst.msk [vmem:[#allocation3 + $0xa0] sm:$0xff] %vm54_vm1, %v4342_v25  ;;  %v4377_v42 = vsel %vm54_vm1, %v4342_v25, 0.0  ;;  %v4588_v15 = vld [vmem:[#allocation3 + $0x78] sm:$0xff]  ;;  %v4587_v57 = vld [vmem:[#allocation3 + $0x70] sm:$0xff] }
 0x5b2   :  { %v6105_v3 = vpop.eup %6104  ;;  %v4345_v9 = vmul.f32 %v6103_v55, %v9384_v18  ;;  %4359 = vst.msk [vmem:[#allocation3 + $0xa8] sm:$0xff] %vm54_vm1, %v4343_v1  ;;  %v3792_v47 = vadd.f32 %v3791_v40, %v3790_v22  ;;  %v4586_v55 = vld [vmem:[#allocation3 + $0x68] sm:$0xff] }
 0x5b3   :  { %v6107_v8 = vpop.eup %6106  ;;  %v4346_v13 = vmul.f32 %v6105_v3, %v9387_v49  ;;  %v4376_v39 = vadd.f32 %v4375_v35, %v4374_v11  ;;  %4360 = vst.msk [vmem:[#allocation3 + $0xb0] sm:$0xff] %vm54_vm1, %v4344_v12  ;;  %v4379_v49 = vsel %vm54_vm1, %v4343_v1, 0.0  ;;  %v10053_v1 = vmov 0.0   ;;  %v4584_v11 = vld [vmem:[#allocation3 + $0x58] sm:$0xff]  ;;  %v4583_v3 = vld [vmem:[#allocation3 + $0x50] sm:$0xff]  ;;  %v4581_v35 = vld [vmem:[#allocation3 + $0x40] sm:$0xff] }
 0x5b4   :  { %v6109_v28 = vpop.eup %6108  ;;  %v4347_v6 = vmul.f32 %v6107_v8, %v9390_v62  ;;  %4361 = vst.msk [vmem:[#allocation3 + $0xb8] sm:$0xff] %vm54_vm1, %v4345_v9  ;;  %v4580_v8 = vld [vmem:[#allocation3 + $0x38] sm:$0xff]  ;;  %v4712_v32 = vld [vmem:[#allocation3 + $0x80] sm:$0xff] }
 0x5b5   :  { %v6111_v31 = vpop.eup %6110  ;;  %v4348_v18 = vmul.f32 %v6109_v28, %v9393_v38  ;;  %v4378_v41 = vadd.f32 %v4377_v42, %v4376_v39  ;;  %4362 = vst.msk [vmem:[#allocation3 + $0xc0] sm:$0xff] %vm54_vm1, %v4346_v13  ;;  %v4381_v38 = vsel %vm54_vm1, %v4344_v12, 0.0  ;;  %v4585_v12 = vld [vmem:[#allocation3 + $0x60] sm:$0xff]  ;;  %v4578_v39 = vld [vmem:[#allocation3 + $0x28] sm:$0xff]  ;;  %v4575_v42 = vld [vmem:[#allocation3 + $0x10] sm:$0xff] }
 0x5b6   :  { %v6113_v33 = vpop.eup %6112  ;;  %v4349_v5 = vmul.f32 %v6111_v31, %v9396_v63  ;;  %4363 = vst.msk [vmem:[#allocation3 + $0xc8] sm:$0xff] %vm54_vm1, %v4347_v6  ;;  %v4387_v53 = vsel %vm54_vm1, %v4347_v6, 0.0  ;;  %v4577_v28 = vld [vmem:[#allocation3 + $0x20] sm:$0xff]  ;;  %v4576_v6 = vld [vmem:[#allocation3 + $0x18] sm:$0xff]  ;;  %v4574_v31 = vld [vmem:[#allocation3 + $0x8] sm:$0xff] }
 0x5b7   :  { %v6115_v43 = vpop.eup %6114  ;;  %v4350_v62 = vmul.f32 %v6113_v33, %v9399_v27  ;;  %v4380_v48 = vadd.f32 %v4379_v49, %v4378_v41  ;;  %4364 = vst.msk [vmem:[#allocation3 + $0xd0] sm:$0xff] %vm54_vm1, %v4348_v18  ;;  %v4383_v27 = vsel %vm54_vm1, %v4345_v9, 0.0  ;;  %v4389_v44 = vsel %vm54_vm1, %v4348_v18, 0.0  ;;  %v4582_v9 = vld [vmem:[#allocation3 + $0x48] sm:$0xff]  ;;  %v4573_v18 = vld [vmem:[#allocation3] sm:$0xff] }
 0x5b8   :  { %v6117_v36 = vpop.eup %6116  ;;  %v4351_v30 = vmul.f32 %v6115_v43, %v9402_v59  ;;  %4365 = vst.msk [vmem:[#allocation3 + $0xd8] sm:$0xff] %vm54_vm1, %v4349_v5  ;;  %v4385_v59 = vsel %vm54_vm1, %v4346_v13, 0.0  ;;  %v4579_v13 = vld [vmem:[#allocation3 + $0x30] sm:$0xff]  ;;  %v4713_v51 = vld [vmem:[#allocation3 + $0x88] sm:$0xff] }
 0x5b9   :  { %v6119_v58 = vpop.eup %6118  ;;  %v4352_v63 = vmul.f32 %v6117_v36, %v9405_v24  ;;  %v4382_v2 = vadd.f32 %v4381_v38, %v4380_v48  ;;  %4366 = vst.msk [vmem:[#allocation3 + $0xe0] sm:$0xff] %vm54_vm1, %v4350_v62  ;;  %v4393_v60 = vsel %vm54_vm1, %v4350_v62, 0.0  ;;  %v6138_v33 = vld [vmem:[%s9556_s6] sm:$0x1] }
 0x5ba   :  { %v4353_v34 = vmul.f32 %v6119_v58, %v9408_v21  ;;  %4367 = vst.msk [vmem:[#allocation3 + $0xe8] sm:$0xff] %vm54_vm1, %v4351_v30  ;;  %v4391_v21 = vsel %vm54_vm1, %v4349_v5, 0.0  ;;  %v4395_v46 = vsel %vm54_vm1, %v4351_v30, 0.0 }
 0x5bb   :  { %v4384_v14 = vadd.f32 %v4383_v27, %v4382_v2  ;;  %4368 = vst.msk [vmem:[#allocation3 + $0xf0] sm:$0xff] %vm54_vm1, %v4352_v63  ;;  %v4397_v50 = vsel %vm54_vm1, %v4352_v63, 0.0 }
 0x5bc   :  { %4369 = vst.msk [vmem:[#allocation3 + $0xf8] sm:$0xff] %vm54_vm1, %v4353_v34  ;;  %v4399_v7 = vsel %vm54_vm1, %v4353_v34, 0.0 }
 0x5bd   :  { %v4386_v19 = vadd.f32 %v4385_v59, %v4384_v14  ;;  %v4721_v14 = vld [vmem:[#allocation3 + $0xc8] sm:$0xff]  ;;  %v4720_v59 = vld [vmem:[#allocation3 + $0xc0] sm:$0xff] }
 0x5be   :  { %v4722_v27 = vld [vmem:[#allocation3 + $0xd0] sm:$0xff] }
 0x5bf   :  { %v4388_v24 = vadd.f32 %v4387_v53, %v4386_v19  ;;  %v4723_v34 = vld [vmem:[#allocation3 + $0xd8] sm:$0xff]  ;;  %v4718_v53 = vld [vmem:[#allocation3 + $0xb0] sm:$0xff] }
 0x5c0   :  { %v4724_v2 = vld [vmem:[#allocation3 + $0xe0] sm:$0xff]  ;;  %v4719_v19 = vld [vmem:[#allocation3 + $0xb8] sm:$0xff] }
 0x5c1   :  { %v4390_v0 = vadd.f32 %v4389_v44, %v4388_v24  ;;  %v4725_v63 = vld [vmem:[#allocation3 + $0xe8] sm:$0xff]  ;;  %v4716_v44 = vld [vmem:[#allocation3 + $0xa0] sm:$0xff] }
 0x5c2   :  { %v4726_v58 = vld [vmem:[#allocation3 + $0xf0] sm:$0xff]  ;;  %v4717_v24 = vld [vmem:[#allocation3 + $0xa8] sm:$0xff] }
 0x5c3   :  { %v4392_v23 = vadd.f32 %v4391_v21, %v4390_v0  ;;  %v4727_v38 = vld [vmem:[#allocation3 + $0xf8] sm:$0xff]  ;;  %v4714_v21 = vld [vmem:[#allocation3 + $0x90] sm:$0xff] }
 0x5c4   :  { %v4715_v0 = vld [vmem:[#allocation3 + $0x98] sm:$0xff] }
 0x5c5   :  { %v4394_v16 = vadd.f32 %v4393_v60, %v4392_v23  ;;  %v6139_v60 = vld [vmem:[%s9558_s8] sm:$0x1]  ;;  %s6166_s8 = smov [#allocation4]  }
 0x5c6   :  { %s4852_s5 = sshll.u32 %s6166_s8, 4  ;;  %s4853_s5 = int_to_ptr.vmem [resolvable:$true] %s4852_s5 }
 0x5c7   :  { %v4396_v17 = vadd.f32 %v4395_v46, %v4394_v16  ;;  %s6141_s27 = scalar_lea.vmem %s4853_s5, 512  ;;  %p6146_p1 = scmp.lt.s32.totalorder %s4853_s5, %s4853_s5 }
 0x5c8   :  { %p6142_p0 = scmp.ne.s32.totalorder %s4853_s5, %s6141_s27  ;;  %p6147_p2 = scmp.lt.s32.totalorder %s6141_s27, %s6141_s27 }
 0x5c9   :  { %v4398_v56 = vadd.f32 %v4397_v50, %v4396_v17 }
 0x5ca   :  { %p6148_p3 = por %p6147_p2, %p6146_p1 }
 0x5cb   :  { %v4400_v61 = vadd.f32 %v4399_v7, %v4398_v56  ;;  %v10054_v7 = vld [vmem:[#allocation7_spill] sm:$0xff] }
 0x5cc   :  { %p6149_p4 = pnand %p6148_p3, %p6142_p0 }
 0x5cd   :  { %v4401_v37 = vrot.slane %v4400_v61, 4 }
 0x5cf   :  { %v4402_v20 = vadd.f32 %v4401_v37, %v4400_v61  ;;  %v6140_v61 = vld [vmem:[%s9559_s9] sm:$0xff] }
 0x5d1   :  { %v4403_v26 = vrot.slane %v4402_v20, 2 }
 0x5d3   :  { %v4404_v29 = vadd.f32 %v4403_v26, %v4402_v20  ;;  %v10055_v26 = vld [vmem:[#allocation21_spill] sm:$0xff] }
 0x5d5   :  { %v4405_v54 = vrot.slane %v4404_v29, 1 }
 0x5d7   :  { %v4406_v45 = vadd.f32 %v4405_v54, %v4404_v29 }
 0x5d9   :  { %v4407_v25 = vadd.f32 %v4406_v45, %v3792_v47 }
 0x5db   :  { %v4408_v52 = vmul.f32 0.00390625, %v4407_v25 }
 0x5dd   :  { %5516 = vmatmul.mubr.msk.f32.vlgmr.msra.gmra.mxu0 %vm54_vm1, %v4408_v52 }
 0x5de   :  { %5524 = vmatpush3.xpose.msk.msra.mxu0 %vm54_vm1, %v4588_v15  ;;  %5555 = vmatprep.mubr.msk.f32.mxu0 %vm6164_vm4, %v10053_v1 }
 0x5df   :  { %5525 = vmatprep.subr.mxu0 %v10053_v1 }
 0x5e2   :  { %5526 = vmatpush3.xpose.msk.msra.mxu0 %vm54_vm1, %v4587_v57 }
 0x5e3   :  { %5527 = vmatprep.subr.mxu0 %v10053_v1 }
 0x5e6   :  { %5528 = vmatpush3.xpose.msk.msra.mxu0 %vm54_vm1, %v4586_v55 }
 0x5e7   :  { %5529 = vmatprep.subr.mxu0 %v10053_v1 }
 0x5ea   :  { %5530 = vmatpush3.xpose.msk.msra.mxu0 %vm54_vm1, %v4585_v12 }
 0x5eb   :  { %5531 = vmatprep.subr.mxu0 %v10053_v1 }
 0x5ee   :  { %5532 = vmatpush3.xpose.msk.msra.mxu0 %vm54_vm1, %v4584_v11 }
 0x5ef   :  { %5533 = vmatprep.subr.mxu0 %v10053_v1 }
 0x5f2   :  { %5534 = vmatpush3.xpose.msk.msra.mxu0 %vm54_vm1, %v4583_v3 }
 0x5f3   :  { %5535 = vmatprep.subr.mxu0 %v10053_v1 }
 0x5f6   :  { %5536 = vmatpush3.xpose.msk.msra.mxu0 %vm54_vm1, %v4582_v9 }
 0x5f7   :  { %5537 = vmatprep.subr.mxu0 %v10053_v1 }
 0x5fa   :  { %5538 = vmatpush3.xpose.msk.msra.mxu0 %vm54_vm1, %v4581_v35 }
 0x5fb   :  { %5539 = vmatprep.subr.mxu0 %v10053_v1 }
 0x5fe   :  { %5540 = vmatpush3.xpose.msk.msra.mxu0 %vm54_vm1, %v4580_v8 }
 0x5ff   :  { %5541 = vmatprep.subr.mxu0 %v10053_v1 }
 0x602   :  { %5542 = vmatpush3.xpose.msk.msra.mxu0 %vm54_vm1, %v4579_v13 }
 0x603   :  { %5543 = vmatprep.subr.mxu0 %v10053_v1 }
 0x606   :  { %5544 = vmatpush3.xpose.msk.msra.mxu0 %vm54_vm1, %v4578_v39 }
 0x607   :  { %5545 = vmatprep.subr.mxu0 %v10053_v1 }
 0x60a   :  { %5546 = vmatpush3.xpose.msk.msra.mxu0 %vm54_vm1, %v4577_v28 }
 0x60b   :  { %5547 = vmatprep.subr.mxu0 %v10053_v1 }
 0x60e   :  { %5548 = vmatpush3.xpose.msk.msra.mxu0 %vm54_vm1, %v4576_v6 }
 0x60f   :  { %5549 = vmatprep.subr.mxu0 %v10053_v1 }
 0x612   :  { %5550 = vmatpush3.xpose.msk.msra.mxu0 %vm54_vm1, %v4575_v42 }
 0x613   :  { %5551 = vmatprep.subr.mxu0 %v10053_v1 }
 0x616   :  { %5552 = vmatpush3.xpose.msk.msra.mxu0 %vm54_vm1, %v4574_v31 }
 0x617   :  { %5553 = vmatprep.subr.mxu0 %v10053_v1 }
 0x61a   :  { %5554 = vmatpush3.xpose.msk.msra.mxu0 %vm54_vm1, %v4573_v18 }
 0x69d   :  { %v4478_v41 = vpop.f32.mrf.mxu0 }
 0x69e   :  { %v4479_v5 = vadd.f32 %v6138_v33, %v4478_v41 }
 0x69f   :  { %v5517_v49 = vpop.f32.mrf.mxu0 }
 0x6a0   :  { %v5129_v43 = vmul.f32 -1.442695, %v4479_v5 }
 0x6a2   :  { %6120 = vpow2.f32 %v5129_v43 }
 0x6af   :  { %v6121_v62 = vpop.eup %6120 }
 0x6b0   :  { %v4485_v48 = vadd.f32 1.0, %v6121_v62 }
 0x6b2   :  { %6122 = vrcp.f32 %v4485_v48 }
 0x6bf   :  { %v6123_v36 = vpop.eup %6122 }
 0x6c0   :  { %v4488_v30 = vmul.f32 %v6123_v36, %v4479_v5 }
 0x6c2   :  { %5521 = vmatmul.mubr.msk.f32.vlgmr.msra.gmra.mxu1 %vm2138_vm6, %v4488_v30 }
 0x6c3   :  { %5559 = vmatpush3.xpose.msk.msra.mxu1 %vm54_vm1, %v4727_v38  ;;  %5590 = vmatprep.mubr.msk.f32.mxu1 %vm6164_vm4, %v10053_v1 }
 0x6c4   :  { %5560 = vmatprep.subr.mxu1 %v10053_v1 }
 0x6c7   :  { %5561 = vmatpush3.xpose.msk.msra.mxu1 %vm54_vm1, %v4726_v58 }
 0x6c8   :  { %5562 = vmatprep.subr.mxu1 %v10053_v1 }
 0x6cb   :  { %5563 = vmatpush3.xpose.msk.msra.mxu1 %vm54_vm1, %v4725_v63 }
 0x6cc   :  { %5564 = vmatprep.subr.mxu1 %v10053_v1 }
 0x6cf   :  { %5565 = vmatpush3.xpose.msk.msra.mxu1 %vm54_vm1, %v4724_v2 }
 0x6d0   :  { %5566 = vmatprep.subr.mxu1 %v10053_v1 }
 0x6d3   :  { %5567 = vmatpush3.xpose.msk.msra.mxu1 %vm54_vm1, %v4723_v34 }
 0x6d4   :  { %5568 = vmatprep.subr.mxu1 %v10053_v1 }
 0x6d7   :  { %5569 = vmatpush3.xpose.msk.msra.mxu1 %vm54_vm1, %v4722_v27 }
 0x6d8   :  { %5570 = vmatprep.subr.mxu1 %v10053_v1 }
 0x6db   :  { %5571 = vmatpush3.xpose.msk.msra.mxu1 %vm54_vm1, %v4721_v14 }
 0x6dc   :  { %5572 = vmatprep.subr.mxu1 %v10053_v1 }
 0x6df   :  { %5573 = vmatpush3.xpose.msk.msra.mxu1 %vm54_vm1, %v4720_v59 }
 0x6e0   :  { %5574 = vmatprep.subr.mxu1 %v10053_v1 }
 0x6e3   :  { %5575 = vmatpush3.xpose.msk.msra.mxu1 %vm54_vm1, %v4719_v19 }
 0x6e4   :  { %5576 = vmatprep.subr.mxu1 %v10053_v1 }
 0x6e7   :  { %5577 = vmatpush3.xpose.msk.msra.mxu1 %vm54_vm1, %v4718_v53 }
 0x6e8   :  { %5578 = vmatprep.subr.mxu1 %v10053_v1 }
 0x6eb   :  { %5579 = vmatpush3.xpose.msk.msra.mxu1 %vm54_vm1, %v4717_v24 }
 0x6ec   :  { %5580 = vmatprep.subr.mxu1 %v10053_v1 }
 0x6ef   :  { %5581 = vmatpush3.xpose.msk.msra.mxu1 %vm54_vm1, %v4716_v44 }
 0x6f0   :  { %5582 = vmatprep.subr.mxu1 %v10053_v1 }
 0x6f3   :  { %5583 = vmatpush3.xpose.msk.msra.mxu1 %vm54_vm1, %v4715_v0 }
 0x6f4   :  { %5584 = vmatprep.subr.mxu1 %v10053_v1 }
 0x6f7   :  { %5585 = vmatpush3.xpose.msk.msra.mxu1 %vm54_vm1, %v4714_v21 }
 0x6f8   :  { %5586 = vmatprep.subr.mxu1 %v10053_v1 }
 0x6fb   :  { %5587 = vmatpush3.xpose.msk.msra.mxu1 %vm54_vm1, %v4713_v51 }
 0x6fc   :  { %5588 = vmatprep.subr.mxu1 %v10053_v1 }
 0x6ff   :  { %5589 = vmatpush3.xpose.msk.msra.mxu1 %vm54_vm1, %v4712_v32 }
 0x782   :  { %v4558_v23 = vpop.f32.mrf.mxu1 }
 0x783   :  { %v4559_v16 = vadd.f32 %v6139_v60, %v4558_v23 }
 0x784   :  { %v5522_v46 = vpop.f32.mrf.mxu1 }
 0x785   :  { %v5132_v10 = vmul.f32 -1.442695, %v4559_v16 }
 0x787   :  { %6124 = vpow2.f32 %v5132_v10 }
 0x794   :  { %v6125_v17 = vpop.eup %6124 }
 0x795   :  { %v4565_v50 = vadd.f32 1.0, %v6125_v17 }
 0x797   :  { %6126 = vrcp.f32 %v4565_v50 }
 0x7a4   :  { %v6127_v56 = vpop.eup %6126 }
 0x7a5   :  { %v4571_v4 = vrot.slane %v6127_v56, %v10054_v7 }
 0x7a7   :  { %v4572_v37 = vmul.f32 %v6140_v61, %v4571_v4 }
 0x7a9   :  { %5556 = vmatmul.mubr.msk.f32.vlgmr.msra.gmra.mxu0 %vm54_vm1, %v4572_v37  ;;  %5591 = vmatmul.mubr.msk.f32.vlgmr.msra.gmra.mxu1 %vm54_vm1, %v4572_v37 }
 0x869   :  { %v4706_v22 = vpop.f32.mrf.mxu0  ;;  %v4842_v20 = vpop.f32.mrf.mxu1 }
 0x86a   :  { %v4707_v40 = vadd.f32 %v4706_v22, %v10055_v26  ;;  %v4843_v29 = vadd.f32 %v4842_v20, %v10055_v26 }
 0x86b   :  { %v5557_v54 = vpop.f32.mrf.mxu0  ;;  %v5592_v47 = vpop.f32.mrf.mxu1 }
 0x86c   :  { %4711 = vst [vmem:[#allocation4 + $0x10] sm:$0xff] %v4707_v40  ;;  %4846 = vst [vmem:[#allocation4 + $0x18] sm:$0xff] %v4843_v29 }
 0x86d   :  { %6152 = shalt.err (!%p6149_p4)
}
 0x86e   :  { %s6167_s9 = smov 256   ;;  %s6168_s28 = smov 16  }
 0x86f   :  { %4858 = dma.vmem_to_hbm [thread:$0]  %s4853_s5, 512, %s9561_s11, [#allocation5], %s6167_s9, %s6167_s9, %s6168_s28  }
 0x870   :  { %6161 = dma.done.wait [#allocation5], 512  }
 0x871   :  { %6162 = vsyncadd [#allocation5], 4294966784 }
 0x872   :  { %4862 = vsyncpa [#allocation5], 1 }

</bundles_post_ra>
